<compile_context>
chip_gen: v7x
topology: tpu7x:2x2x1
jax: 0.10.0
libtpu: 0.0.40
codegen_flags: <defaults>
</compile_context>

<pallas_src>
import functools

import jax
import jax.numpy as jnp
from jax import lax
from jax.experimental import pallas as pl
from jax.experimental.pallas import tpu as pltpu

# ----------------------------------------------------------------------------
# ResNet-50 backbone (plain JAX glue, deterministic init, NHWC layout)
# ----------------------------------------------------------------------------
_BN_SCALE = (1.0 + 1e-5) ** -0.5  # eval BN: gamma=1, beta=0, mean=0, var=1

# Static architecture config (width, num_blocks, first_stride) per stage.
_RESNET50_STAGES = ((64, 3, 1), (128, 4, 2), (256, 6, 2), (512, 3, 2))


def _he_conv(key, kh, kw, in_c, out_c):
    fan_in = in_c * kh * kw
    return jax.random.normal(key, (kh, kw, in_c, out_c), jnp.float32) * jnp.sqrt(
        2.0 / fan_in
    )


def _conv2d(x, w, stride=1, padding=0):
    # NHWC activations, HWIO weights: TPU-preferred conv layout.
    return lax.conv_general_dilated(
        x,
        w,
        (stride, stride),
        [(padding, padding), (padding, padding)],
        dimension_numbers=("NHWC", "HWIO", "NHWC"),
    )


def _bn(x):
    return x * _BN_SCALE


def make_resnet50_params(key):
    keys = jax.random.split(key, 8)
    params = {"conv1": _he_conv(keys[0], 7, 7, 3, 64)}
    layers = []
    in_c = 64
    for li, (width, blocks, _stride) in enumerate(_RESNET50_STAGES):
        blks = []
        for i in range(blocks):
            k = jax.random.fold_in(keys[1 + li], i)
            ks = jax.random.split(k, 4)
            blk = {
                "c1": _he_conv(ks[0], 1, 1, in_c, width),
                "c2": _he_conv(ks[1], 3, 3, width, width),
                "c3": _he_conv(ks[2], 1, 1, width, width * 4),
            }
            if i == 0:  # downsample projection on the first block of each stage
                blk["ds"] = _he_conv(ks[3], 1, 1, in_c, width * 4)
            blks.append(blk)
            in_c = width * 4
        layers.append(blks)
    params["layers"] = layers
    return params


def resnet50_features(x_nhwc, params):
    # stem: 7x7/2 conv -> BN -> relu -> 3x3/2 maxpool
    x = jax.nn.relu(_bn(_conv2d(x_nhwc, params["conv1"], stride=2, padding=3)))
    x = lax.reduce_window(
        x,
        -jnp.inf,
        lax.max,
        (1, 3, 3, 1),
        (1, 2, 2, 1),
        ((0, 0), (1, 1), (1, 1), (0, 0)),
    )
    for li, (_width, blocks, stage_stride) in enumerate(_RESNET50_STAGES):
        for i in range(blocks):
            p = params["layers"][li][i]
            s = stage_stride if i == 0 else 1  # static Python int (hashable)
            identity = x
            out = jax.nn.relu(_bn(_conv2d(x, p["c1"])))
            out = jax.nn.relu(_bn(_conv2d(out, p["c2"], stride=s, padding=1)))
            out = _bn(_conv2d(out, p["c3"]))
            if "ds" in p:
                identity = _bn(_conv2d(x, p["ds"], stride=s))
            x = jax.nn.relu(out + identity)
    return x  # (B, H/32, W/32, 2048) NHWC


# ----------------------------------------------------------------------------
# Fused Pallas head kernel: spatial attention + weighted GAP + classifier MLP
# ----------------------------------------------------------------------------
def _attention_classifier_kernel(
    feat_ref,    # (1, M, C)    bf16  — M = Bt*HW rows (batch folded into MXU M)
    w1_ref,      # (C, 512)     bf16  — attention 1x1 conv as matmul weight
    b1_ref,      # (1, 512)     f32
    w2_ref,      # (1, 512)     f32   — attention 512->1 conv as a row vector
    b2_ref,      # (1, 1)       f32
    w3_ref,      # (C, 512)     bf16  — classifier Linear(2048, 512)
    b3_ref,      # (1, 512)     f32
    w4_ref,      # (512, NCp)   bf16  — classifier Linear(512, NC), NC padded to 128
    b4_ref,      # (1, NCp)     f32
    att_ref,     # (1, 1, M)    f32   — lane-dense attention output
    logits_ref,  # (1, Bt, NCp) f32
):
    f = feat_ref[0]                      # (M, C) bf16
    m = f.shape[0]
    bt = logits_ref.shape[1]
    hw = m // bt                         # static Python ints at trace time

    # --- spatial attention conv1x1 (2048->512) + ReLU: one big MXU GEMM, f32 acc
    a1 = jnp.dot(f, w1_ref[...], preferred_element_type=jnp.float32) + b1_ref[...]
    a1 = jnp.maximum(a1, 0.0)                                   # (M, 512) f32

    # --- conv1x1 (512->1) as a VPU multiply + lane reduction (no N=1 MXU matmul),
    #     then sigmoid.  All elementwise work kept in f32 (v5e has no bf16 VPU/EUP).
    row = jnp.sum(a1 * w2_ref[...], axis=-1)                    # (M,) f32
    att_row = jax.nn.sigmoid(row[None, :] + b2_ref[...])        # (1, M) f32 lane-dense
    att_ref[...] = att_row[None]                                # (1, 1, M) one wide store

    # --- attention-weighted global average pool for all bt images in ONE MXU dot:
    #     P[r, j] = att[j] if row j belongs to image r else 0   (no (M, C) attended temp)
    rows = lax.broadcasted_iota(jnp.int32, (bt, m), 0)
    cols = lax.broadcasted_iota(jnp.int32, (bt, m), 1)
    in_group = (cols >= rows * hw) & (cols < (rows + 1) * hw)
    p_mat = jnp.where(in_group, att_row, 0.0).astype(f.dtype)   # (bt, M) bf16
    pooled = jnp.dot(p_mat, f, preferred_element_type=jnp.float32) * (1.0 / hw)  # (bt, C)

    # --- classifier MLP fused into the same grid step (rows are independent)
    h = jnp.dot(
        pooled.astype(w3_ref.dtype), w3_ref[...], preferred_element_type=jnp.float32
    ) + b3_ref[...]
    h = jnp.maximum(h, 0.0)                                     # (bt, 512) f32
    # TODO(synk): Dropout(0.5) is identity in eval/inference mode.
    logits = jnp.dot(
        h.astype(w4_ref.dtype), w4_ref[...], preferred_element_type=jnp.float32
    ) + b4_ref[...]
    logits_ref[...] = logits[None]                              # (1, bt, NCp)


def _pick_batch_tile(batch, hw, target_rows=1024, min_fill_rows=256):
    """How many batch elements to fold into one grid step.

    Target ~1024 rows for the dominant (M, 2048)x(2048, 512) GEMM (fills the
    256-row MXU on v6e/v7x, 128-row on v5e) while keeping the live VMEM set
    (feat block x2 buffers + f32 intermediates + weights) well under ~48 MiB
    for v7x's 64 MiB VMEM.  Prefers >=2 grid steps (v7x has 2 TensorCores)
    when that still keeps the MXU M dimension filled.
    """
    bt = max(1, min(batch, max(1, target_rows // max(hw, 1))))
    while batch % bt:
        bt -= 1
    if bt == batch and batch % 2 == 0 and (batch // 2) * hw >= min_fill_rows:
        bt = batch // 2  # give the second TensorCore work without starving the MXU
    return bt


def enhanced_resnet_head(features_nhwc, head_params, num_classes):
    """features_nhwc: (B, H, W, 2048) -> (logits (B, NC), attention_map (B,1,H,W))."""
    B, H, W, C = features_nhwc.shape
    HW = H * W
    w1, b1, w2, b2, w3, b3, w4p, b4p = head_params
    NCp = w4p.shape[1]

    bt = _pick_batch_tile(B, HW)
    nb = B // bt
    M = bt * HW

    # Backbone runs NHWC, so no HBM transpose is needed; fold bt batch elements
    # per grid step and cast the feature slab to bf16 for the MXU.
    feat = features_nhwc.reshape(nb, M, C).astype(jnp.bfloat16)

    att3, logits3 = pl.pallas_call(
        _attention_classifier_kernel,
        out_shape=(
            jax.ShapeDtypeStruct((nb, 1, M), jnp.float32),
            jax.ShapeDtypeStruct((nb, bt, NCp), jnp.float32),
        ),
        grid=(nb,),
        in_specs=[
            pl.BlockSpec((1, M, C), lambda b: (b, 0, 0)),
            pl.BlockSpec((C, 512), lambda b: (0, 0)),
            pl.BlockSpec((1, 512), lambda b: (0, 0)),
            pl.BlockSpec((1, 512), lambda b: (0, 0)),
            pl.BlockSpec((1, 1), lambda b: (0, 0)),
            pl.BlockSpec((C, 512), lambda b: (0, 0)),
            pl.BlockSpec((1, 512), lambda b: (0, 0)),
            pl.BlockSpec((512, NCp), lambda b: (0, 0)),
            pl.BlockSpec((1, NCp), lambda b: (0, 0)),
        ],
        out_specs=(
            pl.BlockSpec((1, 1, M), lambda b: (b, 0, 0)),
            pl.BlockSpec((1, bt, NCp), lambda b: (b, 0, 0)),
        ),
        compiler_params=pltpu.CompilerParams(
            dimension_semantics=("parallel",),          # independent steps; 2 TCs on v7x
            vmem_limit_bytes=48 * 1024 * 1024,          # < v7x 64 MiB cap; fine on v5e/v6e
        ),
    )(feat, w1, b1, w2, b2, w3, b3, w4p, b4p)

    logits = logits3.reshape(B, NCp)[:, :num_classes]   # drop the lane padding
    att_map = att3.reshape(B, 1, H, W)                  # HW flattened row-major
    return logits, att_map


def make_head_params(key, num_classes):
    C = 2048
    ncp = max(128, ((num_classes + 127) // 128) * 128)  # lane-dense logits store
    ks = jax.random.split(key, 8)
    # Big GEMM weights in bf16 (MXU fast path, half the HBM weight traffic);
    # biases and the 512->1 attention projection stay f32 (VPU path).
    w1 = (jax.random.normal(ks[0], (C, 512), jnp.float32) / jnp.sqrt(1.0 * C)).astype(
        jnp.bfloat16
    )
    b1 = jax.random.normal(ks[1], (1, 512), jnp.float32) * 0.01
    w2 = jax.random.normal(ks[2], (1, 512), jnp.float32) / jnp.sqrt(512.0)
    b2 = jax.random.normal(ks[3], (1, 1), jnp.float32) * 0.01
    w3 = (jax.random.normal(ks[4], (C, 512), jnp.float32) / jnp.sqrt(1.0 * C)).astype(
        jnp.bfloat16
    )
    b3 = jax.random.normal(ks[5], (1, 512), jnp.float32) * 0.01
    w4 = jax.random.normal(ks[6], (512, num_classes), jnp.float32) / jnp.sqrt(512.0)
    b4 = jax.random.normal(ks[7], (1, num_classes), jnp.float32) * 0.01
    # Pad the classifier output dim to 128 lanes (extra logits are sliced off).
    w4p = jnp.zeros((512, ncp), jnp.float32).at[:, :num_classes].set(w4).astype(
        jnp.bfloat16
    )
    b4p = jnp.zeros((1, ncp), jnp.float32).at[:, :num_classes].set(b4)
    return (w1, b1, w2, b2, w3, b3, w4p, b4p)


@functools.partial(jax.jit, static_argnames=("num_classes",))
def enhanced_resnet_forward(x_nchw, backbone_params, head_params, *, num_classes):
    x = jnp.transpose(x_nchw, (0, 2, 3, 1))              # NCHW -> NHWC (3 ch, cheap)
    features = resnet50_features(x, backbone_params)     # (B, H/32, W/32, 2048)
    return enhanced_resnet_head(features, head_params, num_classes)


if __name__ == "__main__":
    num_classes = 10
    key = jax.random.PRNGKey(0)
    k_x, k_bb, k_head = jax.random.split(key, 3)

    # small but valid: 64x64 image -> 2x2 feature map with 2048 channels
    x = jax.random.normal(k_x, (2, 3, 64, 64), jnp.float32)

    backbone_params = make_resnet50_params(k_bb)
    head_params = make_head_params(k_head, num_classes)

    logits, att_map = enhanced_resnet_forward(
        x, backbone_params, head_params, num_classes=num_classes
    )
    jax.block_until_ready((logits, att_map))

    assert logits.shape == (2, num_classes), logits.shape
    assert att_map.shape == (2, 1, 2, 2), att_map.shape
    assert bool(jnp.all(jnp.isfinite(logits))) and bool(jnp.all(jnp.isfinite(att_map)))
    assert bool(jnp.all(att_map >= 0.0)) and bool(jnp.all(att_map <= 1.0))  # sigmoid

    print("KERNEL_OK")
</pallas_src>

<mosaic_0001>
module attributes {stable_mosaic.version = 11 : i64} {
  func.func @_attention_classifier_kernel(%arg0: i32, %arg1: memref<1x8x2048xbf16, #tpu.memory_space<vmem>>, %arg2: memref<2048x512xbf16, #tpu.memory_space<vmem>>, %arg3: memref<1x512xf32, #tpu.memory_space<vmem>>, %arg4: memref<1x512xf32, #tpu.memory_space<vmem>>, %arg5: memref<1x1xf32, #tpu.memory_space<vmem>>, %arg6: memref<2048x512xbf16, #tpu.memory_space<vmem>>, %arg7: memref<1x512xf32, #tpu.memory_space<vmem>>, %arg8: memref<512x128xbf16, #tpu.memory_space<vmem>>, %arg9: memref<1x128xf32, #tpu.memory_space<vmem>>, %arg10: memref<1x1x8xf32, #tpu.memory_space<vmem>>, %arg11: memref<1x2x128xf32, #tpu.memory_space<vmem>>) attributes {dimension_semantics = [#tpu.dimension_semantics<parallel>], iteration_bounds = array<i64: 1>, scalar_prefetch = 0 : i64, scratch_operands = 0 : i64, tpu.core_type = #tpu.core_type<tc>, window_params = [{transform_indices = @transform_0, window_bounds = array<i64: 1, 8, 2048>}, {pipeline_mode = #tpu.pipeline_mode<synchronous>, transform_indices = @transform_1, window_bounds = array<i64: 2048, 512>}, {pipeline_mode = #tpu.pipeline_mode<synchronous>, transform_indices = @transform_2, window_bounds = array<i64: 1, 512>}, {pipeline_mode = #tpu.pipeline_mode<synchronous>, transform_indices = @transform_3, window_bounds = array<i64: 1, 512>}, {pipeline_mode = #tpu.pipeline_mode<synchronous>, transform_indices = @transform_4, window_bounds = array<i64: 1, 1>}, {pipeline_mode = #tpu.pipeline_mode<synchronous>, transform_indices = @transform_5, window_bounds = array<i64: 2048, 512>}, {pipeline_mode = #tpu.pipeline_mode<synchronous>, transform_indices = @transform_6, window_bounds = array<i64: 1, 512>}, {pipeline_mode = #tpu.pipeline_mode<synchronous>, transform_indices = @transform_7, window_bounds = array<i64: 512, 128>}, {pipeline_mode = #tpu.pipeline_mode<synchronous>, transform_indices = @transform_8, window_bounds = array<i64: 1, 128>}, {transform_indices = @transform_9, window_bounds = array<i64: 1, 1, 8>}, {transform_indices = @transform_10, window_bounds = array<i64: 1, 2, 128>}]} {
    %c0 = arith.constant 0 : index
    %c0_0 = arith.constant 0 : index
    %c0_1 = arith.constant 0 : index
    %0 = vector.load %arg1[%c0, %c0_0, %c0_1] : memref<1x8x2048xbf16, #tpu.memory_space<vmem>>, vector<1x8x2048xbf16>
    %1 = vector.shape_cast %0 : vector<1x8x2048xbf16> to vector<8x2048xbf16>
    %c0_2 = arith.constant 0 : index
    %c0_3 = arith.constant 0 : index
    %2 = vector.load %arg2[%c0_2, %c0_3] : memref<2048x512xbf16, #tpu.memory_space<vmem>>, vector<2048x512xbf16>
    %cst = arith.constant dense<0.000000e+00> : vector<8x512xf32>
    %3 = tpu.matmul %1, %2, %cst {dimension_numbers = #tpu.dot_dimension_numbers<[1], [0], [0], [1], [0, 0, 1, 1], [], []>} : vector<8x2048xbf16>, vector<2048x512xbf16>, vector<8x512xf32> -> vector<8x512xf32>
    %c0_4 = arith.constant 0 : index
    %c0_5 = arith.constant 0 : index
    %4 = vector.load %arg3[%c0_4, %c0_5] : memref<1x512xf32, #tpu.memory_space<vmem>>, vector<1x512xf32>
    %5 = vector.broadcast %4 : vector<1x512xf32> to vector<8x512xf32>
    %6 = arith.addf %3, %5 : vector<8x512xf32>
    %cst_6 = arith.constant 0.000000e+00 : f32
    %7 = vector.broadcast %cst_6 : f32 to vector<8x512xf32>
    %8 = arith.maximumf %6, %7 : vector<8x512xf32>
    %c0_7 = arith.constant 0 : index
    %c0_8 = arith.constant 0 : index
    %9 = vector.load %arg4[%c0_7, %c0_8] : memref<1x512xf32, #tpu.memory_space<vmem>>, vector<1x512xf32>
    %10 = vector.broadcast %9 : vector<1x512xf32> to vector<8x512xf32>
    %11 = arith.mulf %8, %10 : vector<8x512xf32>
    %cst_9 = arith.constant dense<0.000000e+00> : vector<8xf32>
    %12 = vector.multi_reduction <add>, %11, %cst_9 [1] : vector<8x512xf32> to vector<8xf32>
    %13 = vector.shape_cast %12 : vector<8xf32> to vector<1x8xf32>
    %c0_10 = arith.constant 0 : index
    %c0_11 = arith.constant 0 : index
    %14 = vector.load %arg5[%c0_10, %c0_11] : memref<1x1xf32, #tpu.memory_space<vmem>>, vector<1x1xf32>
    %15 = vector.broadcast %14 : vector<1x1xf32> to vector<1x8xf32>
    %16 = arith.addf %13, %15 : vector<1x8xf32>
    %17 = arith.negf %16 : vector<1x8xf32>
    %18 = math.exp %17 : vector<1x8xf32>
    %cst_12 = arith.constant 1.000000e+00 : f32
    %19 = vector.broadcast %cst_12 : f32 to vector<1x8xf32>
    %20 = arith.addf %19, %18 : vector<1x8xf32>
    %21 = arith.divf %19, %20 : vector<1x8xf32>
    %22 = vector.shape_cast %21 : vector<1x8xf32> to vector<1x1x8xf32>
    %c0_13 = arith.constant 0 : index
    %c0_14 = arith.constant 0 : index
    %c0_15 = arith.constant 0 : index
    %23 = vector.load %arg10[%c0_13, %c0_14, %c0_15] : memref<1x1x8xf32, #tpu.memory_space<vmem>>, vector<1x1x8xf32>
    tpu.vector_store %arg10[%c0_13, %c0_14, %c0_15], %22 {strides = array<i32>} : memref<1x1x8xf32, #tpu.memory_space<vmem>>, vector<1x1x8xf32>,
    %24 = tpu.iota {dimensions = array<i32: 0>} : vector<2x8xi32>
    %25 = tpu.iota {dimensions = array<i32: 1>} : vector<2x8xi32>
    %c4_i32 = arith.constant 4 : i32
    %26 = vector.broadcast %c4_i32 : i32 to vector<2x8xi32>
    %27 = arith.muli %24, %26 : vector<2x8xi32>
    %28 = arith.cmpi sge, %25, %27 : vector<2x8xi32>
    %c1_i32 = arith.constant 1 : i32
    %29 = vector.broadcast %c1_i32 : i32 to vector<2x8xi32>
    %30 = arith.addi %24, %29 : vector<2x8xi32>
    %c4_i32_16 = arith.constant 4 : i32
    %31 = vector.broadcast %c4_i32_16 : i32 to vector<2x8xi32>
    %32 = arith.muli %30, %31 : vector<2x8xi32>
    %33 = arith.cmpi slt, %25, %32 : vector<2x8xi32>
    %34 = arith.andi %28, %33 : vector<2x8xi1>
    %cst_17 = arith.constant 0.000000e+00 : f32
    %35 = vector.shape_cast %21 : vector<1x8xf32> to vector<1x8xf32>
    %36 = vector.broadcast %35 : vector<1x8xf32> to vector<2x8xf32>
    %37 = vector.broadcast %cst_17 : f32 to vector<2x8xf32>
    %38 = arith.select %34, %36, %37 : vector<2x8xi1>, vector<2x8xf32>
    %39 = arith.truncf %38 : vector<2x8xf32> to vector<2x8xbf16>
    %cst_18 = arith.constant dense<0.000000e+00> : vector<2x2048xf32>
    %40 = tpu.matmul %39, %1, %cst_18 {dimension_numbers = #tpu.dot_dimension_numbers<[1], [0], [0], [1], [0, 0, 1, 1], [], []>} : vector<2x8xbf16>, vector<8x2048xbf16>, vector<2x2048xf32> -> vector<2x2048xf32>
    %cst_19 = arith.constant 2.500000e-01 : f32
    %41 = vector.broadcast %cst_19 : f32 to vector<2x2048xf32>
    %42 = arith.mulf %40, %41 : vector<2x2048xf32>
    %43 = arith.truncf %42 : vector<2x2048xf32> to vector<2x2048xbf16>
    %c0_20 = arith.constant 0 : index
    %c0_21 = arith.constant 0 : index
    %44 = vector.load %arg6[%c0_20, %c0_21] : memref<2048x512xbf16, #tpu.memory_space<vmem>>, vector<2048x512xbf16>
    %cst_22 = arith.constant dense<0.000000e+00> : vector<2x512xf32>
    %45 = tpu.matmul %43, %44, %cst_22 {dimension_numbers = #tpu.dot_dimension_numbers<[1], [0], [0], [1], [0, 0, 1, 1], [], []>} : vector<2x2048xbf16>, vector<2048x512xbf16>, vector<2x512xf32> -> vector<2x512xf32>
    %c0_23 = arith.constant 0 : index
    %c0_24 = arith.constant 0 : index
    %46 = vector.load %arg7[%c0_23, %c0_24] : memref<1x512xf32, #tpu.memory_space<vmem>>, vector<1x512xf32>
    %47 = vector.broadcast %46 : vector<1x512xf32> to vector<2x512xf32>
    %48 = arith.addf %45, %47 : vector<2x512xf32>
    %cst_25 = arith.constant 0.000000e+00 : f32
    %49 = vector.broadcast %cst_25 : f32 to vector<2x512xf32>
    %50 = arith.maximumf %48, %49 : vector<2x512xf32>
    %51 = arith.truncf %50 : vector<2x512xf32> to vector<2x512xbf16>
    %c0_26 = arith.constant 0 : index
    %c0_27 = arith.constant 0 : index
    %52 = vector.load %arg8[%c0_26, %c0_27] : memref<512x128xbf16, #tpu.memory_space<vmem>>, vector<512x128xbf16>
    %cst_28 = arith.constant dense<0.000000e+00> : vector<2x128xf32>
    %53 = tpu.matmul %51, %52, %cst_28 {dimension_numbers = #tpu.dot_dimension_numbers<[1], [0], [0], [1], [0, 0, 1, 1], [], []>} : vector<2x512xbf16>, vector<512x128xbf16>, vector<2x128xf32> -> vector<2x128xf32>
    %c0_29 = arith.constant 0 : index
    %c0_30 = arith.constant 0 : index
    %54 = vector.load %arg9[%c0_29, %c0_30] : memref<1x128xf32, #tpu.memory_space<vmem>>, vector<1x128xf32>
    %55 = vector.broadcast %54 : vector<1x128xf32> to vector<2x128xf32>
    %56 = arith.addf %53, %55 : vector<2x128xf32>
    %57 = vector.shape_cast %56 : vector<2x128xf32> to vector<1x2x128xf32>
    %c0_31 = arith.constant 0 : index
    %c0_32 = arith.constant 0 : index
    %c0_33 = arith.constant 0 : index
    %58 = vector.load %arg11[%c0_31, %c0_32, %c0_33] : memref<1x2x128xf32, #tpu.memory_space<vmem>>, vector<1x2x128xf32>
    tpu.vector_store %arg11[%c0_31, %c0_32, %c0_33], %57 {strides = array<i32>} : memref<1x2x128xf32, #tpu.memory_space<vmem>>, vector<1x2x128xf32>,
    return
  }
  func.func @transform_0(%arg0: i32) -> (i32, i32, i32) {
    %c0_i32 = arith.constant 0 : i32
    %c0_i32_0 = arith.constant 0 : i32
    %c0_i32_1 = arith.constant 0 : i32
    return %arg0, %c0_i32, %c0_i32_0 : i32, i32, i32
  }
  func.func @transform_1(%arg0: i32) -> (i32, i32) {
    %c0_i32 = arith.constant 0 : i32
    %c0_i32_0 = arith.constant 0 : i32
    %c0_i32_1 = arith.constant 0 : i32
    return %c0_i32, %c0_i32_0 : i32, i32
  }
  func.func @transform_2(%arg0: i32) -> (i32, i32) {
    %c0_i32 = arith.constant 0 : i32
    %c0_i32_0 = arith.constant 0 : i32
    %c0_i32_1 = arith.constant 0 : i32
    return %c0_i32, %c0_i32_0 : i32, i32
  }
  func.func @transform_3(%arg0: i32) -> (i32, i32) {
    %c0_i32 = arith.constant 0 : i32
    %c0_i32_0 = arith.constant 0 : i32
    %c0_i32_1 = arith.constant 0 : i32
    return %c0_i32, %c0_i32_0 : i32, i32
  }
  func.func @transform_4(%arg0: i32) -> (i32, i32) {
    %c0_i32 = arith.constant 0 : i32
    %c0_i32_0 = arith.constant 0 : i32
    %c0_i32_1 = arith.constant 0 : i32
    return %c0_i32, %c0_i32_0 : i32, i32
  }
  func.func @transform_5(%arg0: i32) -> (i32, i32) {
    %c0_i32 = arith.constant 0 : i32
    %c0_i32_0 = arith.constant 0 : i32
    %c0_i32_1 = arith.constant 0 : i32
    return %c0_i32, %c0_i32_0 : i32, i32
  }
  func.func @transform_6(%arg0: i32) -> (i32, i32) {
    %c0_i32 = arith.constant 0 : i32
    %c0_i32_0 = arith.constant 0 : i32
    %c0_i32_1 = arith.constant 0 : i32
    return %c0_i32, %c0_i32_0 : i32, i32
  }
  func.func @transform_7(%arg0: i32) -> (i32, i32) {
    %c0_i32 = arith.constant 0 : i32
    %c0_i32_0 = arith.constant 0 : i32
    %c0_i32_1 = arith.constant 0 : i32
    return %c0_i32, %c0_i32_0 : i32, i32
  }
  func.func @transform_8(%arg0: i32) -> (i32, i32) {
    %c0_i32 = arith.constant 0 : i32
    %c0_i32_0 = arith.constant 0 : i32
    %c0_i32_1 = arith.constant 0 : i32
    return %c0_i32, %c0_i32_0 : i32, i32
  }
  func.func @transform_9(%arg0: i32) -> (i32, i32, i32) {
    %c0_i32 = arith.constant 0 : i32
    %c0_i32_0 = arith.constant 0 : i32
    %c0_i32_1 = arith.constant 0 : i32
    return %arg0, %c0_i32, %c0_i32_0 : i32, i32, i32
  }
  func.func @transform_10(%arg0: i32) -> (i32, i32, i32) {
    %c0_i32 = arith.constant 0 : i32
    %c0_i32_0 = arith.constant 0 : i32
    %c0_i32_1 = arith.constant 0 : i32
    return %arg0, %c0_i32, %c0_i32_0 : i32, i32, i32
  }
}

</mosaic_0001>

<bundles_post_ra>
// kernel: reverse
= control target key start
LH: loop header
LB: loop body
LE: loop exit
PB: predicated region body
PF: predicated region fallthrough
CT: control target
= control target key end

     0   :  { %s10166_s6 = smov 0   ;;  %s10168_s7 = smov 0   ;;  %s13587_s0 = inlined_call_operand.vmem [shape: f32[3,3,512,512], index: 0, kind: input, shape index: {}]   ;;  %s13588_s1 = inlined_call_operand.vmem [shape: bf16[3,3,512,512], index: 1, kind: output, shape index: {}]  }
   0x1   :  { %s10170_s8 = smov 0  }
   0x2 LB: > { %s25_s9 = sadd.s32 1, %s10150_s7  ;;  %p7794_p0 = scmp.ge.s32.totalorder %s10154_s8, 1  ;;  %s10154_s8 = sphi %s10170_s8, %s7_s8   ;;  %s10150_s7 = sphi %s10168_s7, %s13590_s7   ;;  %s10146_s6 = sphi %s10166_s6, %s13589_s6  }
   0x3   : > { %p27_p1 = scmp.ge.s32.totalorder %s25_s9, 2  ;;  %p77_p2 = scmp.lt.s32.totalorder %s10154_s8, 3 }
   0x5   : > { %s13592_s9 = smov (%p27_p1, %s25_s9), 0  ;;  %p78_p3 = pnand %p7794_p0, %p77_p2 }
   0x6   : > { %s7795_s10 = sshll.u32 (!%p78_p3), %s10146_s6, 5 }
   0x7   : > { %81 = sbr.rel (%p78_p3) target bundleno = 590 (0x24e), region = 20  ;;  %p139_p4 = scmp.lt.s32.totalorder (!%p78_p3), %s7795_s10, 63 }
   0xe   : > { %s13594_s10 = smov (!%p139_p4, %s7795_s10), 63 }
   0xf   : > { %s10106_s11 = sshll.u32 %s13594_s10, 5  ;;  %s10107_s15 = sshll.u32 %s13594_s10, 4 }
  0x10   : > { %s10187_s14 = scalar_lea.vmem %s13587_s0, %s10106_s11  ;;  %s10210_s18 = scalar_lea.vmem %s13588_s1, %s10107_s15 }
  0x11   : > { %v7801_v0 = vld [vmem:[%s10187_s14 + $0x4000] sm:$0xff]  ;;  %v8088_v15 = vld [vmem:[%s10187_s14 + $0x4008] sm:$0xff] }
  0x12   : > { %v7802_v1 = vld [vmem:[%s10187_s14 + $0x2800] sm:$0xff]  ;;  %v8091_v16 = vld [vmem:[%s10187_s14 + $0x2808] sm:$0xff]  ;;  %v1049_v21 = vpack.c.bf16 %v8088_v15, %v7801_v0 }
  0x13   : > { %v7803_v2 = vld [vmem:[%s10187_s14 + $0x1000] sm:$0xff]  ;;  %v8094_v17 = vld [vmem:[%s10187_s14 + $0x1008] sm:$0xff]  ;;  %v1057_v22 = vpack.c.bf16 %v8091_v16, %v7802_v1 }
  0x14   : > { %v7804_v3 = vld [vmem:[%s10187_s14 + $0x3800] sm:$0xff]  ;;  %v1065_v23 = vpack.c.bf16 %v8094_v17, %v7803_v2  ;;  %v8097_v24 = vld [vmem:[%s10187_s14 + $0x3808] sm:$0xff]  ;;  %8090 = vst [vmem:[%s10210_s18] sm:$0xff] %v1049_v21 }
  0x15   : > { %v7805_v4 = vld [vmem:[%s10187_s14 + $0x2000] sm:$0xff]  ;;  %v8100_v25 = vld [vmem:[%s10187_s14 + $0x2008] sm:$0xff]  ;;  %v1073_v30 = vpack.c.bf16 %v8097_v24, %v7804_v3  ;;  %8093 = vst [vmem:[%s10210_s18 + $0xc00] sm:$0xff] %v1057_v22 }
  0x16   : > { %v7806_v5 = vld [vmem:[%s10187_s14 + $0x800] sm:$0xff]  ;;  %v8103_v26 = vld [vmem:[%s10187_s14 + $0x808] sm:$0xff]  ;;  %v1081_v31 = vpack.c.bf16 %v8100_v25, %v7805_v4  ;;  %8096 = vst [vmem:[%s10210_s18 + $0x1800] sm:$0xff] %v1065_v23 }
  0x17   : > { %v7807_v6 = vld [vmem:[%s10187_s14 + $0x3000] sm:$0xff]  ;;  %v1089_v32 = vpack.c.bf16 %v8103_v26, %v7806_v5  ;;  %v8106_v33 = vld [vmem:[%s10187_s14 + $0x3008] sm:$0xff]  ;;  %8099 = vst [vmem:[%s10210_s18 + $0x400] sm:$0xff] %v1073_v30 }
  0x18   : > { %v7808_v7 = vld [vmem:[%s10187_s14 + $0x1800] sm:$0xff]  ;;  %v8109_v34 = vld [vmem:[%s10187_s14 + $0x1808] sm:$0xff]  ;;  %v1097_v39 = vpack.c.bf16 %v8106_v33, %v7807_v6  ;;  %8102 = vst [vmem:[%s10210_s18 + $0x1000] sm:$0xff] %v1081_v31 }
  0x19   : > { %v204_v8 = vld [vmem:[%s10187_s14] sm:$0xff]  ;;  %v8112_v35 = vld [vmem:[%s10187_s14 + $0x8] sm:$0xff]  ;;  %v1105_v40 = vpack.c.bf16 %v8109_v34, %v7808_v7  ;;  %8105 = vst [vmem:[%s10210_s18 + $0x1c00] sm:$0xff] %v1089_v32 }
  0x1a   : > { %v10199_v9 = vld [vmem:[%s10187_s14 + $0x4020] sm:$0xff]  ;;  %v1113_v41 = vpack.c.bf16 %v8112_v35, %v204_v8  ;;  %v8115_v42 = vld [vmem:[%s10187_s14 + $0x4028] sm:$0xff]  ;;  %8108 = vst [vmem:[%s10210_s18 + $0x800] sm:$0xff] %v1097_v39 }
  0x1b   : > { %v10202_v10 = vld [vmem:[%s10187_s14 + $0x2820] sm:$0xff]  ;;  %v8118_v43 = vld [vmem:[%s10187_s14 + $0x2828] sm:$0xff]  ;;  %v1121_v48 = vpack.c.bf16 %v8115_v42, %v10199_v9  ;;  %8111 = vst [vmem:[%s10210_s18 + $0x1400] sm:$0xff] %v1105_v40 }
  0x1c   : > { %v10205_v11 = vld [vmem:[%s10187_s14 + $0x1020] sm:$0xff]  ;;  %v8121_v44 = vld [vmem:[%s10187_s14 + $0x1028] sm:$0xff]  ;;  %v1129_v49 = vpack.c.bf16 %v8118_v43, %v10202_v10  ;;  %8114 = vst [vmem:[%s10210_s18 + $0x2000] sm:$0xff] %v1113_v41 }
  0x1d   : > { %v10213_v12 = vld [vmem:[%s10187_s14 + $0x3820] sm:$0xff]  ;;  %v1137_v50 = vpack.c.bf16 %v8121_v44, %v10205_v11  ;;  %v8124_v51 = vld [vmem:[%s10187_s14 + $0x3828] sm:$0xff]  ;;  %8117 = vst [vmem:[%s10210_s18 + $0x10] sm:$0xff] %v1121_v48 }
  0x1e   : > { %v10216_v13 = vld [vmem:[%s10187_s14 + $0x2020] sm:$0xff]  ;;  %v8127_v52 = vld [vmem:[%s10187_s14 + $0x2028] sm:$0xff]  ;;  %v1145_v57 = vpack.c.bf16 %v8124_v51, %v10213_v12  ;;  %8120 = vst [vmem:[%s10210_s18 + $0xc10] sm:$0xff] %v1129_v49 }
  0x1f   : > { %v10219_v14 = vld [vmem:[%s10187_s14 + $0x820] sm:$0xff]  ;;  %v8130_v53 = vld [vmem:[%s10187_s14 + $0x828] sm:$0xff]  ;;  %v1153_v58 = vpack.c.bf16 %v8127_v52, %v10216_v13  ;;  %8123 = vst [vmem:[%s10210_s18 + $0x1810] sm:$0xff] %v1137_v50 }
  0x20   : > { %v10225_v18 = vld [vmem:[%s10187_s14 + $0x3020] sm:$0xff]  ;;  %v1161_v59 = vpack.c.bf16 %v8130_v53, %v10219_v14  ;;  %v8133_v60 = vld [vmem:[%s10187_s14 + $0x3028] sm:$0xff]  ;;  %8126 = vst [vmem:[%s10210_s18 + $0x410] sm:$0xff] %v1145_v57 }
  0x21   : > { %v10228_v19 = vld [vmem:[%s10187_s14 + $0x1820] sm:$0xff]  ;;  %v8136_v61 = vld [vmem:[%s10187_s14 + $0x1828] sm:$0xff]  ;;  %v1169_v2 = vpack.c.bf16 %v8133_v60, %v10225_v18  ;;  %8129 = vst [vmem:[%s10210_s18 + $0x1010] sm:$0xff] %v1153_v58 }
  0x22   : > { %v10231_v20 = vld [vmem:[%s10187_s14 + $0x20] sm:$0xff]  ;;  %v8139_v62 = vld [vmem:[%s10187_s14 + $0x28] sm:$0xff]  ;;  %v1177_v3 = vpack.c.bf16 %v8136_v61, %v10228_v19  ;;  %8132 = vst [vmem:[%s10210_s18 + $0x1c10] sm:$0xff] %v1161_v59 }
  0x23   : > { %v10237_v27 = vld [vmem:[%s10187_s14 + $0x4040] sm:$0xff]  ;;  %v1185_v4 = vpack.c.bf16 %v8139_v62, %v10231_v20  ;;  %v8142_v5 = vld [vmem:[%s10187_s14 + $0x4048] sm:$0xff]  ;;  %8135 = vst [vmem:[%s10210_s18 + $0x810] sm:$0xff] %v1169_v2 }
  0x24   : > { %v10240_v28 = vld [vmem:[%s10187_s14 + $0x2840] sm:$0xff]  ;;  %v8145_v6 = vld [vmem:[%s10187_s14 + $0x2848] sm:$0xff]  ;;  %v1193_v11 = vpack.c.bf16 %v8142_v5, %v10237_v27  ;;  %8138 = vst [vmem:[%s10210_s18 + $0x1410] sm:$0xff] %v1177_v3 }
  0x25   : > { %v10243_v29 = vld [vmem:[%s10187_s14 + $0x1040] sm:$0xff]  ;;  %v8148_v7 = vld [vmem:[%s10187_s14 + $0x1048] sm:$0xff]  ;;  %v1201_v12 = vpack.c.bf16 %v8145_v6, %v10240_v28  ;;  %8141 = vst [vmem:[%s10210_s18 + $0x2010] sm:$0xff] %v1185_v4 }
  0x26   : > { %v10249_v36 = vld [vmem:[%s10187_s14 + $0x3840] sm:$0xff]  ;;  %v1209_v13 = vpack.c.bf16 %v8148_v7, %v10243_v29  ;;  %v8151_v14 = vld [vmem:[%s10187_s14 + $0x3848] sm:$0xff]  ;;  %8144 = vst [vmem:[%s10210_s18 + $0x20] sm:$0xff] %v1193_v11 }
  0x27   : > { %v10252_v37 = vld [vmem:[%s10187_s14 + $0x2040] sm:$0xff]  ;;  %v8154_v15 = vld [vmem:[%s10187_s14 + $0x2048] sm:$0xff]  ;;  %v1217_v20 = vpack.c.bf16 %v8151_v14, %v10249_v36  ;;  %8147 = vst [vmem:[%s10210_s18 + $0xc20] sm:$0xff] %v1201_v12 }
  0x28   : > { %v10255_v38 = vld [vmem:[%s10187_s14 + $0x840] sm:$0xff]  ;;  %v8157_v16 = vld [vmem:[%s10187_s14 + $0x848] sm:$0xff]  ;;  %v1225_v21 = vpack.c.bf16 %v8154_v15, %v10252_v37  ;;  %8150 = vst [vmem:[%s10210_s18 + $0x1820] sm:$0xff] %v1209_v13 }
  0x29   : > { %v10264_v45 = vld [vmem:[%s10187_s14 + $0x3040] sm:$0xff]  ;;  %v1233_v22 = vpack.c.bf16 %v8157_v16, %v10255_v38  ;;  %v8160_v23 = vld [vmem:[%s10187_s14 + $0x3048] sm:$0xff]  ;;  %8153 = vst [vmem:[%s10210_s18 + $0x420] sm:$0xff] %v1217_v20 }
  0x2a   : > { %v10267_v46 = vld [vmem:[%s10187_s14 + $0x1840] sm:$0xff]  ;;  %v8163_v24 = vld [vmem:[%s10187_s14 + $0x1848] sm:$0xff]  ;;  %v1241_v29 = vpack.c.bf16 %v8160_v23, %v10264_v45  ;;  %8156 = vst [vmem:[%s10210_s18 + $0x1020] sm:$0xff] %v1225_v21 }
  0x2b   : > { %v10270_v47 = vld [vmem:[%s10187_s14 + $0x40] sm:$0xff]  ;;  %v8166_v25 = vld [vmem:[%s10187_s14 + $0x48] sm:$0xff]  ;;  %v1249_v30 = vpack.c.bf16 %v8163_v24, %v10267_v46  ;;  %8159 = vst [vmem:[%s10210_s18 + $0x1c20] sm:$0xff] %v1233_v22 }
  0x2c   : > { %v10282_v54 = vld [vmem:[%s10187_s14 + $0x4060] sm:$0xff]  ;;  %v1257_v31 = vpack.c.bf16 %v8166_v25, %v10270_v47  ;;  %v8169_v32 = vld [vmem:[%s10187_s14 + $0x4068] sm:$0xff]  ;;  %8162 = vst [vmem:[%s10210_s18 + $0x820] sm:$0xff] %v1241_v29 }
  0x2d   : > { %v10285_v55 = vld [vmem:[%s10187_s14 + $0x2860] sm:$0xff]  ;;  %v8172_v33 = vld [vmem:[%s10187_s14 + $0x2868] sm:$0xff]  ;;  %v1265_v38 = vpack.c.bf16 %v8169_v32, %v10282_v54  ;;  %8165 = vst [vmem:[%s10210_s18 + $0x1420] sm:$0xff] %v1249_v30 }
  0x2e   : > { %v10288_v56 = vld [vmem:[%s10187_s14 + $0x1060] sm:$0xff]  ;;  %v8175_v34 = vld [vmem:[%s10187_s14 + $0x1068] sm:$0xff]  ;;  %v1273_v39 = vpack.c.bf16 %v8172_v33, %v10285_v55  ;;  %8168 = vst [vmem:[%s10210_s18 + $0x2020] sm:$0xff] %v1257_v31 }
  0x2f   : > { %v10300_v63 = vld [vmem:[%s10187_s14 + $0x3860] sm:$0xff]  ;;  %v1281_v40 = vpack.c.bf16 %v8175_v34, %v10288_v56  ;;  %v8178_v41 = vld [vmem:[%s10187_s14 + $0x3868] sm:$0xff]  ;;  %8171 = vst [vmem:[%s10210_s18 + $0x30] sm:$0xff] %v1265_v38 }
  0x30   : > { %v10303_v0 = vld [vmem:[%s10187_s14 + $0x2060] sm:$0xff]  ;;  %v8181_v42 = vld [vmem:[%s10187_s14 + $0x2068] sm:$0xff]  ;;  %v1289_v47 = vpack.c.bf16 %v8178_v41, %v10300_v63  ;;  %8174 = vst [vmem:[%s10210_s18 + $0xc30] sm:$0xff] %v1273_v39 }
  0x31   : > { %v10306_v1 = vld [vmem:[%s10187_s14 + $0x860] sm:$0xff]  ;;  %v8184_v43 = vld [vmem:[%s10187_s14 + $0x868] sm:$0xff]  ;;  %v1297_v48 = vpack.c.bf16 %v8181_v42, %v10303_v0  ;;  %8177 = vst [vmem:[%s10210_s18 + $0x1830] sm:$0xff] %v1281_v40 }
  0x32   : > { %v10318_v8 = vld [vmem:[%s10187_s14 + $0x3060] sm:$0xff]  ;;  %v1305_v49 = vpack.c.bf16 %v8184_v43, %v10306_v1  ;;  %v8187_v50 = vld [vmem:[%s10187_s14 + $0x3068] sm:$0xff]  ;;  %8180 = vst [vmem:[%s10210_s18 + $0x430] sm:$0xff] %v1289_v47 }
  0x33   : > { %v10321_v9 = vld [vmem:[%s10187_s14 + $0x1860] sm:$0xff]  ;;  %v8190_v51 = vld [vmem:[%s10187_s14 + $0x1868] sm:$0xff]  ;;  %v1313_v56 = vpack.c.bf16 %v8187_v50, %v10318_v8  ;;  %8183 = vst [vmem:[%s10210_s18 + $0x1030] sm:$0xff] %v1297_v48 }
  0x34   : > { %v10324_v10 = vld [vmem:[%s10187_s14 + $0x60] sm:$0xff]  ;;  %v8193_v52 = vld [vmem:[%s10187_s14 + $0x68] sm:$0xff]  ;;  %v1321_v57 = vpack.c.bf16 %v8190_v51, %v10321_v9  ;;  %8186 = vst [vmem:[%s10210_s18 + $0x1c30] sm:$0xff] %v1305_v49 }
  0x35   : > { %v10336_v17 = vld [vmem:[%s10187_s14 + $0x4080] sm:$0xff]  ;;  %v1329_v58 = vpack.c.bf16 %v8193_v52, %v10324_v10  ;;  %v8196_v59 = vld [vmem:[%s10187_s14 + $0x4088] sm:$0xff]  ;;  %8189 = vst [vmem:[%s10210_s18 + $0x830] sm:$0xff] %v1313_v56 }
  0x36   : > { %v10339_v18 = vld [vmem:[%s10187_s14 + $0x2880] sm:$0xff]  ;;  %v8199_v60 = vld [vmem:[%s10187_s14 + $0x2888] sm:$0xff]  ;;  %v1337_v1 = vpack.c.bf16 %v8196_v59, %v10336_v17  ;;  %8192 = vst [vmem:[%s10210_s18 + $0x1430] sm:$0xff] %v1321_v57 }
  0x37   : > { %v10342_v19 = vld [vmem:[%s10187_s14 + $0x1080] sm:$0xff]  ;;  %v8202_v61 = vld [vmem:[%s10187_s14 + $0x1088] sm:$0xff]  ;;  %v1345_v2 = vpack.c.bf16 %v8199_v60, %v10339_v18  ;;  %8195 = vst [vmem:[%s10210_s18 + $0x2030] sm:$0xff] %v1329_v58 }
  0x38   : > { %v10354_v26 = vld [vmem:[%s10187_s14 + $0x3880] sm:$0xff]  ;;  %v1353_v3 = vpack.c.bf16 %v8202_v61, %v10342_v19  ;;  %v8205_v4 = vld [vmem:[%s10187_s14 + $0x3888] sm:$0xff]  ;;  %8198 = vst [vmem:[%s10210_s18 + $0x40] sm:$0xff] %v1337_v1 }
  0x39   : > { %v10357_v27 = vld [vmem:[%s10187_s14 + $0x2080] sm:$0xff]  ;;  %v8208_v5 = vld [vmem:[%s10187_s14 + $0x2088] sm:$0xff]  ;;  %v1361_v10 = vpack.c.bf16 %v8205_v4, %v10354_v26  ;;  %8201 = vst [vmem:[%s10210_s18 + $0xc40] sm:$0xff] %v1345_v2 }
  0x3a   : > { %v10360_v28 = vld [vmem:[%s10187_s14 + $0x880] sm:$0xff]  ;;  %v8211_v6 = vld [vmem:[%s10187_s14 + $0x888] sm:$0xff]  ;;  %v1369_v11 = vpack.c.bf16 %v8208_v5, %v10357_v27  ;;  %8204 = vst [vmem:[%s10210_s18 + $0x1840] sm:$0xff] %v1353_v3 }
  0x3b   : > { %v10372_v35 = vld [vmem:[%s10187_s14 + $0x3080] sm:$0xff]  ;;  %v1377_v12 = vpack.c.bf16 %v8211_v6, %v10360_v28  ;;  %v8214_v13 = vld [vmem:[%s10187_s14 + $0x3088] sm:$0xff]  ;;  %8207 = vst [vmem:[%s10210_s18 + $0x440] sm:$0xff] %v1361_v10 }
  0x3c   : > { %v10375_v36 = vld [vmem:[%s10187_s14 + $0x1880] sm:$0xff]  ;;  %v8217_v14 = vld [vmem:[%s10187_s14 + $0x1888] sm:$0xff]  ;;  %v1385_v19 = vpack.c.bf16 %v8214_v13, %v10372_v35  ;;  %8210 = vst [vmem:[%s10210_s18 + $0x1040] sm:$0xff] %v1369_v11 }
  0x3d   : > { %v10378_v37 = vld [vmem:[%s10187_s14 + $0x80] sm:$0xff]  ;;  %v8220_v15 = vld [vmem:[%s10187_s14 + $0x88] sm:$0xff]  ;;  %v1393_v20 = vpack.c.bf16 %v8217_v14, %v10375_v36  ;;  %8213 = vst [vmem:[%s10210_s18 + $0x1c40] sm:$0xff] %v1377_v12 }
  0x3e   : > { %v10390_v44 = vld [vmem:[%s10187_s14 + $0x40a0] sm:$0xff]  ;;  %v1401_v21 = vpack.c.bf16 %v8220_v15, %v10378_v37  ;;  %v8223_v22 = vld [vmem:[%s10187_s14 + $0x40a8] sm:$0xff]  ;;  %8216 = vst [vmem:[%s10210_s18 + $0x840] sm:$0xff] %v1385_v19 }
  0x3f   : > { %v10393_v45 = vld [vmem:[%s10187_s14 + $0x28a0] sm:$0xff]  ;;  %v8226_v23 = vld [vmem:[%s10187_s14 + $0x28a8] sm:$0xff]  ;;  %v1409_v28 = vpack.c.bf16 %v8223_v22, %v10390_v44  ;;  %8219 = vst [vmem:[%s10210_s18 + $0x1440] sm:$0xff] %v1393_v20 }
  0x40   : > { %v10396_v46 = vld [vmem:[%s10187_s14 + $0x10a0] sm:$0xff]  ;;  %v8229_v24 = vld [vmem:[%s10187_s14 + $0x10a8] sm:$0xff]  ;;  %v1417_v29 = vpack.c.bf16 %v8226_v23, %v10393_v45  ;;  %8222 = vst [vmem:[%s10210_s18 + $0x2040] sm:$0xff] %v1401_v21 }
  0x41   : > { %v10408_v53 = vld [vmem:[%s10187_s14 + $0x38a0] sm:$0xff]  ;;  %v1425_v30 = vpack.c.bf16 %v8229_v24, %v10396_v46  ;;  %v8232_v31 = vld [vmem:[%s10187_s14 + $0x38a8] sm:$0xff]  ;;  %8225 = vst [vmem:[%s10210_s18 + $0x50] sm:$0xff] %v1409_v28 }
  0x42   : > { %v10411_v54 = vld [vmem:[%s10187_s14 + $0x20a0] sm:$0xff]  ;;  %v8235_v32 = vld [vmem:[%s10187_s14 + $0x20a8] sm:$0xff]  ;;  %v1433_v37 = vpack.c.bf16 %v8232_v31, %v10408_v53  ;;  %8228 = vst [vmem:[%s10210_s18 + $0xc50] sm:$0xff] %v1417_v29 }
  0x43   : > { %v10414_v55 = vld [vmem:[%s10187_s14 + $0x8a0] sm:$0xff]  ;;  %v8238_v33 = vld [vmem:[%s10187_s14 + $0x8a8] sm:$0xff]  ;;  %v1441_v38 = vpack.c.bf16 %v8235_v32, %v10411_v54  ;;  %8231 = vst [vmem:[%s10210_s18 + $0x1850] sm:$0xff] %v1425_v30 }
  0x44   : > { %v10426_v62 = vld [vmem:[%s10187_s14 + $0x30a0] sm:$0xff]  ;;  %v1449_v39 = vpack.c.bf16 %v8238_v33, %v10414_v55  ;;  %v8241_v40 = vld [vmem:[%s10187_s14 + $0x30a8] sm:$0xff]  ;;  %8234 = vst [vmem:[%s10210_s18 + $0x450] sm:$0xff] %v1433_v37 }
  0x45   : > { %v10429_v63 = vld [vmem:[%s10187_s14 + $0x18a0] sm:$0xff]  ;;  %v8244_v41 = vld [vmem:[%s10187_s14 + $0x18a8] sm:$0xff]  ;;  %v1457_v46 = vpack.c.bf16 %v8241_v40, %v10426_v62  ;;  %8237 = vst [vmem:[%s10210_s18 + $0x1050] sm:$0xff] %v1441_v38 }
  0x46   : > { %v10432_v0 = vld [vmem:[%s10187_s14 + $0xa0] sm:$0xff]  ;;  %v8247_v42 = vld [vmem:[%s10187_s14 + $0xa8] sm:$0xff]  ;;  %v1465_v47 = vpack.c.bf16 %v8244_v41, %v10429_v63  ;;  %8240 = vst [vmem:[%s10210_s18 + $0x1c50] sm:$0xff] %v1449_v39 }
  0x47   : > { %v10444_v7 = vld [vmem:[%s10187_s14 + $0x40c0] sm:$0xff]  ;;  %v1473_v48 = vpack.c.bf16 %v8247_v42, %v10432_v0  ;;  %v8250_v49 = vld [vmem:[%s10187_s14 + $0x40c8] sm:$0xff]  ;;  %8243 = vst [vmem:[%s10210_s18 + $0x850] sm:$0xff] %v1457_v46 }
  0x48   : > { %v10447_v8 = vld [vmem:[%s10187_s14 + $0x28c0] sm:$0xff]  ;;  %v8253_v50 = vld [vmem:[%s10187_s14 + $0x28c8] sm:$0xff]  ;;  %v1481_v55 = vpack.c.bf16 %v8250_v49, %v10444_v7  ;;  %8246 = vst [vmem:[%s10210_s18 + $0x1450] sm:$0xff] %v1465_v47 }
  0x49   : > { %v10450_v9 = vld [vmem:[%s10187_s14 + $0x10c0] sm:$0xff]  ;;  %v8256_v51 = vld [vmem:[%s10187_s14 + $0x10c8] sm:$0xff]  ;;  %v1489_v56 = vpack.c.bf16 %v8253_v50, %v10447_v8  ;;  %8249 = vst [vmem:[%s10210_s18 + $0x2050] sm:$0xff] %v1473_v48 }
  0x4a   : > { %v10462_v16 = vld [vmem:[%s10187_s14 + $0x38c0] sm:$0xff]  ;;  %v1497_v57 = vpack.c.bf16 %v8256_v51, %v10450_v9  ;;  %v8259_v58 = vld [vmem:[%s10187_s14 + $0x38c8] sm:$0xff]  ;;  %8252 = vst [vmem:[%s10210_s18 + $0x60] sm:$0xff] %v1481_v55 }
  0x4b   : > { %v10465_v17 = vld [vmem:[%s10187_s14 + $0x20c0] sm:$0xff]  ;;  %v8262_v59 = vld [vmem:[%s10187_s14 + $0x20c8] sm:$0xff]  ;;  %v1505_v0 = vpack.c.bf16 %v8259_v58, %v10462_v16  ;;  %8255 = vst [vmem:[%s10210_s18 + $0xc60] sm:$0xff] %v1489_v56 }
  0x4c   : > { %v10468_v18 = vld [vmem:[%s10187_s14 + $0x8c0] sm:$0xff]  ;;  %v8265_v60 = vld [vmem:[%s10187_s14 + $0x8c8] sm:$0xff]  ;;  %v1513_v1 = vpack.c.bf16 %v8262_v59, %v10465_v17  ;;  %8258 = vst [vmem:[%s10210_s18 + $0x1860] sm:$0xff] %v1497_v57 }
  0x4d   : > { %v10480_v25 = vld [vmem:[%s10187_s14 + $0x30c0] sm:$0xff]  ;;  %v1521_v2 = vpack.c.bf16 %v8265_v60, %v10468_v18  ;;  %v8268_v3 = vld [vmem:[%s10187_s14 + $0x30c8] sm:$0xff]  ;;  %8261 = vst [vmem:[%s10210_s18 + $0x460] sm:$0xff] %v1505_v0 }
  0x4e   : > { %v10483_v26 = vld [vmem:[%s10187_s14 + $0x18c0] sm:$0xff]  ;;  %v8271_v4 = vld [vmem:[%s10187_s14 + $0x18c8] sm:$0xff]  ;;  %v1529_v9 = vpack.c.bf16 %v8268_v3, %v10480_v25  ;;  %8264 = vst [vmem:[%s10210_s18 + $0x1060] sm:$0xff] %v1513_v1 }
  0x4f   : > { %v10486_v27 = vld [vmem:[%s10187_s14 + $0xc0] sm:$0xff]  ;;  %v8274_v5 = vld [vmem:[%s10187_s14 + $0xc8] sm:$0xff]  ;;  %v1537_v10 = vpack.c.bf16 %v8271_v4, %v10483_v26  ;;  %8267 = vst [vmem:[%s10210_s18 + $0x1c60] sm:$0xff] %v1521_v2 }
  0x50   : > { %v10498_v34 = vld [vmem:[%s10187_s14 + $0x40e0] sm:$0xff]  ;;  %v1545_v11 = vpack.c.bf16 %v8274_v5, %v10486_v27  ;;  %v8277_v12 = vld [vmem:[%s10187_s14 + $0x40e8] sm:$0xff]  ;;  %8270 = vst [vmem:[%s10210_s18 + $0x860] sm:$0xff] %v1529_v9 }
  0x51   : > { %v10501_v35 = vld [vmem:[%s10187_s14 + $0x28e0] sm:$0xff]  ;;  %v8280_v13 = vld [vmem:[%s10187_s14 + $0x28e8] sm:$0xff]  ;;  %v1553_v18 = vpack.c.bf16 %v8277_v12, %v10498_v34  ;;  %8273 = vst [vmem:[%s10210_s18 + $0x1460] sm:$0xff] %v1537_v10 }
  0x52   : > { %v10504_v36 = vld [vmem:[%s10187_s14 + $0x10e0] sm:$0xff]  ;;  %v8283_v14 = vld [vmem:[%s10187_s14 + $0x10e8] sm:$0xff]  ;;  %v1561_v19 = vpack.c.bf16 %v8280_v13, %v10501_v35  ;;  %8276 = vst [vmem:[%s10210_s18 + $0x2060] sm:$0xff] %v1545_v11 }
  0x53   : > { %v10516_v43 = vld [vmem:[%s10187_s14 + $0x38e0] sm:$0xff]  ;;  %v1569_v20 = vpack.c.bf16 %v8283_v14, %v10504_v36  ;;  %v8286_v21 = vld [vmem:[%s10187_s14 + $0x38e8] sm:$0xff]  ;;  %8279 = vst [vmem:[%s10210_s18 + $0x70] sm:$0xff] %v1553_v18 }
  0x54   : > { %v10519_v44 = vld [vmem:[%s10187_s14 + $0x20e0] sm:$0xff]  ;;  %v8289_v22 = vld [vmem:[%s10187_s14 + $0x20e8] sm:$0xff]  ;;  %v1577_v27 = vpack.c.bf16 %v8286_v21, %v10516_v43  ;;  %8282 = vst [vmem:[%s10210_s18 + $0xc70] sm:$0xff] %v1561_v19 }
  0x55   : > { %v10522_v45 = vld [vmem:[%s10187_s14 + $0x8e0] sm:$0xff]  ;;  %v8292_v23 = vld [vmem:[%s10187_s14 + $0x8e8] sm:$0xff]  ;;  %v1585_v28 = vpack.c.bf16 %v8289_v22, %v10519_v44  ;;  %8285 = vst [vmem:[%s10210_s18 + $0x1870] sm:$0xff] %v1569_v20 }
  0x56   : > { %v10534_v52 = vld [vmem:[%s10187_s14 + $0x30e0] sm:$0xff]  ;;  %v1593_v29 = vpack.c.bf16 %v8292_v23, %v10522_v45  ;;  %v8295_v30 = vld [vmem:[%s10187_s14 + $0x30e8] sm:$0xff]  ;;  %8288 = vst [vmem:[%s10210_s18 + $0x470] sm:$0xff] %v1577_v27 }
  0x57   : > { %v10537_v53 = vld [vmem:[%s10187_s14 + $0x18e0] sm:$0xff]  ;;  %v8298_v31 = vld [vmem:[%s10187_s14 + $0x18e8] sm:$0xff]  ;;  %v1601_v36 = vpack.c.bf16 %v8295_v30, %v10534_v52  ;;  %8291 = vst [vmem:[%s10210_s18 + $0x1070] sm:$0xff] %v1585_v28 }
  0x58   : > { %v10540_v54 = vld [vmem:[%s10187_s14 + $0xe0] sm:$0xff]  ;;  %v8301_v32 = vld [vmem:[%s10187_s14 + $0xe8] sm:$0xff]  ;;  %v1609_v37 = vpack.c.bf16 %v8298_v31, %v10537_v53  ;;  %8294 = vst [vmem:[%s10210_s18 + $0x1c70] sm:$0xff] %v1593_v29 }
  0x59   : > { %v10552_v61 = vld [vmem:[%s10187_s14 + $0x4100] sm:$0xff]  ;;  %v1617_v38 = vpack.c.bf16 %v8301_v32, %v10540_v54  ;;  %v8304_v39 = vld [vmem:[%s10187_s14 + $0x4108] sm:$0xff]  ;;  %8297 = vst [vmem:[%s10210_s18 + $0x870] sm:$0xff] %v1601_v36 }
  0x5a   : > { %v10555_v62 = vld [vmem:[%s10187_s14 + $0x2900] sm:$0xff]  ;;  %v8307_v40 = vld [vmem:[%s10187_s14 + $0x2908] sm:$0xff]  ;;  %v1625_v45 = vpack.c.bf16 %v8304_v39, %v10552_v61  ;;  %8300 = vst [vmem:[%s10210_s18 + $0x1470] sm:$0xff] %v1609_v37 }
  0x5b   : > { %v10558_v63 = vld [vmem:[%s10187_s14 + $0x1100] sm:$0xff]  ;;  %v8310_v41 = vld [vmem:[%s10187_s14 + $0x1108] sm:$0xff]  ;;  %v1633_v46 = vpack.c.bf16 %v8307_v40, %v10555_v62  ;;  %8303 = vst [vmem:[%s10210_s18 + $0x2070] sm:$0xff] %v1617_v38 }
  0x5c   : > { %v10570_v6 = vld [vmem:[%s10187_s14 + $0x3900] sm:$0xff]  ;;  %v1641_v47 = vpack.c.bf16 %v8310_v41, %v10558_v63  ;;  %v8313_v48 = vld [vmem:[%s10187_s14 + $0x3908] sm:$0xff]  ;;  %8306 = vst [vmem:[%s10210_s18 + $0x80] sm:$0xff] %v1625_v45 }
  0x5d   : > { %v10573_v7 = vld [vmem:[%s10187_s14 + $0x2100] sm:$0xff]  ;;  %v8316_v49 = vld [vmem:[%s10187_s14 + $0x2108] sm:$0xff]  ;;  %v1649_v54 = vpack.c.bf16 %v8313_v48, %v10570_v6  ;;  %8309 = vst [vmem:[%s10210_s18 + $0xc80] sm:$0xff] %v1633_v46 }
  0x5e   : > { %v10576_v8 = vld [vmem:[%s10187_s14 + $0x900] sm:$0xff]  ;;  %v8319_v50 = vld [vmem:[%s10187_s14 + $0x908] sm:$0xff]  ;;  %v1657_v55 = vpack.c.bf16 %v8316_v49, %v10573_v7  ;;  %8312 = vst [vmem:[%s10210_s18 + $0x1880] sm:$0xff] %v1641_v47 }
  0x5f   : > { %v10588_v15 = vld [vmem:[%s10187_s14 + $0x3100] sm:$0xff]  ;;  %v1665_v56 = vpack.c.bf16 %v8319_v50, %v10576_v8  ;;  %v8322_v57 = vld [vmem:[%s10187_s14 + $0x3108] sm:$0xff]  ;;  %8315 = vst [vmem:[%s10210_s18 + $0x480] sm:$0xff] %v1649_v54 }
  0x60   : > { %v10591_v16 = vld [vmem:[%s10187_s14 + $0x1900] sm:$0xff]  ;;  %v8325_v58 = vld [vmem:[%s10187_s14 + $0x1908] sm:$0xff]  ;;  %v1673_v63 = vpack.c.bf16 %v8322_v57, %v10588_v15  ;;  %8318 = vst [vmem:[%s10210_s18 + $0x1080] sm:$0xff] %v1657_v55 }
  0x61   : > { %v10594_v17 = vld [vmem:[%s10187_s14 + $0x100] sm:$0xff]  ;;  %v8328_v59 = vld [vmem:[%s10187_s14 + $0x108] sm:$0xff]  ;;  %v1681_v0 = vpack.c.bf16 %v8325_v58, %v10591_v16  ;;  %8321 = vst [vmem:[%s10210_s18 + $0x1c80] sm:$0xff] %v1665_v56 }
  0x62   : > { %v10606_v24 = vld [vmem:[%s10187_s14 + $0x4120] sm:$0xff]  ;;  %v1689_v1 = vpack.c.bf16 %v8328_v59, %v10594_v17  ;;  %v8331_v2 = vld [vmem:[%s10187_s14 + $0x4128] sm:$0xff]  ;;  %8324 = vst [vmem:[%s10210_s18 + $0x880] sm:$0xff] %v1673_v63 }
  0x63   : > { %v10609_v25 = vld [vmem:[%s10187_s14 + $0x2920] sm:$0xff]  ;;  %v8334_v3 = vld [vmem:[%s10187_s14 + $0x2928] sm:$0xff]  ;;  %v1697_v8 = vpack.c.bf16 %v8331_v2, %v10606_v24  ;;  %8327 = vst [vmem:[%s10210_s18 + $0x1480] sm:$0xff] %v1681_v0 }
  0x64   : > { %v10612_v26 = vld [vmem:[%s10187_s14 + $0x1120] sm:$0xff]  ;;  %v8337_v4 = vld [vmem:[%s10187_s14 + $0x1128] sm:$0xff]  ;;  %v1705_v9 = vpack.c.bf16 %v8334_v3, %v10609_v25  ;;  %8330 = vst [vmem:[%s10210_s18 + $0x2080] sm:$0xff] %v1689_v1 }
  0x65   : > { %v10624_v33 = vld [vmem:[%s10187_s14 + $0x3920] sm:$0xff]  ;;  %v1713_v10 = vpack.c.bf16 %v8337_v4, %v10612_v26  ;;  %v8340_v11 = vld [vmem:[%s10187_s14 + $0x3928] sm:$0xff]  ;;  %8333 = vst [vmem:[%s10210_s18 + $0x90] sm:$0xff] %v1697_v8 }
  0x66   : > { %v10627_v34 = vld [vmem:[%s10187_s14 + $0x2120] sm:$0xff]  ;;  %v8343_v12 = vld [vmem:[%s10187_s14 + $0x2128] sm:$0xff]  ;;  %v1721_v17 = vpack.c.bf16 %v8340_v11, %v10624_v33  ;;  %8336 = vst [vmem:[%s10210_s18 + $0xc90] sm:$0xff] %v1705_v9 }
  0x67   : > { %v10630_v35 = vld [vmem:[%s10187_s14 + $0x920] sm:$0xff]  ;;  %v8346_v13 = vld [vmem:[%s10187_s14 + $0x928] sm:$0xff]  ;;  %v1729_v18 = vpack.c.bf16 %v8343_v12, %v10627_v34  ;;  %8339 = vst [vmem:[%s10210_s18 + $0x1890] sm:$0xff] %v1713_v10 }
  0x68   : > { %v10642_v42 = vld [vmem:[%s10187_s14 + $0x3120] sm:$0xff]  ;;  %v1737_v19 = vpack.c.bf16 %v8346_v13, %v10630_v35  ;;  %v8349_v20 = vld [vmem:[%s10187_s14 + $0x3128] sm:$0xff]  ;;  %8342 = vst [vmem:[%s10210_s18 + $0x490] sm:$0xff] %v1721_v17 }
  0x69   : > { %v10645_v43 = vld [vmem:[%s10187_s14 + $0x1920] sm:$0xff]  ;;  %v8352_v21 = vld [vmem:[%s10187_s14 + $0x1928] sm:$0xff]  ;;  %v1745_v26 = vpack.c.bf16 %v8349_v20, %v10642_v42  ;;  %8345 = vst [vmem:[%s10210_s18 + $0x1090] sm:$0xff] %v1729_v18 }
  0x6a   : > { %v10648_v44 = vld [vmem:[%s10187_s14 + $0x120] sm:$0xff]  ;;  %v8355_v22 = vld [vmem:[%s10187_s14 + $0x128] sm:$0xff]  ;;  %v1753_v27 = vpack.c.bf16 %v8352_v21, %v10645_v43  ;;  %8348 = vst [vmem:[%s10210_s18 + $0x1c90] sm:$0xff] %v1737_v19 }
  0x6b   : > { %v10660_v51 = vld [vmem:[%s10187_s14 + $0x4140] sm:$0xff]  ;;  %v1761_v28 = vpack.c.bf16 %v8355_v22, %v10648_v44  ;;  %v8358_v29 = vld [vmem:[%s10187_s14 + $0x4148] sm:$0xff]  ;;  %8351 = vst [vmem:[%s10210_s18 + $0x890] sm:$0xff] %v1745_v26 }
  0x6c   : > { %v10663_v52 = vld [vmem:[%s10187_s14 + $0x2940] sm:$0xff]  ;;  %v8361_v30 = vld [vmem:[%s10187_s14 + $0x2948] sm:$0xff]  ;;  %v1769_v35 = vpack.c.bf16 %v8358_v29, %v10660_v51  ;;  %8354 = vst [vmem:[%s10210_s18 + $0x1490] sm:$0xff] %v1753_v27 }
  0x6d   : > { %v10666_v53 = vld [vmem:[%s10187_s14 + $0x1140] sm:$0xff]  ;;  %v8364_v31 = vld [vmem:[%s10187_s14 + $0x1148] sm:$0xff]  ;;  %v1777_v36 = vpack.c.bf16 %v8361_v30, %v10663_v52  ;;  %8357 = vst [vmem:[%s10210_s18 + $0x2090] sm:$0xff] %v1761_v28 }
  0x6e   : > { %v10678_v60 = vld [vmem:[%s10187_s14 + $0x3940] sm:$0xff]  ;;  %v1785_v37 = vpack.c.bf16 %v8364_v31, %v10666_v53  ;;  %v8367_v38 = vld [vmem:[%s10187_s14 + $0x3948] sm:$0xff]  ;;  %8360 = vst [vmem:[%s10210_s18 + $0xa0] sm:$0xff] %v1769_v35 }
  0x6f   : > { %v10681_v61 = vld [vmem:[%s10187_s14 + $0x2140] sm:$0xff]  ;;  %v8370_v39 = vld [vmem:[%s10187_s14 + $0x2148] sm:$0xff]  ;;  %v1793_v44 = vpack.c.bf16 %v8367_v38, %v10678_v60  ;;  %8363 = vst [vmem:[%s10210_s18 + $0xca0] sm:$0xff] %v1777_v36 }
  0x70   : > { %v10684_v62 = vld [vmem:[%s10187_s14 + $0x940] sm:$0xff]  ;;  %v8373_v40 = vld [vmem:[%s10187_s14 + $0x948] sm:$0xff]  ;;  %v1801_v45 = vpack.c.bf16 %v8370_v39, %v10681_v61  ;;  %8366 = vst [vmem:[%s10210_s18 + $0x18a0] sm:$0xff] %v1785_v37 }
  0x71   : > { %v10696_v5 = vld [vmem:[%s10187_s14 + $0x3140] sm:$0xff]  ;;  %v1809_v46 = vpack.c.bf16 %v8373_v40, %v10684_v62  ;;  %v8376_v47 = vld [vmem:[%s10187_s14 + $0x3148] sm:$0xff]  ;;  %8369 = vst [vmem:[%s10210_s18 + $0x4a0] sm:$0xff] %v1793_v44 }
  0x72   : > { %v10699_v6 = vld [vmem:[%s10187_s14 + $0x1940] sm:$0xff]  ;;  %v8379_v48 = vld [vmem:[%s10187_s14 + $0x1948] sm:$0xff]  ;;  %v1817_v53 = vpack.c.bf16 %v8376_v47, %v10696_v5  ;;  %8372 = vst [vmem:[%s10210_s18 + $0x10a0] sm:$0xff] %v1801_v45 }
  0x73   : > { %v10702_v7 = vld [vmem:[%s10187_s14 + $0x140] sm:$0xff]  ;;  %v8382_v49 = vld [vmem:[%s10187_s14 + $0x148] sm:$0xff]  ;;  %v1825_v54 = vpack.c.bf16 %v8379_v48, %v10699_v6  ;;  %8375 = vst [vmem:[%s10210_s18 + $0x1ca0] sm:$0xff] %v1809_v46 }
  0x74   : > { %v10714_v14 = vld [vmem:[%s10187_s14 + $0x4160] sm:$0xff]  ;;  %v1833_v55 = vpack.c.bf16 %v8382_v49, %v10702_v7  ;;  %v8385_v56 = vld [vmem:[%s10187_s14 + $0x4168] sm:$0xff]  ;;  %8378 = vst [vmem:[%s10210_s18 + $0x8a0] sm:$0xff] %v1817_v53 }
  0x75   : > { %v10717_v15 = vld [vmem:[%s10187_s14 + $0x2960] sm:$0xff]  ;;  %v8388_v57 = vld [vmem:[%s10187_s14 + $0x2968] sm:$0xff]  ;;  %v1841_v62 = vpack.c.bf16 %v8385_v56, %v10714_v14  ;;  %8381 = vst [vmem:[%s10210_s18 + $0x14a0] sm:$0xff] %v1825_v54 }
  0x76   : > { %v10720_v16 = vld [vmem:[%s10187_s14 + $0x1160] sm:$0xff]  ;;  %v8391_v58 = vld [vmem:[%s10187_s14 + $0x1168] sm:$0xff]  ;;  %v1849_v63 = vpack.c.bf16 %v8388_v57, %v10717_v15  ;;  %8384 = vst [vmem:[%s10210_s18 + $0x20a0] sm:$0xff] %v1833_v55 }
  0x77   : > { %v10732_v23 = vld [vmem:[%s10187_s14 + $0x3960] sm:$0xff]  ;;  %v1857_v0 = vpack.c.bf16 %v8391_v58, %v10720_v16  ;;  %v8394_v1 = vld [vmem:[%s10187_s14 + $0x3968] sm:$0xff]  ;;  %8387 = vst [vmem:[%s10210_s18 + $0xb0] sm:$0xff] %v1841_v62 }
  0x78   : > { %v10735_v24 = vld [vmem:[%s10187_s14 + $0x2160] sm:$0xff]  ;;  %v8397_v2 = vld [vmem:[%s10187_s14 + $0x2168] sm:$0xff]  ;;  %v1865_v7 = vpack.c.bf16 %v8394_v1, %v10732_v23  ;;  %8390 = vst [vmem:[%s10210_s18 + $0xcb0] sm:$0xff] %v1849_v63 }
  0x79   : > { %v10738_v25 = vld [vmem:[%s10187_s14 + $0x960] sm:$0xff]  ;;  %v8400_v3 = vld [vmem:[%s10187_s14 + $0x968] sm:$0xff]  ;;  %v1873_v8 = vpack.c.bf16 %v8397_v2, %v10735_v24  ;;  %8393 = vst [vmem:[%s10210_s18 + $0x18b0] sm:$0xff] %v1857_v0 }
  0x7a   : > { %v10750_v32 = vld [vmem:[%s10187_s14 + $0x3160] sm:$0xff]  ;;  %v1881_v9 = vpack.c.bf16 %v8400_v3, %v10738_v25  ;;  %v8403_v10 = vld [vmem:[%s10187_s14 + $0x3168] sm:$0xff]  ;;  %8396 = vst [vmem:[%s10210_s18 + $0x4b0] sm:$0xff] %v1865_v7 }
  0x7b   : > { %v10753_v33 = vld [vmem:[%s10187_s14 + $0x1960] sm:$0xff]  ;;  %v8406_v11 = vld [vmem:[%s10187_s14 + $0x1968] sm:$0xff]  ;;  %v1889_v16 = vpack.c.bf16 %v8403_v10, %v10750_v32  ;;  %8399 = vst [vmem:[%s10210_s18 + $0x10b0] sm:$0xff] %v1873_v8 }
  0x7c   : > { %v10756_v34 = vld [vmem:[%s10187_s14 + $0x160] sm:$0xff]  ;;  %v8409_v12 = vld [vmem:[%s10187_s14 + $0x168] sm:$0xff]  ;;  %v1897_v17 = vpack.c.bf16 %v8406_v11, %v10753_v33  ;;  %8402 = vst [vmem:[%s10210_s18 + $0x1cb0] sm:$0xff] %v1881_v9 }
  0x7d   : > { %v10768_v41 = vld [vmem:[%s10187_s14 + $0x4180] sm:$0xff]  ;;  %v1905_v18 = vpack.c.bf16 %v8409_v12, %v10756_v34  ;;  %v8412_v19 = vld [vmem:[%s10187_s14 + $0x4188] sm:$0xff]  ;;  %8405 = vst [vmem:[%s10210_s18 + $0x8b0] sm:$0xff] %v1889_v16 }
  0x7e   : > { %v10771_v42 = vld [vmem:[%s10187_s14 + $0x2980] sm:$0xff]  ;;  %v8415_v20 = vld [vmem:[%s10187_s14 + $0x2988] sm:$0xff]  ;;  %v1913_v25 = vpack.c.bf16 %v8412_v19, %v10768_v41  ;;  %8408 = vst [vmem:[%s10210_s18 + $0x14b0] sm:$0xff] %v1897_v17 }
  0x7f   : > { %v10774_v43 = vld [vmem:[%s10187_s14 + $0x1180] sm:$0xff]  ;;  %v8418_v21 = vld [vmem:[%s10187_s14 + $0x1188] sm:$0xff]  ;;  %v1921_v26 = vpack.c.bf16 %v8415_v20, %v10771_v42  ;;  %8411 = vst [vmem:[%s10210_s18 + $0x20b0] sm:$0xff] %v1905_v18 }
  0x80   : > { %v10786_v50 = vld [vmem:[%s10187_s14 + $0x3980] sm:$0xff]  ;;  %v1929_v27 = vpack.c.bf16 %v8418_v21, %v10774_v43  ;;  %v8421_v28 = vld [vmem:[%s10187_s14 + $0x3988] sm:$0xff]  ;;  %8414 = vst [vmem:[%s10210_s18 + $0xc0] sm:$0xff] %v1913_v25 }
  0x81   : > { %v10789_v51 = vld [vmem:[%s10187_s14 + $0x2180] sm:$0xff]  ;;  %v8424_v29 = vld [vmem:[%s10187_s14 + $0x2188] sm:$0xff]  ;;  %v1937_v34 = vpack.c.bf16 %v8421_v28, %v10786_v50  ;;  %8417 = vst [vmem:[%s10210_s18 + $0xcc0] sm:$0xff] %v1921_v26 }
  0x82   : > { %v10792_v52 = vld [vmem:[%s10187_s14 + $0x980] sm:$0xff]  ;;  %v8427_v30 = vld [vmem:[%s10187_s14 + $0x988] sm:$0xff]  ;;  %v1945_v35 = vpack.c.bf16 %v8424_v29, %v10789_v51  ;;  %8420 = vst [vmem:[%s10210_s18 + $0x18c0] sm:$0xff] %v1929_v27 }
  0x83   : > { %v10804_v59 = vld [vmem:[%s10187_s14 + $0x3180] sm:$0xff]  ;;  %v1953_v36 = vpack.c.bf16 %v8427_v30, %v10792_v52  ;;  %v8430_v37 = vld [vmem:[%s10187_s14 + $0x3188] sm:$0xff]  ;;  %8423 = vst [vmem:[%s10210_s18 + $0x4c0] sm:$0xff] %v1937_v34 }
  0x84   : > { %v10807_v60 = vld [vmem:[%s10187_s14 + $0x1980] sm:$0xff]  ;;  %v8433_v38 = vld [vmem:[%s10187_s14 + $0x1988] sm:$0xff]  ;;  %v1961_v43 = vpack.c.bf16 %v8430_v37, %v10804_v59  ;;  %8426 = vst [vmem:[%s10210_s18 + $0x10c0] sm:$0xff] %v1945_v35 }
  0x85   : > { %v10810_v61 = vld [vmem:[%s10187_s14 + $0x180] sm:$0xff]  ;;  %v8436_v39 = vld [vmem:[%s10187_s14 + $0x188] sm:$0xff]  ;;  %v1969_v44 = vpack.c.bf16 %v8433_v38, %v10807_v60  ;;  %8429 = vst [vmem:[%s10210_s18 + $0x1cc0] sm:$0xff] %v1953_v36 }
  0x86   : > { %v10822_v4 = vld [vmem:[%s10187_s14 + $0x41a0] sm:$0xff]  ;;  %v1977_v45 = vpack.c.bf16 %v8436_v39, %v10810_v61  ;;  %v8439_v46 = vld [vmem:[%s10187_s14 + $0x41a8] sm:$0xff]  ;;  %8432 = vst [vmem:[%s10210_s18 + $0x8c0] sm:$0xff] %v1961_v43 }
  0x87   : > { %v10825_v5 = vld [vmem:[%s10187_s14 + $0x29a0] sm:$0xff]  ;;  %v8442_v47 = vld [vmem:[%s10187_s14 + $0x29a8] sm:$0xff]  ;;  %v1985_v52 = vpack.c.bf16 %v8439_v46, %v10822_v4  ;;  %8435 = vst [vmem:[%s10210_s18 + $0x14c0] sm:$0xff] %v1969_v44 }
  0x88   : > { %v10828_v6 = vld [vmem:[%s10187_s14 + $0x11a0] sm:$0xff]  ;;  %v8445_v48 = vld [vmem:[%s10187_s14 + $0x11a8] sm:$0xff]  ;;  %v1993_v53 = vpack.c.bf16 %v8442_v47, %v10825_v5  ;;  %8438 = vst [vmem:[%s10210_s18 + $0x20c0] sm:$0xff] %v1977_v45 }
  0x89   : > { %v10840_v13 = vld [vmem:[%s10187_s14 + $0x39a0] sm:$0xff]  ;;  %v2001_v54 = vpack.c.bf16 %v8445_v48, %v10828_v6  ;;  %v8448_v55 = vld [vmem:[%s10187_s14 + $0x39a8] sm:$0xff]  ;;  %8441 = vst [vmem:[%s10210_s18 + $0xd0] sm:$0xff] %v1985_v52 }
  0x8a   : > { %v10843_v14 = vld [vmem:[%s10187_s14 + $0x21a0] sm:$0xff]  ;;  %v8451_v56 = vld [vmem:[%s10187_s14 + $0x21a8] sm:$0xff]  ;;  %v2009_v61 = vpack.c.bf16 %v8448_v55, %v10840_v13  ;;  %8444 = vst [vmem:[%s10210_s18 + $0xcd0] sm:$0xff] %v1993_v53 }
  0x8b   : > { %v10846_v15 = vld [vmem:[%s10187_s14 + $0x9a0] sm:$0xff]  ;;  %v8454_v57 = vld [vmem:[%s10187_s14 + $0x9a8] sm:$0xff]  ;;  %v2017_v62 = vpack.c.bf16 %v8451_v56, %v10843_v14  ;;  %8447 = vst [vmem:[%s10210_s18 + $0x18d0] sm:$0xff] %v2001_v54 }
  0x8c   : > { %v10858_v22 = vld [vmem:[%s10187_s14 + $0x31a0] sm:$0xff]  ;;  %v2025_v63 = vpack.c.bf16 %v8454_v57, %v10846_v15  ;;  %v8457_v0 = vld [vmem:[%s10187_s14 + $0x31a8] sm:$0xff]  ;;  %8450 = vst [vmem:[%s10210_s18 + $0x4d0] sm:$0xff] %v2009_v61 }
  0x8d   : > { %v10861_v23 = vld [vmem:[%s10187_s14 + $0x19a0] sm:$0xff]  ;;  %v8460_v1 = vld [vmem:[%s10187_s14 + $0x19a8] sm:$0xff]  ;;  %v2033_v6 = vpack.c.bf16 %v8457_v0, %v10858_v22  ;;  %8453 = vst [vmem:[%s10210_s18 + $0x10d0] sm:$0xff] %v2017_v62 }
  0x8e   : > { %v10864_v24 = vld [vmem:[%s10187_s14 + $0x1a0] sm:$0xff]  ;;  %v8463_v2 = vld [vmem:[%s10187_s14 + $0x1a8] sm:$0xff]  ;;  %v2041_v7 = vpack.c.bf16 %v8460_v1, %v10861_v23  ;;  %8456 = vst [vmem:[%s10210_s18 + $0x1cd0] sm:$0xff] %v2025_v63 }
  0x8f   : > { %v10876_v31 = vld [vmem:[%s10187_s14 + $0x41c0] sm:$0xff]  ;;  %v2049_v8 = vpack.c.bf16 %v8463_v2, %v10864_v24  ;;  %v8466_v9 = vld [vmem:[%s10187_s14 + $0x41c8] sm:$0xff]  ;;  %8459 = vst [vmem:[%s10210_s18 + $0x8d0] sm:$0xff] %v2033_v6 }
  0x90   : > { %v10879_v32 = vld [vmem:[%s10187_s14 + $0x29c0] sm:$0xff]  ;;  %v8469_v10 = vld [vmem:[%s10187_s14 + $0x29c8] sm:$0xff]  ;;  %v2057_v15 = vpack.c.bf16 %v8466_v9, %v10876_v31  ;;  %8462 = vst [vmem:[%s10210_s18 + $0x14d0] sm:$0xff] %v2041_v7 }
  0x91   : > { %v10882_v33 = vld [vmem:[%s10187_s14 + $0x11c0] sm:$0xff]  ;;  %v8472_v11 = vld [vmem:[%s10187_s14 + $0x11c8] sm:$0xff]  ;;  %v2065_v16 = vpack.c.bf16 %v8469_v10, %v10879_v32  ;;  %8465 = vst [vmem:[%s10210_s18 + $0x20d0] sm:$0xff] %v2049_v8 }
  0x92   : > { %v10894_v40 = vld [vmem:[%s10187_s14 + $0x39c0] sm:$0xff]  ;;  %v2073_v17 = vpack.c.bf16 %v8472_v11, %v10882_v33  ;;  %v8475_v18 = vld [vmem:[%s10187_s14 + $0x39c8] sm:$0xff]  ;;  %8468 = vst [vmem:[%s10210_s18 + $0xe0] sm:$0xff] %v2057_v15 }
  0x93   : > { %v10897_v41 = vld [vmem:[%s10187_s14 + $0x21c0] sm:$0xff]  ;;  %v8478_v19 = vld [vmem:[%s10187_s14 + $0x21c8] sm:$0xff]  ;;  %v2081_v24 = vpack.c.bf16 %v8475_v18, %v10894_v40  ;;  %8471 = vst [vmem:[%s10210_s18 + $0xce0] sm:$0xff] %v2065_v16 }
  0x94   : > { %v10900_v42 = vld [vmem:[%s10187_s14 + $0x9c0] sm:$0xff]  ;;  %v8481_v20 = vld [vmem:[%s10187_s14 + $0x9c8] sm:$0xff]  ;;  %v2089_v25 = vpack.c.bf16 %v8478_v19, %v10897_v41  ;;  %8474 = vst [vmem:[%s10210_s18 + $0x18e0] sm:$0xff] %v2073_v17 }
  0x95   : > { %v10912_v49 = vld [vmem:[%s10187_s14 + $0x31c0] sm:$0xff]  ;;  %v2097_v26 = vpack.c.bf16 %v8481_v20, %v10900_v42  ;;  %v8484_v27 = vld [vmem:[%s10187_s14 + $0x31c8] sm:$0xff]  ;;  %8477 = vst [vmem:[%s10210_s18 + $0x4e0] sm:$0xff] %v2081_v24 }
  0x96   : > { %v10915_v50 = vld [vmem:[%s10187_s14 + $0x19c0] sm:$0xff]  ;;  %v8487_v28 = vld [vmem:[%s10187_s14 + $0x19c8] sm:$0xff]  ;;  %v2105_v33 = vpack.c.bf16 %v8484_v27, %v10912_v49  ;;  %8480 = vst [vmem:[%s10210_s18 + $0x10e0] sm:$0xff] %v2089_v25 }
  0x97   : > { %v10918_v51 = vld [vmem:[%s10187_s14 + $0x1c0] sm:$0xff]  ;;  %v8490_v29 = vld [vmem:[%s10187_s14 + $0x1c8] sm:$0xff]  ;;  %v2113_v34 = vpack.c.bf16 %v8487_v28, %v10915_v50  ;;  %8483 = vst [vmem:[%s10210_s18 + $0x1ce0] sm:$0xff] %v2097_v26 }
  0x98   : > { %v10930_v58 = vld [vmem:[%s10187_s14 + $0x41e0] sm:$0xff]  ;;  %v2121_v35 = vpack.c.bf16 %v8490_v29, %v10918_v51  ;;  %v8493_v36 = vld [vmem:[%s10187_s14 + $0x41e8] sm:$0xff]  ;;  %8486 = vst [vmem:[%s10210_s18 + $0x8e0] sm:$0xff] %v2105_v33 }
  0x99   : > { %v10933_v59 = vld [vmem:[%s10187_s14 + $0x29e0] sm:$0xff]  ;;  %v8496_v37 = vld [vmem:[%s10187_s14 + $0x29e8] sm:$0xff]  ;;  %v2129_v42 = vpack.c.bf16 %v8493_v36, %v10930_v58  ;;  %8489 = vst [vmem:[%s10210_s18 + $0x14e0] sm:$0xff] %v2113_v34 }
  0x9a   : > { %v10936_v60 = vld [vmem:[%s10187_s14 + $0x11e0] sm:$0xff]  ;;  %v8499_v38 = vld [vmem:[%s10187_s14 + $0x11e8] sm:$0xff]  ;;  %v2137_v43 = vpack.c.bf16 %v8496_v37, %v10933_v59  ;;  %8492 = vst [vmem:[%s10210_s18 + $0x20e0] sm:$0xff] %v2121_v35 }
  0x9b   : > { %v10948_v3 = vld [vmem:[%s10187_s14 + $0x39e0] sm:$0xff]  ;;  %v2145_v44 = vpack.c.bf16 %v8499_v38, %v10936_v60  ;;  %v8502_v45 = vld [vmem:[%s10187_s14 + $0x39e8] sm:$0xff]  ;;  %8495 = vst [vmem:[%s10210_s18 + $0xf0] sm:$0xff] %v2129_v42 }
  0x9c   : > { %v10951_v4 = vld [vmem:[%s10187_s14 + $0x21e0] sm:$0xff]  ;;  %v8505_v46 = vld [vmem:[%s10187_s14 + $0x21e8] sm:$0xff]  ;;  %v2153_v51 = vpack.c.bf16 %v8502_v45, %v10948_v3  ;;  %8498 = vst [vmem:[%s10210_s18 + $0xcf0] sm:$0xff] %v2137_v43 }
  0x9d   : > { %v10954_v5 = vld [vmem:[%s10187_s14 + $0x9e0] sm:$0xff]  ;;  %v8508_v47 = vld [vmem:[%s10187_s14 + $0x9e8] sm:$0xff]  ;;  %v2161_v52 = vpack.c.bf16 %v8505_v46, %v10951_v4  ;;  %8501 = vst [vmem:[%s10210_s18 + $0x18f0] sm:$0xff] %v2145_v44 }
  0x9e   : > { %v10966_v12 = vld [vmem:[%s10187_s14 + $0x31e0] sm:$0xff]  ;;  %v2169_v53 = vpack.c.bf16 %v8508_v47, %v10954_v5  ;;  %v8511_v54 = vld [vmem:[%s10187_s14 + $0x31e8] sm:$0xff]  ;;  %8504 = vst [vmem:[%s10210_s18 + $0x4f0] sm:$0xff] %v2153_v51 }
  0x9f   : > { %v10969_v13 = vld [vmem:[%s10187_s14 + $0x19e0] sm:$0xff]  ;;  %v8514_v55 = vld [vmem:[%s10187_s14 + $0x19e8] sm:$0xff]  ;;  %v2177_v60 = vpack.c.bf16 %v8511_v54, %v10966_v12  ;;  %8507 = vst [vmem:[%s10210_s18 + $0x10f0] sm:$0xff] %v2161_v52 }
  0xa0   : > { %v10972_v14 = vld [vmem:[%s10187_s14 + $0x1e0] sm:$0xff]  ;;  %v8517_v56 = vld [vmem:[%s10187_s14 + $0x1e8] sm:$0xff]  ;;  %v2185_v61 = vpack.c.bf16 %v8514_v55, %v10969_v13  ;;  %8510 = vst [vmem:[%s10210_s18 + $0x1cf0] sm:$0xff] %v2169_v53 }
  0xa1   : > { %v10984_v21 = vld [vmem:[%s10187_s14 + $0x4200] sm:$0xff]  ;;  %v2193_v62 = vpack.c.bf16 %v8517_v56, %v10972_v14  ;;  %v8520_v63 = vld [vmem:[%s10187_s14 + $0x4208] sm:$0xff]  ;;  %8513 = vst [vmem:[%s10210_s18 + $0x8f0] sm:$0xff] %v2177_v60 }
  0xa2   : > { %v10987_v22 = vld [vmem:[%s10187_s14 + $0x2a00] sm:$0xff]  ;;  %v8523_v0 = vld [vmem:[%s10187_s14 + $0x2a08] sm:$0xff]  ;;  %v2201_v5 = vpack.c.bf16 %v8520_v63, %v10984_v21  ;;  %8516 = vst [vmem:[%s10210_s18 + $0x14f0] sm:$0xff] %v2185_v61 }
  0xa3   : > { %v10990_v23 = vld [vmem:[%s10187_s14 + $0x1200] sm:$0xff]  ;;  %v8526_v1 = vld [vmem:[%s10187_s14 + $0x1208] sm:$0xff]  ;;  %v2209_v6 = vpack.c.bf16 %v8523_v0, %v10987_v22  ;;  %8519 = vst [vmem:[%s10210_s18 + $0x20f0] sm:$0xff] %v2193_v62 }
  0xa4   : > { %v11002_v30 = vld [vmem:[%s10187_s14 + $0x3a00] sm:$0xff]  ;;  %v2217_v7 = vpack.c.bf16 %v8526_v1, %v10990_v23  ;;  %v8529_v8 = vld [vmem:[%s10187_s14 + $0x3a08] sm:$0xff]  ;;  %8522 = vst [vmem:[%s10210_s18 + $0x100] sm:$0xff] %v2201_v5 }
  0xa5   : > { %v11005_v31 = vld [vmem:[%s10187_s14 + $0x2200] sm:$0xff]  ;;  %v8532_v9 = vld [vmem:[%s10187_s14 + $0x2208] sm:$0xff]  ;;  %v2225_v14 = vpack.c.bf16 %v8529_v8, %v11002_v30  ;;  %8525 = vst [vmem:[%s10210_s18 + $0xd00] sm:$0xff] %v2209_v6 }
  0xa6   : > { %v11008_v32 = vld [vmem:[%s10187_s14 + $0xa00] sm:$0xff]  ;;  %v8535_v10 = vld [vmem:[%s10187_s14 + $0xa08] sm:$0xff]  ;;  %v2233_v15 = vpack.c.bf16 %v8532_v9, %v11005_v31  ;;  %8528 = vst [vmem:[%s10210_s18 + $0x1900] sm:$0xff] %v2217_v7 }
  0xa7   : > { %v11020_v39 = vld [vmem:[%s10187_s14 + $0x3200] sm:$0xff]  ;;  %v2241_v16 = vpack.c.bf16 %v8535_v10, %v11008_v32  ;;  %v8538_v17 = vld [vmem:[%s10187_s14 + $0x3208] sm:$0xff]  ;;  %8531 = vst [vmem:[%s10210_s18 + $0x500] sm:$0xff] %v2225_v14 }
  0xa8   : > { %v11023_v40 = vld [vmem:[%s10187_s14 + $0x1a00] sm:$0xff]  ;;  %v8541_v18 = vld [vmem:[%s10187_s14 + $0x1a08] sm:$0xff]  ;;  %v2249_v23 = vpack.c.bf16 %v8538_v17, %v11020_v39  ;;  %8534 = vst [vmem:[%s10210_s18 + $0x1100] sm:$0xff] %v2233_v15 }
  0xa9   : > { %v11026_v41 = vld [vmem:[%s10187_s14 + $0x200] sm:$0xff]  ;;  %v8544_v19 = vld [vmem:[%s10187_s14 + $0x208] sm:$0xff]  ;;  %v2257_v24 = vpack.c.bf16 %v8541_v18, %v11023_v40  ;;  %8537 = vst [vmem:[%s10210_s18 + $0x1d00] sm:$0xff] %v2241_v16 }
  0xaa   : > { %v11038_v48 = vld [vmem:[%s10187_s14 + $0x4220] sm:$0xff]  ;;  %v2265_v25 = vpack.c.bf16 %v8544_v19, %v11026_v41  ;;  %v8547_v26 = vld [vmem:[%s10187_s14 + $0x4228] sm:$0xff]  ;;  %8540 = vst [vmem:[%s10210_s18 + $0x900] sm:$0xff] %v2249_v23 }
  0xab   : > { %v11041_v49 = vld [vmem:[%s10187_s14 + $0x2a20] sm:$0xff]  ;;  %v8550_v27 = vld [vmem:[%s10187_s14 + $0x2a28] sm:$0xff]  ;;  %v2273_v32 = vpack.c.bf16 %v8547_v26, %v11038_v48  ;;  %8543 = vst [vmem:[%s10210_s18 + $0x1500] sm:$0xff] %v2257_v24 }
  0xac   : > { %v11044_v50 = vld [vmem:[%s10187_s14 + $0x1220] sm:$0xff]  ;;  %v8553_v28 = vld [vmem:[%s10187_s14 + $0x1228] sm:$0xff]  ;;  %v2281_v33 = vpack.c.bf16 %v8550_v27, %v11041_v49  ;;  %8546 = vst [vmem:[%s10210_s18 + $0x2100] sm:$0xff] %v2265_v25 }
  0xad   : > { %v11056_v57 = vld [vmem:[%s10187_s14 + $0x3a20] sm:$0xff]  ;;  %v2289_v34 = vpack.c.bf16 %v8553_v28, %v11044_v50  ;;  %v8556_v35 = vld [vmem:[%s10187_s14 + $0x3a28] sm:$0xff]  ;;  %8549 = vst [vmem:[%s10210_s18 + $0x110] sm:$0xff] %v2273_v32 }
  0xae   : > { %v11059_v58 = vld [vmem:[%s10187_s14 + $0x2220] sm:$0xff]  ;;  %v8559_v36 = vld [vmem:[%s10187_s14 + $0x2228] sm:$0xff]  ;;  %v2297_v41 = vpack.c.bf16 %v8556_v35, %v11056_v57  ;;  %8552 = vst [vmem:[%s10210_s18 + $0xd10] sm:$0xff] %v2281_v33 }
  0xaf   : > { %v11062_v59 = vld [vmem:[%s10187_s14 + $0xa20] sm:$0xff]  ;;  %v8562_v37 = vld [vmem:[%s10187_s14 + $0xa28] sm:$0xff]  ;;  %v2305_v42 = vpack.c.bf16 %v8559_v36, %v11059_v58  ;;  %8555 = vst [vmem:[%s10210_s18 + $0x1910] sm:$0xff] %v2289_v34 }
  0xb0   : > { %v11074_v2 = vld [vmem:[%s10187_s14 + $0x3220] sm:$0xff]  ;;  %v2313_v43 = vpack.c.bf16 %v8562_v37, %v11062_v59  ;;  %v8565_v44 = vld [vmem:[%s10187_s14 + $0x3228] sm:$0xff]  ;;  %8558 = vst [vmem:[%s10210_s18 + $0x510] sm:$0xff] %v2297_v41 }
  0xb1   : > { %v11077_v3 = vld [vmem:[%s10187_s14 + $0x1a20] sm:$0xff]  ;;  %v8568_v45 = vld [vmem:[%s10187_s14 + $0x1a28] sm:$0xff]  ;;  %v2321_v50 = vpack.c.bf16 %v8565_v44, %v11074_v2  ;;  %8561 = vst [vmem:[%s10210_s18 + $0x1110] sm:$0xff] %v2305_v42 }
  0xb2   : > { %v11080_v4 = vld [vmem:[%s10187_s14 + $0x220] sm:$0xff]  ;;  %v8571_v46 = vld [vmem:[%s10187_s14 + $0x228] sm:$0xff]  ;;  %v2329_v51 = vpack.c.bf16 %v8568_v45, %v11077_v3  ;;  %8564 = vst [vmem:[%s10210_s18 + $0x1d10] sm:$0xff] %v2313_v43 }
  0xb3   : > { %v11092_v11 = vld [vmem:[%s10187_s14 + $0x4240] sm:$0xff]  ;;  %v2337_v52 = vpack.c.bf16 %v8571_v46, %v11080_v4  ;;  %v8574_v53 = vld [vmem:[%s10187_s14 + $0x4248] sm:$0xff]  ;;  %8567 = vst [vmem:[%s10210_s18 + $0x910] sm:$0xff] %v2321_v50 }
  0xb4   : > { %v11095_v12 = vld [vmem:[%s10187_s14 + $0x2a40] sm:$0xff]  ;;  %v8577_v54 = vld [vmem:[%s10187_s14 + $0x2a48] sm:$0xff]  ;;  %v2345_v59 = vpack.c.bf16 %v8574_v53, %v11092_v11  ;;  %8570 = vst [vmem:[%s10210_s18 + $0x1510] sm:$0xff] %v2329_v51 }
  0xb5   : > { %v11098_v13 = vld [vmem:[%s10187_s14 + $0x1240] sm:$0xff]  ;;  %v8580_v55 = vld [vmem:[%s10187_s14 + $0x1248] sm:$0xff]  ;;  %v2353_v60 = vpack.c.bf16 %v8577_v54, %v11095_v12  ;;  %8573 = vst [vmem:[%s10210_s18 + $0x2110] sm:$0xff] %v2337_v52 }
  0xb6   : > { %v11110_v20 = vld [vmem:[%s10187_s14 + $0x3a40] sm:$0xff]  ;;  %v2361_v61 = vpack.c.bf16 %v8580_v55, %v11098_v13  ;;  %v8583_v62 = vld [vmem:[%s10187_s14 + $0x3a48] sm:$0xff]  ;;  %8576 = vst [vmem:[%s10210_s18 + $0x120] sm:$0xff] %v2345_v59 }
  0xb7   : > { %v11113_v21 = vld [vmem:[%s10187_s14 + $0x2240] sm:$0xff]  ;;  %v8586_v63 = vld [vmem:[%s10187_s14 + $0x2248] sm:$0xff]  ;;  %v2369_v4 = vpack.c.bf16 %v8583_v62, %v11110_v20  ;;  %8579 = vst [vmem:[%s10210_s18 + $0xd20] sm:$0xff] %v2353_v60 }
  0xb8   : > { %v11116_v22 = vld [vmem:[%s10187_s14 + $0xa40] sm:$0xff]  ;;  %v8589_v0 = vld [vmem:[%s10187_s14 + $0xa48] sm:$0xff]  ;;  %v2377_v5 = vpack.c.bf16 %v8586_v63, %v11113_v21  ;;  %8582 = vst [vmem:[%s10210_s18 + $0x1920] sm:$0xff] %v2361_v61 }
  0xb9   : > { %v11128_v29 = vld [vmem:[%s10187_s14 + $0x3240] sm:$0xff]  ;;  %v2385_v6 = vpack.c.bf16 %v8589_v0, %v11116_v22  ;;  %v8592_v7 = vld [vmem:[%s10187_s14 + $0x3248] sm:$0xff]  ;;  %8585 = vst [vmem:[%s10210_s18 + $0x520] sm:$0xff] %v2369_v4 }
  0xba   : > { %v11131_v30 = vld [vmem:[%s10187_s14 + $0x1a40] sm:$0xff]  ;;  %v8595_v8 = vld [vmem:[%s10187_s14 + $0x1a48] sm:$0xff]  ;;  %v2393_v13 = vpack.c.bf16 %v8592_v7, %v11128_v29  ;;  %8588 = vst [vmem:[%s10210_s18 + $0x1120] sm:$0xff] %v2377_v5 }
  0xbb   : > { %v11134_v31 = vld [vmem:[%s10187_s14 + $0x240] sm:$0xff]  ;;  %v8598_v9 = vld [vmem:[%s10187_s14 + $0x248] sm:$0xff]  ;;  %v2401_v14 = vpack.c.bf16 %v8595_v8, %v11131_v30  ;;  %8591 = vst [vmem:[%s10210_s18 + $0x1d20] sm:$0xff] %v2385_v6 }
  0xbc   : > { %v11146_v38 = vld [vmem:[%s10187_s14 + $0x4260] sm:$0xff]  ;;  %v2409_v15 = vpack.c.bf16 %v8598_v9, %v11134_v31  ;;  %v8601_v16 = vld [vmem:[%s10187_s14 + $0x4268] sm:$0xff]  ;;  %8594 = vst [vmem:[%s10210_s18 + $0x920] sm:$0xff] %v2393_v13 }
  0xbd   : > { %v11149_v39 = vld [vmem:[%s10187_s14 + $0x2a60] sm:$0xff]  ;;  %v8604_v17 = vld [vmem:[%s10187_s14 + $0x2a68] sm:$0xff]  ;;  %v2417_v22 = vpack.c.bf16 %v8601_v16, %v11146_v38  ;;  %8597 = vst [vmem:[%s10210_s18 + $0x1520] sm:$0xff] %v2401_v14 }
  0xbe   : > { %v11152_v40 = vld [vmem:[%s10187_s14 + $0x1260] sm:$0xff]  ;;  %v8607_v18 = vld [vmem:[%s10187_s14 + $0x1268] sm:$0xff]  ;;  %v2425_v23 = vpack.c.bf16 %v8604_v17, %v11149_v39  ;;  %8600 = vst [vmem:[%s10210_s18 + $0x2120] sm:$0xff] %v2409_v15 }
  0xbf   : > { %v11164_v47 = vld [vmem:[%s10187_s14 + $0x3a60] sm:$0xff]  ;;  %v2433_v24 = vpack.c.bf16 %v8607_v18, %v11152_v40  ;;  %v8610_v25 = vld [vmem:[%s10187_s14 + $0x3a68] sm:$0xff]  ;;  %8603 = vst [vmem:[%s10210_s18 + $0x130] sm:$0xff] %v2417_v22 }
  0xc0   : > { %v11167_v48 = vld [vmem:[%s10187_s14 + $0x2260] sm:$0xff]  ;;  %v8613_v26 = vld [vmem:[%s10187_s14 + $0x2268] sm:$0xff]  ;;  %v2441_v31 = vpack.c.bf16 %v8610_v25, %v11164_v47  ;;  %8606 = vst [vmem:[%s10210_s18 + $0xd30] sm:$0xff] %v2425_v23 }
  0xc1   : > { %v11170_v49 = vld [vmem:[%s10187_s14 + $0xa60] sm:$0xff]  ;;  %v8616_v27 = vld [vmem:[%s10187_s14 + $0xa68] sm:$0xff]  ;;  %v2449_v32 = vpack.c.bf16 %v8613_v26, %v11167_v48  ;;  %8609 = vst [vmem:[%s10210_s18 + $0x1930] sm:$0xff] %v2433_v24 }
  0xc2   : > { %v11182_v56 = vld [vmem:[%s10187_s14 + $0x3260] sm:$0xff]  ;;  %v2457_v33 = vpack.c.bf16 %v8616_v27, %v11170_v49  ;;  %v8619_v34 = vld [vmem:[%s10187_s14 + $0x3268] sm:$0xff]  ;;  %8612 = vst [vmem:[%s10210_s18 + $0x530] sm:$0xff] %v2441_v31 }
  0xc3   : > { %v11185_v57 = vld [vmem:[%s10187_s14 + $0x1a60] sm:$0xff]  ;;  %v8622_v35 = vld [vmem:[%s10187_s14 + $0x1a68] sm:$0xff]  ;;  %v2465_v40 = vpack.c.bf16 %v8619_v34, %v11182_v56  ;;  %8615 = vst [vmem:[%s10210_s18 + $0x1130] sm:$0xff] %v2449_v32 }
  0xc4   : > { %v11188_v58 = vld [vmem:[%s10187_s14 + $0x260] sm:$0xff]  ;;  %v8625_v36 = vld [vmem:[%s10187_s14 + $0x268] sm:$0xff]  ;;  %v2473_v41 = vpack.c.bf16 %v8622_v35, %v11185_v57  ;;  %8618 = vst [vmem:[%s10210_s18 + $0x1d30] sm:$0xff] %v2457_v33 }
  0xc5   : > { %v11200_v1 = vld [vmem:[%s10187_s14 + $0x4280] sm:$0xff]  ;;  %v2481_v42 = vpack.c.bf16 %v8625_v36, %v11188_v58  ;;  %v8628_v43 = vld [vmem:[%s10187_s14 + $0x4288] sm:$0xff]  ;;  %8621 = vst [vmem:[%s10210_s18 + $0x930] sm:$0xff] %v2465_v40 }
  0xc6   : > { %v11203_v2 = vld [vmem:[%s10187_s14 + $0x2a80] sm:$0xff]  ;;  %v8631_v44 = vld [vmem:[%s10187_s14 + $0x2a88] sm:$0xff]  ;;  %v2489_v49 = vpack.c.bf16 %v8628_v43, %v11200_v1  ;;  %8624 = vst [vmem:[%s10210_s18 + $0x1530] sm:$0xff] %v2473_v41 }
  0xc7   : > { %v11206_v3 = vld [vmem:[%s10187_s14 + $0x1280] sm:$0xff]  ;;  %v8634_v45 = vld [vmem:[%s10187_s14 + $0x1288] sm:$0xff]  ;;  %v2497_v50 = vpack.c.bf16 %v8631_v44, %v11203_v2  ;;  %8627 = vst [vmem:[%s10210_s18 + $0x2130] sm:$0xff] %v2481_v42 }
  0xc8   : > { %v11218_v10 = vld [vmem:[%s10187_s14 + $0x3a80] sm:$0xff]  ;;  %v2505_v51 = vpack.c.bf16 %v8634_v45, %v11206_v3  ;;  %v8637_v52 = vld [vmem:[%s10187_s14 + $0x3a88] sm:$0xff]  ;;  %8630 = vst [vmem:[%s10210_s18 + $0x140] sm:$0xff] %v2489_v49 }
  0xc9   : > { %v11221_v11 = vld [vmem:[%s10187_s14 + $0x2280] sm:$0xff]  ;;  %v8640_v53 = vld [vmem:[%s10187_s14 + $0x2288] sm:$0xff]  ;;  %v2513_v58 = vpack.c.bf16 %v8637_v52, %v11218_v10  ;;  %8633 = vst [vmem:[%s10210_s18 + $0xd40] sm:$0xff] %v2497_v50 }
  0xca   : > { %v11224_v12 = vld [vmem:[%s10187_s14 + $0xa80] sm:$0xff]  ;;  %v8643_v54 = vld [vmem:[%s10187_s14 + $0xa88] sm:$0xff]  ;;  %v2521_v59 = vpack.c.bf16 %v8640_v53, %v11221_v11  ;;  %8636 = vst [vmem:[%s10210_s18 + $0x1940] sm:$0xff] %v2505_v51 }
  0xcb   : > { %v11236_v19 = vld [vmem:[%s10187_s14 + $0x3280] sm:$0xff]  ;;  %v2529_v60 = vpack.c.bf16 %v8643_v54, %v11224_v12  ;;  %v8646_v61 = vld [vmem:[%s10187_s14 + $0x3288] sm:$0xff]  ;;  %8639 = vst [vmem:[%s10210_s18 + $0x540] sm:$0xff] %v2513_v58 }
  0xcc   : > { %v11239_v20 = vld [vmem:[%s10187_s14 + $0x1a80] sm:$0xff]  ;;  %v8649_v62 = vld [vmem:[%s10187_s14 + $0x1a88] sm:$0xff]  ;;  %v2537_v3 = vpack.c.bf16 %v8646_v61, %v11236_v19  ;;  %8642 = vst [vmem:[%s10210_s18 + $0x1140] sm:$0xff] %v2521_v59 }
  0xcd   : > { %v11242_v21 = vld [vmem:[%s10187_s14 + $0x280] sm:$0xff]  ;;  %v8652_v63 = vld [vmem:[%s10187_s14 + $0x288] sm:$0xff]  ;;  %v2545_v4 = vpack.c.bf16 %v8649_v62, %v11239_v20  ;;  %8645 = vst [vmem:[%s10210_s18 + $0x1d40] sm:$0xff] %v2529_v60 }
  0xce   : > { %v11254_v28 = vld [vmem:[%s10187_s14 + $0x42a0] sm:$0xff]  ;;  %v2553_v5 = vpack.c.bf16 %v8652_v63, %v11242_v21  ;;  %v8655_v6 = vld [vmem:[%s10187_s14 + $0x42a8] sm:$0xff]  ;;  %8648 = vst [vmem:[%s10210_s18 + $0x940] sm:$0xff] %v2537_v3 }
  0xcf   : > { %v11257_v29 = vld [vmem:[%s10187_s14 + $0x2aa0] sm:$0xff]  ;;  %v8658_v7 = vld [vmem:[%s10187_s14 + $0x2aa8] sm:$0xff]  ;;  %v2561_v12 = vpack.c.bf16 %v8655_v6, %v11254_v28  ;;  %8651 = vst [vmem:[%s10210_s18 + $0x1540] sm:$0xff] %v2545_v4 }
  0xd0   : > { %v11260_v30 = vld [vmem:[%s10187_s14 + $0x12a0] sm:$0xff]  ;;  %v8661_v8 = vld [vmem:[%s10187_s14 + $0x12a8] sm:$0xff]  ;;  %v2569_v13 = vpack.c.bf16 %v8658_v7, %v11257_v29  ;;  %8654 = vst [vmem:[%s10210_s18 + $0x2140] sm:$0xff] %v2553_v5 }
  0xd1   : > { %v11272_v37 = vld [vmem:[%s10187_s14 + $0x3aa0] sm:$0xff]  ;;  %v2577_v14 = vpack.c.bf16 %v8661_v8, %v11260_v30  ;;  %v8664_v15 = vld [vmem:[%s10187_s14 + $0x3aa8] sm:$0xff]  ;;  %8657 = vst [vmem:[%s10210_s18 + $0x150] sm:$0xff] %v2561_v12 }
  0xd2   : > { %v11275_v38 = vld [vmem:[%s10187_s14 + $0x22a0] sm:$0xff]  ;;  %v8667_v16 = vld [vmem:[%s10187_s14 + $0x22a8] sm:$0xff]  ;;  %v2585_v21 = vpack.c.bf16 %v8664_v15, %v11272_v37  ;;  %8660 = vst [vmem:[%s10210_s18 + $0xd50] sm:$0xff] %v2569_v13 }
  0xd3   : > { %v11278_v39 = vld [vmem:[%s10187_s14 + $0xaa0] sm:$0xff]  ;;  %v8670_v17 = vld [vmem:[%s10187_s14 + $0xaa8] sm:$0xff]  ;;  %v2593_v22 = vpack.c.bf16 %v8667_v16, %v11275_v38  ;;  %8663 = vst [vmem:[%s10210_s18 + $0x1950] sm:$0xff] %v2577_v14 }
  0xd4   : > { %v11290_v46 = vld [vmem:[%s10187_s14 + $0x32a0] sm:$0xff]  ;;  %v2601_v23 = vpack.c.bf16 %v8670_v17, %v11278_v39  ;;  %v8673_v24 = vld [vmem:[%s10187_s14 + $0x32a8] sm:$0xff]  ;;  %8666 = vst [vmem:[%s10210_s18 + $0x550] sm:$0xff] %v2585_v21 }
  0xd5   : > { %v11293_v47 = vld [vmem:[%s10187_s14 + $0x1aa0] sm:$0xff]  ;;  %v8676_v25 = vld [vmem:[%s10187_s14 + $0x1aa8] sm:$0xff]  ;;  %v2609_v30 = vpack.c.bf16 %v8673_v24, %v11290_v46  ;;  %8669 = vst [vmem:[%s10210_s18 + $0x1150] sm:$0xff] %v2593_v22 }
  0xd6   : > { %v11296_v48 = vld [vmem:[%s10187_s14 + $0x2a0] sm:$0xff]  ;;  %v8679_v26 = vld [vmem:[%s10187_s14 + $0x2a8] sm:$0xff]  ;;  %v2617_v31 = vpack.c.bf16 %v8676_v25, %v11293_v47  ;;  %8672 = vst [vmem:[%s10210_s18 + $0x1d50] sm:$0xff] %v2601_v23 }
  0xd7   : > { %v11308_v55 = vld [vmem:[%s10187_s14 + $0x42c0] sm:$0xff]  ;;  %v2625_v32 = vpack.c.bf16 %v8679_v26, %v11296_v48  ;;  %v8682_v33 = vld [vmem:[%s10187_s14 + $0x42c8] sm:$0xff]  ;;  %8675 = vst [vmem:[%s10210_s18 + $0x950] sm:$0xff] %v2609_v30 }
  0xd8   : > { %v11311_v56 = vld [vmem:[%s10187_s14 + $0x2ac0] sm:$0xff]  ;;  %v8685_v34 = vld [vmem:[%s10187_s14 + $0x2ac8] sm:$0xff]  ;;  %v2633_v39 = vpack.c.bf16 %v8682_v33, %v11308_v55  ;;  %8678 = vst [vmem:[%s10210_s18 + $0x1550] sm:$0xff] %v2617_v31 }
  0xd9   : > { %v11314_v57 = vld [vmem:[%s10187_s14 + $0x12c0] sm:$0xff]  ;;  %v8688_v35 = vld [vmem:[%s10187_s14 + $0x12c8] sm:$0xff]  ;;  %v2641_v40 = vpack.c.bf16 %v8685_v34, %v11311_v56  ;;  %8681 = vst [vmem:[%s10210_s18 + $0x2150] sm:$0xff] %v2625_v32 }
  0xda   : > { %v11326_v0 = vld [vmem:[%s10187_s14 + $0x3ac0] sm:$0xff]  ;;  %v2649_v41 = vpack.c.bf16 %v8688_v35, %v11314_v57  ;;  %v8691_v42 = vld [vmem:[%s10187_s14 + $0x3ac8] sm:$0xff]  ;;  %8684 = vst [vmem:[%s10210_s18 + $0x160] sm:$0xff] %v2633_v39 }
  0xdb   : > { %v11329_v1 = vld [vmem:[%s10187_s14 + $0x22c0] sm:$0xff]  ;;  %v8694_v43 = vld [vmem:[%s10187_s14 + $0x22c8] sm:$0xff]  ;;  %v2657_v48 = vpack.c.bf16 %v8691_v42, %v11326_v0  ;;  %8687 = vst [vmem:[%s10210_s18 + $0xd60] sm:$0xff] %v2641_v40 }
  0xdc   : > { %v11332_v2 = vld [vmem:[%s10187_s14 + $0xac0] sm:$0xff]  ;;  %v8697_v44 = vld [vmem:[%s10187_s14 + $0xac8] sm:$0xff]  ;;  %v2665_v49 = vpack.c.bf16 %v8694_v43, %v11329_v1  ;;  %8690 = vst [vmem:[%s10210_s18 + $0x1960] sm:$0xff] %v2649_v41 }
  0xdd   : > { %v11344_v9 = vld [vmem:[%s10187_s14 + $0x32c0] sm:$0xff]  ;;  %v2673_v50 = vpack.c.bf16 %v8697_v44, %v11332_v2  ;;  %v8700_v51 = vld [vmem:[%s10187_s14 + $0x32c8] sm:$0xff]  ;;  %8693 = vst [vmem:[%s10210_s18 + $0x560] sm:$0xff] %v2657_v48 }
  0xde   : > { %v11347_v10 = vld [vmem:[%s10187_s14 + $0x1ac0] sm:$0xff]  ;;  %v8703_v52 = vld [vmem:[%s10187_s14 + $0x1ac8] sm:$0xff]  ;;  %v2681_v57 = vpack.c.bf16 %v8700_v51, %v11344_v9  ;;  %8696 = vst [vmem:[%s10210_s18 + $0x1160] sm:$0xff] %v2665_v49 }
  0xdf   : > { %v11350_v11 = vld [vmem:[%s10187_s14 + $0x2c0] sm:$0xff]  ;;  %v8706_v53 = vld [vmem:[%s10187_s14 + $0x2c8] sm:$0xff]  ;;  %v2689_v58 = vpack.c.bf16 %v8703_v52, %v11347_v10  ;;  %8699 = vst [vmem:[%s10210_s18 + $0x1d60] sm:$0xff] %v2673_v50 }
  0xe0   : > { %v11362_v18 = vld [vmem:[%s10187_s14 + $0x42e0] sm:$0xff]  ;;  %v2697_v59 = vpack.c.bf16 %v8706_v53, %v11350_v11  ;;  %v8709_v60 = vld [vmem:[%s10187_s14 + $0x42e8] sm:$0xff]  ;;  %8702 = vst [vmem:[%s10210_s18 + $0x960] sm:$0xff] %v2681_v57 }
  0xe1   : > { %v11365_v19 = vld [vmem:[%s10187_s14 + $0x2ae0] sm:$0xff]  ;;  %v8712_v61 = vld [vmem:[%s10187_s14 + $0x2ae8] sm:$0xff]  ;;  %v2705_v2 = vpack.c.bf16 %v8709_v60, %v11362_v18  ;;  %8705 = vst [vmem:[%s10210_s18 + $0x1560] sm:$0xff] %v2689_v58 }
  0xe2   : > { %v11368_v20 = vld [vmem:[%s10187_s14 + $0x12e0] sm:$0xff]  ;;  %v8715_v62 = vld [vmem:[%s10187_s14 + $0x12e8] sm:$0xff]  ;;  %v2713_v3 = vpack.c.bf16 %v8712_v61, %v11365_v19  ;;  %8708 = vst [vmem:[%s10210_s18 + $0x2160] sm:$0xff] %v2697_v59 }
  0xe3   : > { %v11380_v27 = vld [vmem:[%s10187_s14 + $0x3ae0] sm:$0xff]  ;;  %v2721_v4 = vpack.c.bf16 %v8715_v62, %v11368_v20  ;;  %v8718_v5 = vld [vmem:[%s10187_s14 + $0x3ae8] sm:$0xff]  ;;  %8711 = vst [vmem:[%s10210_s18 + $0x170] sm:$0xff] %v2705_v2 }
  0xe4   : > { %v11383_v28 = vld [vmem:[%s10187_s14 + $0x22e0] sm:$0xff]  ;;  %v8721_v6 = vld [vmem:[%s10187_s14 + $0x22e8] sm:$0xff]  ;;  %v2729_v11 = vpack.c.bf16 %v8718_v5, %v11380_v27  ;;  %8714 = vst [vmem:[%s10210_s18 + $0xd70] sm:$0xff] %v2713_v3 }
  0xe5   : > { %v11386_v29 = vld [vmem:[%s10187_s14 + $0xae0] sm:$0xff]  ;;  %v8724_v7 = vld [vmem:[%s10187_s14 + $0xae8] sm:$0xff]  ;;  %v2737_v12 = vpack.c.bf16 %v8721_v6, %v11383_v28  ;;  %8717 = vst [vmem:[%s10210_s18 + $0x1970] sm:$0xff] %v2721_v4 }
  0xe6   : > { %v11398_v36 = vld [vmem:[%s10187_s14 + $0x32e0] sm:$0xff]  ;;  %v2745_v13 = vpack.c.bf16 %v8724_v7, %v11386_v29  ;;  %v8727_v14 = vld [vmem:[%s10187_s14 + $0x32e8] sm:$0xff]  ;;  %8720 = vst [vmem:[%s10210_s18 + $0x570] sm:$0xff] %v2729_v11 }
  0xe7   : > { %v11401_v37 = vld [vmem:[%s10187_s14 + $0x1ae0] sm:$0xff]  ;;  %v8730_v15 = vld [vmem:[%s10187_s14 + $0x1ae8] sm:$0xff]  ;;  %v2753_v20 = vpack.c.bf16 %v8727_v14, %v11398_v36  ;;  %8723 = vst [vmem:[%s10210_s18 + $0x1170] sm:$0xff] %v2737_v12 }
  0xe8   : > { %v11404_v38 = vld [vmem:[%s10187_s14 + $0x2e0] sm:$0xff]  ;;  %v8733_v16 = vld [vmem:[%s10187_s14 + $0x2e8] sm:$0xff]  ;;  %v2761_v21 = vpack.c.bf16 %v8730_v15, %v11401_v37  ;;  %8726 = vst [vmem:[%s10210_s18 + $0x1d70] sm:$0xff] %v2745_v13 }
  0xe9   : > { %v11416_v45 = vld [vmem:[%s10187_s14 + $0x4300] sm:$0xff]  ;;  %v2769_v22 = vpack.c.bf16 %v8733_v16, %v11404_v38  ;;  %v8736_v23 = vld [vmem:[%s10187_s14 + $0x4308] sm:$0xff]  ;;  %8729 = vst [vmem:[%s10210_s18 + $0x970] sm:$0xff] %v2753_v20 }
  0xea   : > { %v11419_v46 = vld [vmem:[%s10187_s14 + $0x2b00] sm:$0xff]  ;;  %v8739_v24 = vld [vmem:[%s10187_s14 + $0x2b08] sm:$0xff]  ;;  %v2777_v29 = vpack.c.bf16 %v8736_v23, %v11416_v45  ;;  %8732 = vst [vmem:[%s10210_s18 + $0x1570] sm:$0xff] %v2761_v21 }
  0xeb   : > { %v11422_v47 = vld [vmem:[%s10187_s14 + $0x1300] sm:$0xff]  ;;  %v8742_v25 = vld [vmem:[%s10187_s14 + $0x1308] sm:$0xff]  ;;  %v2785_v30 = vpack.c.bf16 %v8739_v24, %v11419_v46  ;;  %8735 = vst [vmem:[%s10210_s18 + $0x2170] sm:$0xff] %v2769_v22 }
  0xec   : > { %v11434_v54 = vld [vmem:[%s10187_s14 + $0x3b00] sm:$0xff]  ;;  %v2793_v31 = vpack.c.bf16 %v8742_v25, %v11422_v47  ;;  %v8745_v32 = vld [vmem:[%s10187_s14 + $0x3b08] sm:$0xff]  ;;  %8738 = vst [vmem:[%s10210_s18 + $0x180] sm:$0xff] %v2777_v29 }
  0xed   : > { %v11437_v55 = vld [vmem:[%s10187_s14 + $0x2300] sm:$0xff]  ;;  %v8748_v33 = vld [vmem:[%s10187_s14 + $0x2308] sm:$0xff]  ;;  %v2801_v38 = vpack.c.bf16 %v8745_v32, %v11434_v54  ;;  %8741 = vst [vmem:[%s10210_s18 + $0xd80] sm:$0xff] %v2785_v30 }
  0xee   : > { %v11440_v56 = vld [vmem:[%s10187_s14 + $0xb00] sm:$0xff]  ;;  %v8751_v34 = vld [vmem:[%s10187_s14 + $0xb08] sm:$0xff]  ;;  %v2809_v39 = vpack.c.bf16 %v8748_v33, %v11437_v55  ;;  %8744 = vst [vmem:[%s10210_s18 + $0x1980] sm:$0xff] %v2793_v31 }
  0xef   : > { %v11452_v63 = vld [vmem:[%s10187_s14 + $0x3300] sm:$0xff]  ;;  %v2817_v40 = vpack.c.bf16 %v8751_v34, %v11440_v56  ;;  %v8754_v41 = vld [vmem:[%s10187_s14 + $0x3308] sm:$0xff]  ;;  %8747 = vst [vmem:[%s10210_s18 + $0x580] sm:$0xff] %v2801_v38 }
  0xf0   : > { %v11455_v0 = vld [vmem:[%s10187_s14 + $0x1b00] sm:$0xff]  ;;  %v8757_v42 = vld [vmem:[%s10187_s14 + $0x1b08] sm:$0xff]  ;;  %v2825_v47 = vpack.c.bf16 %v8754_v41, %v11452_v63  ;;  %8750 = vst [vmem:[%s10210_s18 + $0x1180] sm:$0xff] %v2809_v39 }
  0xf1   : > { %v11458_v1 = vld [vmem:[%s10187_s14 + $0x300] sm:$0xff]  ;;  %v8760_v43 = vld [vmem:[%s10187_s14 + $0x308] sm:$0xff]  ;;  %v2833_v48 = vpack.c.bf16 %v8757_v42, %v11455_v0  ;;  %8753 = vst [vmem:[%s10210_s18 + $0x1d80] sm:$0xff] %v2817_v40 }
  0xf2   : > { %v11470_v8 = vld [vmem:[%s10187_s14 + $0x4320] sm:$0xff]  ;;  %v2841_v49 = vpack.c.bf16 %v8760_v43, %v11458_v1  ;;  %v8763_v50 = vld [vmem:[%s10187_s14 + $0x4328] sm:$0xff]  ;;  %8756 = vst [vmem:[%s10210_s18 + $0x980] sm:$0xff] %v2825_v47 }
  0xf3   : > { %v11473_v9 = vld [vmem:[%s10187_s14 + $0x2b20] sm:$0xff]  ;;  %v8766_v51 = vld [vmem:[%s10187_s14 + $0x2b28] sm:$0xff]  ;;  %v2849_v56 = vpack.c.bf16 %v8763_v50, %v11470_v8  ;;  %8759 = vst [vmem:[%s10210_s18 + $0x1580] sm:$0xff] %v2833_v48 }
  0xf4   : > { %v11476_v10 = vld [vmem:[%s10187_s14 + $0x1320] sm:$0xff]  ;;  %v8769_v52 = vld [vmem:[%s10187_s14 + $0x1328] sm:$0xff]  ;;  %v2857_v57 = vpack.c.bf16 %v8766_v51, %v11473_v9  ;;  %8762 = vst [vmem:[%s10210_s18 + $0x2180] sm:$0xff] %v2841_v49 }
  0xf5   : > { %v11488_v17 = vld [vmem:[%s10187_s14 + $0x3b20] sm:$0xff]  ;;  %v2865_v58 = vpack.c.bf16 %v8769_v52, %v11476_v10  ;;  %v8772_v59 = vld [vmem:[%s10187_s14 + $0x3b28] sm:$0xff]  ;;  %8765 = vst [vmem:[%s10210_s18 + $0x190] sm:$0xff] %v2849_v56 }
  0xf6   : > { %v11491_v18 = vld [vmem:[%s10187_s14 + $0x2320] sm:$0xff]  ;;  %v8775_v60 = vld [vmem:[%s10187_s14 + $0x2328] sm:$0xff]  ;;  %v2873_v1 = vpack.c.bf16 %v8772_v59, %v11488_v17  ;;  %8768 = vst [vmem:[%s10210_s18 + $0xd90] sm:$0xff] %v2857_v57 }
  0xf7   : > { %v11494_v19 = vld [vmem:[%s10187_s14 + $0xb20] sm:$0xff]  ;;  %v8778_v61 = vld [vmem:[%s10187_s14 + $0xb28] sm:$0xff]  ;;  %v2881_v2 = vpack.c.bf16 %v8775_v60, %v11491_v18  ;;  %8771 = vst [vmem:[%s10210_s18 + $0x1990] sm:$0xff] %v2865_v58 }
  0xf8   : > { %v11506_v26 = vld [vmem:[%s10187_s14 + $0x3320] sm:$0xff]  ;;  %v2889_v3 = vpack.c.bf16 %v8778_v61, %v11494_v19  ;;  %v8781_v4 = vld [vmem:[%s10187_s14 + $0x3328] sm:$0xff]  ;;  %8774 = vst [vmem:[%s10210_s18 + $0x590] sm:$0xff] %v2873_v1 }
  0xf9   : > { %v11509_v27 = vld [vmem:[%s10187_s14 + $0x1b20] sm:$0xff]  ;;  %v8784_v5 = vld [vmem:[%s10187_s14 + $0x1b28] sm:$0xff]  ;;  %v2897_v10 = vpack.c.bf16 %v8781_v4, %v11506_v26  ;;  %8777 = vst [vmem:[%s10210_s18 + $0x1190] sm:$0xff] %v2881_v2 }
  0xfa   : > { %v11512_v28 = vld [vmem:[%s10187_s14 + $0x320] sm:$0xff]  ;;  %v8787_v6 = vld [vmem:[%s10187_s14 + $0x328] sm:$0xff]  ;;  %v2905_v11 = vpack.c.bf16 %v8784_v5, %v11509_v27  ;;  %8780 = vst [vmem:[%s10210_s18 + $0x1d90] sm:$0xff] %v2889_v3 }
  0xfb   : > { %v11524_v35 = vld [vmem:[%s10187_s14 + $0x4340] sm:$0xff]  ;;  %v2913_v12 = vpack.c.bf16 %v8787_v6, %v11512_v28  ;;  %v8790_v13 = vld [vmem:[%s10187_s14 + $0x4348] sm:$0xff]  ;;  %8783 = vst [vmem:[%s10210_s18 + $0x990] sm:$0xff] %v2897_v10 }
  0xfc   : > { %v11527_v36 = vld [vmem:[%s10187_s14 + $0x2b40] sm:$0xff]  ;;  %v8793_v14 = vld [vmem:[%s10187_s14 + $0x2b48] sm:$0xff]  ;;  %v2921_v19 = vpack.c.bf16 %v8790_v13, %v11524_v35  ;;  %8786 = vst [vmem:[%s10210_s18 + $0x1590] sm:$0xff] %v2905_v11 }
  0xfd   : > { %v11530_v37 = vld [vmem:[%s10187_s14 + $0x1340] sm:$0xff]  ;;  %v8796_v15 = vld [vmem:[%s10187_s14 + $0x1348] sm:$0xff]  ;;  %v2929_v20 = vpack.c.bf16 %v8793_v14, %v11527_v36  ;;  %8789 = vst [vmem:[%s10210_s18 + $0x2190] sm:$0xff] %v2913_v12 }
  0xfe   : > { %v11542_v44 = vld [vmem:[%s10187_s14 + $0x3b40] sm:$0xff]  ;;  %v2937_v21 = vpack.c.bf16 %v8796_v15, %v11530_v37  ;;  %v8799_v22 = vld [vmem:[%s10187_s14 + $0x3b48] sm:$0xff]  ;;  %8792 = vst [vmem:[%s10210_s18 + $0x1a0] sm:$0xff] %v2921_v19 }
  0xff   : > { %v11545_v45 = vld [vmem:[%s10187_s14 + $0x2340] sm:$0xff]  ;;  %v8802_v23 = vld [vmem:[%s10187_s14 + $0x2348] sm:$0xff]  ;;  %v2945_v28 = vpack.c.bf16 %v8799_v22, %v11542_v44  ;;  %8795 = vst [vmem:[%s10210_s18 + $0xda0] sm:$0xff] %v2929_v20 }
 0x100   : > { %v11548_v46 = vld [vmem:[%s10187_s14 + $0xb40] sm:$0xff]  ;;  %v8805_v24 = vld [vmem:[%s10187_s14 + $0xb48] sm:$0xff]  ;;  %v2953_v29 = vpack.c.bf16 %v8802_v23, %v11545_v45  ;;  %8798 = vst [vmem:[%s10210_s18 + $0x19a0] sm:$0xff] %v2937_v21 }
 0x101   : > { %v11560_v53 = vld [vmem:[%s10187_s14 + $0x3340] sm:$0xff]  ;;  %v2961_v30 = vpack.c.bf16 %v8805_v24, %v11548_v46  ;;  %v8808_v31 = vld [vmem:[%s10187_s14 + $0x3348] sm:$0xff]  ;;  %8801 = vst [vmem:[%s10210_s18 + $0x5a0] sm:$0xff] %v2945_v28 }
 0x102   : > { %v11563_v54 = vld [vmem:[%s10187_s14 + $0x1b40] sm:$0xff]  ;;  %v8811_v32 = vld [vmem:[%s10187_s14 + $0x1b48] sm:$0xff]  ;;  %v2969_v37 = vpack.c.bf16 %v8808_v31, %v11560_v53  ;;  %8804 = vst [vmem:[%s10210_s18 + $0x11a0] sm:$0xff] %v2953_v29 }
 0x103   : > { %v11566_v55 = vld [vmem:[%s10187_s14 + $0x340] sm:$0xff]  ;;  %v8814_v33 = vld [vmem:[%s10187_s14 + $0x348] sm:$0xff]  ;;  %v2977_v38 = vpack.c.bf16 %v8811_v32, %v11563_v54  ;;  %8807 = vst [vmem:[%s10210_s18 + $0x1da0] sm:$0xff] %v2961_v30 }
 0x104   : > { %v11578_v62 = vld [vmem:[%s10187_s14 + $0x4360] sm:$0xff]  ;;  %v2985_v39 = vpack.c.bf16 %v8814_v33, %v11566_v55  ;;  %v8817_v40 = vld [vmem:[%s10187_s14 + $0x4368] sm:$0xff]  ;;  %8810 = vst [vmem:[%s10210_s18 + $0x9a0] sm:$0xff] %v2969_v37 }
 0x105   : > { %v11581_v63 = vld [vmem:[%s10187_s14 + $0x2b60] sm:$0xff]  ;;  %v8820_v41 = vld [vmem:[%s10187_s14 + $0x2b68] sm:$0xff]  ;;  %v2993_v46 = vpack.c.bf16 %v8817_v40, %v11578_v62  ;;  %8813 = vst [vmem:[%s10210_s18 + $0x15a0] sm:$0xff] %v2977_v38 }
 0x106   : > { %v11584_v0 = vld [vmem:[%s10187_s14 + $0x1360] sm:$0xff]  ;;  %v8823_v42 = vld [vmem:[%s10187_s14 + $0x1368] sm:$0xff]  ;;  %v3001_v47 = vpack.c.bf16 %v8820_v41, %v11581_v63  ;;  %8816 = vst [vmem:[%s10210_s18 + $0x21a0] sm:$0xff] %v2985_v39 }
 0x107   : > { %v11596_v7 = vld [vmem:[%s10187_s14 + $0x3b60] sm:$0xff]  ;;  %v3009_v48 = vpack.c.bf16 %v8823_v42, %v11584_v0  ;;  %v8826_v49 = vld [vmem:[%s10187_s14 + $0x3b68] sm:$0xff]  ;;  %8819 = vst [vmem:[%s10210_s18 + $0x1b0] sm:$0xff] %v2993_v46 }
 0x108   : > { %v11599_v8 = vld [vmem:[%s10187_s14 + $0x2360] sm:$0xff]  ;;  %v8829_v50 = vld [vmem:[%s10187_s14 + $0x2368] sm:$0xff]  ;;  %v3017_v55 = vpack.c.bf16 %v8826_v49, %v11596_v7  ;;  %8822 = vst [vmem:[%s10210_s18 + $0xdb0] sm:$0xff] %v3001_v47 }
 0x109   : > { %v11602_v9 = vld [vmem:[%s10187_s14 + $0xb60] sm:$0xff]  ;;  %v8832_v51 = vld [vmem:[%s10187_s14 + $0xb68] sm:$0xff]  ;;  %v3025_v56 = vpack.c.bf16 %v8829_v50, %v11599_v8  ;;  %8825 = vst [vmem:[%s10210_s18 + $0x19b0] sm:$0xff] %v3009_v48 }
 0x10a   : > { %v11614_v16 = vld [vmem:[%s10187_s14 + $0x3360] sm:$0xff]  ;;  %v3033_v57 = vpack.c.bf16 %v8832_v51, %v11602_v9  ;;  %v8835_v58 = vld [vmem:[%s10187_s14 + $0x3368] sm:$0xff]  ;;  %8828 = vst [vmem:[%s10210_s18 + $0x5b0] sm:$0xff] %v3017_v55 }
 0x10b   : > { %v11617_v17 = vld [vmem:[%s10187_s14 + $0x1b60] sm:$0xff]  ;;  %v8838_v59 = vld [vmem:[%s10187_s14 + $0x1b68] sm:$0xff]  ;;  %v3041_v0 = vpack.c.bf16 %v8835_v58, %v11614_v16  ;;  %8831 = vst [vmem:[%s10210_s18 + $0x11b0] sm:$0xff] %v3025_v56 }
 0x10c   : > { %v11620_v18 = vld [vmem:[%s10187_s14 + $0x360] sm:$0xff]  ;;  %v8841_v60 = vld [vmem:[%s10187_s14 + $0x368] sm:$0xff]  ;;  %v3049_v1 = vpack.c.bf16 %v8838_v59, %v11617_v17  ;;  %8834 = vst [vmem:[%s10210_s18 + $0x1db0] sm:$0xff] %v3033_v57 }
 0x10d   : > { %v11632_v25 = vld [vmem:[%s10187_s14 + $0x4380] sm:$0xff]  ;;  %v3057_v2 = vpack.c.bf16 %v8841_v60, %v11620_v18  ;;  %v8844_v3 = vld [vmem:[%s10187_s14 + $0x4388] sm:$0xff]  ;;  %8837 = vst [vmem:[%s10210_s18 + $0x9b0] sm:$0xff] %v3041_v0 }
 0x10e   : > { %v11635_v26 = vld [vmem:[%s10187_s14 + $0x2b80] sm:$0xff]  ;;  %v8847_v4 = vld [vmem:[%s10187_s14 + $0x2b88] sm:$0xff]  ;;  %v3065_v9 = vpack.c.bf16 %v8844_v3, %v11632_v25  ;;  %8840 = vst [vmem:[%s10210_s18 + $0x15b0] sm:$0xff] %v3049_v1 }
 0x10f   : > { %v11638_v27 = vld [vmem:[%s10187_s14 + $0x1380] sm:$0xff]  ;;  %v8850_v5 = vld [vmem:[%s10187_s14 + $0x1388] sm:$0xff]  ;;  %v3073_v10 = vpack.c.bf16 %v8847_v4, %v11635_v26  ;;  %8843 = vst [vmem:[%s10210_s18 + $0x21b0] sm:$0xff] %v3057_v2 }
 0x110   : > { %v11650_v34 = vld [vmem:[%s10187_s14 + $0x3b80] sm:$0xff]  ;;  %v3081_v11 = vpack.c.bf16 %v8850_v5, %v11638_v27  ;;  %v8853_v12 = vld [vmem:[%s10187_s14 + $0x3b88] sm:$0xff]  ;;  %8846 = vst [vmem:[%s10210_s18 + $0x1c0] sm:$0xff] %v3065_v9 }
 0x111   : > { %v11653_v35 = vld [vmem:[%s10187_s14 + $0x2380] sm:$0xff]  ;;  %v8856_v13 = vld [vmem:[%s10187_s14 + $0x2388] sm:$0xff]  ;;  %v3089_v18 = vpack.c.bf16 %v8853_v12, %v11650_v34  ;;  %8849 = vst [vmem:[%s10210_s18 + $0xdc0] sm:$0xff] %v3073_v10 }
 0x112   : > { %v11656_v36 = vld [vmem:[%s10187_s14 + $0xb80] sm:$0xff]  ;;  %v8859_v14 = vld [vmem:[%s10187_s14 + $0xb88] sm:$0xff]  ;;  %v3097_v19 = vpack.c.bf16 %v8856_v13, %v11653_v35  ;;  %8852 = vst [vmem:[%s10210_s18 + $0x19c0] sm:$0xff] %v3081_v11 }
 0x113   : > { %v11668_v43 = vld [vmem:[%s10187_s14 + $0x3380] sm:$0xff]  ;;  %v3105_v20 = vpack.c.bf16 %v8859_v14, %v11656_v36  ;;  %v8862_v21 = vld [vmem:[%s10187_s14 + $0x3388] sm:$0xff]  ;;  %8855 = vst [vmem:[%s10210_s18 + $0x5c0] sm:$0xff] %v3089_v18 }
 0x114   : > { %v11671_v44 = vld [vmem:[%s10187_s14 + $0x1b80] sm:$0xff]  ;;  %v8865_v22 = vld [vmem:[%s10187_s14 + $0x1b88] sm:$0xff]  ;;  %v3113_v27 = vpack.c.bf16 %v8862_v21, %v11668_v43  ;;  %8858 = vst [vmem:[%s10210_s18 + $0x11c0] sm:$0xff] %v3097_v19 }
 0x115   : > { %v11674_v45 = vld [vmem:[%s10187_s14 + $0x380] sm:$0xff]  ;;  %v8868_v23 = vld [vmem:[%s10187_s14 + $0x388] sm:$0xff]  ;;  %v3121_v28 = vpack.c.bf16 %v8865_v22, %v11671_v44  ;;  %8861 = vst [vmem:[%s10210_s18 + $0x1dc0] sm:$0xff] %v3105_v20 }
 0x116   : > { %v11686_v52 = vld [vmem:[%s10187_s14 + $0x43a0] sm:$0xff]  ;;  %v3129_v29 = vpack.c.bf16 %v8868_v23, %v11674_v45  ;;  %v8871_v30 = vld [vmem:[%s10187_s14 + $0x43a8] sm:$0xff]  ;;  %8864 = vst [vmem:[%s10210_s18 + $0x9c0] sm:$0xff] %v3113_v27 }
 0x117   : > { %v11689_v53 = vld [vmem:[%s10187_s14 + $0x2ba0] sm:$0xff]  ;;  %v8874_v31 = vld [vmem:[%s10187_s14 + $0x2ba8] sm:$0xff]  ;;  %v3137_v36 = vpack.c.bf16 %v8871_v30, %v11686_v52  ;;  %8867 = vst [vmem:[%s10210_s18 + $0x15c0] sm:$0xff] %v3121_v28 }
 0x118   : > { %v11692_v54 = vld [vmem:[%s10187_s14 + $0x13a0] sm:$0xff]  ;;  %v8877_v32 = vld [vmem:[%s10187_s14 + $0x13a8] sm:$0xff]  ;;  %v3145_v37 = vpack.c.bf16 %v8874_v31, %v11689_v53  ;;  %8870 = vst [vmem:[%s10210_s18 + $0x21c0] sm:$0xff] %v3129_v29 }
 0x119   : > { %v11704_v61 = vld [vmem:[%s10187_s14 + $0x3ba0] sm:$0xff]  ;;  %v3153_v38 = vpack.c.bf16 %v8877_v32, %v11692_v54  ;;  %v8880_v39 = vld [vmem:[%s10187_s14 + $0x3ba8] sm:$0xff]  ;;  %8873 = vst [vmem:[%s10210_s18 + $0x1d0] sm:$0xff] %v3137_v36  ;;  %v8952_v32 = vld [vmem:[%s10187_s14 + $0x4010] sm:$0xff] }
 0x11a   : > { %v11707_v62 = vld [vmem:[%s10187_s14 + $0x23a0] sm:$0xff]  ;;  %v8883_v40 = vld [vmem:[%s10187_s14 + $0x23a8] sm:$0xff]  ;;  %v3161_v45 = vpack.c.bf16 %v8880_v39, %v11704_v61  ;;  %8876 = vst [vmem:[%s10210_s18 + $0xdd0] sm:$0xff] %v3145_v37  ;;  %v8956_v36 = vld [vmem:[%s10187_s14 + $0x2010] sm:$0xff] }
 0x11b   : > { %v11710_v63 = vld [vmem:[%s10187_s14 + $0xba0] sm:$0xff]  ;;  %v8886_v41 = vld [vmem:[%s10187_s14 + $0xba8] sm:$0xff]  ;;  %v3169_v46 = vpack.c.bf16 %v8883_v40, %v11707_v62  ;;  %8879 = vst [vmem:[%s10210_s18 + $0x19d0] sm:$0xff] %v3153_v38  ;;  %v8957_v37 = vld [vmem:[%s10187_s14 + $0x810] sm:$0xff] }
 0x11c   : > { %v11722_v6 = vld [vmem:[%s10187_s14 + $0x33a0] sm:$0xff]  ;;  %v3177_v47 = vpack.c.bf16 %v8886_v41, %v11710_v63  ;;  %v8889_v48 = vld [vmem:[%s10187_s14 + $0x33a8] sm:$0xff]  ;;  %8882 = vst [vmem:[%s10210_s18 + $0x5d0] sm:$0xff] %v3161_v45  ;;  %v8958_v38 = vld [vmem:[%s10187_s14 + $0x3010] sm:$0xff] }
 0x11d   : > { %v11725_v7 = vld [vmem:[%s10187_s14 + $0x1ba0] sm:$0xff]  ;;  %v8892_v49 = vld [vmem:[%s10187_s14 + $0x1ba8] sm:$0xff]  ;;  %v3185_v54 = vpack.c.bf16 %v8889_v48, %v11722_v6  ;;  %8885 = vst [vmem:[%s10210_s18 + $0x11d0] sm:$0xff] %v3169_v46  ;;  %v8959_v39 = vld [vmem:[%s10187_s14 + $0x1810] sm:$0xff] }
 0x11e   : > { %v11728_v8 = vld [vmem:[%s10187_s14 + $0x3a0] sm:$0xff]  ;;  %v8895_v50 = vld [vmem:[%s10187_s14 + $0x3a8] sm:$0xff]  ;;  %v3193_v55 = vpack.c.bf16 %v8892_v49, %v11725_v7  ;;  %8888 = vst [vmem:[%s10210_s18 + $0x1dd0] sm:$0xff] %v3177_v47  ;;  %v8960_v40 = vld [vmem:[%s10187_s14 + $0x10] sm:$0xff] }
 0x11f   : > { %v11740_v15 = vld [vmem:[%s10187_s14 + $0x43c0] sm:$0xff]  ;;  %v3201_v56 = vpack.c.bf16 %v8895_v50, %v11728_v8  ;;  %v8898_v57 = vld [vmem:[%s10187_s14 + $0x43c8] sm:$0xff]  ;;  %8891 = vst [vmem:[%s10210_s18 + $0x9d0] sm:$0xff] %v3185_v54  ;;  %v11896_v41 = vld [vmem:[%s10187_s14 + $0x4030] sm:$0xff] }
 0x120   : > { %v11743_v16 = vld [vmem:[%s10187_s14 + $0x2bc0] sm:$0xff]  ;;  %v8901_v58 = vld [vmem:[%s10187_s14 + $0x2bc8] sm:$0xff]  ;;  %v3209_v63 = vpack.c.bf16 %v8898_v57, %v11740_v15  ;;  %8894 = vst [vmem:[%s10210_s18 + $0x15d0] sm:$0xff] %v3193_v55  ;;  %v11908_v45 = vld [vmem:[%s10187_s14 + $0x2030] sm:$0xff] }
 0x121   : > { %v11746_v17 = vld [vmem:[%s10187_s14 + $0x13c0] sm:$0xff]  ;;  %v8904_v59 = vld [vmem:[%s10187_s14 + $0x13c8] sm:$0xff]  ;;  %v3217_v0 = vpack.c.bf16 %v8901_v58, %v11743_v16  ;;  %8897 = vst [vmem:[%s10210_s18 + $0x21d0] sm:$0xff] %v3201_v56  ;;  %v11911_v46 = vld [vmem:[%s10187_s14 + $0x830] sm:$0xff] }
 0x122   : > { %v11758_v24 = vld [vmem:[%s10187_s14 + $0x3bc0] sm:$0xff]  ;;  %v3225_v1 = vpack.c.bf16 %v8904_v59, %v11746_v17  ;;  %v8907_v2 = vld [vmem:[%s10187_s14 + $0x3bc8] sm:$0xff]  ;;  %8900 = vst [vmem:[%s10210_s18 + $0x1e0] sm:$0xff] %v3209_v63  ;;  %v9240_v47 = vld [vmem:[%s10187_s14 + $0x4018] sm:$0xff] }
 0x123   : > { %v11761_v25 = vld [vmem:[%s10187_s14 + $0x23c0] sm:$0xff]  ;;  %v8910_v3 = vld [vmem:[%s10187_s14 + $0x23c8] sm:$0xff]  ;;  %v3233_v5 = vpack.c.bf16 %v8907_v2, %v11758_v24  ;;  %8903 = vst [vmem:[%s10210_s18 + $0xde0] sm:$0xff] %v3217_v0  ;;  %v9243_v48 = vld [vmem:[%s10187_s14 + $0x2818] sm:$0xff] }
 0x124   : > { %v11764_v26 = vld [vmem:[%s10187_s14 + $0xbc0] sm:$0xff]  ;;  %v8913_v4 = vld [vmem:[%s10187_s14 + $0xbc8] sm:$0xff]  ;;  %v3241_v6 = vpack.c.bf16 %v8910_v3, %v11761_v25  ;;  %8906 = vst [vmem:[%s10210_s18 + $0x19e0] sm:$0xff] %v3225_v1  ;;  %v9246_v49 = vld [vmem:[%s10187_s14 + $0x1018] sm:$0xff] }
 0x125   : > { %v11776_v33 = vld [vmem:[%s10187_s14 + $0x33c0] sm:$0xff]  ;;  %v3249_v7 = vpack.c.bf16 %v8913_v4, %v11764_v26  ;;  %v8916_v8 = vld [vmem:[%s10187_s14 + $0x33c8] sm:$0xff]  ;;  %8909 = vst [vmem:[%s10210_s18 + $0x5e0] sm:$0xff] %v3233_v5  ;;  %v11917_v50 = vld [vmem:[%s10187_s14 + $0x3030] sm:$0xff] }
 0x126   : > { %v11779_v34 = vld [vmem:[%s10187_s14 + $0x1bc0] sm:$0xff]  ;;  %v8919_v9 = vld [vmem:[%s10187_s14 + $0x1bc8] sm:$0xff]  ;;  %v3257_v11 = vpack.c.bf16 %v8916_v8, %v11776_v33  ;;  %8912 = vst [vmem:[%s10210_s18 + $0x11e0] sm:$0xff] %v3241_v6  ;;  %v8953_v33 = vld [vmem:[%s10187_s14 + $0x2810] sm:$0xff] }
 0x127   : > { %v11782_v35 = vld [vmem:[%s10187_s14 + $0x3c0] sm:$0xff]  ;;  %v8922_v10 = vld [vmem:[%s10187_s14 + $0x3c8] sm:$0xff]  ;;  %v3265_v12 = vpack.c.bf16 %v8919_v9, %v11779_v34  ;;  %8915 = vst [vmem:[%s10210_s18 + $0x1de0] sm:$0xff] %v3249_v7  ;;  %v8954_v34 = vld [vmem:[%s10187_s14 + $0x1010] sm:$0xff]  ;;  %v4225_v54 = vpack.c.bf16 %v9243_v48, %v8953_v33 }
 0x128   : > { %v11794_v42 = vld [vmem:[%s10187_s14 + $0x43e0] sm:$0xff]  ;;  %v3273_v13 = vpack.c.bf16 %v8922_v10, %v11782_v35  ;;  %v8925_v14 = vld [vmem:[%s10187_s14 + $0x43e8] sm:$0xff]  ;;  %8918 = vst [vmem:[%s10210_s18 + $0x9e0] sm:$0xff] %v3257_v11  ;;  %v8955_v35 = vld [vmem:[%s10187_s14 + $0x3810] sm:$0xff]  ;;  %v4233_v55 = vpack.c.bf16 %v9246_v49, %v8954_v34 }
 0x129   : > { %v11797_v43 = vld [vmem:[%s10187_s14 + $0x2be0] sm:$0xff]  ;;  %v8928_v15 = vld [vmem:[%s10187_s14 + $0x2be8] sm:$0xff]  ;;  %v3281_v17 = vpack.c.bf16 %v8925_v14, %v11794_v42  ;;  %8921 = vst [vmem:[%s10210_s18 + $0x15e0] sm:$0xff] %v3265_v12  ;;  %v11899_v42 = vld [vmem:[%s10187_s14 + $0x2830] sm:$0xff] }
 0x12a   : > { %v11800_v44 = vld [vmem:[%s10187_s14 + $0x13e0] sm:$0xff]  ;;  %v8931_v16 = vld [vmem:[%s10187_s14 + $0x13e8] sm:$0xff]  ;;  %v3289_v18 = vpack.c.bf16 %v8928_v15, %v11797_v43  ;;  %8924 = vst [vmem:[%s10210_s18 + $0x21e0] sm:$0xff] %v3273_v13  ;;  %v11902_v43 = vld [vmem:[%s10187_s14 + $0x1030] sm:$0xff] }
 0x12b   : > { %v11812_v51 = vld [vmem:[%s10187_s14 + $0x3be0] sm:$0xff]  ;;  %v3297_v19 = vpack.c.bf16 %v8931_v16, %v11800_v44  ;;  %v8934_v20 = vld [vmem:[%s10187_s14 + $0x3be8] sm:$0xff]  ;;  %8927 = vst [vmem:[%s10210_s18 + $0x1f0] sm:$0xff] %v3281_v17  ;;  %v11905_v44 = vld [vmem:[%s10187_s14 + $0x3830] sm:$0xff] }
 0x12c   : > { %v11815_v52 = vld [vmem:[%s10187_s14 + $0x23e0] sm:$0xff]  ;;  %v8937_v21 = vld [vmem:[%s10187_s14 + $0x23e8] sm:$0xff]  ;;  %v3305_v23 = vpack.c.bf16 %v8934_v20, %v11812_v51  ;;  %8930 = vst [vmem:[%s10210_s18 + $0xdf0] sm:$0xff] %v3289_v18  ;;  %v11920_v51 = vld [vmem:[%s10187_s14 + $0x1830] sm:$0xff] }
 0x12d   : > { %v11818_v53 = vld [vmem:[%s10187_s14 + $0xbe0] sm:$0xff]  ;;  %v8940_v22 = vld [vmem:[%s10187_s14 + $0xbe8] sm:$0xff]  ;;  %v3313_v24 = vpack.c.bf16 %v8937_v21, %v11815_v52  ;;  %8933 = vst [vmem:[%s10210_s18 + $0x19f0] sm:$0xff] %v3297_v19  ;;  %v11923_v52 = vld [vmem:[%s10187_s14 + $0x30] sm:$0xff] }
 0x12e   : > { %v8085_v60 = vld [vmem:[%s10187_s14 + $0x33e0] sm:$0xff]  ;;  %v3321_v25 = vpack.c.bf16 %v8940_v22, %v11818_v53  ;;  %v8943_v26 = vld [vmem:[%s10187_s14 + $0x33e8] sm:$0xff]  ;;  %8936 = vst [vmem:[%s10210_s18 + $0x5f0] sm:$0xff] %v3305_v23  ;;  %v4217_v53 = vpack.c.bf16 %v9240_v47, %v8952_v32  ;;  %v9249_v56 = vld [vmem:[%s10187_s14 + $0x3818] sm:$0xff] }
 0x12f   : > { %v8086_v61 = vld [vmem:[%s10187_s14 + $0x1be0] sm:$0xff]  ;;  %v8946_v27 = vld [vmem:[%s10187_s14 + $0x1be8] sm:$0xff]  ;;  %v3329_v29 = vpack.c.bf16 %v8943_v26, %v8085_v60  ;;  %8939 = vst [vmem:[%s10210_s18 + $0x11f0] sm:$0xff] %v3313_v24  ;;  %v9252_v57 = vld [vmem:[%s10187_s14 + $0x2018] sm:$0xff] }
 0x130   : > { %v8087_v62 = vld [vmem:[%s10187_s14 + $0x3e0] sm:$0xff]  ;;  %v8949_v28 = vld [vmem:[%s10187_s14 + $0x3e8] sm:$0xff]  ;;  %v3337_v30 = vpack.c.bf16 %v8946_v27, %v8086_v61  ;;  %8942 = vst [vmem:[%s10210_s18 + $0x1df0] sm:$0xff] %v3321_v25  ;;  %v9255_v58 = vld [vmem:[%s10187_s14 + $0x818] sm:$0xff]  ;;  %v4249_v63 = vpack.c.bf16 %v9252_v57, %v8956_v36 }
 0x131   : > { %v3345_v31 = vpack.c.bf16 %v8949_v28, %v8087_v62  ;;  %8945 = vst [vmem:[%s10210_s18 + $0x9f0] sm:$0xff] %v3329_v29  ;;  %v11929_v59 = vld [vmem:[%s10187_s14 + $0x4050] sm:$0xff]  ;;  %v4241_v62 = vpack.c.bf16 %v9249_v56, %v8955_v35  ;;  %v4257_v0 = vpack.c.bf16 %v9255_v58, %v8957_v37  ;;  %v9258_v1 = vld [vmem:[%s10187_s14 + $0x3018] sm:$0xff]  ;;  %9242 = vst [vmem:[%s10210_s18 + $0x8] sm:$0xff] %v4217_v53 }
 0x132   : > { %8948 = vst [vmem:[%s10210_s18 + $0x15f0] sm:$0xff] %v3337_v30  ;;  %v11932_v60 = vld [vmem:[%s10187_s14 + $0x2850] sm:$0xff]  ;;  %v9261_v2 = vld [vmem:[%s10187_s14 + $0x1818] sm:$0xff]  ;;  %9245 = vst [vmem:[%s10210_s18 + $0xc08] sm:$0xff] %v4225_v54  ;;  %v4265_v7 = vpack.c.bf16 %v9258_v1, %v8958_v38 }
 0x133   : > { %8951 = vst [vmem:[%s10210_s18 + $0x21f0] sm:$0xff] %v3345_v31  ;;  %v11935_v61 = vld [vmem:[%s10187_s14 + $0x1050] sm:$0xff]  ;;  %v9264_v3 = vld [vmem:[%s10187_s14 + $0x18] sm:$0xff]  ;;  %9248 = vst [vmem:[%s10210_s18 + $0x1808] sm:$0xff] %v4233_v55  ;;  %v4273_v8 = vpack.c.bf16 %v9261_v2, %v8959_v39 }
 0x134   : > { %v11941_v4 = vld [vmem:[%s10187_s14 + $0x3850] sm:$0xff]  ;;  %v4281_v9 = vpack.c.bf16 %v9264_v3, %v8960_v40  ;;  %v9267_v10 = vld [vmem:[%s10187_s14 + $0x4038] sm:$0xff]  ;;  %9251 = vst [vmem:[%s10210_s18 + $0x408] sm:$0xff] %v4241_v62  ;;  %9254 = vst [vmem:[%s10210_s18 + $0x1008] sm:$0xff] %v4249_v63 }
 0x135   : > { %v11944_v5 = vld [vmem:[%s10187_s14 + $0x2050] sm:$0xff]  ;;  %v9270_v11 = vld [vmem:[%s10187_s14 + $0x2838] sm:$0xff]  ;;  %9257 = vst [vmem:[%s10210_s18 + $0x1c08] sm:$0xff] %v4257_v0  ;;  %v4289_v16 = vpack.c.bf16 %v9267_v10, %v11896_v41  ;;  %9260 = vst [vmem:[%s10210_s18 + $0x808] sm:$0xff] %v4265_v7 }
 0x136   : > { %v11947_v6 = vld [vmem:[%s10187_s14 + $0x850] sm:$0xff]  ;;  %v9273_v12 = vld [vmem:[%s10187_s14 + $0x1038] sm:$0xff]  ;;  %v4297_v17 = vpack.c.bf16 %v9270_v11, %v11899_v42  ;;  %9263 = vst [vmem:[%s10210_s18 + $0x1408] sm:$0xff] %v4273_v8  ;;  %9266 = vst [vmem:[%s10210_s18 + $0x2008] sm:$0xff] %v4281_v9 }
 0x137   : > { %v11956_v13 = vld [vmem:[%s10187_s14 + $0x3050] sm:$0xff]  ;;  %v4305_v18 = vpack.c.bf16 %v9273_v12, %v11902_v43  ;;  %v9276_v19 = vld [vmem:[%s10187_s14 + $0x3838] sm:$0xff]  ;;  %9269 = vst [vmem:[%s10210_s18 + $0x18] sm:$0xff] %v4289_v16 }
 0x138   : > { %v11959_v14 = vld [vmem:[%s10187_s14 + $0x1850] sm:$0xff]  ;;  %v9279_v20 = vld [vmem:[%s10187_s14 + $0x2038] sm:$0xff]  ;;  %v4313_v25 = vpack.c.bf16 %v9276_v19, %v11905_v44  ;;  %9272 = vst [vmem:[%s10210_s18 + $0xc18] sm:$0xff] %v4297_v17 }
 0x139   : > { %v11962_v15 = vld [vmem:[%s10187_s14 + $0x50] sm:$0xff]  ;;  %v9282_v21 = vld [vmem:[%s10187_s14 + $0x838] sm:$0xff]  ;;  %v4321_v26 = vpack.c.bf16 %v9279_v20, %v11908_v45  ;;  %9275 = vst [vmem:[%s10210_s18 + $0x1818] sm:$0xff] %v4305_v18 }
 0x13a   : > { %v11974_v22 = vld [vmem:[%s10187_s14 + $0x4070] sm:$0xff]  ;;  %v4329_v27 = vpack.c.bf16 %v9282_v21, %v11911_v46  ;;  %v9285_v28 = vld [vmem:[%s10187_s14 + $0x3038] sm:$0xff]  ;;  %9278 = vst [vmem:[%s10210_s18 + $0x418] sm:$0xff] %v4313_v25 }
 0x13b   : > { %v11977_v23 = vld [vmem:[%s10187_s14 + $0x2870] sm:$0xff]  ;;  %v9288_v29 = vld [vmem:[%s10187_s14 + $0x1838] sm:$0xff]  ;;  %v4337_v34 = vpack.c.bf16 %v9285_v28, %v11917_v50  ;;  %9281 = vst [vmem:[%s10210_s18 + $0x1018] sm:$0xff] %v4321_v26 }
 0x13c   : > { %v11980_v24 = vld [vmem:[%s10187_s14 + $0x1070] sm:$0xff]  ;;  %v9291_v30 = vld [vmem:[%s10187_s14 + $0x38] sm:$0xff]  ;;  %v4345_v35 = vpack.c.bf16 %v9288_v29, %v11920_v51  ;;  %9284 = vst [vmem:[%s10210_s18 + $0x1c18] sm:$0xff] %v4329_v27 }
 0x13d   : > { %v11992_v31 = vld [vmem:[%s10187_s14 + $0x3870] sm:$0xff]  ;;  %v4353_v36 = vpack.c.bf16 %v9291_v30, %v11923_v52  ;;  %v9294_v37 = vld [vmem:[%s10187_s14 + $0x4058] sm:$0xff]  ;;  %9287 = vst [vmem:[%s10210_s18 + $0x818] sm:$0xff] %v4337_v34 }
 0x13e   : > { %v11995_v32 = vld [vmem:[%s10187_s14 + $0x2070] sm:$0xff]  ;;  %v9297_v38 = vld [vmem:[%s10187_s14 + $0x2858] sm:$0xff]  ;;  %v4361_v43 = vpack.c.bf16 %v9294_v37, %v11929_v59  ;;  %9290 = vst [vmem:[%s10210_s18 + $0x1418] sm:$0xff] %v4345_v35 }
 0x13f   : > { %v11998_v33 = vld [vmem:[%s10187_s14 + $0x870] sm:$0xff]  ;;  %v9300_v39 = vld [vmem:[%s10187_s14 + $0x1058] sm:$0xff]  ;;  %v4369_v44 = vpack.c.bf16 %v9297_v38, %v11932_v60  ;;  %9293 = vst [vmem:[%s10210_s18 + $0x2018] sm:$0xff] %v4353_v36 }
 0x140   : > { %v12010_v40 = vld [vmem:[%s10187_s14 + $0x3070] sm:$0xff]  ;;  %v4377_v45 = vpack.c.bf16 %v9300_v39, %v11935_v61  ;;  %v9303_v46 = vld [vmem:[%s10187_s14 + $0x3858] sm:$0xff]  ;;  %9296 = vst [vmem:[%s10210_s18 + $0x28] sm:$0xff] %v4361_v43 }
 0x141   : > { %v12013_v41 = vld [vmem:[%s10187_s14 + $0x1870] sm:$0xff]  ;;  %v9306_v47 = vld [vmem:[%s10187_s14 + $0x2058] sm:$0xff]  ;;  %v4385_v52 = vpack.c.bf16 %v9303_v46, %v11941_v4  ;;  %9299 = vst [vmem:[%s10210_s18 + $0xc28] sm:$0xff] %v4369_v44 }
 0x142   : > { %v12016_v42 = vld [vmem:[%s10187_s14 + $0x70] sm:$0xff]  ;;  %v9309_v48 = vld [vmem:[%s10187_s14 + $0x858] sm:$0xff]  ;;  %v4393_v53 = vpack.c.bf16 %v9306_v47, %v11944_v5  ;;  %9302 = vst [vmem:[%s10210_s18 + $0x1828] sm:$0xff] %v4377_v45 }
 0x143   : > { %v12028_v49 = vld [vmem:[%s10187_s14 + $0x4090] sm:$0xff]  ;;  %v4401_v54 = vpack.c.bf16 %v9309_v48, %v11947_v6  ;;  %v9312_v55 = vld [vmem:[%s10187_s14 + $0x3058] sm:$0xff]  ;;  %9305 = vst [vmem:[%s10210_s18 + $0x428] sm:$0xff] %v4385_v52 }
 0x144   : > { %v12031_v50 = vld [vmem:[%s10187_s14 + $0x2890] sm:$0xff]  ;;  %v9315_v56 = vld [vmem:[%s10187_s14 + $0x1858] sm:$0xff]  ;;  %v4409_v61 = vpack.c.bf16 %v9312_v55, %v11956_v13  ;;  %9308 = vst [vmem:[%s10210_s18 + $0x1028] sm:$0xff] %v4393_v53 }
 0x145   : > { %v12034_v51 = vld [vmem:[%s10187_s14 + $0x1090] sm:$0xff]  ;;  %v9318_v57 = vld [vmem:[%s10187_s14 + $0x58] sm:$0xff]  ;;  %v4417_v62 = vpack.c.bf16 %v9315_v56, %v11959_v14  ;;  %9311 = vst [vmem:[%s10210_s18 + $0x1c28] sm:$0xff] %v4401_v54 }
 0x146   : > { %v12046_v58 = vld [vmem:[%s10187_s14 + $0x3890] sm:$0xff]  ;;  %v4425_v63 = vpack.c.bf16 %v9318_v57, %v11962_v15  ;;  %v9321_v0 = vld [vmem:[%s10187_s14 + $0x4078] sm:$0xff]  ;;  %9314 = vst [vmem:[%s10210_s18 + $0x828] sm:$0xff] %v4409_v61 }
 0x147   : > { %v12049_v59 = vld [vmem:[%s10187_s14 + $0x2090] sm:$0xff]  ;;  %v9324_v1 = vld [vmem:[%s10187_s14 + $0x2878] sm:$0xff]  ;;  %v4433_v6 = vpack.c.bf16 %v9321_v0, %v11974_v22  ;;  %9317 = vst [vmem:[%s10210_s18 + $0x1428] sm:$0xff] %v4417_v62 }
 0x148   : > { %v12052_v60 = vld [vmem:[%s10187_s14 + $0x890] sm:$0xff]  ;;  %v9327_v2 = vld [vmem:[%s10187_s14 + $0x1078] sm:$0xff]  ;;  %v4441_v7 = vpack.c.bf16 %v9324_v1, %v11977_v23  ;;  %9320 = vst [vmem:[%s10210_s18 + $0x2028] sm:$0xff] %v4425_v63 }
 0x149   : > { %v12064_v3 = vld [vmem:[%s10187_s14 + $0x3090] sm:$0xff]  ;;  %v4449_v8 = vpack.c.bf16 %v9327_v2, %v11980_v24  ;;  %v9330_v9 = vld [vmem:[%s10187_s14 + $0x3878] sm:$0xff]  ;;  %9323 = vst [vmem:[%s10210_s18 + $0x38] sm:$0xff] %v4433_v6 }
 0x14a   : > { %v12067_v4 = vld [vmem:[%s10187_s14 + $0x1890] sm:$0xff]  ;;  %v9333_v10 = vld [vmem:[%s10187_s14 + $0x2078] sm:$0xff]  ;;  %v4457_v15 = vpack.c.bf16 %v9330_v9, %v11992_v31  ;;  %9326 = vst [vmem:[%s10210_s18 + $0xc38] sm:$0xff] %v4441_v7 }
 0x14b   : > { %v12070_v5 = vld [vmem:[%s10187_s14 + $0x90] sm:$0xff]  ;;  %v9336_v11 = vld [vmem:[%s10187_s14 + $0x878] sm:$0xff]  ;;  %v4465_v16 = vpack.c.bf16 %v9333_v10, %v11995_v32  ;;  %9329 = vst [vmem:[%s10210_s18 + $0x1838] sm:$0xff] %v4449_v8 }
 0x14c   : > { %v12082_v12 = vld [vmem:[%s10187_s14 + $0x40b0] sm:$0xff]  ;;  %v4473_v17 = vpack.c.bf16 %v9336_v11, %v11998_v33  ;;  %v9339_v18 = vld [vmem:[%s10187_s14 + $0x3078] sm:$0xff]  ;;  %9332 = vst [vmem:[%s10210_s18 + $0x438] sm:$0xff] %v4457_v15 }
 0x14d   : > { %v12085_v13 = vld [vmem:[%s10187_s14 + $0x28b0] sm:$0xff]  ;;  %v9342_v19 = vld [vmem:[%s10187_s14 + $0x1878] sm:$0xff]  ;;  %v4481_v24 = vpack.c.bf16 %v9339_v18, %v12010_v40  ;;  %9335 = vst [vmem:[%s10210_s18 + $0x1038] sm:$0xff] %v4465_v16 }
 0x14e   : > { %v12088_v14 = vld [vmem:[%s10187_s14 + $0x10b0] sm:$0xff]  ;;  %v9345_v20 = vld [vmem:[%s10187_s14 + $0x78] sm:$0xff]  ;;  %v4489_v25 = vpack.c.bf16 %v9342_v19, %v12013_v41  ;;  %9338 = vst [vmem:[%s10210_s18 + $0x1c38] sm:$0xff] %v4473_v17 }
 0x14f   : > { %v12100_v21 = vld [vmem:[%s10187_s14 + $0x38b0] sm:$0xff]  ;;  %v4497_v26 = vpack.c.bf16 %v9345_v20, %v12016_v42  ;;  %v9348_v27 = vld [vmem:[%s10187_s14 + $0x4098] sm:$0xff]  ;;  %9341 = vst [vmem:[%s10210_s18 + $0x838] sm:$0xff] %v4481_v24 }
 0x150   : > { %v12103_v22 = vld [vmem:[%s10187_s14 + $0x20b0] sm:$0xff]  ;;  %v9351_v28 = vld [vmem:[%s10187_s14 + $0x2898] sm:$0xff]  ;;  %v4505_v33 = vpack.c.bf16 %v9348_v27, %v12028_v49  ;;  %9344 = vst [vmem:[%s10210_s18 + $0x1438] sm:$0xff] %v4489_v25 }
 0x151   : > { %v12106_v23 = vld [vmem:[%s10187_s14 + $0x8b0] sm:$0xff]  ;;  %v9354_v29 = vld [vmem:[%s10187_s14 + $0x1098] sm:$0xff]  ;;  %v4513_v34 = vpack.c.bf16 %v9351_v28, %v12031_v50  ;;  %9347 = vst [vmem:[%s10210_s18 + $0x2038] sm:$0xff] %v4497_v26 }
 0x152   : > { %v12118_v30 = vld [vmem:[%s10187_s14 + $0x30b0] sm:$0xff]  ;;  %v4521_v35 = vpack.c.bf16 %v9354_v29, %v12034_v51  ;;  %v9357_v36 = vld [vmem:[%s10187_s14 + $0x3898] sm:$0xff]  ;;  %9350 = vst [vmem:[%s10210_s18 + $0x48] sm:$0xff] %v4505_v33 }
 0x153   : > { %v12121_v31 = vld [vmem:[%s10187_s14 + $0x18b0] sm:$0xff]  ;;  %v9360_v37 = vld [vmem:[%s10187_s14 + $0x2098] sm:$0xff]  ;;  %v4529_v42 = vpack.c.bf16 %v9357_v36, %v12046_v58  ;;  %9353 = vst [vmem:[%s10210_s18 + $0xc48] sm:$0xff] %v4513_v34 }
 0x154   : > { %v12124_v32 = vld [vmem:[%s10187_s14 + $0xb0] sm:$0xff]  ;;  %v9363_v38 = vld [vmem:[%s10187_s14 + $0x898] sm:$0xff]  ;;  %v4537_v43 = vpack.c.bf16 %v9360_v37, %v12049_v59  ;;  %9356 = vst [vmem:[%s10210_s18 + $0x1848] sm:$0xff] %v4521_v35 }
 0x155   : > { %v12136_v39 = vld [vmem:[%s10187_s14 + $0x40d0] sm:$0xff]  ;;  %v4545_v44 = vpack.c.bf16 %v9363_v38, %v12052_v60  ;;  %v9366_v45 = vld [vmem:[%s10187_s14 + $0x3098] sm:$0xff]  ;;  %9359 = vst [vmem:[%s10210_s18 + $0x448] sm:$0xff] %v4529_v42 }
 0x156   : > { %v12139_v40 = vld [vmem:[%s10187_s14 + $0x28d0] sm:$0xff]  ;;  %v9369_v46 = vld [vmem:[%s10187_s14 + $0x1898] sm:$0xff]  ;;  %v4553_v51 = vpack.c.bf16 %v9366_v45, %v12064_v3  ;;  %9362 = vst [vmem:[%s10210_s18 + $0x1048] sm:$0xff] %v4537_v43 }
 0x157   : > { %v12142_v41 = vld [vmem:[%s10187_s14 + $0x10d0] sm:$0xff]  ;;  %v9372_v47 = vld [vmem:[%s10187_s14 + $0x98] sm:$0xff]  ;;  %v4561_v52 = vpack.c.bf16 %v9369_v46, %v12067_v4  ;;  %9365 = vst [vmem:[%s10210_s18 + $0x1c48] sm:$0xff] %v4545_v44 }
 0x158   : > { %v12154_v48 = vld [vmem:[%s10187_s14 + $0x38d0] sm:$0xff]  ;;  %v4569_v53 = vpack.c.bf16 %v9372_v47, %v12070_v5  ;;  %v9375_v54 = vld [vmem:[%s10187_s14 + $0x40b8] sm:$0xff]  ;;  %9368 = vst [vmem:[%s10210_s18 + $0x848] sm:$0xff] %v4553_v51 }
 0x159   : > { %v12157_v49 = vld [vmem:[%s10187_s14 + $0x20d0] sm:$0xff]  ;;  %v9378_v55 = vld [vmem:[%s10187_s14 + $0x28b8] sm:$0xff]  ;;  %v4577_v60 = vpack.c.bf16 %v9375_v54, %v12082_v12  ;;  %9371 = vst [vmem:[%s10210_s18 + $0x1448] sm:$0xff] %v4561_v52 }
 0x15a   : > { %v12160_v50 = vld [vmem:[%s10187_s14 + $0x8d0] sm:$0xff]  ;;  %v9381_v56 = vld [vmem:[%s10187_s14 + $0x10b8] sm:$0xff]  ;;  %v4585_v61 = vpack.c.bf16 %v9378_v55, %v12085_v13  ;;  %9374 = vst [vmem:[%s10210_s18 + $0x2048] sm:$0xff] %v4569_v53 }
 0x15b   : > { %v12172_v57 = vld [vmem:[%s10187_s14 + $0x30d0] sm:$0xff]  ;;  %v4593_v62 = vpack.c.bf16 %v9381_v56, %v12088_v14  ;;  %v9384_v63 = vld [vmem:[%s10187_s14 + $0x38b8] sm:$0xff]  ;;  %9377 = vst [vmem:[%s10210_s18 + $0x58] sm:$0xff] %v4577_v60 }
 0x15c   : > { %v12175_v58 = vld [vmem:[%s10187_s14 + $0x18d0] sm:$0xff]  ;;  %v9387_v0 = vld [vmem:[%s10187_s14 + $0x20b8] sm:$0xff]  ;;  %v4601_v5 = vpack.c.bf16 %v9384_v63, %v12100_v21  ;;  %9380 = vst [vmem:[%s10210_s18 + $0xc58] sm:$0xff] %v4585_v61 }
 0x15d   : > { %v12178_v59 = vld [vmem:[%s10187_s14 + $0xd0] sm:$0xff]  ;;  %v9390_v1 = vld [vmem:[%s10187_s14 + $0x8b8] sm:$0xff]  ;;  %v4609_v6 = vpack.c.bf16 %v9387_v0, %v12103_v22  ;;  %9383 = vst [vmem:[%s10210_s18 + $0x1858] sm:$0xff] %v4593_v62 }
 0x15e   : > { %v12190_v2 = vld [vmem:[%s10187_s14 + $0x40f0] sm:$0xff]  ;;  %v4617_v7 = vpack.c.bf16 %v9390_v1, %v12106_v23  ;;  %v9393_v8 = vld [vmem:[%s10187_s14 + $0x30b8] sm:$0xff]  ;;  %9386 = vst [vmem:[%s10210_s18 + $0x458] sm:$0xff] %v4601_v5 }
 0x15f   : > { %v12193_v3 = vld [vmem:[%s10187_s14 + $0x28f0] sm:$0xff]  ;;  %v9396_v9 = vld [vmem:[%s10187_s14 + $0x18b8] sm:$0xff]  ;;  %v4625_v14 = vpack.c.bf16 %v9393_v8, %v12118_v30  ;;  %9389 = vst [vmem:[%s10210_s18 + $0x1058] sm:$0xff] %v4609_v6 }
 0x160   : > { %v12196_v4 = vld [vmem:[%s10187_s14 + $0x10f0] sm:$0xff]  ;;  %v9399_v10 = vld [vmem:[%s10187_s14 + $0xb8] sm:$0xff]  ;;  %v4633_v15 = vpack.c.bf16 %v9396_v9, %v12121_v31  ;;  %9392 = vst [vmem:[%s10210_s18 + $0x1c58] sm:$0xff] %v4617_v7 }
 0x161   : > { %v12208_v11 = vld [vmem:[%s10187_s14 + $0x38f0] sm:$0xff]  ;;  %v4641_v16 = vpack.c.bf16 %v9399_v10, %v12124_v32  ;;  %v9402_v17 = vld [vmem:[%s10187_s14 + $0x40d8] sm:$0xff]  ;;  %9395 = vst [vmem:[%s10210_s18 + $0x858] sm:$0xff] %v4625_v14 }
 0x162   : > { %v12211_v12 = vld [vmem:[%s10187_s14 + $0x20f0] sm:$0xff]  ;;  %v9405_v18 = vld [vmem:[%s10187_s14 + $0x28d8] sm:$0xff]  ;;  %v4649_v23 = vpack.c.bf16 %v9402_v17, %v12136_v39  ;;  %9398 = vst [vmem:[%s10210_s18 + $0x1458] sm:$0xff] %v4633_v15 }
 0x163   : > { %v12214_v13 = vld [vmem:[%s10187_s14 + $0x8f0] sm:$0xff]  ;;  %v9408_v19 = vld [vmem:[%s10187_s14 + $0x10d8] sm:$0xff]  ;;  %v4657_v24 = vpack.c.bf16 %v9405_v18, %v12139_v40  ;;  %9401 = vst [vmem:[%s10210_s18 + $0x2058] sm:$0xff] %v4641_v16 }
 0x164   : > { %v12226_v20 = vld [vmem:[%s10187_s14 + $0x30f0] sm:$0xff]  ;;  %v4665_v25 = vpack.c.bf16 %v9408_v19, %v12142_v41  ;;  %v9411_v26 = vld [vmem:[%s10187_s14 + $0x38d8] sm:$0xff]  ;;  %9404 = vst [vmem:[%s10210_s18 + $0x68] sm:$0xff] %v4649_v23 }
 0x165   : > { %v12229_v21 = vld [vmem:[%s10187_s14 + $0x18f0] sm:$0xff]  ;;  %v9414_v27 = vld [vmem:[%s10187_s14 + $0x20d8] sm:$0xff]  ;;  %v4673_v32 = vpack.c.bf16 %v9411_v26, %v12154_v48  ;;  %9407 = vst [vmem:[%s10210_s18 + $0xc68] sm:$0xff] %v4657_v24 }
 0x166   : > { %v12232_v22 = vld [vmem:[%s10187_s14 + $0xf0] sm:$0xff]  ;;  %v9417_v28 = vld [vmem:[%s10187_s14 + $0x8d8] sm:$0xff]  ;;  %v4681_v33 = vpack.c.bf16 %v9414_v27, %v12157_v49  ;;  %9410 = vst [vmem:[%s10210_s18 + $0x1868] sm:$0xff] %v4665_v25 }
 0x167   : > { %v12244_v29 = vld [vmem:[%s10187_s14 + $0x4110] sm:$0xff]  ;;  %v4689_v34 = vpack.c.bf16 %v9417_v28, %v12160_v50  ;;  %v9420_v35 = vld [vmem:[%s10187_s14 + $0x30d8] sm:$0xff]  ;;  %9413 = vst [vmem:[%s10210_s18 + $0x468] sm:$0xff] %v4673_v32 }
 0x168   : > { %v12247_v30 = vld [vmem:[%s10187_s14 + $0x2910] sm:$0xff]  ;;  %v9423_v36 = vld [vmem:[%s10187_s14 + $0x18d8] sm:$0xff]  ;;  %v4697_v41 = vpack.c.bf16 %v9420_v35, %v12172_v57  ;;  %9416 = vst [vmem:[%s10210_s18 + $0x1068] sm:$0xff] %v4681_v33 }
 0x169   : > { %v12250_v31 = vld [vmem:[%s10187_s14 + $0x1110] sm:$0xff]  ;;  %v9426_v37 = vld [vmem:[%s10187_s14 + $0xd8] sm:$0xff]  ;;  %v4705_v42 = vpack.c.bf16 %v9423_v36, %v12175_v58  ;;  %9419 = vst [vmem:[%s10210_s18 + $0x1c68] sm:$0xff] %v4689_v34 }
 0x16a   : > { %v12262_v38 = vld [vmem:[%s10187_s14 + $0x3910] sm:$0xff]  ;;  %v4713_v43 = vpack.c.bf16 %v9426_v37, %v12178_v59  ;;  %v9429_v44 = vld [vmem:[%s10187_s14 + $0x40f8] sm:$0xff]  ;;  %9422 = vst [vmem:[%s10210_s18 + $0x868] sm:$0xff] %v4697_v41 }
 0x16b   : > { %v12265_v39 = vld [vmem:[%s10187_s14 + $0x2110] sm:$0xff]  ;;  %v9432_v45 = vld [vmem:[%s10187_s14 + $0x28f8] sm:$0xff]  ;;  %v4721_v50 = vpack.c.bf16 %v9429_v44, %v12190_v2  ;;  %9425 = vst [vmem:[%s10210_s18 + $0x1468] sm:$0xff] %v4705_v42 }
 0x16c   : > { %v12268_v40 = vld [vmem:[%s10187_s14 + $0x910] sm:$0xff]  ;;  %v9435_v46 = vld [vmem:[%s10187_s14 + $0x10f8] sm:$0xff]  ;;  %v4729_v51 = vpack.c.bf16 %v9432_v45, %v12193_v3  ;;  %9428 = vst [vmem:[%s10210_s18 + $0x2068] sm:$0xff] %v4713_v43 }
 0x16d   : > { %v12280_v47 = vld [vmem:[%s10187_s14 + $0x3110] sm:$0xff]  ;;  %v4737_v52 = vpack.c.bf16 %v9435_v46, %v12196_v4  ;;  %v9438_v53 = vld [vmem:[%s10187_s14 + $0x38f8] sm:$0xff]  ;;  %9431 = vst [vmem:[%s10210_s18 + $0x78] sm:$0xff] %v4721_v50 }
 0x16e   : > { %v12283_v48 = vld [vmem:[%s10187_s14 + $0x1910] sm:$0xff]  ;;  %v9441_v54 = vld [vmem:[%s10187_s14 + $0x20f8] sm:$0xff]  ;;  %v4745_v59 = vpack.c.bf16 %v9438_v53, %v12208_v11  ;;  %9434 = vst [vmem:[%s10210_s18 + $0xc78] sm:$0xff] %v4729_v51 }
 0x16f   : > { %v12286_v49 = vld [vmem:[%s10187_s14 + $0x110] sm:$0xff]  ;;  %v9444_v55 = vld [vmem:[%s10187_s14 + $0x8f8] sm:$0xff]  ;;  %v4753_v60 = vpack.c.bf16 %v9441_v54, %v12211_v12  ;;  %9437 = vst [vmem:[%s10210_s18 + $0x1878] sm:$0xff] %v4737_v52 }
 0x170   : > { %v12298_v56 = vld [vmem:[%s10187_s14 + $0x4130] sm:$0xff]  ;;  %v4761_v61 = vpack.c.bf16 %v9444_v55, %v12214_v13  ;;  %v9447_v62 = vld [vmem:[%s10187_s14 + $0x30f8] sm:$0xff]  ;;  %9440 = vst [vmem:[%s10210_s18 + $0x478] sm:$0xff] %v4745_v59 }
 0x171   : > { %v12301_v57 = vld [vmem:[%s10187_s14 + $0x2930] sm:$0xff]  ;;  %v9450_v63 = vld [vmem:[%s10187_s14 + $0x18f8] sm:$0xff]  ;;  %v4769_v4 = vpack.c.bf16 %v9447_v62, %v12226_v20  ;;  %9443 = vst [vmem:[%s10210_s18 + $0x1078] sm:$0xff] %v4753_v60 }
 0x172   : > { %v12304_v58 = vld [vmem:[%s10187_s14 + $0x1130] sm:$0xff]  ;;  %v9453_v0 = vld [vmem:[%s10187_s14 + $0xf8] sm:$0xff]  ;;  %v4777_v5 = vpack.c.bf16 %v9450_v63, %v12229_v21  ;;  %9446 = vst [vmem:[%s10210_s18 + $0x1c78] sm:$0xff] %v4761_v61 }
 0x173   : > { %v12316_v1 = vld [vmem:[%s10187_s14 + $0x3930] sm:$0xff]  ;;  %v4785_v6 = vpack.c.bf16 %v9453_v0, %v12232_v22  ;;  %v9456_v7 = vld [vmem:[%s10187_s14 + $0x4118] sm:$0xff]  ;;  %9449 = vst [vmem:[%s10210_s18 + $0x878] sm:$0xff] %v4769_v4 }
 0x174   : > { %v12319_v2 = vld [vmem:[%s10187_s14 + $0x2130] sm:$0xff]  ;;  %v9459_v8 = vld [vmem:[%s10187_s14 + $0x2918] sm:$0xff]  ;;  %v4793_v13 = vpack.c.bf16 %v9456_v7, %v12244_v29  ;;  %9452 = vst [vmem:[%s10210_s18 + $0x1478] sm:$0xff] %v4777_v5 }
 0x175   : > { %v12322_v3 = vld [vmem:[%s10187_s14 + $0x930] sm:$0xff]  ;;  %v9462_v9 = vld [vmem:[%s10187_s14 + $0x1118] sm:$0xff]  ;;  %v4801_v14 = vpack.c.bf16 %v9459_v8, %v12247_v30  ;;  %9455 = vst [vmem:[%s10210_s18 + $0x2078] sm:$0xff] %v4785_v6 }
 0x176   : > { %v12334_v10 = vld [vmem:[%s10187_s14 + $0x3130] sm:$0xff]  ;;  %v4809_v15 = vpack.c.bf16 %v9462_v9, %v12250_v31  ;;  %v9465_v16 = vld [vmem:[%s10187_s14 + $0x3918] sm:$0xff]  ;;  %9458 = vst [vmem:[%s10210_s18 + $0x88] sm:$0xff] %v4793_v13 }
 0x177   : > { %v12337_v11 = vld [vmem:[%s10187_s14 + $0x1930] sm:$0xff]  ;;  %v9468_v17 = vld [vmem:[%s10187_s14 + $0x2118] sm:$0xff]  ;;  %v4817_v22 = vpack.c.bf16 %v9465_v16, %v12262_v38  ;;  %9461 = vst [vmem:[%s10210_s18 + $0xc88] sm:$0xff] %v4801_v14 }
 0x178   : > { %v12340_v12 = vld [vmem:[%s10187_s14 + $0x130] sm:$0xff]  ;;  %v9471_v18 = vld [vmem:[%s10187_s14 + $0x918] sm:$0xff]  ;;  %v4825_v23 = vpack.c.bf16 %v9468_v17, %v12265_v39  ;;  %9464 = vst [vmem:[%s10210_s18 + $0x1888] sm:$0xff] %v4809_v15 }
 0x179   : > { %v12352_v19 = vld [vmem:[%s10187_s14 + $0x4150] sm:$0xff]  ;;  %v4833_v24 = vpack.c.bf16 %v9471_v18, %v12268_v40  ;;  %v9474_v25 = vld [vmem:[%s10187_s14 + $0x3118] sm:$0xff]  ;;  %9467 = vst [vmem:[%s10210_s18 + $0x488] sm:$0xff] %v4817_v22 }
 0x17a   : > { %v12355_v20 = vld [vmem:[%s10187_s14 + $0x2950] sm:$0xff]  ;;  %v9477_v26 = vld [vmem:[%s10187_s14 + $0x1918] sm:$0xff]  ;;  %v4841_v31 = vpack.c.bf16 %v9474_v25, %v12280_v47  ;;  %9470 = vst [vmem:[%s10210_s18 + $0x1088] sm:$0xff] %v4825_v23 }
 0x17b   : > { %v12358_v21 = vld [vmem:[%s10187_s14 + $0x1150] sm:$0xff]  ;;  %v9480_v27 = vld [vmem:[%s10187_s14 + $0x118] sm:$0xff]  ;;  %v4849_v32 = vpack.c.bf16 %v9477_v26, %v12283_v48  ;;  %9473 = vst [vmem:[%s10210_s18 + $0x1c88] sm:$0xff] %v4833_v24 }
 0x17c   : > { %v12370_v28 = vld [vmem:[%s10187_s14 + $0x3950] sm:$0xff]  ;;  %v4857_v33 = vpack.c.bf16 %v9480_v27, %v12286_v49  ;;  %v9483_v34 = vld [vmem:[%s10187_s14 + $0x4138] sm:$0xff]  ;;  %9476 = vst [vmem:[%s10210_s18 + $0x888] sm:$0xff] %v4841_v31 }
 0x17d   : > { %v12373_v29 = vld [vmem:[%s10187_s14 + $0x2150] sm:$0xff]  ;;  %v9486_v35 = vld [vmem:[%s10187_s14 + $0x2938] sm:$0xff]  ;;  %v4865_v40 = vpack.c.bf16 %v9483_v34, %v12298_v56  ;;  %9479 = vst [vmem:[%s10210_s18 + $0x1488] sm:$0xff] %v4849_v32 }
 0x17e   : > { %v12376_v30 = vld [vmem:[%s10187_s14 + $0x950] sm:$0xff]  ;;  %v9489_v36 = vld [vmem:[%s10187_s14 + $0x1138] sm:$0xff]  ;;  %v4873_v41 = vpack.c.bf16 %v9486_v35, %v12301_v57  ;;  %9482 = vst [vmem:[%s10210_s18 + $0x2088] sm:$0xff] %v4857_v33 }
 0x17f   : > { %v12388_v37 = vld [vmem:[%s10187_s14 + $0x3150] sm:$0xff]  ;;  %v4881_v42 = vpack.c.bf16 %v9489_v36, %v12304_v58  ;;  %v9492_v43 = vld [vmem:[%s10187_s14 + $0x3938] sm:$0xff]  ;;  %9485 = vst [vmem:[%s10210_s18 + $0x98] sm:$0xff] %v4865_v40 }
 0x180   : > { %v12391_v38 = vld [vmem:[%s10187_s14 + $0x1950] sm:$0xff]  ;;  %v9495_v44 = vld [vmem:[%s10187_s14 + $0x2138] sm:$0xff]  ;;  %v4889_v49 = vpack.c.bf16 %v9492_v43, %v12316_v1  ;;  %9488 = vst [vmem:[%s10210_s18 + $0xc98] sm:$0xff] %v4873_v41 }
 0x181   : > { %v12394_v39 = vld [vmem:[%s10187_s14 + $0x150] sm:$0xff]  ;;  %v9498_v45 = vld [vmem:[%s10187_s14 + $0x938] sm:$0xff]  ;;  %v4897_v50 = vpack.c.bf16 %v9495_v44, %v12319_v2  ;;  %9491 = vst [vmem:[%s10210_s18 + $0x1898] sm:$0xff] %v4881_v42 }
 0x182   : > { %v12406_v46 = vld [vmem:[%s10187_s14 + $0x4170] sm:$0xff]  ;;  %v4905_v51 = vpack.c.bf16 %v9498_v45, %v12322_v3  ;;  %v9501_v52 = vld [vmem:[%s10187_s14 + $0x3138] sm:$0xff]  ;;  %9494 = vst [vmem:[%s10210_s18 + $0x498] sm:$0xff] %v4889_v49 }
 0x183   : > { %v12409_v47 = vld [vmem:[%s10187_s14 + $0x2970] sm:$0xff]  ;;  %v9504_v53 = vld [vmem:[%s10187_s14 + $0x1938] sm:$0xff]  ;;  %v4913_v58 = vpack.c.bf16 %v9501_v52, %v12334_v10  ;;  %9497 = vst [vmem:[%s10210_s18 + $0x1098] sm:$0xff] %v4897_v50 }
 0x184   : > { %v12412_v48 = vld [vmem:[%s10187_s14 + $0x1170] sm:$0xff]  ;;  %v9507_v54 = vld [vmem:[%s10187_s14 + $0x138] sm:$0xff]  ;;  %v4921_v59 = vpack.c.bf16 %v9504_v53, %v12337_v11  ;;  %9500 = vst [vmem:[%s10210_s18 + $0x1c98] sm:$0xff] %v4905_v51 }
 0x185   : > { %v12424_v55 = vld [vmem:[%s10187_s14 + $0x3970] sm:$0xff]  ;;  %v4929_v60 = vpack.c.bf16 %v9507_v54, %v12340_v12  ;;  %v9510_v61 = vld [vmem:[%s10187_s14 + $0x4158] sm:$0xff]  ;;  %9503 = vst [vmem:[%s10210_s18 + $0x898] sm:$0xff] %v4913_v58 }
 0x186   : > { %v12427_v56 = vld [vmem:[%s10187_s14 + $0x2170] sm:$0xff]  ;;  %v9513_v62 = vld [vmem:[%s10187_s14 + $0x2958] sm:$0xff]  ;;  %v4937_v3 = vpack.c.bf16 %v9510_v61, %v12352_v19  ;;  %9506 = vst [vmem:[%s10210_s18 + $0x1498] sm:$0xff] %v4921_v59 }
 0x187   : > { %v12430_v57 = vld [vmem:[%s10187_s14 + $0x970] sm:$0xff]  ;;  %v9516_v63 = vld [vmem:[%s10187_s14 + $0x1158] sm:$0xff]  ;;  %v4945_v4 = vpack.c.bf16 %v9513_v62, %v12355_v20  ;;  %9509 = vst [vmem:[%s10210_s18 + $0x2098] sm:$0xff] %v4929_v60 }
 0x188   : > { %v12442_v0 = vld [vmem:[%s10187_s14 + $0x3170] sm:$0xff]  ;;  %v4953_v5 = vpack.c.bf16 %v9516_v63, %v12358_v21  ;;  %v9519_v6 = vld [vmem:[%s10187_s14 + $0x3958] sm:$0xff]  ;;  %9512 = vst [vmem:[%s10210_s18 + $0xa8] sm:$0xff] %v4937_v3 }
 0x189   : > { %v12445_v1 = vld [vmem:[%s10187_s14 + $0x1970] sm:$0xff]  ;;  %v9522_v7 = vld [vmem:[%s10187_s14 + $0x2158] sm:$0xff]  ;;  %v4961_v12 = vpack.c.bf16 %v9519_v6, %v12370_v28  ;;  %9515 = vst [vmem:[%s10210_s18 + $0xca8] sm:$0xff] %v4945_v4 }
 0x18a   : > { %v12448_v2 = vld [vmem:[%s10187_s14 + $0x170] sm:$0xff]  ;;  %v9525_v8 = vld [vmem:[%s10187_s14 + $0x958] sm:$0xff]  ;;  %v4969_v13 = vpack.c.bf16 %v9522_v7, %v12373_v29  ;;  %9518 = vst [vmem:[%s10210_s18 + $0x18a8] sm:$0xff] %v4953_v5 }
 0x18b   : > { %v12460_v9 = vld [vmem:[%s10187_s14 + $0x4190] sm:$0xff]  ;;  %v4977_v14 = vpack.c.bf16 %v9525_v8, %v12376_v30  ;;  %v9528_v15 = vld [vmem:[%s10187_s14 + $0x3158] sm:$0xff]  ;;  %9521 = vst [vmem:[%s10210_s18 + $0x4a8] sm:$0xff] %v4961_v12 }
 0x18c   : > { %v12463_v10 = vld [vmem:[%s10187_s14 + $0x2990] sm:$0xff]  ;;  %v9531_v16 = vld [vmem:[%s10187_s14 + $0x1958] sm:$0xff]  ;;  %v4985_v21 = vpack.c.bf16 %v9528_v15, %v12388_v37  ;;  %9524 = vst [vmem:[%s10210_s18 + $0x10a8] sm:$0xff] %v4969_v13 }
 0x18d   : > { %v12466_v11 = vld [vmem:[%s10187_s14 + $0x1190] sm:$0xff]  ;;  %v9534_v17 = vld [vmem:[%s10187_s14 + $0x158] sm:$0xff]  ;;  %v4993_v22 = vpack.c.bf16 %v9531_v16, %v12391_v38  ;;  %9527 = vst [vmem:[%s10210_s18 + $0x1ca8] sm:$0xff] %v4977_v14 }
 0x18e   : > { %v12478_v18 = vld [vmem:[%s10187_s14 + $0x3990] sm:$0xff]  ;;  %v5001_v23 = vpack.c.bf16 %v9534_v17, %v12394_v39  ;;  %v9537_v24 = vld [vmem:[%s10187_s14 + $0x4178] sm:$0xff]  ;;  %9530 = vst [vmem:[%s10210_s18 + $0x8a8] sm:$0xff] %v4985_v21 }
 0x18f   : > { %v12481_v19 = vld [vmem:[%s10187_s14 + $0x2190] sm:$0xff]  ;;  %v9540_v25 = vld [vmem:[%s10187_s14 + $0x2978] sm:$0xff]  ;;  %v5009_v30 = vpack.c.bf16 %v9537_v24, %v12406_v46  ;;  %9533 = vst [vmem:[%s10210_s18 + $0x14a8] sm:$0xff] %v4993_v22 }
 0x190   : > { %v12484_v20 = vld [vmem:[%s10187_s14 + $0x990] sm:$0xff]  ;;  %v9543_v26 = vld [vmem:[%s10187_s14 + $0x1178] sm:$0xff]  ;;  %v5017_v31 = vpack.c.bf16 %v9540_v25, %v12409_v47  ;;  %9536 = vst [vmem:[%s10210_s18 + $0x20a8] sm:$0xff] %v5001_v23 }
 0x191   : > { %v12496_v27 = vld [vmem:[%s10187_s14 + $0x3190] sm:$0xff]  ;;  %v5025_v32 = vpack.c.bf16 %v9543_v26, %v12412_v48  ;;  %v9546_v33 = vld [vmem:[%s10187_s14 + $0x3978] sm:$0xff]  ;;  %9539 = vst [vmem:[%s10210_s18 + $0xb8] sm:$0xff] %v5009_v30 }
 0x192   : > { %v12499_v28 = vld [vmem:[%s10187_s14 + $0x1990] sm:$0xff]  ;;  %v9549_v34 = vld [vmem:[%s10187_s14 + $0x2178] sm:$0xff]  ;;  %v5033_v39 = vpack.c.bf16 %v9546_v33, %v12424_v55  ;;  %9542 = vst [vmem:[%s10210_s18 + $0xcb8] sm:$0xff] %v5017_v31 }
 0x193   : > { %v12502_v29 = vld [vmem:[%s10187_s14 + $0x190] sm:$0xff]  ;;  %v9552_v35 = vld [vmem:[%s10187_s14 + $0x978] sm:$0xff]  ;;  %v5041_v40 = vpack.c.bf16 %v9549_v34, %v12427_v56  ;;  %9545 = vst [vmem:[%s10210_s18 + $0x18b8] sm:$0xff] %v5025_v32 }
 0x194   : > { %v12514_v36 = vld [vmem:[%s10187_s14 + $0x41b0] sm:$0xff]  ;;  %v5049_v41 = vpack.c.bf16 %v9552_v35, %v12430_v57  ;;  %v9555_v42 = vld [vmem:[%s10187_s14 + $0x3178] sm:$0xff]  ;;  %9548 = vst [vmem:[%s10210_s18 + $0x4b8] sm:$0xff] %v5033_v39 }
 0x195   : > { %v12517_v37 = vld [vmem:[%s10187_s14 + $0x29b0] sm:$0xff]  ;;  %v9558_v43 = vld [vmem:[%s10187_s14 + $0x1978] sm:$0xff]  ;;  %v5057_v48 = vpack.c.bf16 %v9555_v42, %v12442_v0  ;;  %9551 = vst [vmem:[%s10210_s18 + $0x10b8] sm:$0xff] %v5041_v40 }
 0x196   : > { %v12520_v38 = vld [vmem:[%s10187_s14 + $0x11b0] sm:$0xff]  ;;  %v9561_v44 = vld [vmem:[%s10187_s14 + $0x178] sm:$0xff]  ;;  %v5065_v49 = vpack.c.bf16 %v9558_v43, %v12445_v1  ;;  %9554 = vst [vmem:[%s10210_s18 + $0x1cb8] sm:$0xff] %v5049_v41 }
 0x197   : > { %v12532_v45 = vld [vmem:[%s10187_s14 + $0x39b0] sm:$0xff]  ;;  %v5073_v50 = vpack.c.bf16 %v9561_v44, %v12448_v2  ;;  %v9564_v51 = vld [vmem:[%s10187_s14 + $0x4198] sm:$0xff]  ;;  %9557 = vst [vmem:[%s10210_s18 + $0x8b8] sm:$0xff] %v5057_v48 }
 0x198   : > { %v12535_v46 = vld [vmem:[%s10187_s14 + $0x21b0] sm:$0xff]  ;;  %v9567_v52 = vld [vmem:[%s10187_s14 + $0x2998] sm:$0xff]  ;;  %v5081_v57 = vpack.c.bf16 %v9564_v51, %v12460_v9  ;;  %9560 = vst [vmem:[%s10210_s18 + $0x14b8] sm:$0xff] %v5065_v49 }
 0x199   : > { %v12538_v47 = vld [vmem:[%s10187_s14 + $0x9b0] sm:$0xff]  ;;  %v9570_v53 = vld [vmem:[%s10187_s14 + $0x1198] sm:$0xff]  ;;  %v5089_v58 = vpack.c.bf16 %v9567_v52, %v12463_v10  ;;  %9563 = vst [vmem:[%s10210_s18 + $0x20b8] sm:$0xff] %v5073_v50 }
 0x19a   : > { %v12550_v54 = vld [vmem:[%s10187_s14 + $0x31b0] sm:$0xff]  ;;  %v5097_v59 = vpack.c.bf16 %v9570_v53, %v12466_v11  ;;  %v9573_v60 = vld [vmem:[%s10187_s14 + $0x3998] sm:$0xff]  ;;  %9566 = vst [vmem:[%s10210_s18 + $0xc8] sm:$0xff] %v5081_v57 }
 0x19b   : > { %v12553_v55 = vld [vmem:[%s10187_s14 + $0x19b0] sm:$0xff]  ;;  %v9576_v61 = vld [vmem:[%s10187_s14 + $0x2198] sm:$0xff]  ;;  %v5105_v2 = vpack.c.bf16 %v9573_v60, %v12478_v18  ;;  %9569 = vst [vmem:[%s10210_s18 + $0xcc8] sm:$0xff] %v5089_v58 }
 0x19c   : > { %v12556_v56 = vld [vmem:[%s10187_s14 + $0x1b0] sm:$0xff]  ;;  %v9579_v62 = vld [vmem:[%s10187_s14 + $0x998] sm:$0xff]  ;;  %v5113_v3 = vpack.c.bf16 %v9576_v61, %v12481_v19  ;;  %9572 = vst [vmem:[%s10210_s18 + $0x18c8] sm:$0xff] %v5097_v59 }
 0x19d   : > { %v12568_v63 = vld [vmem:[%s10187_s14 + $0x41d0] sm:$0xff]  ;;  %v5121_v4 = vpack.c.bf16 %v9579_v62, %v12484_v20  ;;  %v9582_v5 = vld [vmem:[%s10187_s14 + $0x3198] sm:$0xff]  ;;  %9575 = vst [vmem:[%s10210_s18 + $0x4c8] sm:$0xff] %v5105_v2 }
 0x19e   : > { %v12571_v0 = vld [vmem:[%s10187_s14 + $0x29d0] sm:$0xff]  ;;  %v9585_v6 = vld [vmem:[%s10187_s14 + $0x1998] sm:$0xff]  ;;  %v5129_v11 = vpack.c.bf16 %v9582_v5, %v12496_v27  ;;  %9578 = vst [vmem:[%s10210_s18 + $0x10c8] sm:$0xff] %v5113_v3 }
 0x19f   : > { %v12574_v1 = vld [vmem:[%s10187_s14 + $0x11d0] sm:$0xff]  ;;  %v9588_v7 = vld [vmem:[%s10187_s14 + $0x198] sm:$0xff]  ;;  %v5137_v12 = vpack.c.bf16 %v9585_v6, %v12499_v28  ;;  %9581 = vst [vmem:[%s10210_s18 + $0x1cc8] sm:$0xff] %v5121_v4 }
 0x1a0   : > { %v12586_v8 = vld [vmem:[%s10187_s14 + $0x39d0] sm:$0xff]  ;;  %v5145_v13 = vpack.c.bf16 %v9588_v7, %v12502_v29  ;;  %v9591_v14 = vld [vmem:[%s10187_s14 + $0x41b8] sm:$0xff]  ;;  %9584 = vst [vmem:[%s10210_s18 + $0x8c8] sm:$0xff] %v5129_v11 }
 0x1a1   : > { %v12589_v9 = vld [vmem:[%s10187_s14 + $0x21d0] sm:$0xff]  ;;  %v9594_v15 = vld [vmem:[%s10187_s14 + $0x29b8] sm:$0xff]  ;;  %v5153_v20 = vpack.c.bf16 %v9591_v14, %v12514_v36  ;;  %9587 = vst [vmem:[%s10210_s18 + $0x14c8] sm:$0xff] %v5137_v12 }
 0x1a2   : > { %v12592_v10 = vld [vmem:[%s10187_s14 + $0x9d0] sm:$0xff]  ;;  %v9597_v16 = vld [vmem:[%s10187_s14 + $0x11b8] sm:$0xff]  ;;  %v5161_v21 = vpack.c.bf16 %v9594_v15, %v12517_v37  ;;  %9590 = vst [vmem:[%s10210_s18 + $0x20c8] sm:$0xff] %v5145_v13 }
 0x1a3   : > { %v12604_v17 = vld [vmem:[%s10187_s14 + $0x31d0] sm:$0xff]  ;;  %v5169_v22 = vpack.c.bf16 %v9597_v16, %v12520_v38  ;;  %v9600_v23 = vld [vmem:[%s10187_s14 + $0x39b8] sm:$0xff]  ;;  %9593 = vst [vmem:[%s10210_s18 + $0xd8] sm:$0xff] %v5153_v20 }
 0x1a4   : > { %v12607_v18 = vld [vmem:[%s10187_s14 + $0x19d0] sm:$0xff]  ;;  %v9603_v24 = vld [vmem:[%s10187_s14 + $0x21b8] sm:$0xff]  ;;  %v5177_v29 = vpack.c.bf16 %v9600_v23, %v12532_v45  ;;  %9596 = vst [vmem:[%s10210_s18 + $0xcd8] sm:$0xff] %v5161_v21 }
 0x1a5   : > { %v12610_v19 = vld [vmem:[%s10187_s14 + $0x1d0] sm:$0xff]  ;;  %v9606_v25 = vld [vmem:[%s10187_s14 + $0x9b8] sm:$0xff]  ;;  %v5185_v30 = vpack.c.bf16 %v9603_v24, %v12535_v46  ;;  %9599 = vst [vmem:[%s10210_s18 + $0x18d8] sm:$0xff] %v5169_v22 }
 0x1a6   : > { %v12622_v26 = vld [vmem:[%s10187_s14 + $0x41f0] sm:$0xff]  ;;  %v5193_v31 = vpack.c.bf16 %v9606_v25, %v12538_v47  ;;  %v9609_v32 = vld [vmem:[%s10187_s14 + $0x31b8] sm:$0xff]  ;;  %9602 = vst [vmem:[%s10210_s18 + $0x4d8] sm:$0xff] %v5177_v29 }
 0x1a7   : > { %v12625_v27 = vld [vmem:[%s10187_s14 + $0x29f0] sm:$0xff]  ;;  %v9612_v33 = vld [vmem:[%s10187_s14 + $0x19b8] sm:$0xff]  ;;  %v5201_v38 = vpack.c.bf16 %v9609_v32, %v12550_v54  ;;  %9605 = vst [vmem:[%s10210_s18 + $0x10d8] sm:$0xff] %v5185_v30 }
 0x1a8   : > { %v12628_v28 = vld [vmem:[%s10187_s14 + $0x11f0] sm:$0xff]  ;;  %v9615_v34 = vld [vmem:[%s10187_s14 + $0x1b8] sm:$0xff]  ;;  %v5209_v39 = vpack.c.bf16 %v9612_v33, %v12553_v55  ;;  %9608 = vst [vmem:[%s10210_s18 + $0x1cd8] sm:$0xff] %v5193_v31 }
 0x1a9   : > { %v12640_v35 = vld [vmem:[%s10187_s14 + $0x39f0] sm:$0xff]  ;;  %v5217_v40 = vpack.c.bf16 %v9615_v34, %v12556_v56  ;;  %v9618_v41 = vld [vmem:[%s10187_s14 + $0x41d8] sm:$0xff]  ;;  %9611 = vst [vmem:[%s10210_s18 + $0x8d8] sm:$0xff] %v5201_v38 }
 0x1aa   : > { %v12643_v36 = vld [vmem:[%s10187_s14 + $0x21f0] sm:$0xff]  ;;  %v9621_v42 = vld [vmem:[%s10187_s14 + $0x29d8] sm:$0xff]  ;;  %v5225_v47 = vpack.c.bf16 %v9618_v41, %v12568_v63  ;;  %9614 = vst [vmem:[%s10210_s18 + $0x14d8] sm:$0xff] %v5209_v39 }
 0x1ab   : > { %v12646_v37 = vld [vmem:[%s10187_s14 + $0x9f0] sm:$0xff]  ;;  %v9624_v43 = vld [vmem:[%s10187_s14 + $0x11d8] sm:$0xff]  ;;  %v5233_v48 = vpack.c.bf16 %v9621_v42, %v12571_v0  ;;  %9617 = vst [vmem:[%s10210_s18 + $0x20d8] sm:$0xff] %v5217_v40 }
 0x1ac   : > { %v12658_v44 = vld [vmem:[%s10187_s14 + $0x31f0] sm:$0xff]  ;;  %v5241_v49 = vpack.c.bf16 %v9624_v43, %v12574_v1  ;;  %v9627_v50 = vld [vmem:[%s10187_s14 + $0x39d8] sm:$0xff]  ;;  %9620 = vst [vmem:[%s10210_s18 + $0xe8] sm:$0xff] %v5225_v47 }
 0x1ad   : > { %v12661_v45 = vld [vmem:[%s10187_s14 + $0x19f0] sm:$0xff]  ;;  %v9630_v51 = vld [vmem:[%s10187_s14 + $0x21d8] sm:$0xff]  ;;  %v5249_v56 = vpack.c.bf16 %v9627_v50, %v12586_v8  ;;  %9623 = vst [vmem:[%s10210_s18 + $0xce8] sm:$0xff] %v5233_v48 }
 0x1ae   : > { %v12664_v46 = vld [vmem:[%s10187_s14 + $0x1f0] sm:$0xff]  ;;  %v9633_v52 = vld [vmem:[%s10187_s14 + $0x9d8] sm:$0xff]  ;;  %v5257_v57 = vpack.c.bf16 %v9630_v51, %v12589_v9  ;;  %9626 = vst [vmem:[%s10210_s18 + $0x18e8] sm:$0xff] %v5241_v49 }
 0x1af   : > { %v12676_v53 = vld [vmem:[%s10187_s14 + $0x4210] sm:$0xff]  ;;  %v5265_v58 = vpack.c.bf16 %v9633_v52, %v12592_v10  ;;  %v9636_v59 = vld [vmem:[%s10187_s14 + $0x31d8] sm:$0xff]  ;;  %9629 = vst [vmem:[%s10210_s18 + $0x4e8] sm:$0xff] %v5249_v56 }
 0x1b0   : > { %v12679_v54 = vld [vmem:[%s10187_s14 + $0x2a10] sm:$0xff]  ;;  %v9639_v60 = vld [vmem:[%s10187_s14 + $0x19d8] sm:$0xff]  ;;  %v5273_v1 = vpack.c.bf16 %v9636_v59, %v12604_v17  ;;  %9632 = vst [vmem:[%s10210_s18 + $0x10e8] sm:$0xff] %v5257_v57 }
 0x1b1   : > { %v12682_v55 = vld [vmem:[%s10187_s14 + $0x1210] sm:$0xff]  ;;  %v9642_v61 = vld [vmem:[%s10187_s14 + $0x1d8] sm:$0xff]  ;;  %v5281_v2 = vpack.c.bf16 %v9639_v60, %v12607_v18  ;;  %9635 = vst [vmem:[%s10210_s18 + $0x1ce8] sm:$0xff] %v5265_v58 }
 0x1b2   : > { %v12694_v62 = vld [vmem:[%s10187_s14 + $0x3a10] sm:$0xff]  ;;  %v5289_v3 = vpack.c.bf16 %v9642_v61, %v12610_v19  ;;  %v9645_v4 = vld [vmem:[%s10187_s14 + $0x41f8] sm:$0xff]  ;;  %9638 = vst [vmem:[%s10210_s18 + $0x8e8] sm:$0xff] %v5273_v1 }
 0x1b3   : > { %v12697_v63 = vld [vmem:[%s10187_s14 + $0x2210] sm:$0xff]  ;;  %v9648_v5 = vld [vmem:[%s10187_s14 + $0x29f8] sm:$0xff]  ;;  %v5297_v10 = vpack.c.bf16 %v9645_v4, %v12622_v26  ;;  %9641 = vst [vmem:[%s10210_s18 + $0x14e8] sm:$0xff] %v5281_v2 }
 0x1b4   : > { %v12700_v0 = vld [vmem:[%s10187_s14 + $0xa10] sm:$0xff]  ;;  %v9651_v6 = vld [vmem:[%s10187_s14 + $0x11f8] sm:$0xff]  ;;  %v5305_v11 = vpack.c.bf16 %v9648_v5, %v12625_v27  ;;  %9644 = vst [vmem:[%s10210_s18 + $0x20e8] sm:$0xff] %v5289_v3 }
 0x1b5   : > { %v12712_v7 = vld [vmem:[%s10187_s14 + $0x3210] sm:$0xff]  ;;  %v5313_v12 = vpack.c.bf16 %v9651_v6, %v12628_v28  ;;  %v9654_v13 = vld [vmem:[%s10187_s14 + $0x39f8] sm:$0xff]  ;;  %9647 = vst [vmem:[%s10210_s18 + $0xf8] sm:$0xff] %v5297_v10 }
 0x1b6   : > { %v12715_v8 = vld [vmem:[%s10187_s14 + $0x1a10] sm:$0xff]  ;;  %v9657_v14 = vld [vmem:[%s10187_s14 + $0x21f8] sm:$0xff]  ;;  %v5321_v19 = vpack.c.bf16 %v9654_v13, %v12640_v35  ;;  %9650 = vst [vmem:[%s10210_s18 + $0xcf8] sm:$0xff] %v5305_v11 }
 0x1b7   : > { %v12718_v9 = vld [vmem:[%s10187_s14 + $0x210] sm:$0xff]  ;;  %v9660_v15 = vld [vmem:[%s10187_s14 + $0x9f8] sm:$0xff]  ;;  %v5329_v20 = vpack.c.bf16 %v9657_v14, %v12643_v36  ;;  %9653 = vst [vmem:[%s10210_s18 + $0x18f8] sm:$0xff] %v5313_v12 }
 0x1b8   : > { %v12730_v16 = vld [vmem:[%s10187_s14 + $0x4230] sm:$0xff]  ;;  %v5337_v21 = vpack.c.bf16 %v9660_v15, %v12646_v37  ;;  %v9663_v22 = vld [vmem:[%s10187_s14 + $0x31f8] sm:$0xff]  ;;  %9656 = vst [vmem:[%s10210_s18 + $0x4f8] sm:$0xff] %v5321_v19 }
 0x1b9   : > { %v12733_v17 = vld [vmem:[%s10187_s14 + $0x2a30] sm:$0xff]  ;;  %v9666_v23 = vld [vmem:[%s10187_s14 + $0x19f8] sm:$0xff]  ;;  %v5345_v28 = vpack.c.bf16 %v9663_v22, %v12658_v44  ;;  %9659 = vst [vmem:[%s10210_s18 + $0x10f8] sm:$0xff] %v5329_v20 }
 0x1ba   : > { %v12736_v18 = vld [vmem:[%s10187_s14 + $0x1230] sm:$0xff]  ;;  %v9669_v24 = vld [vmem:[%s10187_s14 + $0x1f8] sm:$0xff]  ;;  %v5353_v29 = vpack.c.bf16 %v9666_v23, %v12661_v45  ;;  %9662 = vst [vmem:[%s10210_s18 + $0x1cf8] sm:$0xff] %v5337_v21 }
 0x1bb   : > { %v12748_v25 = vld [vmem:[%s10187_s14 + $0x3a30] sm:$0xff]  ;;  %v5361_v30 = vpack.c.bf16 %v9669_v24, %v12664_v46  ;;  %v9672_v31 = vld [vmem:[%s10187_s14 + $0x4218] sm:$0xff]  ;;  %9665 = vst [vmem:[%s10210_s18 + $0x8f8] sm:$0xff] %v5345_v28 }
 0x1bc   : > { %v12751_v26 = vld [vmem:[%s10187_s14 + $0x2230] sm:$0xff]  ;;  %v9675_v32 = vld [vmem:[%s10187_s14 + $0x2a18] sm:$0xff]  ;;  %v5369_v37 = vpack.c.bf16 %v9672_v31, %v12676_v53  ;;  %9668 = vst [vmem:[%s10210_s18 + $0x14f8] sm:$0xff] %v5353_v29 }
 0x1bd   : > { %v12754_v27 = vld [vmem:[%s10187_s14 + $0xa30] sm:$0xff]  ;;  %v9678_v33 = vld [vmem:[%s10187_s14 + $0x1218] sm:$0xff]  ;;  %v5377_v38 = vpack.c.bf16 %v9675_v32, %v12679_v54  ;;  %9671 = vst [vmem:[%s10210_s18 + $0x20f8] sm:$0xff] %v5361_v30 }
 0x1be   : > { %v12766_v34 = vld [vmem:[%s10187_s14 + $0x3230] sm:$0xff]  ;;  %v5385_v39 = vpack.c.bf16 %v9678_v33, %v12682_v55  ;;  %v9681_v40 = vld [vmem:[%s10187_s14 + $0x3a18] sm:$0xff]  ;;  %9674 = vst [vmem:[%s10210_s18 + $0x108] sm:$0xff] %v5369_v37 }
 0x1bf   : > { %v12769_v35 = vld [vmem:[%s10187_s14 + $0x1a30] sm:$0xff]  ;;  %v9684_v41 = vld [vmem:[%s10187_s14 + $0x2218] sm:$0xff]  ;;  %v5393_v46 = vpack.c.bf16 %v9681_v40, %v12694_v62  ;;  %9677 = vst [vmem:[%s10210_s18 + $0xd08] sm:$0xff] %v5377_v38 }
 0x1c0   : > { %v12772_v36 = vld [vmem:[%s10187_s14 + $0x230] sm:$0xff]  ;;  %v9687_v42 = vld [vmem:[%s10187_s14 + $0xa18] sm:$0xff]  ;;  %v5401_v47 = vpack.c.bf16 %v9684_v41, %v12697_v63  ;;  %9680 = vst [vmem:[%s10210_s18 + $0x1908] sm:$0xff] %v5385_v39 }
 0x1c1   : > { %v12784_v43 = vld [vmem:[%s10187_s14 + $0x4250] sm:$0xff]  ;;  %v5409_v48 = vpack.c.bf16 %v9687_v42, %v12700_v0  ;;  %v9690_v49 = vld [vmem:[%s10187_s14 + $0x3218] sm:$0xff]  ;;  %9683 = vst [vmem:[%s10210_s18 + $0x508] sm:$0xff] %v5393_v46 }
 0x1c2   : > { %v12787_v44 = vld [vmem:[%s10187_s14 + $0x2a50] sm:$0xff]  ;;  %v9693_v50 = vld [vmem:[%s10187_s14 + $0x1a18] sm:$0xff]  ;;  %v5417_v55 = vpack.c.bf16 %v9690_v49, %v12712_v7  ;;  %9686 = vst [vmem:[%s10210_s18 + $0x1108] sm:$0xff] %v5401_v47 }
 0x1c3   : > { %v12790_v45 = vld [vmem:[%s10187_s14 + $0x1250] sm:$0xff]  ;;  %v9696_v51 = vld [vmem:[%s10187_s14 + $0x218] sm:$0xff]  ;;  %v5425_v56 = vpack.c.bf16 %v9693_v50, %v12715_v8  ;;  %9689 = vst [vmem:[%s10210_s18 + $0x1d08] sm:$0xff] %v5409_v48 }
 0x1c4   : > { %v12802_v52 = vld [vmem:[%s10187_s14 + $0x3a50] sm:$0xff]  ;;  %v5433_v57 = vpack.c.bf16 %v9696_v51, %v12718_v9  ;;  %v9699_v58 = vld [vmem:[%s10187_s14 + $0x4238] sm:$0xff]  ;;  %9692 = vst [vmem:[%s10210_s18 + $0x908] sm:$0xff] %v5417_v55 }
 0x1c5   : > { %v12805_v53 = vld [vmem:[%s10187_s14 + $0x2250] sm:$0xff]  ;;  %v9702_v59 = vld [vmem:[%s10187_s14 + $0x2a38] sm:$0xff]  ;;  %v5441_v0 = vpack.c.bf16 %v9699_v58, %v12730_v16  ;;  %9695 = vst [vmem:[%s10210_s18 + $0x1508] sm:$0xff] %v5425_v56 }
 0x1c6   : > { %v12808_v54 = vld [vmem:[%s10187_s14 + $0xa50] sm:$0xff]  ;;  %v9705_v60 = vld [vmem:[%s10187_s14 + $0x1238] sm:$0xff]  ;;  %v5449_v1 = vpack.c.bf16 %v9702_v59, %v12733_v17  ;;  %9698 = vst [vmem:[%s10210_s18 + $0x2108] sm:$0xff] %v5433_v57 }
 0x1c7   : > { %v12820_v61 = vld [vmem:[%s10187_s14 + $0x3250] sm:$0xff]  ;;  %v5457_v2 = vpack.c.bf16 %v9705_v60, %v12736_v18  ;;  %v9708_v3 = vld [vmem:[%s10187_s14 + $0x3a38] sm:$0xff]  ;;  %9701 = vst [vmem:[%s10210_s18 + $0x118] sm:$0xff] %v5441_v0 }
 0x1c8   : > { %v12823_v62 = vld [vmem:[%s10187_s14 + $0x1a50] sm:$0xff]  ;;  %v9711_v4 = vld [vmem:[%s10187_s14 + $0x2238] sm:$0xff]  ;;  %v5465_v9 = vpack.c.bf16 %v9708_v3, %v12748_v25  ;;  %9704 = vst [vmem:[%s10210_s18 + $0xd18] sm:$0xff] %v5449_v1 }
 0x1c9   : > { %v12826_v63 = vld [vmem:[%s10187_s14 + $0x250] sm:$0xff]  ;;  %v9714_v5 = vld [vmem:[%s10187_s14 + $0xa38] sm:$0xff]  ;;  %v5473_v10 = vpack.c.bf16 %v9711_v4, %v12751_v26  ;;  %9707 = vst [vmem:[%s10210_s18 + $0x1918] sm:$0xff] %v5457_v2 }
 0x1ca   : > { %v12838_v6 = vld [vmem:[%s10187_s14 + $0x4270] sm:$0xff]  ;;  %v5481_v11 = vpack.c.bf16 %v9714_v5, %v12754_v27  ;;  %v9717_v12 = vld [vmem:[%s10187_s14 + $0x3238] sm:$0xff]  ;;  %9710 = vst [vmem:[%s10210_s18 + $0x518] sm:$0xff] %v5465_v9 }
 0x1cb   : > { %v12841_v7 = vld [vmem:[%s10187_s14 + $0x2a70] sm:$0xff]  ;;  %v9720_v13 = vld [vmem:[%s10187_s14 + $0x1a38] sm:$0xff]  ;;  %v5489_v18 = vpack.c.bf16 %v9717_v12, %v12766_v34  ;;  %9713 = vst [vmem:[%s10210_s18 + $0x1118] sm:$0xff] %v5473_v10 }
 0x1cc   : > { %v12844_v8 = vld [vmem:[%s10187_s14 + $0x1270] sm:$0xff]  ;;  %v9723_v14 = vld [vmem:[%s10187_s14 + $0x238] sm:$0xff]  ;;  %v5497_v19 = vpack.c.bf16 %v9720_v13, %v12769_v35  ;;  %9716 = vst [vmem:[%s10210_s18 + $0x1d18] sm:$0xff] %v5481_v11 }
 0x1cd   : > { %v12856_v15 = vld [vmem:[%s10187_s14 + $0x3a70] sm:$0xff]  ;;  %v5505_v20 = vpack.c.bf16 %v9723_v14, %v12772_v36  ;;  %v9726_v21 = vld [vmem:[%s10187_s14 + $0x4258] sm:$0xff]  ;;  %9719 = vst [vmem:[%s10210_s18 + $0x918] sm:$0xff] %v5489_v18 }
 0x1ce   : > { %v12859_v16 = vld [vmem:[%s10187_s14 + $0x2270] sm:$0xff]  ;;  %v9729_v22 = vld [vmem:[%s10187_s14 + $0x2a58] sm:$0xff]  ;;  %v5513_v27 = vpack.c.bf16 %v9726_v21, %v12784_v43  ;;  %9722 = vst [vmem:[%s10210_s18 + $0x1518] sm:$0xff] %v5497_v19 }
 0x1cf   : > { %v12862_v17 = vld [vmem:[%s10187_s14 + $0xa70] sm:$0xff]  ;;  %v9732_v23 = vld [vmem:[%s10187_s14 + $0x1258] sm:$0xff]  ;;  %v5521_v28 = vpack.c.bf16 %v9729_v22, %v12787_v44  ;;  %9725 = vst [vmem:[%s10210_s18 + $0x2118] sm:$0xff] %v5505_v20 }
 0x1d0   : > { %v12874_v24 = vld [vmem:[%s10187_s14 + $0x3270] sm:$0xff]  ;;  %v5529_v29 = vpack.c.bf16 %v9732_v23, %v12790_v45  ;;  %v9735_v30 = vld [vmem:[%s10187_s14 + $0x3a58] sm:$0xff]  ;;  %9728 = vst [vmem:[%s10210_s18 + $0x128] sm:$0xff] %v5513_v27 }
 0x1d1   : > { %v12877_v25 = vld [vmem:[%s10187_s14 + $0x1a70] sm:$0xff]  ;;  %v9738_v31 = vld [vmem:[%s10187_s14 + $0x2258] sm:$0xff]  ;;  %v5537_v36 = vpack.c.bf16 %v9735_v30, %v12802_v52  ;;  %9731 = vst [vmem:[%s10210_s18 + $0xd28] sm:$0xff] %v5521_v28 }
 0x1d2   : > { %v12880_v26 = vld [vmem:[%s10187_s14 + $0x270] sm:$0xff]  ;;  %v9741_v32 = vld [vmem:[%s10187_s14 + $0xa58] sm:$0xff]  ;;  %v5545_v37 = vpack.c.bf16 %v9738_v31, %v12805_v53  ;;  %9734 = vst [vmem:[%s10210_s18 + $0x1928] sm:$0xff] %v5529_v29 }
 0x1d3   : > { %v12892_v33 = vld [vmem:[%s10187_s14 + $0x4290] sm:$0xff]  ;;  %v5553_v38 = vpack.c.bf16 %v9741_v32, %v12808_v54  ;;  %v9744_v39 = vld [vmem:[%s10187_s14 + $0x3258] sm:$0xff]  ;;  %9737 = vst [vmem:[%s10210_s18 + $0x528] sm:$0xff] %v5537_v36 }
 0x1d4   : > { %v12895_v34 = vld [vmem:[%s10187_s14 + $0x2a90] sm:$0xff]  ;;  %v9747_v40 = vld [vmem:[%s10187_s14 + $0x1a58] sm:$0xff]  ;;  %v5561_v45 = vpack.c.bf16 %v9744_v39, %v12820_v61  ;;  %9740 = vst [vmem:[%s10210_s18 + $0x1128] sm:$0xff] %v5545_v37 }
 0x1d5   : > { %v12898_v35 = vld [vmem:[%s10187_s14 + $0x1290] sm:$0xff]  ;;  %v9750_v41 = vld [vmem:[%s10187_s14 + $0x258] sm:$0xff]  ;;  %v5569_v46 = vpack.c.bf16 %v9747_v40, %v12823_v62  ;;  %9743 = vst [vmem:[%s10210_s18 + $0x1d28] sm:$0xff] %v5553_v38 }
 0x1d6   : > { %v12910_v42 = vld [vmem:[%s10187_s14 + $0x3a90] sm:$0xff]  ;;  %v5577_v47 = vpack.c.bf16 %v9750_v41, %v12826_v63  ;;  %v9753_v48 = vld [vmem:[%s10187_s14 + $0x4278] sm:$0xff]  ;;  %9746 = vst [vmem:[%s10210_s18 + $0x928] sm:$0xff] %v5561_v45 }
 0x1d7   : > { %v12913_v43 = vld [vmem:[%s10187_s14 + $0x2290] sm:$0xff]  ;;  %v9756_v49 = vld [vmem:[%s10187_s14 + $0x2a78] sm:$0xff]  ;;  %v5585_v54 = vpack.c.bf16 %v9753_v48, %v12838_v6  ;;  %9749 = vst [vmem:[%s10210_s18 + $0x1528] sm:$0xff] %v5569_v46 }
 0x1d8   : > { %v12916_v44 = vld [vmem:[%s10187_s14 + $0xa90] sm:$0xff]  ;;  %v9759_v50 = vld [vmem:[%s10187_s14 + $0x1278] sm:$0xff]  ;;  %v5593_v55 = vpack.c.bf16 %v9756_v49, %v12841_v7  ;;  %9752 = vst [vmem:[%s10210_s18 + $0x2128] sm:$0xff] %v5577_v47 }
 0x1d9   : > { %v12928_v51 = vld [vmem:[%s10187_s14 + $0x3290] sm:$0xff]  ;;  %v5601_v56 = vpack.c.bf16 %v9759_v50, %v12844_v8  ;;  %v9762_v57 = vld [vmem:[%s10187_s14 + $0x3a78] sm:$0xff]  ;;  %9755 = vst [vmem:[%s10210_s18 + $0x138] sm:$0xff] %v5585_v54 }
 0x1da   : > { %v12931_v52 = vld [vmem:[%s10187_s14 + $0x1a90] sm:$0xff]  ;;  %v9765_v58 = vld [vmem:[%s10187_s14 + $0x2278] sm:$0xff]  ;;  %v5609_v63 = vpack.c.bf16 %v9762_v57, %v12856_v15  ;;  %9758 = vst [vmem:[%s10210_s18 + $0xd38] sm:$0xff] %v5593_v55 }
 0x1db   : > { %v12934_v53 = vld [vmem:[%s10187_s14 + $0x290] sm:$0xff]  ;;  %v9768_v59 = vld [vmem:[%s10187_s14 + $0xa78] sm:$0xff]  ;;  %v5617_v0 = vpack.c.bf16 %v9765_v58, %v12859_v16  ;;  %9761 = vst [vmem:[%s10210_s18 + $0x1938] sm:$0xff] %v5601_v56 }
 0x1dc   : > { %v12946_v60 = vld [vmem:[%s10187_s14 + $0x42b0] sm:$0xff]  ;;  %v5625_v1 = vpack.c.bf16 %v9768_v59, %v12862_v17  ;;  %v9771_v2 = vld [vmem:[%s10187_s14 + $0x3278] sm:$0xff]  ;;  %9764 = vst [vmem:[%s10210_s18 + $0x538] sm:$0xff] %v5609_v63 }
 0x1dd   : > { %v12949_v61 = vld [vmem:[%s10187_s14 + $0x2ab0] sm:$0xff]  ;;  %v9774_v3 = vld [vmem:[%s10187_s14 + $0x1a78] sm:$0xff]  ;;  %v5633_v8 = vpack.c.bf16 %v9771_v2, %v12874_v24  ;;  %9767 = vst [vmem:[%s10210_s18 + $0x1138] sm:$0xff] %v5617_v0 }
 0x1de   : > { %v12952_v62 = vld [vmem:[%s10187_s14 + $0x12b0] sm:$0xff]  ;;  %v9777_v4 = vld [vmem:[%s10187_s14 + $0x278] sm:$0xff]  ;;  %v5641_v9 = vpack.c.bf16 %v9774_v3, %v12877_v25  ;;  %9770 = vst [vmem:[%s10210_s18 + $0x1d38] sm:$0xff] %v5625_v1 }
 0x1df   : > { %v12964_v5 = vld [vmem:[%s10187_s14 + $0x3ab0] sm:$0xff]  ;;  %v5649_v10 = vpack.c.bf16 %v9777_v4, %v12880_v26  ;;  %v9780_v11 = vld [vmem:[%s10187_s14 + $0x4298] sm:$0xff]  ;;  %9773 = vst [vmem:[%s10210_s18 + $0x938] sm:$0xff] %v5633_v8 }
 0x1e0   : > { %v12967_v6 = vld [vmem:[%s10187_s14 + $0x22b0] sm:$0xff]  ;;  %v9783_v12 = vld [vmem:[%s10187_s14 + $0x2a98] sm:$0xff]  ;;  %v5657_v17 = vpack.c.bf16 %v9780_v11, %v12892_v33  ;;  %9776 = vst [vmem:[%s10210_s18 + $0x1538] sm:$0xff] %v5641_v9 }
 0x1e1   : > { %v12970_v7 = vld [vmem:[%s10187_s14 + $0xab0] sm:$0xff]  ;;  %v9786_v13 = vld [vmem:[%s10187_s14 + $0x1298] sm:$0xff]  ;;  %v5665_v18 = vpack.c.bf16 %v9783_v12, %v12895_v34  ;;  %9779 = vst [vmem:[%s10210_s18 + $0x2138] sm:$0xff] %v5649_v10 }
 0x1e2   : > { %v12982_v14 = vld [vmem:[%s10187_s14 + $0x32b0] sm:$0xff]  ;;  %v5673_v19 = vpack.c.bf16 %v9786_v13, %v12898_v35  ;;  %v9789_v20 = vld [vmem:[%s10187_s14 + $0x3a98] sm:$0xff]  ;;  %9782 = vst [vmem:[%s10210_s18 + $0x148] sm:$0xff] %v5657_v17 }
 0x1e3   : > { %v12985_v15 = vld [vmem:[%s10187_s14 + $0x1ab0] sm:$0xff]  ;;  %v9792_v21 = vld [vmem:[%s10187_s14 + $0x2298] sm:$0xff]  ;;  %v5681_v26 = vpack.c.bf16 %v9789_v20, %v12910_v42  ;;  %9785 = vst [vmem:[%s10210_s18 + $0xd48] sm:$0xff] %v5665_v18 }
 0x1e4   : > { %v12988_v16 = vld [vmem:[%s10187_s14 + $0x2b0] sm:$0xff]  ;;  %v9795_v22 = vld [vmem:[%s10187_s14 + $0xa98] sm:$0xff]  ;;  %v5689_v27 = vpack.c.bf16 %v9792_v21, %v12913_v43  ;;  %9788 = vst [vmem:[%s10210_s18 + $0x1948] sm:$0xff] %v5673_v19 }
 0x1e5   : > { %v13000_v23 = vld [vmem:[%s10187_s14 + $0x42d0] sm:$0xff]  ;;  %v5697_v28 = vpack.c.bf16 %v9795_v22, %v12916_v44  ;;  %v9798_v29 = vld [vmem:[%s10187_s14 + $0x3298] sm:$0xff]  ;;  %9791 = vst [vmem:[%s10210_s18 + $0x548] sm:$0xff] %v5681_v26 }
 0x1e6   : > { %v13003_v24 = vld [vmem:[%s10187_s14 + $0x2ad0] sm:$0xff]  ;;  %v9801_v30 = vld [vmem:[%s10187_s14 + $0x1a98] sm:$0xff]  ;;  %v5705_v35 = vpack.c.bf16 %v9798_v29, %v12928_v51  ;;  %9794 = vst [vmem:[%s10210_s18 + $0x1148] sm:$0xff] %v5689_v27 }
 0x1e7   : > { %v13006_v25 = vld [vmem:[%s10187_s14 + $0x12d0] sm:$0xff]  ;;  %v9804_v31 = vld [vmem:[%s10187_s14 + $0x298] sm:$0xff]  ;;  %v5713_v36 = vpack.c.bf16 %v9801_v30, %v12931_v52  ;;  %9797 = vst [vmem:[%s10210_s18 + $0x1d48] sm:$0xff] %v5697_v28 }
 0x1e8   : > { %v13018_v32 = vld [vmem:[%s10187_s14 + $0x3ad0] sm:$0xff]  ;;  %v5721_v37 = vpack.c.bf16 %v9804_v31, %v12934_v53  ;;  %v9807_v38 = vld [vmem:[%s10187_s14 + $0x42b8] sm:$0xff]  ;;  %9800 = vst [vmem:[%s10210_s18 + $0x948] sm:$0xff] %v5705_v35 }
 0x1e9   : > { %v13021_v33 = vld [vmem:[%s10187_s14 + $0x22d0] sm:$0xff]  ;;  %v9810_v39 = vld [vmem:[%s10187_s14 + $0x2ab8] sm:$0xff]  ;;  %v5729_v44 = vpack.c.bf16 %v9807_v38, %v12946_v60  ;;  %9803 = vst [vmem:[%s10210_s18 + $0x1548] sm:$0xff] %v5713_v36 }
 0x1ea   : > { %v13024_v34 = vld [vmem:[%s10187_s14 + $0xad0] sm:$0xff]  ;;  %v9813_v40 = vld [vmem:[%s10187_s14 + $0x12b8] sm:$0xff]  ;;  %v5737_v45 = vpack.c.bf16 %v9810_v39, %v12949_v61  ;;  %9806 = vst [vmem:[%s10210_s18 + $0x2148] sm:$0xff] %v5721_v37 }
 0x1eb   : > { %v13036_v41 = vld [vmem:[%s10187_s14 + $0x32d0] sm:$0xff]  ;;  %v5745_v46 = vpack.c.bf16 %v9813_v40, %v12952_v62  ;;  %v9816_v47 = vld [vmem:[%s10187_s14 + $0x3ab8] sm:$0xff]  ;;  %9809 = vst [vmem:[%s10210_s18 + $0x158] sm:$0xff] %v5729_v44 }
 0x1ec   : > { %v13039_v42 = vld [vmem:[%s10187_s14 + $0x1ad0] sm:$0xff]  ;;  %v9819_v48 = vld [vmem:[%s10187_s14 + $0x22b8] sm:$0xff]  ;;  %v5753_v53 = vpack.c.bf16 %v9816_v47, %v12964_v5  ;;  %9812 = vst [vmem:[%s10210_s18 + $0xd58] sm:$0xff] %v5737_v45 }
 0x1ed   : > { %v13042_v43 = vld [vmem:[%s10187_s14 + $0x2d0] sm:$0xff]  ;;  %v9822_v49 = vld [vmem:[%s10187_s14 + $0xab8] sm:$0xff]  ;;  %v5761_v54 = vpack.c.bf16 %v9819_v48, %v12967_v6  ;;  %9815 = vst [vmem:[%s10210_s18 + $0x1958] sm:$0xff] %v5745_v46 }
 0x1ee   : > { %v13054_v50 = vld [vmem:[%s10187_s14 + $0x42f0] sm:$0xff]  ;;  %v5769_v55 = vpack.c.bf16 %v9822_v49, %v12970_v7  ;;  %v9825_v56 = vld [vmem:[%s10187_s14 + $0x32b8] sm:$0xff]  ;;  %9818 = vst [vmem:[%s10210_s18 + $0x558] sm:$0xff] %v5753_v53 }
 0x1ef   : > { %v13057_v51 = vld [vmem:[%s10187_s14 + $0x2af0] sm:$0xff]  ;;  %v9828_v57 = vld [vmem:[%s10187_s14 + $0x1ab8] sm:$0xff]  ;;  %v5777_v62 = vpack.c.bf16 %v9825_v56, %v12982_v14  ;;  %9821 = vst [vmem:[%s10210_s18 + $0x1158] sm:$0xff] %v5761_v54 }
 0x1f0   : > { %v13060_v52 = vld [vmem:[%s10187_s14 + $0x12f0] sm:$0xff]  ;;  %v9831_v58 = vld [vmem:[%s10187_s14 + $0x2b8] sm:$0xff]  ;;  %v5785_v63 = vpack.c.bf16 %v9828_v57, %v12985_v15  ;;  %9824 = vst [vmem:[%s10210_s18 + $0x1d58] sm:$0xff] %v5769_v55 }
 0x1f1   : > { %v13072_v59 = vld [vmem:[%s10187_s14 + $0x3af0] sm:$0xff]  ;;  %v5793_v0 = vpack.c.bf16 %v9831_v58, %v12988_v16  ;;  %v9834_v1 = vld [vmem:[%s10187_s14 + $0x42d8] sm:$0xff]  ;;  %9827 = vst [vmem:[%s10210_s18 + $0x958] sm:$0xff] %v5777_v62 }
 0x1f2   : > { %v13075_v60 = vld [vmem:[%s10187_s14 + $0x22f0] sm:$0xff]  ;;  %v9837_v2 = vld [vmem:[%s10187_s14 + $0x2ad8] sm:$0xff]  ;;  %v5801_v7 = vpack.c.bf16 %v9834_v1, %v13000_v23  ;;  %9830 = vst [vmem:[%s10210_s18 + $0x1558] sm:$0xff] %v5785_v63 }
 0x1f3   : > { %v13078_v61 = vld [vmem:[%s10187_s14 + $0xaf0] sm:$0xff]  ;;  %v9840_v3 = vld [vmem:[%s10187_s14 + $0x12d8] sm:$0xff]  ;;  %v5809_v8 = vpack.c.bf16 %v9837_v2, %v13003_v24  ;;  %9833 = vst [vmem:[%s10210_s18 + $0x2158] sm:$0xff] %v5793_v0 }
 0x1f4   : > { %v13090_v4 = vld [vmem:[%s10187_s14 + $0x32f0] sm:$0xff]  ;;  %v5817_v9 = vpack.c.bf16 %v9840_v3, %v13006_v25  ;;  %v9843_v10 = vld [vmem:[%s10187_s14 + $0x3ad8] sm:$0xff]  ;;  %9836 = vst [vmem:[%s10210_s18 + $0x168] sm:$0xff] %v5801_v7 }
 0x1f5   : > { %v13093_v5 = vld [vmem:[%s10187_s14 + $0x1af0] sm:$0xff]  ;;  %v9846_v11 = vld [vmem:[%s10187_s14 + $0x22d8] sm:$0xff]  ;;  %v5825_v16 = vpack.c.bf16 %v9843_v10, %v13018_v32  ;;  %9839 = vst [vmem:[%s10210_s18 + $0xd68] sm:$0xff] %v5809_v8 }
 0x1f6   : > { %v13096_v6 = vld [vmem:[%s10187_s14 + $0x2f0] sm:$0xff]  ;;  %v9849_v12 = vld [vmem:[%s10187_s14 + $0xad8] sm:$0xff]  ;;  %v5833_v17 = vpack.c.bf16 %v9846_v11, %v13021_v33  ;;  %9842 = vst [vmem:[%s10210_s18 + $0x1968] sm:$0xff] %v5817_v9 }
 0x1f7   : > { %v13108_v13 = vld [vmem:[%s10187_s14 + $0x4310] sm:$0xff]  ;;  %v5841_v18 = vpack.c.bf16 %v9849_v12, %v13024_v34  ;;  %v9852_v19 = vld [vmem:[%s10187_s14 + $0x32d8] sm:$0xff]  ;;  %9845 = vst [vmem:[%s10210_s18 + $0x568] sm:$0xff] %v5825_v16 }
 0x1f8   : > { %v13111_v14 = vld [vmem:[%s10187_s14 + $0x2b10] sm:$0xff]  ;;  %v9855_v20 = vld [vmem:[%s10187_s14 + $0x1ad8] sm:$0xff]  ;;  %v5849_v25 = vpack.c.bf16 %v9852_v19, %v13036_v41  ;;  %9848 = vst [vmem:[%s10210_s18 + $0x1168] sm:$0xff] %v5833_v17 }
 0x1f9   : > { %v13114_v15 = vld [vmem:[%s10187_s14 + $0x1310] sm:$0xff]  ;;  %v9858_v21 = vld [vmem:[%s10187_s14 + $0x2d8] sm:$0xff]  ;;  %v5857_v26 = vpack.c.bf16 %v9855_v20, %v13039_v42  ;;  %9851 = vst [vmem:[%s10210_s18 + $0x1d68] sm:$0xff] %v5841_v18 }
 0x1fa   : > { %v13126_v22 = vld [vmem:[%s10187_s14 + $0x3b10] sm:$0xff]  ;;  %v5865_v27 = vpack.c.bf16 %v9858_v21, %v13042_v43  ;;  %v9861_v28 = vld [vmem:[%s10187_s14 + $0x42f8] sm:$0xff]  ;;  %9854 = vst [vmem:[%s10210_s18 + $0x968] sm:$0xff] %v5849_v25 }
 0x1fb   : > { %v13129_v23 = vld [vmem:[%s10187_s14 + $0x2310] sm:$0xff]  ;;  %v9864_v29 = vld [vmem:[%s10187_s14 + $0x2af8] sm:$0xff]  ;;  %v5873_v34 = vpack.c.bf16 %v9861_v28, %v13054_v50  ;;  %9857 = vst [vmem:[%s10210_s18 + $0x1568] sm:$0xff] %v5857_v26 }
 0x1fc   : > { %v13132_v24 = vld [vmem:[%s10187_s14 + $0xb10] sm:$0xff]  ;;  %v9867_v30 = vld [vmem:[%s10187_s14 + $0x12f8] sm:$0xff]  ;;  %v5881_v35 = vpack.c.bf16 %v9864_v29, %v13057_v51  ;;  %9860 = vst [vmem:[%s10210_s18 + $0x2168] sm:$0xff] %v5865_v27 }
 0x1fd   : > { %v13144_v31 = vld [vmem:[%s10187_s14 + $0x3310] sm:$0xff]  ;;  %v5889_v36 = vpack.c.bf16 %v9867_v30, %v13060_v52  ;;  %v9870_v37 = vld [vmem:[%s10187_s14 + $0x3af8] sm:$0xff]  ;;  %9863 = vst [vmem:[%s10210_s18 + $0x178] sm:$0xff] %v5873_v34 }
 0x1fe   : > { %v13147_v32 = vld [vmem:[%s10187_s14 + $0x1b10] sm:$0xff]  ;;  %v9873_v38 = vld [vmem:[%s10187_s14 + $0x22f8] sm:$0xff]  ;;  %v5897_v43 = vpack.c.bf16 %v9870_v37, %v13072_v59  ;;  %9866 = vst [vmem:[%s10210_s18 + $0xd78] sm:$0xff] %v5881_v35 }
 0x1ff   : > { %v13150_v33 = vld [vmem:[%s10187_s14 + $0x310] sm:$0xff]  ;;  %v9876_v39 = vld [vmem:[%s10187_s14 + $0xaf8] sm:$0xff]  ;;  %v5905_v44 = vpack.c.bf16 %v9873_v38, %v13075_v60  ;;  %9869 = vst [vmem:[%s10210_s18 + $0x1978] sm:$0xff] %v5889_v36 }
 0x200   : > { %v13162_v40 = vld [vmem:[%s10187_s14 + $0x4330] sm:$0xff]  ;;  %v5913_v45 = vpack.c.bf16 %v9876_v39, %v13078_v61  ;;  %v9879_v46 = vld [vmem:[%s10187_s14 + $0x32f8] sm:$0xff]  ;;  %9872 = vst [vmem:[%s10210_s18 + $0x578] sm:$0xff] %v5897_v43 }
 0x201   : > { %v13165_v41 = vld [vmem:[%s10187_s14 + $0x2b30] sm:$0xff]  ;;  %v9882_v47 = vld [vmem:[%s10187_s14 + $0x1af8] sm:$0xff]  ;;  %v5921_v52 = vpack.c.bf16 %v9879_v46, %v13090_v4  ;;  %9875 = vst [vmem:[%s10210_s18 + $0x1178] sm:$0xff] %v5905_v44 }
 0x202   : > { %v13168_v42 = vld [vmem:[%s10187_s14 + $0x1330] sm:$0xff]  ;;  %v9885_v48 = vld [vmem:[%s10187_s14 + $0x2f8] sm:$0xff]  ;;  %v5929_v53 = vpack.c.bf16 %v9882_v47, %v13093_v5  ;;  %9878 = vst [vmem:[%s10210_s18 + $0x1d78] sm:$0xff] %v5913_v45 }
 0x203   : > { %v13180_v49 = vld [vmem:[%s10187_s14 + $0x3b30] sm:$0xff]  ;;  %v5937_v54 = vpack.c.bf16 %v9885_v48, %v13096_v6  ;;  %v9888_v55 = vld [vmem:[%s10187_s14 + $0x4318] sm:$0xff]  ;;  %9881 = vst [vmem:[%s10210_s18 + $0x978] sm:$0xff] %v5921_v52 }
 0x204   : > { %v13183_v50 = vld [vmem:[%s10187_s14 + $0x2330] sm:$0xff]  ;;  %v9891_v56 = vld [vmem:[%s10187_s14 + $0x2b18] sm:$0xff]  ;;  %v5945_v61 = vpack.c.bf16 %v9888_v55, %v13108_v13  ;;  %9884 = vst [vmem:[%s10210_s18 + $0x1578] sm:$0xff] %v5929_v53 }
 0x205   : > { %v13186_v51 = vld [vmem:[%s10187_s14 + $0xb30] sm:$0xff]  ;;  %v9894_v57 = vld [vmem:[%s10187_s14 + $0x1318] sm:$0xff]  ;;  %v5953_v62 = vpack.c.bf16 %v9891_v56, %v13111_v14  ;;  %9887 = vst [vmem:[%s10210_s18 + $0x2178] sm:$0xff] %v5937_v54 }
 0x206   : > { %v13198_v58 = vld [vmem:[%s10187_s14 + $0x3330] sm:$0xff]  ;;  %v5961_v63 = vpack.c.bf16 %v9894_v57, %v13114_v15  ;;  %v9897_v0 = vld [vmem:[%s10187_s14 + $0x3b18] sm:$0xff]  ;;  %9890 = vst [vmem:[%s10210_s18 + $0x188] sm:$0xff] %v5945_v61 }
 0x207   : > { %v13201_v59 = vld [vmem:[%s10187_s14 + $0x1b30] sm:$0xff]  ;;  %v9900_v1 = vld [vmem:[%s10187_s14 + $0x2318] sm:$0xff]  ;;  %v5969_v6 = vpack.c.bf16 %v9897_v0, %v13126_v22  ;;  %9893 = vst [vmem:[%s10210_s18 + $0xd88] sm:$0xff] %v5953_v62 }
 0x208   : > { %v13204_v60 = vld [vmem:[%s10187_s14 + $0x330] sm:$0xff]  ;;  %v9903_v2 = vld [vmem:[%s10187_s14 + $0xb18] sm:$0xff]  ;;  %v5977_v7 = vpack.c.bf16 %v9900_v1, %v13129_v23  ;;  %9896 = vst [vmem:[%s10210_s18 + $0x1988] sm:$0xff] %v5961_v63 }
 0x209   : > { %v13216_v3 = vld [vmem:[%s10187_s14 + $0x4350] sm:$0xff]  ;;  %v5985_v8 = vpack.c.bf16 %v9903_v2, %v13132_v24  ;;  %v9906_v9 = vld [vmem:[%s10187_s14 + $0x3318] sm:$0xff]  ;;  %9899 = vst [vmem:[%s10210_s18 + $0x588] sm:$0xff] %v5969_v6 }
 0x20a   : > { %v13219_v4 = vld [vmem:[%s10187_s14 + $0x2b50] sm:$0xff]  ;;  %v9909_v10 = vld [vmem:[%s10187_s14 + $0x1b18] sm:$0xff]  ;;  %v5993_v15 = vpack.c.bf16 %v9906_v9, %v13144_v31  ;;  %9902 = vst [vmem:[%s10210_s18 + $0x1188] sm:$0xff] %v5977_v7 }
 0x20b   : > { %v13222_v5 = vld [vmem:[%s10187_s14 + $0x1350] sm:$0xff]  ;;  %v9912_v11 = vld [vmem:[%s10187_s14 + $0x318] sm:$0xff]  ;;  %v6001_v16 = vpack.c.bf16 %v9909_v10, %v13147_v32  ;;  %9905 = vst [vmem:[%s10210_s18 + $0x1d88] sm:$0xff] %v5985_v8 }
 0x20c   : > { %v13234_v12 = vld [vmem:[%s10187_s14 + $0x3b50] sm:$0xff]  ;;  %v6009_v17 = vpack.c.bf16 %v9912_v11, %v13150_v33  ;;  %v9915_v18 = vld [vmem:[%s10187_s14 + $0x4338] sm:$0xff]  ;;  %9908 = vst [vmem:[%s10210_s18 + $0x988] sm:$0xff] %v5993_v15 }
 0x20d   : > { %v13237_v13 = vld [vmem:[%s10187_s14 + $0x2350] sm:$0xff]  ;;  %v9918_v19 = vld [vmem:[%s10187_s14 + $0x2b38] sm:$0xff]  ;;  %v6017_v24 = vpack.c.bf16 %v9915_v18, %v13162_v40  ;;  %9911 = vst [vmem:[%s10210_s18 + $0x1588] sm:$0xff] %v6001_v16 }
 0x20e   : > { %v13240_v14 = vld [vmem:[%s10187_s14 + $0xb50] sm:$0xff]  ;;  %v9921_v20 = vld [vmem:[%s10187_s14 + $0x1338] sm:$0xff]  ;;  %v6025_v25 = vpack.c.bf16 %v9918_v19, %v13165_v41  ;;  %9914 = vst [vmem:[%s10210_s18 + $0x2188] sm:$0xff] %v6009_v17 }
 0x20f   : > { %v13252_v21 = vld [vmem:[%s10187_s14 + $0x3350] sm:$0xff]  ;;  %v6033_v26 = vpack.c.bf16 %v9921_v20, %v13168_v42  ;;  %v9924_v27 = vld [vmem:[%s10187_s14 + $0x3b38] sm:$0xff]  ;;  %9917 = vst [vmem:[%s10210_s18 + $0x198] sm:$0xff] %v6017_v24 }
 0x210   : > { %v13255_v22 = vld [vmem:[%s10187_s14 + $0x1b50] sm:$0xff]  ;;  %v9927_v28 = vld [vmem:[%s10187_s14 + $0x2338] sm:$0xff]  ;;  %v6041_v33 = vpack.c.bf16 %v9924_v27, %v13180_v49  ;;  %9920 = vst [vmem:[%s10210_s18 + $0xd98] sm:$0xff] %v6025_v25 }
 0x211   : > { %v13258_v23 = vld [vmem:[%s10187_s14 + $0x350] sm:$0xff]  ;;  %v9930_v29 = vld [vmem:[%s10187_s14 + $0xb38] sm:$0xff]  ;;  %v6049_v34 = vpack.c.bf16 %v9927_v28, %v13183_v50  ;;  %9923 = vst [vmem:[%s10210_s18 + $0x1998] sm:$0xff] %v6033_v26 }
 0x212   : > { %v13270_v30 = vld [vmem:[%s10187_s14 + $0x4370] sm:$0xff]  ;;  %v6057_v35 = vpack.c.bf16 %v9930_v29, %v13186_v51  ;;  %v9933_v36 = vld [vmem:[%s10187_s14 + $0x3338] sm:$0xff]  ;;  %9926 = vst [vmem:[%s10210_s18 + $0x598] sm:$0xff] %v6041_v33 }
 0x213   : > { %v13273_v31 = vld [vmem:[%s10187_s14 + $0x2b70] sm:$0xff]  ;;  %v9936_v37 = vld [vmem:[%s10187_s14 + $0x1b38] sm:$0xff]  ;;  %v6065_v42 = vpack.c.bf16 %v9933_v36, %v13198_v58  ;;  %9929 = vst [vmem:[%s10210_s18 + $0x1198] sm:$0xff] %v6049_v34 }
 0x214   : > { %v13276_v32 = vld [vmem:[%s10187_s14 + $0x1370] sm:$0xff]  ;;  %v9939_v38 = vld [vmem:[%s10187_s14 + $0x338] sm:$0xff]  ;;  %v6073_v43 = vpack.c.bf16 %v9936_v37, %v13201_v59  ;;  %9932 = vst [vmem:[%s10210_s18 + $0x1d98] sm:$0xff] %v6057_v35 }
 0x215   : > { %v13288_v39 = vld [vmem:[%s10187_s14 + $0x3b70] sm:$0xff]  ;;  %v6081_v44 = vpack.c.bf16 %v9939_v38, %v13204_v60  ;;  %v9942_v45 = vld [vmem:[%s10187_s14 + $0x4358] sm:$0xff]  ;;  %9935 = vst [vmem:[%s10210_s18 + $0x998] sm:$0xff] %v6065_v42 }
 0x216   : > { %v13291_v40 = vld [vmem:[%s10187_s14 + $0x2370] sm:$0xff]  ;;  %v9945_v46 = vld [vmem:[%s10187_s14 + $0x2b58] sm:$0xff]  ;;  %v6089_v51 = vpack.c.bf16 %v9942_v45, %v13216_v3  ;;  %9938 = vst [vmem:[%s10210_s18 + $0x1598] sm:$0xff] %v6073_v43 }
 0x217   : > { %v13294_v41 = vld [vmem:[%s10187_s14 + $0xb70] sm:$0xff]  ;;  %v9948_v47 = vld [vmem:[%s10187_s14 + $0x1358] sm:$0xff]  ;;  %v6097_v52 = vpack.c.bf16 %v9945_v46, %v13219_v4  ;;  %9941 = vst [vmem:[%s10210_s18 + $0x2198] sm:$0xff] %v6081_v44 }
 0x218   : > { %v13306_v48 = vld [vmem:[%s10187_s14 + $0x3370] sm:$0xff]  ;;  %v6105_v53 = vpack.c.bf16 %v9948_v47, %v13222_v5  ;;  %v9951_v54 = vld [vmem:[%s10187_s14 + $0x3b58] sm:$0xff]  ;;  %9944 = vst [vmem:[%s10210_s18 + $0x1a8] sm:$0xff] %v6089_v51 }
 0x219   : > { %v13309_v49 = vld [vmem:[%s10187_s14 + $0x1b70] sm:$0xff]  ;;  %v9954_v55 = vld [vmem:[%s10187_s14 + $0x2358] sm:$0xff]  ;;  %v6113_v60 = vpack.c.bf16 %v9951_v54, %v13234_v12  ;;  %9947 = vst [vmem:[%s10210_s18 + $0xda8] sm:$0xff] %v6097_v52 }
 0x21a   : > { %v13312_v50 = vld [vmem:[%s10187_s14 + $0x370] sm:$0xff]  ;;  %v9957_v56 = vld [vmem:[%s10187_s14 + $0xb58] sm:$0xff]  ;;  %v6121_v61 = vpack.c.bf16 %v9954_v55, %v13237_v13  ;;  %9950 = vst [vmem:[%s10210_s18 + $0x19a8] sm:$0xff] %v6105_v53 }
 0x21b   : > { %v13324_v57 = vld [vmem:[%s10187_s14 + $0x4390] sm:$0xff]  ;;  %v6129_v62 = vpack.c.bf16 %v9957_v56, %v13240_v14  ;;  %v9960_v63 = vld [vmem:[%s10187_s14 + $0x3358] sm:$0xff]  ;;  %9953 = vst [vmem:[%s10210_s18 + $0x5a8] sm:$0xff] %v6113_v60 }
 0x21c   : > { %v13327_v58 = vld [vmem:[%s10187_s14 + $0x2b90] sm:$0xff]  ;;  %v9963_v0 = vld [vmem:[%s10187_s14 + $0x1b58] sm:$0xff]  ;;  %v6137_v5 = vpack.c.bf16 %v9960_v63, %v13252_v21  ;;  %9956 = vst [vmem:[%s10210_s18 + $0x11a8] sm:$0xff] %v6121_v61 }
 0x21d   : > { %v13330_v59 = vld [vmem:[%s10187_s14 + $0x1390] sm:$0xff]  ;;  %v9966_v1 = vld [vmem:[%s10187_s14 + $0x358] sm:$0xff]  ;;  %v6145_v6 = vpack.c.bf16 %v9963_v0, %v13255_v22  ;;  %9959 = vst [vmem:[%s10210_s18 + $0x1da8] sm:$0xff] %v6129_v62 }
 0x21e   : > { %v13342_v2 = vld [vmem:[%s10187_s14 + $0x3b90] sm:$0xff]  ;;  %v6153_v7 = vpack.c.bf16 %v9966_v1, %v13258_v23  ;;  %v9969_v8 = vld [vmem:[%s10187_s14 + $0x4378] sm:$0xff]  ;;  %9962 = vst [vmem:[%s10210_s18 + $0x9a8] sm:$0xff] %v6137_v5 }
 0x21f   : > { %v13345_v3 = vld [vmem:[%s10187_s14 + $0x2390] sm:$0xff]  ;;  %v9972_v9 = vld [vmem:[%s10187_s14 + $0x2b78] sm:$0xff]  ;;  %v6161_v14 = vpack.c.bf16 %v9969_v8, %v13270_v30  ;;  %9965 = vst [vmem:[%s10210_s18 + $0x15a8] sm:$0xff] %v6145_v6 }
 0x220   : > { %v13348_v4 = vld [vmem:[%s10187_s14 + $0xb90] sm:$0xff]  ;;  %v9975_v10 = vld [vmem:[%s10187_s14 + $0x1378] sm:$0xff]  ;;  %v6169_v15 = vpack.c.bf16 %v9972_v9, %v13273_v31  ;;  %9968 = vst [vmem:[%s10210_s18 + $0x21a8] sm:$0xff] %v6153_v7 }
 0x221   : > { %v13360_v11 = vld [vmem:[%s10187_s14 + $0x3390] sm:$0xff]  ;;  %v6177_v16 = vpack.c.bf16 %v9975_v10, %v13276_v32  ;;  %v9978_v17 = vld [vmem:[%s10187_s14 + $0x3b78] sm:$0xff]  ;;  %9971 = vst [vmem:[%s10210_s18 + $0x1b8] sm:$0xff] %v6161_v14 }
 0x222   : > { %v13363_v12 = vld [vmem:[%s10187_s14 + $0x1b90] sm:$0xff]  ;;  %v9981_v18 = vld [vmem:[%s10187_s14 + $0x2378] sm:$0xff]  ;;  %v6185_v23 = vpack.c.bf16 %v9978_v17, %v13288_v39  ;;  %9974 = vst [vmem:[%s10210_s18 + $0xdb8] sm:$0xff] %v6169_v15 }
 0x223   : > { %v13366_v13 = vld [vmem:[%s10187_s14 + $0x390] sm:$0xff]  ;;  %v9984_v19 = vld [vmem:[%s10187_s14 + $0xb78] sm:$0xff]  ;;  %v6193_v24 = vpack.c.bf16 %v9981_v18, %v13291_v40  ;;  %9977 = vst [vmem:[%s10210_s18 + $0x19b8] sm:$0xff] %v6177_v16 }
 0x224   : > { %v13378_v20 = vld [vmem:[%s10187_s14 + $0x43b0] sm:$0xff]  ;;  %v6201_v25 = vpack.c.bf16 %v9984_v19, %v13294_v41  ;;  %v9987_v26 = vld [vmem:[%s10187_s14 + $0x3378] sm:$0xff]  ;;  %9980 = vst [vmem:[%s10210_s18 + $0x5b8] sm:$0xff] %v6185_v23 }
 0x225   : > { %v13381_v21 = vld [vmem:[%s10187_s14 + $0x2bb0] sm:$0xff]  ;;  %v9990_v27 = vld [vmem:[%s10187_s14 + $0x1b78] sm:$0xff]  ;;  %v6209_v32 = vpack.c.bf16 %v9987_v26, %v13306_v48  ;;  %9983 = vst [vmem:[%s10210_s18 + $0x11b8] sm:$0xff] %v6193_v24 }
 0x226   : > { %v13384_v22 = vld [vmem:[%s10187_s14 + $0x13b0] sm:$0xff]  ;;  %v9993_v28 = vld [vmem:[%s10187_s14 + $0x378] sm:$0xff]  ;;  %v6217_v33 = vpack.c.bf16 %v9990_v27, %v13309_v49  ;;  %9986 = vst [vmem:[%s10210_s18 + $0x1db8] sm:$0xff] %v6201_v25 }
 0x227   : > { %v13396_v29 = vld [vmem:[%s10187_s14 + $0x3bb0] sm:$0xff]  ;;  %v6225_v34 = vpack.c.bf16 %v9993_v28, %v13312_v50  ;;  %v9996_v35 = vld [vmem:[%s10187_s14 + $0x4398] sm:$0xff]  ;;  %9989 = vst [vmem:[%s10210_s18 + $0x9b8] sm:$0xff] %v6209_v32 }
 0x228   : > { %v13399_v30 = vld [vmem:[%s10187_s14 + $0x23b0] sm:$0xff]  ;;  %v9999_v36 = vld [vmem:[%s10187_s14 + $0x2b98] sm:$0xff]  ;;  %v6233_v41 = vpack.c.bf16 %v9996_v35, %v13324_v57  ;;  %9992 = vst [vmem:[%s10210_s18 + $0x15b8] sm:$0xff] %v6217_v33 }
 0x229   : > { %v13402_v31 = vld [vmem:[%s10187_s14 + $0xbb0] sm:$0xff]  ;;  %v10002_v37 = vld [vmem:[%s10187_s14 + $0x1398] sm:$0xff]  ;;  %v6241_v42 = vpack.c.bf16 %v9999_v36, %v13327_v58  ;;  %9995 = vst [vmem:[%s10210_s18 + $0x21b8] sm:$0xff] %v6225_v34 }
 0x22a   : > { %v13414_v38 = vld [vmem:[%s10187_s14 + $0x33b0] sm:$0xff]  ;;  %v6249_v43 = vpack.c.bf16 %v10002_v37, %v13330_v59  ;;  %v10005_v44 = vld [vmem:[%s10187_s14 + $0x3b98] sm:$0xff]  ;;  %9998 = vst [vmem:[%s10210_s18 + $0x1c8] sm:$0xff] %v6233_v41 }
 0x22b   : > { %v13417_v39 = vld [vmem:[%s10187_s14 + $0x1bb0] sm:$0xff]  ;;  %v10008_v45 = vld [vmem:[%s10187_s14 + $0x2398] sm:$0xff]  ;;  %v6257_v50 = vpack.c.bf16 %v10005_v44, %v13342_v2  ;;  %10001 = vst [vmem:[%s10210_s18 + $0xdc8] sm:$0xff] %v6241_v42 }
 0x22c   : > { %v13420_v40 = vld [vmem:[%s10187_s14 + $0x3b0] sm:$0xff]  ;;  %v10011_v46 = vld [vmem:[%s10187_s14 + $0xb98] sm:$0xff]  ;;  %v6265_v51 = vpack.c.bf16 %v10008_v45, %v13345_v3  ;;  %10004 = vst [vmem:[%s10210_s18 + $0x19c8] sm:$0xff] %v6249_v43 }
 0x22d   : > { %v13432_v47 = vld [vmem:[%s10187_s14 + $0x43d0] sm:$0xff]  ;;  %v6273_v52 = vpack.c.bf16 %v10011_v46, %v13348_v4  ;;  %v10014_v53 = vld [vmem:[%s10187_s14 + $0x3398] sm:$0xff]  ;;  %10007 = vst [vmem:[%s10210_s18 + $0x5c8] sm:$0xff] %v6257_v50 }
 0x22e   : > { %v13435_v48 = vld [vmem:[%s10187_s14 + $0x2bd0] sm:$0xff]  ;;  %v10017_v54 = vld [vmem:[%s10187_s14 + $0x1b98] sm:$0xff]  ;;  %v6281_v59 = vpack.c.bf16 %v10014_v53, %v13360_v11  ;;  %10010 = vst [vmem:[%s10210_s18 + $0x11c8] sm:$0xff] %v6265_v51 }
 0x22f   : > { %v13438_v49 = vld [vmem:[%s10187_s14 + $0x13d0] sm:$0xff]  ;;  %v10020_v55 = vld [vmem:[%s10187_s14 + $0x398] sm:$0xff]  ;;  %v6289_v60 = vpack.c.bf16 %v10017_v54, %v13363_v12  ;;  %10013 = vst [vmem:[%s10210_s18 + $0x1dc8] sm:$0xff] %v6273_v52 }
 0x230   : > { %v13450_v56 = vld [vmem:[%s10187_s14 + $0x3bd0] sm:$0xff]  ;;  %v6297_v61 = vpack.c.bf16 %v10020_v55, %v13366_v13  ;;  %v10023_v62 = vld [vmem:[%s10187_s14 + $0x43b8] sm:$0xff]  ;;  %10016 = vst [vmem:[%s10210_s18 + $0x9c8] sm:$0xff] %v6281_v59 }
 0x231   : > { %v13453_v57 = vld [vmem:[%s10187_s14 + $0x23d0] sm:$0xff]  ;;  %v10026_v63 = vld [vmem:[%s10187_s14 + $0x2bb8] sm:$0xff]  ;;  %v6305_v4 = vpack.c.bf16 %v10023_v62, %v13378_v20  ;;  %10019 = vst [vmem:[%s10210_s18 + $0x15c8] sm:$0xff] %v6289_v60 }
 0x232   : > { %v13456_v58 = vld [vmem:[%s10187_s14 + $0xbd0] sm:$0xff]  ;;  %v10029_v0 = vld [vmem:[%s10187_s14 + $0x13b8] sm:$0xff]  ;;  %v6313_v5 = vpack.c.bf16 %v10026_v63, %v13381_v21  ;;  %10022 = vst [vmem:[%s10210_s18 + $0x21c8] sm:$0xff] %v6297_v61 }
 0x233   : > { %v13468_v1 = vld [vmem:[%s10187_s14 + $0x33d0] sm:$0xff]  ;;  %v6321_v6 = vpack.c.bf16 %v10029_v0, %v13384_v22  ;;  %v10032_v7 = vld [vmem:[%s10187_s14 + $0x3bb8] sm:$0xff]  ;;  %10025 = vst [vmem:[%s10210_s18 + $0x1d8] sm:$0xff] %v6305_v4 }
 0x234   : > { %v13471_v2 = vld [vmem:[%s10187_s14 + $0x1bd0] sm:$0xff]  ;;  %v10035_v8 = vld [vmem:[%s10187_s14 + $0x23b8] sm:$0xff]  ;;  %v6329_v13 = vpack.c.bf16 %v10032_v7, %v13396_v29  ;;  %10028 = vst [vmem:[%s10210_s18 + $0xdd8] sm:$0xff] %v6313_v5 }
 0x235   : > { %v13474_v3 = vld [vmem:[%s10187_s14 + $0x3d0] sm:$0xff]  ;;  %v10038_v9 = vld [vmem:[%s10187_s14 + $0xbb8] sm:$0xff]  ;;  %v6337_v14 = vpack.c.bf16 %v10035_v8, %v13399_v30  ;;  %10031 = vst [vmem:[%s10210_s18 + $0x19d8] sm:$0xff] %v6321_v6 }
 0x236   : > { %v13486_v10 = vld [vmem:[%s10187_s14 + $0x43f0] sm:$0xff]  ;;  %v6345_v15 = vpack.c.bf16 %v10038_v9, %v13402_v31  ;;  %v10041_v16 = vld [vmem:[%s10187_s14 + $0x33b8] sm:$0xff]  ;;  %10034 = vst [vmem:[%s10210_s18 + $0x5d8] sm:$0xff] %v6329_v13 }
 0x237   : > { %v13489_v11 = vld [vmem:[%s10187_s14 + $0x2bf0] sm:$0xff]  ;;  %v10044_v17 = vld [vmem:[%s10187_s14 + $0x1bb8] sm:$0xff]  ;;  %v6353_v22 = vpack.c.bf16 %v10041_v16, %v13414_v38  ;;  %10037 = vst [vmem:[%s10210_s18 + $0x11d8] sm:$0xff] %v6337_v14 }
 0x238   : > { %v13492_v12 = vld [vmem:[%s10187_s14 + $0x13f0] sm:$0xff]  ;;  %v10047_v18 = vld [vmem:[%s10187_s14 + $0x3b8] sm:$0xff]  ;;  %v6361_v23 = vpack.c.bf16 %v10044_v17, %v13417_v39  ;;  %10040 = vst [vmem:[%s10210_s18 + $0x1dd8] sm:$0xff] %v6345_v15 }
 0x239   : > { %v13504_v19 = vld [vmem:[%s10187_s14 + $0x3bf0] sm:$0xff]  ;;  %v6369_v24 = vpack.c.bf16 %v10047_v18, %v13420_v40  ;;  %v10050_v25 = vld [vmem:[%s10187_s14 + $0x43d8] sm:$0xff]  ;;  %10043 = vst [vmem:[%s10210_s18 + $0x9d8] sm:$0xff] %v6353_v22 }
 0x23a   : > { %v13507_v20 = vld [vmem:[%s10187_s14 + $0x23f0] sm:$0xff]  ;;  %v10053_v26 = vld [vmem:[%s10187_s14 + $0x2bd8] sm:$0xff]  ;;  %v6377_v31 = vpack.c.bf16 %v10050_v25, %v13432_v47  ;;  %10046 = vst [vmem:[%s10210_s18 + $0x15d8] sm:$0xff] %v6361_v23 }
 0x23b   : > { %v13510_v21 = vld [vmem:[%s10187_s14 + $0xbf0] sm:$0xff]  ;;  %v10056_v27 = vld [vmem:[%s10187_s14 + $0x13d8] sm:$0xff]  ;;  %v6385_v32 = vpack.c.bf16 %v10053_v26, %v13435_v48  ;;  %10049 = vst [vmem:[%s10210_s18 + $0x21d8] sm:$0xff] %v6369_v24 }
 0x23c   : > { %v9237_v28 = vld [vmem:[%s10187_s14 + $0x33f0] sm:$0xff]  ;;  %v6393_v33 = vpack.c.bf16 %v10056_v27, %v13438_v49  ;;  %v10059_v34 = vld [vmem:[%s10187_s14 + $0x3bd8] sm:$0xff]  ;;  %10052 = vst [vmem:[%s10210_s18 + $0x1e8] sm:$0xff] %v6377_v31 }
 0x23d   : > { %v9238_v29 = vld [vmem:[%s10187_s14 + $0x1bf0] sm:$0xff]  ;;  %v10062_v35 = vld [vmem:[%s10187_s14 + $0x23d8] sm:$0xff]  ;;  %v6401_v37 = vpack.c.bf16 %v10059_v34, %v13450_v56  ;;  %10055 = vst [vmem:[%s10210_s18 + $0xde8] sm:$0xff] %v6385_v32 }
 0x23e   : > { %v9239_v30 = vld [vmem:[%s10187_s14 + $0x3f0] sm:$0xff]  ;;  %v10065_v36 = vld [vmem:[%s10187_s14 + $0xbd8] sm:$0xff]  ;;  %v6409_v38 = vpack.c.bf16 %v10062_v35, %v13453_v57  ;;  %10058 = vst [vmem:[%s10210_s18 + $0x19e8] sm:$0xff] %v6393_v33 }
 0x23f   : > { %v6417_v39 = vpack.c.bf16 %v10065_v36, %v13456_v58  ;;  %v10068_v40 = vld [vmem:[%s10187_s14 + $0x33d8] sm:$0xff]  ;;  %10061 = vst [vmem:[%s10210_s18 + $0x5e8] sm:$0xff] %v6401_v37 }
 0x240   : > { %v10071_v41 = vld [vmem:[%s10187_s14 + $0x1bd8] sm:$0xff]  ;;  %v6425_v43 = vpack.c.bf16 %v10068_v40, %v13468_v1  ;;  %10064 = vst [vmem:[%s10210_s18 + $0x11e8] sm:$0xff] %v6409_v38 }
 0x241   : > { %v10074_v42 = vld [vmem:[%s10187_s14 + $0x3d8] sm:$0xff]  ;;  %v6433_v44 = vpack.c.bf16 %v10071_v41, %v13471_v2  ;;  %10067 = vst [vmem:[%s10210_s18 + $0x1de8] sm:$0xff] %v6417_v39 }
 0x242   : > { %v6441_v45 = vpack.c.bf16 %v10074_v42, %v13474_v3  ;;  %v10077_v46 = vld [vmem:[%s10187_s14 + $0x43f8] sm:$0xff]  ;;  %10070 = vst [vmem:[%s10210_s18 + $0x9e8] sm:$0xff] %v6425_v43 }
 0x243   : > { %v10080_v47 = vld [vmem:[%s10187_s14 + $0x2bf8] sm:$0xff]  ;;  %v6449_v49 = vpack.c.bf16 %v10077_v46, %v13486_v10  ;;  %10073 = vst [vmem:[%s10210_s18 + $0x15e8] sm:$0xff] %v6433_v44 }
 0x244   : > { %v10083_v48 = vld [vmem:[%s10187_s14 + $0x13f8] sm:$0xff]  ;;  %v6457_v50 = vpack.c.bf16 %v10080_v47, %v13489_v11  ;;  %10076 = vst [vmem:[%s10210_s18 + $0x21e8] sm:$0xff] %v6441_v45 }
 0x245   : > { %v6465_v51 = vpack.c.bf16 %v10083_v48, %v13492_v12  ;;  %v10086_v52 = vld [vmem:[%s10187_s14 + $0x3bf8] sm:$0xff]  ;;  %10079 = vst [vmem:[%s10210_s18 + $0x1f8] sm:$0xff] %v6449_v49 }
 0x246   : > { %v10089_v53 = vld [vmem:[%s10187_s14 + $0x23f8] sm:$0xff]  ;;  %v6473_v55 = vpack.c.bf16 %v10086_v52, %v13504_v19  ;;  %10082 = vst [vmem:[%s10210_s18 + $0xdf8] sm:$0xff] %v6457_v50 }
 0x247   : > { %v10092_v54 = vld [vmem:[%s10187_s14 + $0xbf8] sm:$0xff]  ;;  %v6481_v56 = vpack.c.bf16 %v10089_v53, %v13507_v20  ;;  %10085 = vst [vmem:[%s10210_s18 + $0x19f8] sm:$0xff] %v6465_v51 }
 0x248   : > { %v6489_v57 = vpack.c.bf16 %v10092_v54, %v13510_v21  ;;  %v10095_v58 = vld [vmem:[%s10187_s14 + $0x33f8] sm:$0xff]  ;;  %10088 = vst [vmem:[%s10210_s18 + $0x5f8] sm:$0xff] %v6473_v55 }
 0x249   : > { %v10098_v59 = vld [vmem:[%s10187_s14 + $0x1bf8] sm:$0xff]  ;;  %v6497_v61 = vpack.c.bf16 %v10095_v58, %v9237_v28  ;;  %10091 = vst [vmem:[%s10210_s18 + $0x11f8] sm:$0xff] %v6481_v56 }
 0x24a   : > { %v10101_v60 = vld [vmem:[%s10187_s14 + $0x3f8] sm:$0xff]  ;;  %v6505_v62 = vpack.c.bf16 %v10098_v59, %v9238_v29  ;;  %10094 = vst [vmem:[%s10210_s18 + $0x1df8] sm:$0xff] %v6489_v57 }
 0x24b   : > { %v6513_v63 = vpack.c.bf16 %v10101_v60, %v9239_v30  ;;  %10097 = vst [vmem:[%s10210_s18 + $0x9f8] sm:$0xff] %v6497_v61 }
 0x24c   : > { %10100 = vst [vmem:[%s10210_s18 + $0x15f8] sm:$0xff] %v6505_v62 }
 0x24d   : > { %10103 = vst [vmem:[%s10210_s18 + $0x21f8] sm:$0xff] %v6513_v63 }
 0x24e PF: > { %s7_s8 = sadd.s32 1, %s10154_s8   ;;  %s13589_s6 = smov %s10150_s7 }
 0x24f   : > { %p4_p5 = scmp.ge.s32.totalorder %s7_s8, 4   ;;  %s13590_s7 = smov %s13592_s9 }
 0x251   :  { %6 = sbr.rel (!%p4_p5) target bundleno = 2 (0x2), region = 2919 }

// kernel: enhanced_resnet_forward.1
= control target key start
LH: loop header
LB: loop body
LE: loop exit
PB: predicated region body
PF: predicated region fallthrough
CT: control target
= control target key end

     0   :  { %s14829_s0 = inlined_call_operand.vmem [shape: bf16[1,8,2048], index: 0, kind: input, shape index: {}]   ;;  %s14830_s1 = inlined_call_operand.vmem [shape: bf16[2048,512], index: 1, kind: input, shape index: {}]   ;;  %s14831_s2 = inlined_call_operand.vmem [shape: f32[1,512], index: 2, kind: input, shape index: {}]   ;;  %s14832_s3 = inlined_call_operand.vmem [shape: f32[1,512], index: 3, kind: input, shape index: {}]   ;;  %s14833_s4 = inlined_call_operand.<no memory space> [shape: f32[1,1], index: 4, kind: input, shape index: {}]   ;;  %s14834_s5 = inlined_call_operand.vmem [shape: bf16[2048,512], index: 5, kind: input, shape index: {}]   ;;  %s14835_s6 = inlined_call_operand.vmem [shape: f32[1,512], index: 6, kind: input, shape index: {}]   ;;  %s14836_s7 = inlined_call_operand.vmem [shape: bf16[512,128], index: 7, kind: input, shape index: {}]   ;;  %s14837_s8 = inlined_call_operand.vmem [shape: f32[1,128], index: 8, kind: input, shape index: {}]   ;;  %s14838_s9 = inlined_call_operand.vmem [shape: f32[1,1,8], index: 9, kind: output, shape index: {0}]   ;;  %s14839_s10 = inlined_call_operand.hbm [shape: f32[1,2,128], index: 10, kind: output, shape index: {1}]  }
   0x1   :  { %v16_v0 = vstv %s14833_s4 }
   0x2   :  { %17 = vst [vmem:[#allocation2] sm:$0x1] %v16_v0 }
   0x3   :  { %v9714_v1 = vld [vmem:[%s14830_s1 + $0x4] ss:$16 sps:$4 sm:$0xff]   ;;  %v9716_v2 = vld [vmem:[%s14830_s1 + $0xc] ss:$16 sps:$4 sm:$0xff]   ;;  %v9718_v3 = vld [vmem:[%s14830_s1] ss:$16 sps:$4 sm:$0xff]  }
   0x4   :  { %3196 = vmatprep.subr.bf16.mxu0 %v9714_v1  ;;  %v9719_v4 = vld [vmem:[%s14830_s1 + $0x8] ss:$16 sps:$4 sm:$0xff]   ;;  %3524 = vmatprep.subr.bf16.mxu1 %v9716_v2  ;;  %v9720_v5 = vld [vmem:[%s14830_s1 + $0x24] ss:$16 sps:$4 sm:$0xff]   ;;  %v9722_v6 = vld [vmem:[%s14830_s1 + $0x2c] ss:$16 sps:$4 sm:$0xff]  }
   0x5   :  { %3197 = vmatpush1.bf16.msra.mxu0 %v9718_v3  ;;  %3525 = vmatpush1.bf16.msra.mxu1 %v9719_v4  ;;  %v9724_v7 = vld [vmem:[%s14830_s1 + $0x20] ss:$16 sps:$4 sm:$0xff]   ;;  %v9725_v8 = vld [vmem:[%s14830_s1 + $0x28] ss:$16 sps:$4 sm:$0xff]   ;;  %v9726_v9 = vld [vmem:[%s14830_s1 + $0x44] ss:$16 sps:$4 sm:$0xff]  }
   0x6   :  { %3198 = vmatprep.subr.bf16.mxu0 %v9720_v5  ;;  %3526 = vmatprep.subr.bf16.mxu1 %v9722_v6  ;;  %v9728_v10 = vld [vmem:[%s14830_s1 + $0x4c] ss:$16 sps:$4 sm:$0xff]   ;;  %v9730_v11 = vld [vmem:[%s14830_s1 + $0x40] ss:$16 sps:$4 sm:$0xff]   ;;  %v9731_v12 = vld [vmem:[%s14830_s1 + $0x48] ss:$16 sps:$4 sm:$0xff]  }
   0x7   :  { %v9732_v13 = vld [vmem:[%s14830_s1 + $0x64] ss:$16 sps:$4 sm:$0xff]   ;;  %v9734_v14 = vld [vmem:[%s14830_s1 + $0x6c] ss:$16 sps:$4 sm:$0xff]   ;;  %v9736_v15 = vld [vmem:[%s14830_s1 + $0x60] ss:$16 sps:$4 sm:$0xff]  }
   0x8   :  { %v9737_v16 = vld [vmem:[%s14830_s1 + $0x68] ss:$16 sps:$4 sm:$0xff]   ;;  %v9738_v17 = vld [vmem:[%s14830_s1 + $0x84] ss:$16 sps:$4 sm:$0xff]   ;;  %v9740_v18 = vld [vmem:[%s14830_s1 + $0x8c] ss:$16 sps:$4 sm:$0xff]  }
   0x9   :  { %3199 = vmatpush1.bf16.msra.mxu0 %v9724_v7  ;;  %3527 = vmatpush1.bf16.msra.mxu1 %v9725_v8  ;;  %v9742_v19 = vld [vmem:[%s14830_s1 + $0x80] ss:$16 sps:$4 sm:$0xff]   ;;  %v9743_v20 = vld [vmem:[%s14830_s1 + $0x88] ss:$16 sps:$4 sm:$0xff]   ;;  %v9744_v21 = vld [vmem:[%s14830_s1 + $0xa4] ss:$16 sps:$4 sm:$0xff]  }
   0xa   :  { %3200 = vmatprep.subr.bf16.mxu0 %v9726_v9  ;;  %3528 = vmatprep.subr.bf16.mxu1 %v9728_v10  ;;  %v9746_v22 = vld [vmem:[%s14830_s1 + $0xac] ss:$16 sps:$4 sm:$0xff]   ;;  %v9748_v23 = vld [vmem:[%s14830_s1 + $0xa0] ss:$16 sps:$4 sm:$0xff]   ;;  %v9749_v24 = vld [vmem:[%s14830_s1 + $0xa8] ss:$16 sps:$4 sm:$0xff]  }
   0xb   :  { %v9750_v25 = vld [vmem:[%s14830_s1 + $0xc4] ss:$16 sps:$4 sm:$0xff]   ;;  %v9752_v26 = vld [vmem:[%s14830_s1 + $0xcc] ss:$16 sps:$4 sm:$0xff]   ;;  %v9754_v27 = vld [vmem:[%s14830_s1 + $0xc0] ss:$16 sps:$4 sm:$0xff]  }
   0xc   :  { %v9755_v28 = vld [vmem:[%s14830_s1 + $0xc8] ss:$16 sps:$4 sm:$0xff]   ;;  %v9756_v29 = vld [vmem:[%s14830_s1 + $0xe4] ss:$16 sps:$4 sm:$0xff]   ;;  %v9758_v30 = vld [vmem:[%s14830_s1 + $0xec] ss:$16 sps:$4 sm:$0xff]  }
   0xd   :  { %3201 = vmatpush1.bf16.msra.mxu0 %v9730_v11  ;;  %3529 = vmatpush1.bf16.msra.mxu1 %v9731_v12  ;;  %v9760_v31 = vld [vmem:[%s14830_s1 + $0xe0] ss:$16 sps:$4 sm:$0xff]   ;;  %v9761_v32 = vld [vmem:[%s14830_s1 + $0xe8] ss:$16 sps:$4 sm:$0xff]   ;;  %v9762_v33 = vld [vmem:[%s14830_s1 + $0x104] ss:$16 sps:$4 sm:$0xff]  }
   0xe   :  { %3202 = vmatprep.subr.bf16.mxu0 %v9732_v13  ;;  %3530 = vmatprep.subr.bf16.mxu1 %v9734_v14  ;;  %v9764_v34 = vld [vmem:[%s14830_s1 + $0x10c] ss:$16 sps:$4 sm:$0xff]   ;;  %v9766_v35 = vld [vmem:[%s14830_s1 + $0x100] ss:$16 sps:$4 sm:$0xff]   ;;  %v9767_v36 = vld [vmem:[%s14830_s1 + $0x108] ss:$16 sps:$4 sm:$0xff]  }
   0xf   :  { %v9768_v37 = vld [vmem:[%s14830_s1 + $0x124] ss:$16 sps:$4 sm:$0xff]   ;;  %v9770_v38 = vld [vmem:[%s14830_s1 + $0x12c] ss:$16 sps:$4 sm:$0xff]   ;;  %v9772_v39 = vld [vmem:[%s14830_s1 + $0x120] ss:$16 sps:$4 sm:$0xff]  }
  0x10   :  { %v9773_v40 = vld [vmem:[%s14830_s1 + $0x128] ss:$16 sps:$4 sm:$0xff]   ;;  %v9774_v41 = vld [vmem:[%s14830_s1 + $0x144] ss:$16 sps:$4 sm:$0xff]   ;;  %v9776_v42 = vld [vmem:[%s14830_s1 + $0x14c] ss:$16 sps:$4 sm:$0xff]  }
  0x11   :  { %3203 = vmatpush1.bf16.msra.mxu0 %v9736_v15  ;;  %3531 = vmatpush1.bf16.msra.mxu1 %v9737_v16  ;;  %v9778_v43 = vld [vmem:[%s14830_s1 + $0x140] ss:$16 sps:$4 sm:$0xff]   ;;  %v9779_v44 = vld [vmem:[%s14830_s1 + $0x148] ss:$16 sps:$4 sm:$0xff]   ;;  %v9780_v45 = vld [vmem:[%s14830_s1 + $0x164] ss:$16 sps:$4 sm:$0xff]  }
  0x12   :  { %3204 = vmatprep.subr.bf16.mxu0 %v9738_v17  ;;  %3532 = vmatprep.subr.bf16.mxu1 %v9740_v18  ;;  %v9782_v46 = vld [vmem:[%s14830_s1 + $0x16c] ss:$16 sps:$4 sm:$0xff]   ;;  %v38_v47 = vld [vmem:[%s14829_s0] sm:$0xff]  ;;  %v9785_v50 = vld [vmem:[%s14830_s1 + $0x168] ss:$16 sps:$4 sm:$0xff]  }
  0x13   :  { %v9784_v48 = vld [vmem:[%s14830_s1 + $0x160] ss:$16 sps:$4 sm:$0xff]   ;;  %v11530_v49 = vcombine.high %v38_v47, %v38_v47  ;;  %v9786_v51 = vld [vmem:[%s14830_s1 + $0x184] ss:$16 sps:$4 sm:$0xff]   ;;  %v9788_v52 = vld [vmem:[%s14830_s1 + $0x18c] ss:$16 sps:$4 sm:$0xff]   ;;  %v11594_v6 = vcombine.low %v38_v47, %v38_v47 }
  0x14   :  { %v9790_v53 = vld [vmem:[%s14830_s1 + $0x180] ss:$16 sps:$4 sm:$0xff]   ;;  %v9791_v54 = vld [vmem:[%s14830_s1 + $0x188] ss:$16 sps:$4 sm:$0xff]   ;;  %v9792_v55 = vld [vmem:[%s14830_s1 + $0x1a4] ss:$16 sps:$4 sm:$0xff]  }
  0x15   :  { %3205 = vmatpush1.bf16.msra.mxu0 %v9742_v19  ;;  %3533 = vmatpush1.bf16.msra.mxu1 %v9743_v20  ;;  %v9794_v56 = vld [vmem:[%s14830_s1 + $0x1ac] ss:$16 sps:$4 sm:$0xff]   ;;  %v9796_v57 = vld [vmem:[%s14830_s1 + $0x1a0] ss:$16 sps:$4 sm:$0xff]   ;;  %v9797_v58 = vld [vmem:[%s14830_s1 + $0x1a8] ss:$16 sps:$4 sm:$0xff]  }
  0x16   :  { %3206 = vmatprep.subr.bf16.mxu0 %v9744_v21  ;;  %3534 = vmatprep.subr.bf16.mxu1 %v9746_v22  ;;  %v9798_v59 = vld [vmem:[%s14830_s1 + $0x1c4] ss:$16 sps:$4 sm:$0xff]   ;;  %v9800_v60 = vld [vmem:[%s14830_s1 + $0x1cc] ss:$16 sps:$4 sm:$0xff]   ;;  %v9802_v61 = vld [vmem:[%s14830_s1 + $0x1c0] ss:$16 sps:$4 sm:$0xff]  }
  0x17   :  { %3228 = vmatprep.mubr.bf16.mxu0 %v11530_v49  ;;  %3556 = vmatprep.mubr.bf16.mxu1 %v11530_v49  ;;  %v9803_v62 = vld [vmem:[%s14830_s1 + $0x1c8] ss:$16 sps:$4 sm:$0xff]   ;;  %v9804_v63 = vld [vmem:[%s14830_s1 + $0x1e4] ss:$16 sps:$4 sm:$0xff]   ;;  %v9806_v0 = vld [vmem:[%s14830_s1 + $0x1ec] ss:$16 sps:$4 sm:$0xff]  }
  0x18   :  { %v9808_v1 = vld [vmem:[%s14830_s1 + $0x1e0] ss:$16 sps:$4 sm:$0xff]   ;;  %v9809_v2 = vld [vmem:[%s14830_s1 + $0x1e8] ss:$16 sps:$4 sm:$0xff]   ;;  %v9813_v3 = vld [vmem:[%s14830_s1 + $0x204] ss:$16 sps:$4 sm:$0xff]  }
  0x19   :  { %3207 = vmatpush1.bf16.msra.mxu0 %v9748_v23  ;;  %3535 = vmatpush1.bf16.msra.mxu1 %v9749_v24  ;;  %v9816_v4 = vld [vmem:[%s14830_s1 + $0x20c] ss:$16 sps:$4 sm:$0xff]   ;;  %v9811_v5 = vld [vmem:[%s14830_s1 + $0x200] ss:$16 sps:$4 sm:$0xff]   ;;  %v9814_v7 = vld [vmem:[%s14830_s1 + $0x208] ss:$16 sps:$4 sm:$0xff]  }
  0x1a   :  { %3208 = vmatprep.subr.bf16.mxu0 %v9750_v25  ;;  %3536 = vmatprep.subr.bf16.mxu1 %v9752_v26  ;;  %v9820_v8 = vld [vmem:[%s14830_s1 + $0x224] ss:$16 sps:$4 sm:$0xff]   ;;  %v9823_v9 = vld [vmem:[%s14830_s1 + $0x22c] ss:$16 sps:$4 sm:$0xff]   ;;  %v9818_v10 = vld [vmem:[%s14830_s1 + $0x220] ss:$16 sps:$4 sm:$0xff]  }
  0x1b   :  { %v9821_v11 = vld [vmem:[%s14830_s1 + $0x228] ss:$16 sps:$4 sm:$0xff]   ;;  %v9826_v12 = vld [vmem:[%s14830_s1 + $0x244] ss:$16 sps:$4 sm:$0xff]   ;;  %v9829_v13 = vld [vmem:[%s14830_s1 + $0x24c] ss:$16 sps:$4 sm:$0xff]  }
  0x1c   :  { %v9824_v14 = vld [vmem:[%s14830_s1 + $0x240] ss:$16 sps:$4 sm:$0xff]   ;;  %v9827_v15 = vld [vmem:[%s14830_s1 + $0x248] ss:$16 sps:$4 sm:$0xff]   ;;  %v9832_v16 = vld [vmem:[%s14830_s1 + $0x264] ss:$16 sps:$4 sm:$0xff]  }
  0x1d   :  { %3209 = vmatpush1.bf16.msra.mxu0 %v9754_v27  ;;  %3537 = vmatpush1.bf16.msra.mxu1 %v9755_v28  ;;  %v9835_v17 = vld [vmem:[%s14830_s1 + $0x26c] ss:$16 sps:$4 sm:$0xff]   ;;  %v9830_v18 = vld [vmem:[%s14830_s1 + $0x260] ss:$16 sps:$4 sm:$0xff]   ;;  %v9833_v19 = vld [vmem:[%s14830_s1 + $0x268] ss:$16 sps:$4 sm:$0xff]  }
  0x1e   :  { %3210 = vmatprep.subr.bf16.mxu0 %v9756_v29  ;;  %3538 = vmatprep.subr.bf16.mxu1 %v9758_v30  ;;  %v9838_v20 = vld [vmem:[%s14830_s1 + $0x284] ss:$16 sps:$4 sm:$0xff]   ;;  %v9841_v21 = vld [vmem:[%s14830_s1 + $0x28c] ss:$16 sps:$4 sm:$0xff]   ;;  %v9836_v22 = vld [vmem:[%s14830_s1 + $0x280] ss:$16 sps:$4 sm:$0xff]  }
  0x1f   :  { %v9839_v23 = vld [vmem:[%s14830_s1 + $0x288] ss:$16 sps:$4 sm:$0xff]   ;;  %v9844_v24 = vld [vmem:[%s14830_s1 + $0x2a4] ss:$16 sps:$4 sm:$0xff]   ;;  %v9847_v25 = vld [vmem:[%s14830_s1 + $0x2ac] ss:$16 sps:$4 sm:$0xff]  }
  0x20   :  { %v9842_v26 = vld [vmem:[%s14830_s1 + $0x2a0] ss:$16 sps:$4 sm:$0xff]   ;;  %v9845_v27 = vld [vmem:[%s14830_s1 + $0x2a8] ss:$16 sps:$4 sm:$0xff]   ;;  %v9850_v28 = vld [vmem:[%s14830_s1 + $0x2c4] ss:$16 sps:$4 sm:$0xff]  }
  0x21   :  { %3211 = vmatpush1.bf16.msra.mxu0 %v9760_v31  ;;  %3539 = vmatpush1.bf16.msra.mxu1 %v9761_v32  ;;  %v9853_v29 = vld [vmem:[%s14830_s1 + $0x2cc] ss:$16 sps:$4 sm:$0xff]   ;;  %v9848_v32 = vld [vmem:[%s14830_s1 + $0x2c0] ss:$16 sps:$4 sm:$0xff]  }
  0x22   :  { %3212 = vmatprep.subr.bf16.mxu0 %v9762_v33  ;;  %3540 = vmatprep.subr.bf16.mxu1 %v9764_v34  ;;  %v11670_v30 = vld [vmem:[%s14829_s0 + $0x8] sm:$0xff]  ;;  %v9856_v34 = vld [vmem:[%s14830_s1 + $0x2e4] ss:$16 sps:$4 sm:$0xff]  }
  0x23   :  { %v11674_v31 = vcombine.high %v11670_v30, %v11670_v30  ;;  %v9851_v33 = vld [vmem:[%s14830_s1 + $0x2c8] ss:$16 sps:$4 sm:$0xff]   ;;  %v9877_v47 = vld [vmem:[%s14830_s1 + $0x34c] ss:$16 sps:$4 sm:$0xff]  }
  0x25   :  { %3213 = vmatpush1.bf16.msra.mxu0 %v9766_v35  ;;  %3541 = vmatpush1.bf16.msra.mxu1 %v9767_v36  ;;  %v9859_v35 = vld [vmem:[%s14830_s1 + $0x2ec] ss:$16 sps:$4 sm:$0xff]   ;;  %v9854_v36 = vld [vmem:[%s14830_s1 + $0x2e0] ss:$16 sps:$4 sm:$0xff]  }
  0x26   :  { %3214 = vmatprep.subr.bf16.mxu0 %v9768_v37  ;;  %3542 = vmatprep.subr.bf16.mxu1 %v9770_v38  ;;  %v9857_v37 = vld [vmem:[%s14830_s1 + $0x2e8] ss:$16 sps:$4 sm:$0xff]   ;;  %v9862_v38 = vld [vmem:[%s14830_s1 + $0x304] ss:$16 sps:$4 sm:$0xff]  }
  0x29   :  { %3215 = vmatpush1.bf16.msra.mxu0 %v9772_v39  ;;  %3543 = vmatpush1.bf16.msra.mxu1 %v9773_v40  ;;  %v9865_v39 = vld [vmem:[%s14830_s1 + $0x30c] ss:$16 sps:$4 sm:$0xff]   ;;  %v9860_v40 = vld [vmem:[%s14830_s1 + $0x300] ss:$16 sps:$4 sm:$0xff]  }
  0x2a   :  { %3216 = vmatprep.subr.bf16.mxu0 %v9774_v41  ;;  %3544 = vmatprep.subr.bf16.mxu1 %v9776_v42  ;;  %v9863_v41 = vld [vmem:[%s14830_s1 + $0x308] ss:$16 sps:$4 sm:$0xff]   ;;  %v9868_v42 = vld [vmem:[%s14830_s1 + $0x324] ss:$16 sps:$4 sm:$0xff]  }
  0x2d   :  { %3217 = vmatpush1.bf16.msra.mxu0 %v9778_v43  ;;  %3545 = vmatpush1.bf16.msra.mxu1 %v9779_v44  ;;  %v9871_v43 = vld [vmem:[%s14830_s1 + $0x32c] ss:$16 sps:$4 sm:$0xff]   ;;  %v9866_v44 = vld [vmem:[%s14830_s1 + $0x320] ss:$16 sps:$4 sm:$0xff]  }
  0x2e   :  { %3218 = vmatprep.subr.bf16.mxu0 %v9780_v45  ;;  %3546 = vmatprep.subr.bf16.mxu1 %v9782_v46  ;;  %v9869_v45 = vld [vmem:[%s14830_s1 + $0x328] ss:$16 sps:$4 sm:$0xff]   ;;  %v9874_v46 = vld [vmem:[%s14830_s1 + $0x344] ss:$16 sps:$4 sm:$0xff]  }
  0x31   :  { %3219 = vmatpush1.bf16.msra.mxu0 %v9784_v48  ;;  %3547 = vmatpush1.bf16.msra.mxu1 %v9785_v50  ;;  %v9872_v48 = vld [vmem:[%s14830_s1 + $0x340] ss:$16 sps:$4 sm:$0xff]   ;;  %v9875_v50 = vld [vmem:[%s14830_s1 + $0x348] ss:$16 sps:$4 sm:$0xff]  }
  0x32   :  { %3220 = vmatprep.subr.bf16.mxu0 %v9786_v51  ;;  %3548 = vmatprep.subr.bf16.mxu1 %v9788_v52  ;;  %v9880_v51 = vld [vmem:[%s14830_s1 + $0x364] ss:$16 sps:$4 sm:$0xff]   ;;  %v9883_v52 = vld [vmem:[%s14830_s1 + $0x36c] ss:$16 sps:$4 sm:$0xff]  }
  0x35   :  { %3221 = vmatpush1.bf16.msra.mxu0 %v9790_v53  ;;  %3549 = vmatpush1.bf16.msra.mxu1 %v9791_v54  ;;  %v9878_v53 = vld [vmem:[%s14830_s1 + $0x360] ss:$16 sps:$4 sm:$0xff]   ;;  %v9881_v54 = vld [vmem:[%s14830_s1 + $0x368] ss:$16 sps:$4 sm:$0xff]  }
  0x36   :  { %3222 = vmatprep.subr.bf16.mxu0 %v9792_v55  ;;  %3550 = vmatprep.subr.bf16.mxu1 %v9794_v56  ;;  %v9886_v55 = vld [vmem:[%s14830_s1 + $0x384] ss:$16 sps:$4 sm:$0xff]   ;;  %v9889_v56 = vld [vmem:[%s14830_s1 + $0x38c] ss:$16 sps:$4 sm:$0xff]  }
  0x39   :  { %3223 = vmatpush1.bf16.msra.mxu0 %v9796_v57  ;;  %3551 = vmatpush1.bf16.msra.mxu1 %v9797_v58  ;;  %v9884_v57 = vld [vmem:[%s14830_s1 + $0x380] ss:$16 sps:$4 sm:$0xff]   ;;  %v9887_v58 = vld [vmem:[%s14830_s1 + $0x388] ss:$16 sps:$4 sm:$0xff]  }
  0x3a   :  { %3224 = vmatprep.subr.bf16.mxu0 %v9798_v59  ;;  %3552 = vmatprep.subr.bf16.mxu1 %v9800_v60  ;;  %v9892_v59 = vld [vmem:[%s14830_s1 + $0x3a4] ss:$16 sps:$4 sm:$0xff]   ;;  %v9895_v60 = vld [vmem:[%s14830_s1 + $0x3ac] ss:$16 sps:$4 sm:$0xff]  }
  0x3d   :  { %3225 = vmatpush1.bf16.msra.mxu0 %v9802_v61  ;;  %3553 = vmatpush1.bf16.msra.mxu1 %v9803_v62  ;;  %v9890_v61 = vld [vmem:[%s14830_s1 + $0x3a0] ss:$16 sps:$4 sm:$0xff]   ;;  %v9893_v62 = vld [vmem:[%s14830_s1 + $0x3a8] ss:$16 sps:$4 sm:$0xff]  }
  0x3e   :  { %3226 = vmatprep.subr.bf16.mxu0 %v9804_v63  ;;  %3554 = vmatprep.subr.bf16.mxu1 %v9806_v0  ;;  %v9898_v63 = vld [vmem:[%s14830_s1 + $0x3c4] ss:$16 sps:$4 sm:$0xff]   ;;  %v9901_v0 = vld [vmem:[%s14830_s1 + $0x3cc] ss:$16 sps:$4 sm:$0xff]  }
  0x41   :  { %3227 = vmatpush1.bf16.msra.mxu0 %v9808_v1  ;;  %3555 = vmatpush1.bf16.msra.mxu1 %v9809_v2  ;;  %v9896_v1 = vld [vmem:[%s14830_s1 + $0x3c0] ss:$16 sps:$4 sm:$0xff]   ;;  %v9899_v2 = vld [vmem:[%s14830_s1 + $0x3c8] ss:$16 sps:$4 sm:$0xff]  }
  0x42   :  { %3237 = vmatprep.subr.bf16.mxu0 %v9813_v3  ;;  %3565 = vmatprep.subr.bf16.mxu1 %v9816_v4  ;;  %v9904_v3 = vld [vmem:[%s14830_s1 + $0x3e4] ss:$16 sps:$4 sm:$0xff]   ;;  %v9907_v4 = vld [vmem:[%s14830_s1 + $0x3ec] ss:$16 sps:$4 sm:$0xff]  }
  0x44   :  { %3229 = vmatmul.mubr.bf16.vlgmr.msra.gmra.mrb[0].mxu0 %v11594_v6  ;;  %3557 = vmatmul.mubr.bf16.vlgmr.msra.gmra.mrb[0].mxu1 %v11594_v6 }
  0x45   :  { %3238 = vmatpush1.bf16.msra.mxu0 %v9811_v5  ;;  %3566 = vmatpush1.bf16.msra.mxu1 %v9814_v7  ;;  %v9902_v5 = vld [vmem:[%s14830_s1 + $0x3e0] ss:$16 sps:$4 sm:$0xff]   ;;  %v9905_v7 = vld [vmem:[%s14830_s1 + $0x3e8] ss:$16 sps:$4 sm:$0xff]  }
  0x46   :  { %3239 = vmatprep.subr.bf16.mxu0 %v9820_v8  ;;  %3567 = vmatprep.subr.bf16.mxu1 %v9823_v9  ;;  %v9912_v8 = vld [vmem:[%s14830_s1 + $0x404] ss:$16 sps:$4 sm:$0xff]   ;;  %v9915_v9 = vld [vmem:[%s14830_s1 + $0x40c] ss:$16 sps:$4 sm:$0xff]  }
  0x47   :  { %3269 = vmatprep.mubr.bf16.mxu0 %v11674_v31  ;;  %3597 = vmatprep.mubr.bf16.mxu1 %v11674_v31 }
  0x49   :  { %3240 = vmatpush1.bf16.msra.mxu0 %v9818_v10  ;;  %3568 = vmatpush1.bf16.msra.mxu1 %v9821_v11  ;;  %v11800_v10 = vcombine.low %v11670_v30, %v11670_v30  ;;  %v9910_v11 = vld [vmem:[%s14830_s1 + $0x400] ss:$16 sps:$4 sm:$0xff]   ;;  %v9937_v30 = vld [vmem:[%s14830_s1 + $0x488] ss:$16 sps:$4 sm:$0xff]  }
  0x4a   :  { %3241 = vmatprep.subr.bf16.mxu0 %v9826_v12  ;;  %3569 = vmatprep.subr.bf16.mxu1 %v9829_v13  ;;  %v9913_v12 = vld [vmem:[%s14830_s1 + $0x408] ss:$16 sps:$4 sm:$0xff]   ;;  %v9918_v13 = vld [vmem:[%s14830_s1 + $0x424] ss:$16 sps:$4 sm:$0xff]  }
  0x4d   :  { %3242 = vmatpush1.bf16.msra.mxu0 %v9824_v14  ;;  %3570 = vmatpush1.bf16.msra.mxu1 %v9827_v15  ;;  %v11814_v14 = vld [vmem:[%s14829_s0 + $0x10] sm:$0xff]  ;;  %v9921_v15 = vld [vmem:[%s14830_s1 + $0x42c] ss:$16 sps:$4 sm:$0xff]  }
  0x4e   :  { %3243 = vmatprep.subr.bf16.mxu0 %v9832_v16  ;;  %3571 = vmatprep.subr.bf16.mxu1 %v9835_v17  ;;  %v11821_v16 = vcombine.high %v11814_v14, %v11814_v14  ;;  %v9916_v17 = vld [vmem:[%s14830_s1 + $0x420] ss:$16 sps:$4 sm:$0xff]  }
  0x51   :  { %3244 = vmatpush1.bf16.msra.mxu0 %v9830_v18  ;;  %3572 = vmatpush1.bf16.msra.mxu1 %v9833_v19  ;;  %v9919_v18 = vld [vmem:[%s14830_s1 + $0x428] ss:$16 sps:$4 sm:$0xff]   ;;  %v9924_v19 = vld [vmem:[%s14830_s1 + $0x444] ss:$16 sps:$4 sm:$0xff]  }
  0x52   :  { %3245 = vmatprep.subr.bf16.mxu0 %v9838_v20  ;;  %3573 = vmatprep.subr.bf16.mxu1 %v9841_v21  ;;  %v9927_v20 = vld [vmem:[%s14830_s1 + $0x44c] ss:$16 sps:$4 sm:$0xff]   ;;  %v9922_v21 = vld [vmem:[%s14830_s1 + $0x440] ss:$16 sps:$4 sm:$0xff]  }
  0x55   :  { %3246 = vmatpush1.bf16.msra.mxu0 %v9836_v22  ;;  %3574 = vmatpush1.bf16.msra.mxu1 %v9839_v23  ;;  %v9925_v22 = vld [vmem:[%s14830_s1 + $0x448] ss:$16 sps:$4 sm:$0xff]   ;;  %v9930_v23 = vld [vmem:[%s14830_s1 + $0x464] ss:$16 sps:$4 sm:$0xff]  }
  0x56   :  { %3247 = vmatprep.subr.bf16.mxu0 %v9844_v24  ;;  %3575 = vmatprep.subr.bf16.mxu1 %v9847_v25  ;;  %v9933_v24 = vld [vmem:[%s14830_s1 + $0x46c] ss:$16 sps:$4 sm:$0xff]   ;;  %v9928_v25 = vld [vmem:[%s14830_s1 + $0x460] ss:$16 sps:$4 sm:$0xff]  }
  0x59   :  { %3248 = vmatpush1.bf16.msra.mxu0 %v9842_v26  ;;  %3576 = vmatpush1.bf16.msra.mxu1 %v9845_v27  ;;  %v9931_v26 = vld [vmem:[%s14830_s1 + $0x468] ss:$16 sps:$4 sm:$0xff]   ;;  %v9936_v27 = vld [vmem:[%s14830_s1 + $0x484] ss:$16 sps:$4 sm:$0xff]  }
  0x5a   :  { %3249 = vmatprep.subr.bf16.mxu0 %v9850_v28  ;;  %3577 = vmatprep.subr.bf16.mxu1 %v9853_v29  ;;  %v9939_v28 = vld [vmem:[%s14830_s1 + $0x48c] ss:$16 sps:$4 sm:$0xff]   ;;  %v9934_v29 = vld [vmem:[%s14830_s1 + $0x480] ss:$16 sps:$4 sm:$0xff]  }
  0x5d   :  { %3250 = vmatpush1.bf16.msra.mxu0 %v9848_v32  ;;  %3578 = vmatpush1.bf16.msra.mxu1 %v9851_v33  ;;  %v9942_v32 = vld [vmem:[%s14830_s1 + $0x4a4] ss:$16 sps:$4 sm:$0xff]   ;;  %v9945_v33 = vld [vmem:[%s14830_s1 + $0x4ac] ss:$16 sps:$4 sm:$0xff]  }
  0x5e   :  { %3251 = vmatprep.subr.bf16.mxu0 %v9856_v34  ;;  %3579 = vmatprep.subr.bf16.mxu1 %v9859_v35  ;;  %v9940_v34 = vld [vmem:[%s14830_s1 + $0x4a0] ss:$16 sps:$4 sm:$0xff]   ;;  %v9943_v35 = vld [vmem:[%s14830_s1 + $0x4a8] ss:$16 sps:$4 sm:$0xff]  }
  0x61   :  { %3252 = vmatpush1.bf16.msra.mxu0 %v9854_v36  ;;  %3580 = vmatpush1.bf16.msra.mxu1 %v9857_v37  ;;  %v9948_v36 = vld [vmem:[%s14830_s1 + $0x4c4] ss:$16 sps:$4 sm:$0xff]   ;;  %v9951_v37 = vld [vmem:[%s14830_s1 + $0x4cc] ss:$16 sps:$4 sm:$0xff]  }
  0x62   :  { %3253 = vmatprep.subr.bf16.mxu0 %v9862_v38  ;;  %3581 = vmatprep.subr.bf16.mxu1 %v9865_v39  ;;  %v9946_v38 = vld [vmem:[%s14830_s1 + $0x4c0] ss:$16 sps:$4 sm:$0xff]   ;;  %v9949_v39 = vld [vmem:[%s14830_s1 + $0x4c8] ss:$16 sps:$4 sm:$0xff]  }
  0x65   :  { %3254 = vmatpush1.bf16.msra.mxu0 %v9860_v40  ;;  %3582 = vmatpush1.bf16.msra.mxu1 %v9863_v41  ;;  %v9954_v40 = vld [vmem:[%s14830_s1 + $0x4e4] ss:$16 sps:$4 sm:$0xff]   ;;  %v9957_v41 = vld [vmem:[%s14830_s1 + $0x4ec] ss:$16 sps:$4 sm:$0xff]  }
  0x66   :  { %3255 = vmatprep.subr.bf16.mxu0 %v9868_v42  ;;  %3583 = vmatprep.subr.bf16.mxu1 %v9871_v43  ;;  %v9952_v42 = vld [vmem:[%s14830_s1 + $0x4e0] ss:$16 sps:$4 sm:$0xff]   ;;  %v9955_v43 = vld [vmem:[%s14830_s1 + $0x4e8] ss:$16 sps:$4 sm:$0xff]  }
  0x69   :  { %3256 = vmatpush1.bf16.msra.mxu0 %v9866_v44  ;;  %3584 = vmatpush1.bf16.msra.mxu1 %v9869_v45  ;;  %v9960_v44 = vld [vmem:[%s14830_s1 + $0x504] ss:$16 sps:$4 sm:$0xff]   ;;  %v9963_v45 = vld [vmem:[%s14830_s1 + $0x50c] ss:$16 sps:$4 sm:$0xff]  }
  0x6a   :  { %3257 = vmatprep.subr.bf16.mxu0 %v9874_v46  ;;  %3585 = vmatprep.subr.bf16.mxu1 %v9877_v47  ;;  %v9958_v46 = vld [vmem:[%s14830_s1 + $0x500] ss:$16 sps:$4 sm:$0xff]   ;;  %v9961_v47 = vld [vmem:[%s14830_s1 + $0x508] ss:$16 sps:$4 sm:$0xff]  }
  0x6d   :  { %3258 = vmatpush1.bf16.msra.mxu0 %v9872_v48  ;;  %3586 = vmatpush1.bf16.msra.mxu1 %v9875_v50  ;;  %v9966_v48 = vld [vmem:[%s14830_s1 + $0x524] ss:$16 sps:$4 sm:$0xff]   ;;  %v9969_v50 = vld [vmem:[%s14830_s1 + $0x52c] ss:$16 sps:$4 sm:$0xff]  }
  0x6e   :  { %3259 = vmatprep.subr.bf16.mxu0 %v9880_v51  ;;  %3587 = vmatprep.subr.bf16.mxu1 %v9883_v52  ;;  %v9964_v51 = vld [vmem:[%s14830_s1 + $0x520] ss:$16 sps:$4 sm:$0xff]   ;;  %v9967_v52 = vld [vmem:[%s14830_s1 + $0x528] ss:$16 sps:$4 sm:$0xff]  }
  0x71   :  { %3260 = vmatpush1.bf16.msra.mxu0 %v9878_v53  ;;  %3588 = vmatpush1.bf16.msra.mxu1 %v9881_v54  ;;  %v9972_v53 = vld [vmem:[%s14830_s1 + $0x544] ss:$16 sps:$4 sm:$0xff]   ;;  %v9975_v54 = vld [vmem:[%s14830_s1 + $0x54c] ss:$16 sps:$4 sm:$0xff]  }
  0x72   :  { %3261 = vmatprep.subr.bf16.mxu0 %v9886_v55  ;;  %3589 = vmatprep.subr.bf16.mxu1 %v9889_v56  ;;  %v9970_v55 = vld [vmem:[%s14830_s1 + $0x540] ss:$16 sps:$4 sm:$0xff]   ;;  %v9973_v56 = vld [vmem:[%s14830_s1 + $0x548] ss:$16 sps:$4 sm:$0xff]  }
  0x75   :  { %3262 = vmatpush1.bf16.msra.mxu0 %v9884_v57  ;;  %3590 = vmatpush1.bf16.msra.mxu1 %v9887_v58  ;;  %v9978_v57 = vld [vmem:[%s14830_s1 + $0x564] ss:$16 sps:$4 sm:$0xff]   ;;  %v9981_v58 = vld [vmem:[%s14830_s1 + $0x56c] ss:$16 sps:$4 sm:$0xff]  }
  0x76   :  { %3263 = vmatprep.subr.bf16.mxu0 %v9892_v59  ;;  %3591 = vmatprep.subr.bf16.mxu1 %v9895_v60  ;;  %v9976_v59 = vld [vmem:[%s14830_s1 + $0x560] ss:$16 sps:$4 sm:$0xff]   ;;  %v9979_v60 = vld [vmem:[%s14830_s1 + $0x568] ss:$16 sps:$4 sm:$0xff]  }
  0x79   :  { %3264 = vmatpush1.bf16.msra.mxu0 %v9890_v61  ;;  %3592 = vmatpush1.bf16.msra.mxu1 %v9893_v62  ;;  %v9984_v61 = vld [vmem:[%s14830_s1 + $0x584] ss:$16 sps:$4 sm:$0xff]   ;;  %v9987_v62 = vld [vmem:[%s14830_s1 + $0x58c] ss:$16 sps:$4 sm:$0xff]  }
  0x7a   :  { %3265 = vmatprep.subr.bf16.mxu0 %v9898_v63  ;;  %3593 = vmatprep.subr.bf16.mxu1 %v9901_v0  ;;  %v9982_v63 = vld [vmem:[%s14830_s1 + $0x580] ss:$16 sps:$4 sm:$0xff]   ;;  %v9985_v0 = vld [vmem:[%s14830_s1 + $0x588] ss:$16 sps:$4 sm:$0xff]  }
  0x7d   :  { %3266 = vmatpush1.bf16.msra.mxu0 %v9896_v1  ;;  %3594 = vmatpush1.bf16.msra.mxu1 %v9899_v2  ;;  %v9990_v1 = vld [vmem:[%s14830_s1 + $0x5a4] ss:$16 sps:$4 sm:$0xff]   ;;  %v9993_v2 = vld [vmem:[%s14830_s1 + $0x5ac] ss:$16 sps:$4 sm:$0xff]  }
  0x7e   :  { %3267 = vmatprep.subr.bf16.mxu0 %v9904_v3  ;;  %3595 = vmatprep.subr.bf16.mxu1 %v9907_v4  ;;  %v9988_v3 = vld [vmem:[%s14830_s1 + $0x5a0] ss:$16 sps:$4 sm:$0xff]   ;;  %v9991_v4 = vld [vmem:[%s14830_s1 + $0x5a8] ss:$16 sps:$4 sm:$0xff]  }
  0x81   :  { %3268 = vmatpush1.bf16.msra.mxu0 %v9902_v5  ;;  %3596 = vmatpush1.bf16.msra.mxu1 %v9905_v7  ;;  %v9996_v5 = vld [vmem:[%s14830_s1 + $0x5c4] ss:$16 sps:$4 sm:$0xff]   ;;  %v9999_v7 = vld [vmem:[%s14830_s1 + $0x5cc] ss:$16 sps:$4 sm:$0xff]  }
  0x82   :  { %3278 = vmatprep.subr.bf16.mxu0 %v9912_v8  ;;  %3606 = vmatprep.subr.bf16.mxu1 %v9915_v9  ;;  %v9994_v8 = vld [vmem:[%s14830_s1 + $0x5c0] ss:$16 sps:$4 sm:$0xff]   ;;  %v9997_v9 = vld [vmem:[%s14830_s1 + $0x5c8] ss:$16 sps:$4 sm:$0xff]  }
  0x84   :  { %3270 = vmatmul.mubr.bf16.vlgmr.msra.gmra.mrb[0].mxu0 %v11800_v10  ;;  %3598 = vmatmul.mubr.bf16.vlgmr.msra.gmra.mrb[0].mxu1 %v11800_v10 }
  0x85   :  { %3279 = vmatpush1.bf16.msra.mxu0 %v9910_v11  ;;  %3607 = vmatpush1.bf16.msra.mxu1 %v9913_v12  ;;  %v10002_v11 = vld [vmem:[%s14830_s1 + $0x5e4] ss:$16 sps:$4 sm:$0xff]   ;;  %v10005_v12 = vld [vmem:[%s14830_s1 + $0x5ec] ss:$16 sps:$4 sm:$0xff]  }
  0x86   :  { %3280 = vmatprep.subr.bf16.mxu0 %v9918_v13  ;;  %3608 = vmatprep.subr.bf16.mxu1 %v9921_v15  ;;  %v10000_v13 = vld [vmem:[%s14830_s1 + $0x5e0] ss:$16 sps:$4 sm:$0xff]   ;;  %v10003_v15 = vld [vmem:[%s14830_s1 + $0x5e8] ss:$16 sps:$4 sm:$0xff]  }
  0x87   :  { %3310 = vmatprep.mubr.bf16.mxu0 %v11821_v16  ;;  %3638 = vmatprep.mubr.bf16.mxu1 %v11821_v16 }
  0x89   :  { %3281 = vmatpush1.bf16.msra.mxu0 %v9916_v17  ;;  %3609 = vmatpush1.bf16.msra.mxu1 %v9919_v18  ;;  %v10010_v17 = vld [vmem:[%s14830_s1 + $0x604] ss:$16 sps:$4 sm:$0xff]   ;;  %v10013_v18 = vld [vmem:[%s14830_s1 + $0x60c] ss:$16 sps:$4 sm:$0xff]  }
  0x8a   :  { %3282 = vmatprep.subr.bf16.mxu0 %v9924_v19  ;;  %3610 = vmatprep.subr.bf16.mxu1 %v9927_v20  ;;  %v10008_v19 = vld [vmem:[%s14830_s1 + $0x600] ss:$16 sps:$4 sm:$0xff]   ;;  %v12012_v20 = vcombine.low %v11814_v14, %v11814_v14  ;;  %v10019_v14 = vld [vmem:[%s14830_s1 + $0x62c] ss:$16 sps:$4 sm:$0xff]  }
  0x8d   :  { %3283 = vmatpush1.bf16.msra.mxu0 %v9922_v21  ;;  %3611 = vmatpush1.bf16.msra.mxu1 %v9925_v22  ;;  %v10011_v21 = vld [vmem:[%s14830_s1 + $0x608] ss:$16 sps:$4 sm:$0xff]  }
  0x8e   :  { %3284 = vmatprep.subr.bf16.mxu0 %v9930_v23  ;;  %3612 = vmatprep.subr.bf16.mxu1 %v9933_v24  ;;  %v12020_v22 = vld [vmem:[%s14829_s0 + $0x18] sm:$0xff]  ;;  %v10016_v23 = vld [vmem:[%s14830_s1 + $0x624] ss:$16 sps:$4 sm:$0xff]  }
  0x8f   :  { %v12030_v24 = vcombine.high %v12020_v22, %v12020_v22 }
  0x91   :  { %3285 = vmatpush1.bf16.msra.mxu0 %v9928_v25  ;;  %3613 = vmatpush1.bf16.msra.mxu1 %v9931_v26  ;;  %v10014_v25 = vld [vmem:[%s14830_s1 + $0x620] ss:$16 sps:$4 sm:$0xff]   ;;  %v10017_v26 = vld [vmem:[%s14830_s1 + $0x628] ss:$16 sps:$4 sm:$0xff]  }
  0x92   :  { %3286 = vmatprep.subr.bf16.mxu0 %v9936_v27  ;;  %3614 = vmatprep.subr.bf16.mxu1 %v9939_v28  ;;  %v10022_v27 = vld [vmem:[%s14830_s1 + $0x644] ss:$16 sps:$4 sm:$0xff]   ;;  %v10025_v28 = vld [vmem:[%s14830_s1 + $0x64c] ss:$16 sps:$4 sm:$0xff]  }
  0x95   :  { %3287 = vmatpush1.bf16.msra.mxu0 %v9934_v29  ;;  %3615 = vmatpush1.bf16.msra.mxu1 %v9937_v30  ;;  %v10020_v29 = vld [vmem:[%s14830_s1 + $0x640] ss:$16 sps:$4 sm:$0xff]   ;;  %v10023_v30 = vld [vmem:[%s14830_s1 + $0x648] ss:$16 sps:$4 sm:$0xff]  }
  0x96   :  { %3288 = vmatprep.subr.bf16.mxu0 %v9942_v32  ;;  %3616 = vmatprep.subr.bf16.mxu1 %v9945_v33  ;;  %v10028_v32 = vld [vmem:[%s14830_s1 + $0x664] ss:$16 sps:$4 sm:$0xff]   ;;  %v10031_v33 = vld [vmem:[%s14830_s1 + $0x66c] ss:$16 sps:$4 sm:$0xff]  }
  0x99   :  { %3289 = vmatpush1.bf16.msra.mxu0 %v9940_v34  ;;  %3617 = vmatpush1.bf16.msra.mxu1 %v9943_v35  ;;  %v10026_v34 = vld [vmem:[%s14830_s1 + $0x660] ss:$16 sps:$4 sm:$0xff]   ;;  %v10029_v35 = vld [vmem:[%s14830_s1 + $0x668] ss:$16 sps:$4 sm:$0xff]  }
  0x9a   :  { %3290 = vmatprep.subr.bf16.mxu0 %v9948_v36  ;;  %3618 = vmatprep.subr.bf16.mxu1 %v9951_v37  ;;  %v10034_v36 = vld [vmem:[%s14830_s1 + $0x684] ss:$16 sps:$4 sm:$0xff]   ;;  %v10037_v37 = vld [vmem:[%s14830_s1 + $0x68c] ss:$16 sps:$4 sm:$0xff]  }
  0x9d   :  { %3291 = vmatpush1.bf16.msra.mxu0 %v9946_v38  ;;  %3619 = vmatpush1.bf16.msra.mxu1 %v9949_v39  ;;  %v10032_v38 = vld [vmem:[%s14830_s1 + $0x680] ss:$16 sps:$4 sm:$0xff]   ;;  %v10035_v39 = vld [vmem:[%s14830_s1 + $0x688] ss:$16 sps:$4 sm:$0xff]  }
  0x9e   :  { %3292 = vmatprep.subr.bf16.mxu0 %v9954_v40  ;;  %3620 = vmatprep.subr.bf16.mxu1 %v9957_v41  ;;  %v10040_v40 = vld [vmem:[%s14830_s1 + $0x6a4] ss:$16 sps:$4 sm:$0xff]   ;;  %v10043_v41 = vld [vmem:[%s14830_s1 + $0x6ac] ss:$16 sps:$4 sm:$0xff]  }
  0xa1   :  { %3293 = vmatpush1.bf16.msra.mxu0 %v9952_v42  ;;  %3621 = vmatpush1.bf16.msra.mxu1 %v9955_v43  ;;  %v10038_v42 = vld [vmem:[%s14830_s1 + $0x6a0] ss:$16 sps:$4 sm:$0xff]   ;;  %v10041_v43 = vld [vmem:[%s14830_s1 + $0x6a8] ss:$16 sps:$4 sm:$0xff]  }
  0xa2   :  { %3294 = vmatprep.subr.bf16.mxu0 %v9960_v44  ;;  %3622 = vmatprep.subr.bf16.mxu1 %v9963_v45  ;;  %v10046_v44 = vld [vmem:[%s14830_s1 + $0x6c4] ss:$16 sps:$4 sm:$0xff]   ;;  %v10049_v45 = vld [vmem:[%s14830_s1 + $0x6cc] ss:$16 sps:$4 sm:$0xff]  }
  0xa5   :  { %3295 = vmatpush1.bf16.msra.mxu0 %v9958_v46  ;;  %3623 = vmatpush1.bf16.msra.mxu1 %v9961_v47  ;;  %v10044_v46 = vld [vmem:[%s14830_s1 + $0x6c0] ss:$16 sps:$4 sm:$0xff]   ;;  %v10047_v47 = vld [vmem:[%s14830_s1 + $0x6c8] ss:$16 sps:$4 sm:$0xff]  }
  0xa6   :  { %3296 = vmatprep.subr.bf16.mxu0 %v9966_v48  ;;  %3624 = vmatprep.subr.bf16.mxu1 %v9969_v50  ;;  %v10052_v48 = vld [vmem:[%s14830_s1 + $0x6e4] ss:$16 sps:$4 sm:$0xff]   ;;  %v10055_v50 = vld [vmem:[%s14830_s1 + $0x6ec] ss:$16 sps:$4 sm:$0xff]  }
  0xa9   :  { %3297 = vmatpush1.bf16.msra.mxu0 %v9964_v51  ;;  %3625 = vmatpush1.bf16.msra.mxu1 %v9967_v52  ;;  %v10050_v51 = vld [vmem:[%s14830_s1 + $0x6e0] ss:$16 sps:$4 sm:$0xff]   ;;  %v10053_v52 = vld [vmem:[%s14830_s1 + $0x6e8] ss:$16 sps:$4 sm:$0xff]  }
  0xaa   :  { %3298 = vmatprep.subr.bf16.mxu0 %v9972_v53  ;;  %3626 = vmatprep.subr.bf16.mxu1 %v9975_v54  ;;  %v10058_v53 = vld [vmem:[%s14830_s1 + $0x704] ss:$16 sps:$4 sm:$0xff]   ;;  %v10061_v54 = vld [vmem:[%s14830_s1 + $0x70c] ss:$16 sps:$4 sm:$0xff]  }
  0xad   :  { %3299 = vmatpush1.bf16.msra.mxu0 %v9970_v55  ;;  %3627 = vmatpush1.bf16.msra.mxu1 %v9973_v56  ;;  %v10056_v55 = vld [vmem:[%s14830_s1 + $0x700] ss:$16 sps:$4 sm:$0xff]   ;;  %v10059_v56 = vld [vmem:[%s14830_s1 + $0x708] ss:$16 sps:$4 sm:$0xff]  }
  0xae   :  { %3300 = vmatprep.subr.bf16.mxu0 %v9978_v57  ;;  %3628 = vmatprep.subr.bf16.mxu1 %v9981_v58  ;;  %v10064_v57 = vld [vmem:[%s14830_s1 + $0x724] ss:$16 sps:$4 sm:$0xff]   ;;  %v10067_v58 = vld [vmem:[%s14830_s1 + $0x72c] ss:$16 sps:$4 sm:$0xff]  }
  0xb1   :  { %3301 = vmatpush1.bf16.msra.mxu0 %v9976_v59  ;;  %3629 = vmatpush1.bf16.msra.mxu1 %v9979_v60  ;;  %v10062_v59 = vld [vmem:[%s14830_s1 + $0x720] ss:$16 sps:$4 sm:$0xff]   ;;  %v10065_v60 = vld [vmem:[%s14830_s1 + $0x728] ss:$16 sps:$4 sm:$0xff]  }
  0xb2   :  { %3302 = vmatprep.subr.bf16.mxu0 %v9984_v61  ;;  %3630 = vmatprep.subr.bf16.mxu1 %v9987_v62  ;;  %v10070_v61 = vld [vmem:[%s14830_s1 + $0x744] ss:$16 sps:$4 sm:$0xff]   ;;  %v10073_v62 = vld [vmem:[%s14830_s1 + $0x74c] ss:$16 sps:$4 sm:$0xff]  }
  0xb5   :  { %3303 = vmatpush1.bf16.msra.mxu0 %v9982_v63  ;;  %3631 = vmatpush1.bf16.msra.mxu1 %v9985_v0  ;;  %v10068_v63 = vld [vmem:[%s14830_s1 + $0x740] ss:$16 sps:$4 sm:$0xff]   ;;  %v10071_v0 = vld [vmem:[%s14830_s1 + $0x748] ss:$16 sps:$4 sm:$0xff]  }
  0xb6   :  { %3304 = vmatprep.subr.bf16.mxu0 %v9990_v1  ;;  %3632 = vmatprep.subr.bf16.mxu1 %v9993_v2  ;;  %v10076_v1 = vld [vmem:[%s14830_s1 + $0x764] ss:$16 sps:$4 sm:$0xff]   ;;  %v10079_v2 = vld [vmem:[%s14830_s1 + $0x76c] ss:$16 sps:$4 sm:$0xff]  }
  0xb9   :  { %3305 = vmatpush1.bf16.msra.mxu0 %v9988_v3  ;;  %3633 = vmatpush1.bf16.msra.mxu1 %v9991_v4  ;;  %v10074_v3 = vld [vmem:[%s14830_s1 + $0x760] ss:$16 sps:$4 sm:$0xff]   ;;  %v10077_v4 = vld [vmem:[%s14830_s1 + $0x768] ss:$16 sps:$4 sm:$0xff]  }
  0xba   :  { %3306 = vmatprep.subr.bf16.mxu0 %v9996_v5  ;;  %3634 = vmatprep.subr.bf16.mxu1 %v9999_v7  ;;  %v10082_v5 = vld [vmem:[%s14830_s1 + $0x784] ss:$16 sps:$4 sm:$0xff]   ;;  %v10085_v7 = vld [vmem:[%s14830_s1 + $0x78c] ss:$16 sps:$4 sm:$0xff]  }
  0xbd   :  { %3307 = vmatpush1.bf16.msra.mxu0 %v9994_v8  ;;  %3635 = vmatpush1.bf16.msra.mxu1 %v9997_v9  ;;  %v10080_v8 = vld [vmem:[%s14830_s1 + $0x780] ss:$16 sps:$4 sm:$0xff]   ;;  %v10083_v9 = vld [vmem:[%s14830_s1 + $0x788] ss:$16 sps:$4 sm:$0xff]  }
  0xbe   :  { %3308 = vmatprep.subr.bf16.mxu0 %v10002_v11  ;;  %3636 = vmatprep.subr.bf16.mxu1 %v10005_v12  ;;  %v10088_v11 = vld [vmem:[%s14830_s1 + $0x7a4] ss:$16 sps:$4 sm:$0xff]   ;;  %v10091_v12 = vld [vmem:[%s14830_s1 + $0x7ac] ss:$16 sps:$4 sm:$0xff]  }
  0xc1   :  { %3309 = vmatpush1.bf16.msra.mxu0 %v10000_v13  ;;  %3637 = vmatpush1.bf16.msra.mxu1 %v10003_v15  ;;  %v10086_v13 = vld [vmem:[%s14830_s1 + $0x7a0] ss:$16 sps:$4 sm:$0xff]   ;;  %v10089_v15 = vld [vmem:[%s14830_s1 + $0x7a8] ss:$16 sps:$4 sm:$0xff]  }
  0xc2   :  { %3319 = vmatprep.subr.bf16.mxu0 %v10010_v17  ;;  %3647 = vmatprep.subr.bf16.mxu1 %v10013_v18  ;;  %v10094_v17 = vld [vmem:[%s14830_s1 + $0x7c4] ss:$16 sps:$4 sm:$0xff]   ;;  %v10097_v18 = vld [vmem:[%s14830_s1 + $0x7cc] ss:$16 sps:$4 sm:$0xff]  }
  0xc4   :  { %3311 = vmatmul.mubr.bf16.vlgmr.msra.gmra.mrb[0].mxu0 %v12012_v20  ;;  %3639 = vmatmul.mubr.bf16.vlgmr.msra.gmra.mrb[0].mxu1 %v12012_v20 }
  0xc5   :  { %3320 = vmatpush1.bf16.msra.mxu0 %v10008_v19  ;;  %3648 = vmatpush1.bf16.msra.mxu1 %v10011_v21  ;;  %v10092_v19 = vld [vmem:[%s14830_s1 + $0x7c0] ss:$16 sps:$4 sm:$0xff]   ;;  %v10095_v21 = vld [vmem:[%s14830_s1 + $0x7c8] ss:$16 sps:$4 sm:$0xff]  }
  0xc6   :  { %3321 = vmatprep.subr.bf16.mxu0 %v10016_v23  ;;  %3649 = vmatprep.subr.bf16.mxu1 %v10019_v14  ;;  %v10100_v23 = vld [vmem:[%s14830_s1 + $0x7e4] ss:$16 sps:$4 sm:$0xff]   ;;  %v10103_v14 = vld [vmem:[%s14830_s1 + $0x7ec] ss:$16 sps:$4 sm:$0xff]  }
  0xc7   :  { %3351 = vmatprep.mubr.bf16.mxu0 %v12030_v24  ;;  %3679 = vmatprep.mubr.bf16.mxu1 %v12030_v24 }
  0xc9   :  { %3322 = vmatpush1.bf16.msra.mxu0 %v10014_v25  ;;  %3650 = vmatpush1.bf16.msra.mxu1 %v10017_v26  ;;  %v10098_v25 = vld [vmem:[%s14830_s1 + $0x7e0] ss:$16 sps:$4 sm:$0xff]   ;;  %v10101_v26 = vld [vmem:[%s14830_s1 + $0x7e8] ss:$16 sps:$4 sm:$0xff]  }
  0xca   :  { %3323 = vmatprep.subr.bf16.mxu0 %v10022_v27  ;;  %3651 = vmatprep.subr.bf16.mxu1 %v10025_v28  ;;  %v10108_v27 = vld [vmem:[%s14830_s1 + $0x804] ss:$16 sps:$4 sm:$0xff]   ;;  %v10111_v28 = vld [vmem:[%s14830_s1 + $0x80c] ss:$16 sps:$4 sm:$0xff]  }
  0xcd   :  { %3324 = vmatpush1.bf16.msra.mxu0 %v10020_v29  ;;  %3652 = vmatpush1.bf16.msra.mxu1 %v10023_v30  ;;  %v10106_v29 = vld [vmem:[%s14830_s1 + $0x800] ss:$16 sps:$4 sm:$0xff]   ;;  %v12221_v30 = vcombine.low %v12020_v22, %v12020_v22  ;;  %v10117_v22 = vld [vmem:[%s14830_s1 + $0x82c] ss:$16 sps:$4 sm:$0xff]  }
  0xce   :  { %3325 = vmatprep.subr.bf16.mxu0 %v10028_v32  ;;  %3653 = vmatprep.subr.bf16.mxu1 %v10031_v33  ;;  %v12226_v32 = vld [vmem:[%s14829_s0 + $0x20] sm:$0xff]  ;;  %v10109_v33 = vld [vmem:[%s14830_s1 + $0x808] ss:$16 sps:$4 sm:$0xff]  }
  0xd1   :  { %3326 = vmatpush1.bf16.msra.mxu0 %v10026_v34  ;;  %3654 = vmatpush1.bf16.msra.mxu1 %v10029_v35  ;;  %v10114_v34 = vld [vmem:[%s14830_s1 + $0x824] ss:$16 sps:$4 sm:$0xff]   ;;  %v12239_v35 = vcombine.high %v12226_v32, %v12226_v32 }
  0xd2   :  { %3327 = vmatprep.subr.bf16.mxu0 %v10034_v36  ;;  %3655 = vmatprep.subr.bf16.mxu1 %v10037_v37  ;;  %v10112_v36 = vld [vmem:[%s14830_s1 + $0x820] ss:$16 sps:$4 sm:$0xff]   ;;  %v10115_v37 = vld [vmem:[%s14830_s1 + $0x828] ss:$16 sps:$4 sm:$0xff]  }
  0xd5   :  { %3328 = vmatpush1.bf16.msra.mxu0 %v10032_v38  ;;  %3656 = vmatpush1.bf16.msra.mxu1 %v10035_v39  ;;  %v10120_v38 = vld [vmem:[%s14830_s1 + $0x844] ss:$16 sps:$4 sm:$0xff]   ;;  %v10123_v39 = vld [vmem:[%s14830_s1 + $0x84c] ss:$16 sps:$4 sm:$0xff]  }
  0xd6   :  { %3329 = vmatprep.subr.bf16.mxu0 %v10040_v40  ;;  %3657 = vmatprep.subr.bf16.mxu1 %v10043_v41  ;;  %v10118_v40 = vld [vmem:[%s14830_s1 + $0x840] ss:$16 sps:$4 sm:$0xff]   ;;  %v10121_v41 = vld [vmem:[%s14830_s1 + $0x848] ss:$16 sps:$4 sm:$0xff]  }
  0xd9   :  { %3330 = vmatpush1.bf16.msra.mxu0 %v10038_v42  ;;  %3658 = vmatpush1.bf16.msra.mxu1 %v10041_v43  ;;  %v10126_v42 = vld [vmem:[%s14830_s1 + $0x864] ss:$16 sps:$4 sm:$0xff]   ;;  %v10129_v43 = vld [vmem:[%s14830_s1 + $0x86c] ss:$16 sps:$4 sm:$0xff]  }
  0xda   :  { %3331 = vmatprep.subr.bf16.mxu0 %v10046_v44  ;;  %3659 = vmatprep.subr.bf16.mxu1 %v10049_v45  ;;  %v10124_v44 = vld [vmem:[%s14830_s1 + $0x860] ss:$16 sps:$4 sm:$0xff]   ;;  %v10127_v45 = vld [vmem:[%s14830_s1 + $0x868] ss:$16 sps:$4 sm:$0xff]  }
  0xdd   :  { %3332 = vmatpush1.bf16.msra.mxu0 %v10044_v46  ;;  %3660 = vmatpush1.bf16.msra.mxu1 %v10047_v47  ;;  %v10132_v46 = vld [vmem:[%s14830_s1 + $0x884] ss:$16 sps:$4 sm:$0xff]   ;;  %v10135_v47 = vld [vmem:[%s14830_s1 + $0x88c] ss:$16 sps:$4 sm:$0xff]  }
  0xde   :  { %3333 = vmatprep.subr.bf16.mxu0 %v10052_v48  ;;  %3661 = vmatprep.subr.bf16.mxu1 %v10055_v50  ;;  %v10130_v48 = vld [vmem:[%s14830_s1 + $0x880] ss:$16 sps:$4 sm:$0xff]   ;;  %v10133_v50 = vld [vmem:[%s14830_s1 + $0x888] ss:$16 sps:$4 sm:$0xff]  }
  0xe1   :  { %3334 = vmatpush1.bf16.msra.mxu0 %v10050_v51  ;;  %3662 = vmatpush1.bf16.msra.mxu1 %v10053_v52  ;;  %v10138_v51 = vld [vmem:[%s14830_s1 + $0x8a4] ss:$16 sps:$4 sm:$0xff]   ;;  %v10141_v52 = vld [vmem:[%s14830_s1 + $0x8ac] ss:$16 sps:$4 sm:$0xff]  }
  0xe2   :  { %3335 = vmatprep.subr.bf16.mxu0 %v10058_v53  ;;  %3663 = vmatprep.subr.bf16.mxu1 %v10061_v54  ;;  %v10136_v53 = vld [vmem:[%s14830_s1 + $0x8a0] ss:$16 sps:$4 sm:$0xff]   ;;  %v10139_v54 = vld [vmem:[%s14830_s1 + $0x8a8] ss:$16 sps:$4 sm:$0xff]  }
  0xe5   :  { %3336 = vmatpush1.bf16.msra.mxu0 %v10056_v55  ;;  %3664 = vmatpush1.bf16.msra.mxu1 %v10059_v56  ;;  %v10144_v55 = vld [vmem:[%s14830_s1 + $0x8c4] ss:$16 sps:$4 sm:$0xff]   ;;  %v10147_v56 = vld [vmem:[%s14830_s1 + $0x8cc] ss:$16 sps:$4 sm:$0xff]  }
  0xe6   :  { %3337 = vmatprep.subr.bf16.mxu0 %v10064_v57  ;;  %3665 = vmatprep.subr.bf16.mxu1 %v10067_v58  ;;  %v10142_v57 = vld [vmem:[%s14830_s1 + $0x8c0] ss:$16 sps:$4 sm:$0xff]   ;;  %v10145_v58 = vld [vmem:[%s14830_s1 + $0x8c8] ss:$16 sps:$4 sm:$0xff]  }
  0xe9   :  { %3338 = vmatpush1.bf16.msra.mxu0 %v10062_v59  ;;  %3666 = vmatpush1.bf16.msra.mxu1 %v10065_v60  ;;  %v10150_v59 = vld [vmem:[%s14830_s1 + $0x8e4] ss:$16 sps:$4 sm:$0xff]   ;;  %v10153_v60 = vld [vmem:[%s14830_s1 + $0x8ec] ss:$16 sps:$4 sm:$0xff]  }
  0xea   :  { %3339 = vmatprep.subr.bf16.mxu0 %v10070_v61  ;;  %3667 = vmatprep.subr.bf16.mxu1 %v10073_v62  ;;  %v10148_v61 = vld [vmem:[%s14830_s1 + $0x8e0] ss:$16 sps:$4 sm:$0xff]   ;;  %v10151_v62 = vld [vmem:[%s14830_s1 + $0x8e8] ss:$16 sps:$4 sm:$0xff]  }
  0xed   :  { %3340 = vmatpush1.bf16.msra.mxu0 %v10068_v63  ;;  %3668 = vmatpush1.bf16.msra.mxu1 %v10071_v0  ;;  %v10156_v63 = vld [vmem:[%s14830_s1 + $0x904] ss:$16 sps:$4 sm:$0xff]   ;;  %v10159_v0 = vld [vmem:[%s14830_s1 + $0x90c] ss:$16 sps:$4 sm:$0xff]  }
  0xee   :  { %3341 = vmatprep.subr.bf16.mxu0 %v10076_v1  ;;  %3669 = vmatprep.subr.bf16.mxu1 %v10079_v2  ;;  %v10154_v1 = vld [vmem:[%s14830_s1 + $0x900] ss:$16 sps:$4 sm:$0xff]   ;;  %v10157_v2 = vld [vmem:[%s14830_s1 + $0x908] ss:$16 sps:$4 sm:$0xff]  }
  0xf1   :  { %3342 = vmatpush1.bf16.msra.mxu0 %v10074_v3  ;;  %3670 = vmatpush1.bf16.msra.mxu1 %v10077_v4  ;;  %v10162_v3 = vld [vmem:[%s14830_s1 + $0x924] ss:$16 sps:$4 sm:$0xff]   ;;  %v10165_v4 = vld [vmem:[%s14830_s1 + $0x92c] ss:$16 sps:$4 sm:$0xff]  }
  0xf2   :  { %3343 = vmatprep.subr.bf16.mxu0 %v10082_v5  ;;  %3671 = vmatprep.subr.bf16.mxu1 %v10085_v7  ;;  %v10160_v5 = vld [vmem:[%s14830_s1 + $0x920] ss:$16 sps:$4 sm:$0xff]   ;;  %v10163_v7 = vld [vmem:[%s14830_s1 + $0x928] ss:$16 sps:$4 sm:$0xff]  }
  0xf5   :  { %3344 = vmatpush1.bf16.msra.mxu0 %v10080_v8  ;;  %3672 = vmatpush1.bf16.msra.mxu1 %v10083_v9  ;;  %v10168_v8 = vld [vmem:[%s14830_s1 + $0x944] ss:$16 sps:$4 sm:$0xff]   ;;  %v10171_v9 = vld [vmem:[%s14830_s1 + $0x94c] ss:$16 sps:$4 sm:$0xff]  }
  0xf6   :  { %3345 = vmatprep.subr.bf16.mxu0 %v10088_v11  ;;  %3673 = vmatprep.subr.bf16.mxu1 %v10091_v12  ;;  %v10166_v11 = vld [vmem:[%s14830_s1 + $0x940] ss:$16 sps:$4 sm:$0xff]   ;;  %v10169_v12 = vld [vmem:[%s14830_s1 + $0x948] ss:$16 sps:$4 sm:$0xff]  }
  0xf9   :  { %3346 = vmatpush1.bf16.msra.mxu0 %v10086_v13  ;;  %3674 = vmatpush1.bf16.msra.mxu1 %v10089_v15  ;;  %v10174_v13 = vld [vmem:[%s14830_s1 + $0x964] ss:$16 sps:$4 sm:$0xff]   ;;  %v10177_v15 = vld [vmem:[%s14830_s1 + $0x96c] ss:$16 sps:$4 sm:$0xff]  }
  0xfa   :  { %3347 = vmatprep.subr.bf16.mxu0 %v10094_v17  ;;  %3675 = vmatprep.subr.bf16.mxu1 %v10097_v18  ;;  %v10172_v17 = vld [vmem:[%s14830_s1 + $0x960] ss:$16 sps:$4 sm:$0xff]   ;;  %v10175_v18 = vld [vmem:[%s14830_s1 + $0x968] ss:$16 sps:$4 sm:$0xff]  }
  0xfd   :  { %3348 = vmatpush1.bf16.msra.mxu0 %v10092_v19  ;;  %3676 = vmatpush1.bf16.msra.mxu1 %v10095_v21  ;;  %v10180_v19 = vld [vmem:[%s14830_s1 + $0x984] ss:$16 sps:$4 sm:$0xff]   ;;  %v10183_v21 = vld [vmem:[%s14830_s1 + $0x98c] ss:$16 sps:$4 sm:$0xff]  }
  0xfe   :  { %3349 = vmatprep.subr.bf16.mxu0 %v10100_v23  ;;  %3677 = vmatprep.subr.bf16.mxu1 %v10103_v14  ;;  %v10178_v23 = vld [vmem:[%s14830_s1 + $0x980] ss:$16 sps:$4 sm:$0xff]   ;;  %v10181_v14 = vld [vmem:[%s14830_s1 + $0x988] ss:$16 sps:$4 sm:$0xff]  }
 0x101   :  { %3350 = vmatpush1.bf16.msra.mxu0 %v10098_v25  ;;  %3678 = vmatpush1.bf16.msra.mxu1 %v10101_v26  ;;  %v10186_v25 = vld [vmem:[%s14830_s1 + $0x9a4] ss:$16 sps:$4 sm:$0xff]   ;;  %v10189_v26 = vld [vmem:[%s14830_s1 + $0x9ac] ss:$16 sps:$4 sm:$0xff]  }
 0x102   :  { %3360 = vmatprep.subr.bf16.mxu0 %v10108_v27  ;;  %3688 = vmatprep.subr.bf16.mxu1 %v10111_v28  ;;  %v10184_v27 = vld [vmem:[%s14830_s1 + $0x9a0] ss:$16 sps:$4 sm:$0xff]   ;;  %v10187_v28 = vld [vmem:[%s14830_s1 + $0x9a8] ss:$16 sps:$4 sm:$0xff]  }
 0x104   :  { %3352 = vmatmul.mubr.bf16.vlgmr.msra.gmra.mrb[0].mxu0 %v12221_v30  ;;  %3680 = vmatmul.mubr.bf16.vlgmr.msra.gmra.mrb[0].mxu1 %v12221_v30 }
 0x105   :  { %3361 = vmatpush1.bf16.msra.mxu0 %v10106_v29  ;;  %3689 = vmatpush1.bf16.msra.mxu1 %v10109_v33  ;;  %v10192_v29 = vld [vmem:[%s14830_s1 + $0x9c4] ss:$16 sps:$4 sm:$0xff]   ;;  %v10195_v33 = vld [vmem:[%s14830_s1 + $0x9cc] ss:$16 sps:$4 sm:$0xff]  }
 0x106   :  { %3362 = vmatprep.subr.bf16.mxu0 %v10114_v34  ;;  %3690 = vmatprep.subr.bf16.mxu1 %v10117_v22  ;;  %v10190_v34 = vld [vmem:[%s14830_s1 + $0x9c0] ss:$16 sps:$4 sm:$0xff]   ;;  %v10193_v22 = vld [vmem:[%s14830_s1 + $0x9c8] ss:$16 sps:$4 sm:$0xff]  }
 0x107   :  { %3392 = vmatprep.mubr.bf16.mxu0 %v12239_v35  ;;  %3720 = vmatprep.mubr.bf16.mxu1 %v12239_v35 }
 0x109   :  { %3363 = vmatpush1.bf16.msra.mxu0 %v10112_v36  ;;  %3691 = vmatpush1.bf16.msra.mxu1 %v10115_v37  ;;  %v10198_v36 = vld [vmem:[%s14830_s1 + $0x9e4] ss:$16 sps:$4 sm:$0xff]   ;;  %v10201_v37 = vld [vmem:[%s14830_s1 + $0x9ec] ss:$16 sps:$4 sm:$0xff]  }
 0x10a   :  { %3364 = vmatprep.subr.bf16.mxu0 %v10120_v38  ;;  %3692 = vmatprep.subr.bf16.mxu1 %v10123_v39  ;;  %v10196_v38 = vld [vmem:[%s14830_s1 + $0x9e0] ss:$16 sps:$4 sm:$0xff]   ;;  %v10199_v39 = vld [vmem:[%s14830_s1 + $0x9e8] ss:$16 sps:$4 sm:$0xff]  }
 0x10d   :  { %3365 = vmatpush1.bf16.msra.mxu0 %v10118_v40  ;;  %3693 = vmatpush1.bf16.msra.mxu1 %v10121_v41  ;;  %v10206_v40 = vld [vmem:[%s14830_s1 + $0xa04] ss:$16 sps:$4 sm:$0xff]   ;;  %v10209_v41 = vld [vmem:[%s14830_s1 + $0xa0c] ss:$16 sps:$4 sm:$0xff]  }
 0x10e   :  { %3366 = vmatprep.subr.bf16.mxu0 %v10126_v42  ;;  %3694 = vmatprep.subr.bf16.mxu1 %v10129_v43  ;;  %v12428_v42 = vld [vmem:[%s14829_s0 + $0x28] sm:$0xff]  ;;  %v12432_v43 = vcombine.low %v12226_v32, %v12226_v32 }
 0x10f   :  { %v10215_v32 = vld [vmem:[%s14830_s1 + $0xa2c] ss:$16 sps:$4 sm:$0xff]  }
 0x111   :  { %3367 = vmatpush1.bf16.msra.mxu0 %v10124_v44  ;;  %3695 = vmatpush1.bf16.msra.mxu1 %v10127_v45  ;;  %v10204_v44 = vld [vmem:[%s14830_s1 + $0xa00] ss:$16 sps:$4 sm:$0xff]   ;;  %v10207_v45 = vld [vmem:[%s14830_s1 + $0xa08] ss:$16 sps:$4 sm:$0xff]  }
 0x112   :  { %3368 = vmatprep.subr.bf16.mxu0 %v10132_v46  ;;  %3696 = vmatprep.subr.bf16.mxu1 %v10135_v47  ;;  %v10212_v46 = vld [vmem:[%s14830_s1 + $0xa24] ss:$16 sps:$4 sm:$0xff]   ;;  %v12448_v47 = vcombine.high %v12428_v42, %v12428_v42 }
 0x115   :  { %3369 = vmatpush1.bf16.msra.mxu0 %v10130_v48  ;;  %3697 = vmatpush1.bf16.msra.mxu1 %v10133_v50  ;;  %v10210_v48 = vld [vmem:[%s14830_s1 + $0xa20] ss:$16 sps:$4 sm:$0xff]   ;;  %v10213_v50 = vld [vmem:[%s14830_s1 + $0xa28] ss:$16 sps:$4 sm:$0xff]  }
 0x116   :  { %3370 = vmatprep.subr.bf16.mxu0 %v10138_v51  ;;  %3698 = vmatprep.subr.bf16.mxu1 %v10141_v52  ;;  %v10218_v51 = vld [vmem:[%s14830_s1 + $0xa44] ss:$16 sps:$4 sm:$0xff]   ;;  %v10221_v52 = vld [vmem:[%s14830_s1 + $0xa4c] ss:$16 sps:$4 sm:$0xff]  }
 0x119   :  { %3371 = vmatpush1.bf16.msra.mxu0 %v10136_v53  ;;  %3699 = vmatpush1.bf16.msra.mxu1 %v10139_v54  ;;  %v10216_v53 = vld [vmem:[%s14830_s1 + $0xa40] ss:$16 sps:$4 sm:$0xff]   ;;  %v10219_v54 = vld [vmem:[%s14830_s1 + $0xa48] ss:$16 sps:$4 sm:$0xff]  }
 0x11a   :  { %3372 = vmatprep.subr.bf16.mxu0 %v10144_v55  ;;  %3700 = vmatprep.subr.bf16.mxu1 %v10147_v56  ;;  %v10224_v55 = vld [vmem:[%s14830_s1 + $0xa64] ss:$16 sps:$4 sm:$0xff]   ;;  %v10227_v56 = vld [vmem:[%s14830_s1 + $0xa6c] ss:$16 sps:$4 sm:$0xff]  }
 0x11d   :  { %3373 = vmatpush1.bf16.msra.mxu0 %v10142_v57  ;;  %3701 = vmatpush1.bf16.msra.mxu1 %v10145_v58  ;;  %v10222_v57 = vld [vmem:[%s14830_s1 + $0xa60] ss:$16 sps:$4 sm:$0xff]   ;;  %v10225_v58 = vld [vmem:[%s14830_s1 + $0xa68] ss:$16 sps:$4 sm:$0xff]  }
 0x11e   :  { %3374 = vmatprep.subr.bf16.mxu0 %v10150_v59  ;;  %3702 = vmatprep.subr.bf16.mxu1 %v10153_v60  ;;  %v10230_v59 = vld [vmem:[%s14830_s1 + $0xa84] ss:$16 sps:$4 sm:$0xff]   ;;  %v10233_v60 = vld [vmem:[%s14830_s1 + $0xa8c] ss:$16 sps:$4 sm:$0xff]  }
 0x121   :  { %3375 = vmatpush1.bf16.msra.mxu0 %v10148_v61  ;;  %3703 = vmatpush1.bf16.msra.mxu1 %v10151_v62  ;;  %v10228_v61 = vld [vmem:[%s14830_s1 + $0xa80] ss:$16 sps:$4 sm:$0xff]   ;;  %v10231_v62 = vld [vmem:[%s14830_s1 + $0xa88] ss:$16 sps:$4 sm:$0xff]  }
 0x122   :  { %3376 = vmatprep.subr.bf16.mxu0 %v10156_v63  ;;  %3704 = vmatprep.subr.bf16.mxu1 %v10159_v0  ;;  %v10236_v63 = vld [vmem:[%s14830_s1 + $0xaa4] ss:$16 sps:$4 sm:$0xff]   ;;  %v10239_v0 = vld [vmem:[%s14830_s1 + $0xaac] ss:$16 sps:$4 sm:$0xff]  }
 0x125   :  { %3377 = vmatpush1.bf16.msra.mxu0 %v10154_v1  ;;  %3705 = vmatpush1.bf16.msra.mxu1 %v10157_v2  ;;  %v10234_v1 = vld [vmem:[%s14830_s1 + $0xaa0] ss:$16 sps:$4 sm:$0xff]   ;;  %v10237_v2 = vld [vmem:[%s14830_s1 + $0xaa8] ss:$16 sps:$4 sm:$0xff]  }
 0x126   :  { %3378 = vmatprep.subr.bf16.mxu0 %v10162_v3  ;;  %3706 = vmatprep.subr.bf16.mxu1 %v10165_v4  ;;  %v10242_v3 = vld [vmem:[%s14830_s1 + $0xac4] ss:$16 sps:$4 sm:$0xff]   ;;  %v10245_v4 = vld [vmem:[%s14830_s1 + $0xacc] ss:$16 sps:$4 sm:$0xff]  }
 0x129   :  { %3379 = vmatpush1.bf16.msra.mxu0 %v10160_v5  ;;  %3707 = vmatpush1.bf16.msra.mxu1 %v10163_v7  ;;  %v10240_v5 = vld [vmem:[%s14830_s1 + $0xac0] ss:$16 sps:$4 sm:$0xff]   ;;  %v10243_v7 = vld [vmem:[%s14830_s1 + $0xac8] ss:$16 sps:$4 sm:$0xff]  }
 0x12a   :  { %3380 = vmatprep.subr.bf16.mxu0 %v10168_v8  ;;  %3708 = vmatprep.subr.bf16.mxu1 %v10171_v9  ;;  %v10248_v8 = vld [vmem:[%s14830_s1 + $0xae4] ss:$16 sps:$4 sm:$0xff]   ;;  %v10251_v9 = vld [vmem:[%s14830_s1 + $0xaec] ss:$16 sps:$4 sm:$0xff]  }
 0x12d   :  { %3381 = vmatpush1.bf16.msra.mxu0 %v10166_v11  ;;  %3709 = vmatpush1.bf16.msra.mxu1 %v10169_v12  ;;  %v10246_v11 = vld [vmem:[%s14830_s1 + $0xae0] ss:$16 sps:$4 sm:$0xff]   ;;  %v10249_v12 = vld [vmem:[%s14830_s1 + $0xae8] ss:$16 sps:$4 sm:$0xff]  }
 0x12e   :  { %3382 = vmatprep.subr.bf16.mxu0 %v10174_v13  ;;  %3710 = vmatprep.subr.bf16.mxu1 %v10177_v15  ;;  %v10254_v13 = vld [vmem:[%s14830_s1 + $0xb04] ss:$16 sps:$4 sm:$0xff]   ;;  %v10257_v15 = vld [vmem:[%s14830_s1 + $0xb0c] ss:$16 sps:$4 sm:$0xff]  }
 0x131   :  { %3383 = vmatpush1.bf16.msra.mxu0 %v10172_v17  ;;  %3711 = vmatpush1.bf16.msra.mxu1 %v10175_v18  ;;  %v10252_v17 = vld [vmem:[%s14830_s1 + $0xb00] ss:$16 sps:$4 sm:$0xff]   ;;  %v10255_v18 = vld [vmem:[%s14830_s1 + $0xb08] ss:$16 sps:$4 sm:$0xff]  }
 0x132   :  { %3384 = vmatprep.subr.bf16.mxu0 %v10180_v19  ;;  %3712 = vmatprep.subr.bf16.mxu1 %v10183_v21  ;;  %v10260_v19 = vld [vmem:[%s14830_s1 + $0xb24] ss:$16 sps:$4 sm:$0xff]   ;;  %v10263_v21 = vld [vmem:[%s14830_s1 + $0xb2c] ss:$16 sps:$4 sm:$0xff]  }
 0x135   :  { %3385 = vmatpush1.bf16.msra.mxu0 %v10178_v23  ;;  %3713 = vmatpush1.bf16.msra.mxu1 %v10181_v14  ;;  %v10258_v23 = vld [vmem:[%s14830_s1 + $0xb20] ss:$16 sps:$4 sm:$0xff]   ;;  %v10261_v14 = vld [vmem:[%s14830_s1 + $0xb28] ss:$16 sps:$4 sm:$0xff]  }
 0x136   :  { %3386 = vmatprep.subr.bf16.mxu0 %v10186_v25  ;;  %3714 = vmatprep.subr.bf16.mxu1 %v10189_v26  ;;  %v10266_v25 = vld [vmem:[%s14830_s1 + $0xb44] ss:$16 sps:$4 sm:$0xff]   ;;  %v10269_v26 = vld [vmem:[%s14830_s1 + $0xb4c] ss:$16 sps:$4 sm:$0xff]  }
 0x139   :  { %3387 = vmatpush1.bf16.msra.mxu0 %v10184_v27  ;;  %3715 = vmatpush1.bf16.msra.mxu1 %v10187_v28  ;;  %v10264_v27 = vld [vmem:[%s14830_s1 + $0xb40] ss:$16 sps:$4 sm:$0xff]   ;;  %v10267_v28 = vld [vmem:[%s14830_s1 + $0xb48] ss:$16 sps:$4 sm:$0xff]  }
 0x13a   :  { %3388 = vmatprep.subr.bf16.mxu0 %v10192_v29  ;;  %3716 = vmatprep.subr.bf16.mxu1 %v10195_v33  ;;  %v10272_v29 = vld [vmem:[%s14830_s1 + $0xb64] ss:$16 sps:$4 sm:$0xff]   ;;  %v10275_v33 = vld [vmem:[%s14830_s1 + $0xb6c] ss:$16 sps:$4 sm:$0xff]  }
 0x13d   :  { %3389 = vmatpush1.bf16.msra.mxu0 %v10190_v34  ;;  %3717 = vmatpush1.bf16.msra.mxu1 %v10193_v22  ;;  %v10270_v34 = vld [vmem:[%s14830_s1 + $0xb60] ss:$16 sps:$4 sm:$0xff]   ;;  %v10273_v22 = vld [vmem:[%s14830_s1 + $0xb68] ss:$16 sps:$4 sm:$0xff]  }
 0x13e   :  { %3390 = vmatprep.subr.bf16.mxu0 %v10198_v36  ;;  %3718 = vmatprep.subr.bf16.mxu1 %v10201_v37  ;;  %v10278_v36 = vld [vmem:[%s14830_s1 + $0xb84] ss:$16 sps:$4 sm:$0xff]   ;;  %v10281_v37 = vld [vmem:[%s14830_s1 + $0xb8c] ss:$16 sps:$4 sm:$0xff]  }
 0x141   :  { %3391 = vmatpush1.bf16.msra.mxu0 %v10196_v38  ;;  %3719 = vmatpush1.bf16.msra.mxu1 %v10199_v39  ;;  %v10276_v38 = vld [vmem:[%s14830_s1 + $0xb80] ss:$16 sps:$4 sm:$0xff]   ;;  %v10279_v39 = vld [vmem:[%s14830_s1 + $0xb88] ss:$16 sps:$4 sm:$0xff]  }
 0x142   :  { %3401 = vmatprep.subr.bf16.mxu0 %v10206_v40  ;;  %3729 = vmatprep.subr.bf16.mxu1 %v10209_v41  ;;  %v10284_v40 = vld [vmem:[%s14830_s1 + $0xba4] ss:$16 sps:$4 sm:$0xff]   ;;  %v10287_v41 = vld [vmem:[%s14830_s1 + $0xbac] ss:$16 sps:$4 sm:$0xff]  }
 0x144   :  { %3393 = vmatmul.mubr.bf16.vlgmr.msra.gmra.mrb[0].mxu0 %v12432_v43  ;;  %3721 = vmatmul.mubr.bf16.vlgmr.msra.gmra.mrb[0].mxu1 %v12432_v43 }
 0x145   :  { %3402 = vmatpush1.bf16.msra.mxu0 %v10204_v44  ;;  %3730 = vmatpush1.bf16.msra.mxu1 %v10207_v45  ;;  %v10282_v44 = vld [vmem:[%s14830_s1 + $0xba0] ss:$16 sps:$4 sm:$0xff]   ;;  %v10285_v45 = vld [vmem:[%s14830_s1 + $0xba8] ss:$16 sps:$4 sm:$0xff]  }
 0x146   :  { %3403 = vmatprep.subr.bf16.mxu0 %v10212_v46  ;;  %3731 = vmatprep.subr.bf16.mxu1 %v10215_v32  ;;  %v10290_v46 = vld [vmem:[%s14830_s1 + $0xbc4] ss:$16 sps:$4 sm:$0xff]   ;;  %v10293_v32 = vld [vmem:[%s14830_s1 + $0xbcc] ss:$16 sps:$4 sm:$0xff]  }
 0x147   :  { %3433 = vmatprep.mubr.bf16.mxu0 %v12448_v47  ;;  %3761 = vmatprep.mubr.bf16.mxu1 %v12448_v47 }
 0x149   :  { %3404 = vmatpush1.bf16.msra.mxu0 %v10210_v48  ;;  %3732 = vmatpush1.bf16.msra.mxu1 %v10213_v50  ;;  %v10288_v48 = vld [vmem:[%s14830_s1 + $0xbc0] ss:$16 sps:$4 sm:$0xff]   ;;  %v10291_v50 = vld [vmem:[%s14830_s1 + $0xbc8] ss:$16 sps:$4 sm:$0xff]  }
 0x14a   :  { %3405 = vmatprep.subr.bf16.mxu0 %v10218_v51  ;;  %3733 = vmatprep.subr.bf16.mxu1 %v10221_v52  ;;  %v10296_v51 = vld [vmem:[%s14830_s1 + $0xbe4] ss:$16 sps:$4 sm:$0xff]   ;;  %v10299_v52 = vld [vmem:[%s14830_s1 + $0xbec] ss:$16 sps:$4 sm:$0xff]  }
 0x14d   :  { %3406 = vmatpush1.bf16.msra.mxu0 %v10216_v53  ;;  %3734 = vmatpush1.bf16.msra.mxu1 %v10219_v54  ;;  %v10294_v53 = vld [vmem:[%s14830_s1 + $0xbe0] ss:$16 sps:$4 sm:$0xff]   ;;  %v10297_v54 = vld [vmem:[%s14830_s1 + $0xbe8] ss:$16 sps:$4 sm:$0xff]  }
 0x14e   :  { %3407 = vmatprep.subr.bf16.mxu0 %v10224_v55  ;;  %3735 = vmatprep.subr.bf16.mxu1 %v10227_v56  ;;  %v10304_v55 = vld [vmem:[%s14830_s1 + $0xc04] ss:$16 sps:$4 sm:$0xff]   ;;  %v10307_v56 = vld [vmem:[%s14830_s1 + $0xc0c] ss:$16 sps:$4 sm:$0xff]  }
 0x151   :  { %3408 = vmatpush1.bf16.msra.mxu0 %v10222_v57  ;;  %3736 = vmatpush1.bf16.msra.mxu1 %v10225_v58  ;;  %v10302_v57 = vld [vmem:[%s14830_s1 + $0xc00] ss:$16 sps:$4 sm:$0xff]   ;;  %v10305_v58 = vld [vmem:[%s14830_s1 + $0xc08] ss:$16 sps:$4 sm:$0xff]  }
 0x152   :  { %3409 = vmatprep.subr.bf16.mxu0 %v10230_v59  ;;  %3737 = vmatprep.subr.bf16.mxu1 %v10233_v60  ;;  %v12642_v59 = vcombine.low %v12428_v42, %v12428_v42  ;;  %v10310_v60 = vld [vmem:[%s14830_s1 + $0xc24] ss:$16 sps:$4 sm:$0xff]   ;;  %v10308_v42 = vld [vmem:[%s14830_s1 + $0xc20] ss:$16 sps:$4 sm:$0xff]  }
 0x155   :  { %3410 = vmatpush1.bf16.msra.mxu0 %v10228_v61  ;;  %3738 = vmatpush1.bf16.msra.mxu1 %v10231_v62  ;;  %v10313_v61 = vld [vmem:[%s14830_s1 + $0xc2c] ss:$16 sps:$4 sm:$0xff]   ;;  %v12653_v62 = vld [vmem:[%s14829_s0 + $0x30] sm:$0xff] }
 0x156   :  { %3411 = vmatprep.subr.bf16.mxu0 %v10236_v63  ;;  %3739 = vmatprep.subr.bf16.mxu1 %v10239_v0  ;;  %v10311_v63 = vld [vmem:[%s14830_s1 + $0xc28] ss:$16 sps:$4 sm:$0xff]   ;;  %v12663_v0 = vcombine.high %v12653_v62, %v12653_v62 }
 0x159   :  { %3412 = vmatpush1.bf16.msra.mxu0 %v10234_v1  ;;  %3740 = vmatpush1.bf16.msra.mxu1 %v10237_v2  ;;  %v10316_v1 = vld [vmem:[%s14830_s1 + $0xc44] ss:$16 sps:$4 sm:$0xff]   ;;  %v10319_v2 = vld [vmem:[%s14830_s1 + $0xc4c] ss:$16 sps:$4 sm:$0xff]  }
 0x15a   :  { %3413 = vmatprep.subr.bf16.mxu0 %v10242_v3  ;;  %3741 = vmatprep.subr.bf16.mxu1 %v10245_v4  ;;  %v10314_v3 = vld [vmem:[%s14830_s1 + $0xc40] ss:$16 sps:$4 sm:$0xff]   ;;  %v10317_v4 = vld [vmem:[%s14830_s1 + $0xc48] ss:$16 sps:$4 sm:$0xff]  }
 0x15d   :  { %3414 = vmatpush1.bf16.msra.mxu0 %v10240_v5  ;;  %3742 = vmatpush1.bf16.msra.mxu1 %v10243_v7  ;;  %v10322_v5 = vld [vmem:[%s14830_s1 + $0xc64] ss:$16 sps:$4 sm:$0xff]   ;;  %v10325_v7 = vld [vmem:[%s14830_s1 + $0xc6c] ss:$16 sps:$4 sm:$0xff]  }
 0x15e   :  { %3415 = vmatprep.subr.bf16.mxu0 %v10248_v8  ;;  %3743 = vmatprep.subr.bf16.mxu1 %v10251_v9  ;;  %v10320_v8 = vld [vmem:[%s14830_s1 + $0xc60] ss:$16 sps:$4 sm:$0xff]   ;;  %v10323_v9 = vld [vmem:[%s14830_s1 + $0xc68] ss:$16 sps:$4 sm:$0xff]  }
 0x161   :  { %3416 = vmatpush1.bf16.msra.mxu0 %v10246_v11  ;;  %3744 = vmatpush1.bf16.msra.mxu1 %v10249_v12  ;;  %v10328_v11 = vld [vmem:[%s14830_s1 + $0xc84] ss:$16 sps:$4 sm:$0xff]   ;;  %v10331_v12 = vld [vmem:[%s14830_s1 + $0xc8c] ss:$16 sps:$4 sm:$0xff]  }
 0x162   :  { %3417 = vmatprep.subr.bf16.mxu0 %v10254_v13  ;;  %3745 = vmatprep.subr.bf16.mxu1 %v10257_v15  ;;  %v10326_v13 = vld [vmem:[%s14830_s1 + $0xc80] ss:$16 sps:$4 sm:$0xff]   ;;  %v10329_v15 = vld [vmem:[%s14830_s1 + $0xc88] ss:$16 sps:$4 sm:$0xff]  }
 0x165   :  { %3418 = vmatpush1.bf16.msra.mxu0 %v10252_v17  ;;  %3746 = vmatpush1.bf16.msra.mxu1 %v10255_v18  ;;  %v10334_v17 = vld [vmem:[%s14830_s1 + $0xca4] ss:$16 sps:$4 sm:$0xff]   ;;  %v10337_v18 = vld [vmem:[%s14830_s1 + $0xcac] ss:$16 sps:$4 sm:$0xff]  }
 0x166   :  { %3419 = vmatprep.subr.bf16.mxu0 %v10260_v19  ;;  %3747 = vmatprep.subr.bf16.mxu1 %v10263_v21  ;;  %v10332_v19 = vld [vmem:[%s14830_s1 + $0xca0] ss:$16 sps:$4 sm:$0xff]   ;;  %v10335_v21 = vld [vmem:[%s14830_s1 + $0xca8] ss:$16 sps:$4 sm:$0xff]  }
 0x169   :  { %3420 = vmatpush1.bf16.msra.mxu0 %v10258_v23  ;;  %3748 = vmatpush1.bf16.msra.mxu1 %v10261_v14  ;;  %v10340_v23 = vld [vmem:[%s14830_s1 + $0xcc4] ss:$16 sps:$4 sm:$0xff]   ;;  %v10343_v14 = vld [vmem:[%s14830_s1 + $0xccc] ss:$16 sps:$4 sm:$0xff]  }
 0x16a   :  { %3421 = vmatprep.subr.bf16.mxu0 %v10266_v25  ;;  %3749 = vmatprep.subr.bf16.mxu1 %v10269_v26  ;;  %v10338_v25 = vld [vmem:[%s14830_s1 + $0xcc0] ss:$16 sps:$4 sm:$0xff]   ;;  %v10341_v26 = vld [vmem:[%s14830_s1 + $0xcc8] ss:$16 sps:$4 sm:$0xff]  }
 0x16d   :  { %3422 = vmatpush1.bf16.msra.mxu0 %v10264_v27  ;;  %3750 = vmatpush1.bf16.msra.mxu1 %v10267_v28  ;;  %v10346_v27 = vld [vmem:[%s14830_s1 + $0xce4] ss:$16 sps:$4 sm:$0xff]   ;;  %v10349_v28 = vld [vmem:[%s14830_s1 + $0xcec] ss:$16 sps:$4 sm:$0xff]  }
 0x16e   :  { %3423 = vmatprep.subr.bf16.mxu0 %v10272_v29  ;;  %3751 = vmatprep.subr.bf16.mxu1 %v10275_v33  ;;  %v10344_v29 = vld [vmem:[%s14830_s1 + $0xce0] ss:$16 sps:$4 sm:$0xff]   ;;  %v10347_v33 = vld [vmem:[%s14830_s1 + $0xce8] ss:$16 sps:$4 sm:$0xff]  }
 0x171   :  { %3424 = vmatpush1.bf16.msra.mxu0 %v10270_v34  ;;  %3752 = vmatpush1.bf16.msra.mxu1 %v10273_v22  ;;  %v10352_v34 = vld [vmem:[%s14830_s1 + $0xd04] ss:$16 sps:$4 sm:$0xff]   ;;  %v10355_v22 = vld [vmem:[%s14830_s1 + $0xd0c] ss:$16 sps:$4 sm:$0xff]  }
 0x172   :  { %3425 = vmatprep.subr.bf16.mxu0 %v10278_v36  ;;  %3753 = vmatprep.subr.bf16.mxu1 %v10281_v37  ;;  %v10350_v36 = vld [vmem:[%s14830_s1 + $0xd00] ss:$16 sps:$4 sm:$0xff]   ;;  %v10353_v37 = vld [vmem:[%s14830_s1 + $0xd08] ss:$16 sps:$4 sm:$0xff]  }
 0x175   :  { %3426 = vmatpush1.bf16.msra.mxu0 %v10276_v38  ;;  %3754 = vmatpush1.bf16.msra.mxu1 %v10279_v39  ;;  %v10358_v38 = vld [vmem:[%s14830_s1 + $0xd24] ss:$16 sps:$4 sm:$0xff]   ;;  %v10361_v39 = vld [vmem:[%s14830_s1 + $0xd2c] ss:$16 sps:$4 sm:$0xff]  }
 0x176   :  { %3427 = vmatprep.subr.bf16.mxu0 %v10284_v40  ;;  %3755 = vmatprep.subr.bf16.mxu1 %v10287_v41  ;;  %v10356_v40 = vld [vmem:[%s14830_s1 + $0xd20] ss:$16 sps:$4 sm:$0xff]   ;;  %v10359_v41 = vld [vmem:[%s14830_s1 + $0xd28] ss:$16 sps:$4 sm:$0xff]  }
 0x179   :  { %3428 = vmatpush1.bf16.msra.mxu0 %v10282_v44  ;;  %3756 = vmatpush1.bf16.msra.mxu1 %v10285_v45  ;;  %v10364_v44 = vld [vmem:[%s14830_s1 + $0xd44] ss:$16 sps:$4 sm:$0xff]   ;;  %v10367_v45 = vld [vmem:[%s14830_s1 + $0xd4c] ss:$16 sps:$4 sm:$0xff]  }
 0x17a   :  { %3429 = vmatprep.subr.bf16.mxu0 %v10290_v46  ;;  %3757 = vmatprep.subr.bf16.mxu1 %v10293_v32  ;;  %v10362_v46 = vld [vmem:[%s14830_s1 + $0xd40] ss:$16 sps:$4 sm:$0xff]   ;;  %v10365_v32 = vld [vmem:[%s14830_s1 + $0xd48] ss:$16 sps:$4 sm:$0xff]  }
 0x17d   :  { %3430 = vmatpush1.bf16.msra.mxu0 %v10288_v48  ;;  %3758 = vmatpush1.bf16.msra.mxu1 %v10291_v50  ;;  %v10370_v48 = vld [vmem:[%s14830_s1 + $0xd64] ss:$16 sps:$4 sm:$0xff]   ;;  %v10373_v50 = vld [vmem:[%s14830_s1 + $0xd6c] ss:$16 sps:$4 sm:$0xff]  }
 0x17e   :  { %3431 = vmatprep.subr.bf16.mxu0 %v10296_v51  ;;  %3759 = vmatprep.subr.bf16.mxu1 %v10299_v52  ;;  %v10368_v51 = vld [vmem:[%s14830_s1 + $0xd60] ss:$16 sps:$4 sm:$0xff]   ;;  %v10371_v52 = vld [vmem:[%s14830_s1 + $0xd68] ss:$16 sps:$4 sm:$0xff]  }
 0x181   :  { %3432 = vmatpush1.bf16.msra.mxu0 %v10294_v53  ;;  %3760 = vmatpush1.bf16.msra.mxu1 %v10297_v54  ;;  %v10376_v53 = vld [vmem:[%s14830_s1 + $0xd84] ss:$16 sps:$4 sm:$0xff]   ;;  %v10379_v54 = vld [vmem:[%s14830_s1 + $0xd8c] ss:$16 sps:$4 sm:$0xff]  }
 0x182   :  { %3442 = vmatprep.subr.bf16.mxu0 %v10304_v55  ;;  %3770 = vmatprep.subr.bf16.mxu1 %v10307_v56  ;;  %v10374_v55 = vld [vmem:[%s14830_s1 + $0xd80] ss:$16 sps:$4 sm:$0xff]   ;;  %v10377_v56 = vld [vmem:[%s14830_s1 + $0xd88] ss:$16 sps:$4 sm:$0xff]  }
 0x184   :  { %3434 = vmatmul.mubr.bf16.vlgmr.msra.gmra.mrb[0].mxu0 %v12642_v59  ;;  %3762 = vmatmul.mubr.bf16.vlgmr.msra.gmra.mrb[0].mxu1 %v12642_v59 }
 0x185   :  { %3443 = vmatpush1.bf16.msra.mxu0 %v10302_v57  ;;  %3771 = vmatpush1.bf16.msra.mxu1 %v10305_v58  ;;  %v10382_v57 = vld [vmem:[%s14830_s1 + $0xda4] ss:$16 sps:$4 sm:$0xff]   ;;  %v10385_v58 = vld [vmem:[%s14830_s1 + $0xdac] ss:$16 sps:$4 sm:$0xff]  }
 0x186   :  { %3444 = vmatprep.subr.bf16.mxu0 %v10310_v60  ;;  %3772 = vmatprep.subr.bf16.mxu1 %v10313_v61  ;;  %v10380_v60 = vld [vmem:[%s14830_s1 + $0xda0] ss:$16 sps:$4 sm:$0xff]   ;;  %v10383_v61 = vld [vmem:[%s14830_s1 + $0xda8] ss:$16 sps:$4 sm:$0xff]  }
 0x187   :  { %3474 = vmatprep.mubr.bf16.mxu0 %v12663_v0  ;;  %3802 = vmatprep.mubr.bf16.mxu1 %v12663_v0 }
 0x189   :  { %3445 = vmatpush1.bf16.msra.mxu0 %v10308_v42  ;;  %3773 = vmatpush1.bf16.msra.mxu1 %v10311_v63  ;;  %v10388_v42 = vld [vmem:[%s14830_s1 + $0xdc4] ss:$16 sps:$4 sm:$0xff]   ;;  %v10391_v63 = vld [vmem:[%s14830_s1 + $0xdcc] ss:$16 sps:$4 sm:$0xff]  }
 0x18a   :  { %3446 = vmatprep.subr.bf16.mxu0 %v10316_v1  ;;  %3774 = vmatprep.subr.bf16.mxu1 %v10319_v2  ;;  %v10386_v1 = vld [vmem:[%s14830_s1 + $0xdc0] ss:$16 sps:$4 sm:$0xff]   ;;  %v10389_v2 = vld [vmem:[%s14830_s1 + $0xdc8] ss:$16 sps:$4 sm:$0xff]  }
 0x18d   :  { %3447 = vmatpush1.bf16.msra.mxu0 %v10314_v3  ;;  %3775 = vmatpush1.bf16.msra.mxu1 %v10317_v4  ;;  %v10394_v3 = vld [vmem:[%s14830_s1 + $0xde4] ss:$16 sps:$4 sm:$0xff]   ;;  %v10397_v4 = vld [vmem:[%s14830_s1 + $0xdec] ss:$16 sps:$4 sm:$0xff]  }
 0x18e   :  { %3448 = vmatprep.subr.bf16.mxu0 %v10322_v5  ;;  %3776 = vmatprep.subr.bf16.mxu1 %v10325_v7  ;;  %v10392_v5 = vld [vmem:[%s14830_s1 + $0xde0] ss:$16 sps:$4 sm:$0xff]   ;;  %v10395_v7 = vld [vmem:[%s14830_s1 + $0xde8] ss:$16 sps:$4 sm:$0xff]  }
 0x191   :  { %3449 = vmatpush1.bf16.msra.mxu0 %v10320_v8  ;;  %3777 = vmatpush1.bf16.msra.mxu1 %v10323_v9  ;;  %v10402_v8 = vld [vmem:[%s14830_s1 + $0xe04] ss:$16 sps:$4 sm:$0xff]   ;;  %v10405_v9 = vld [vmem:[%s14830_s1 + $0xe0c] ss:$16 sps:$4 sm:$0xff]  }
 0x192   :  { %3450 = vmatprep.subr.bf16.mxu0 %v10328_v11  ;;  %3778 = vmatprep.subr.bf16.mxu1 %v10331_v12  ;;  %v12846_v11 = vld [vmem:[%s14829_s0 + $0x38] sm:$0xff]  ;;  %v10400_v12 = vld [vmem:[%s14830_s1 + $0xe00] ss:$16 sps:$4 sm:$0xff]  }
 0x195   :  { %3451 = vmatpush1.bf16.msra.mxu0 %v10326_v13  ;;  %3779 = vmatpush1.bf16.msra.mxu1 %v10329_v15  ;;  %v10403_v13 = vld [vmem:[%s14830_s1 + $0xe08] ss:$16 sps:$4 sm:$0xff]   ;;  %v12856_v15 = vcombine.low %v12653_v62, %v12653_v62 }
 0x196   :  { %3452 = vmatprep.subr.bf16.mxu0 %v10334_v17  ;;  %3780 = vmatprep.subr.bf16.mxu1 %v10337_v18  ;;  %v10408_v17 = vld [vmem:[%s14830_s1 + $0xe24] ss:$16 sps:$4 sm:$0xff]   ;;  %v10411_v18 = vld [vmem:[%s14830_s1 + $0xe2c] ss:$16 sps:$4 sm:$0xff]   ;;  %v10409_v62 = vld [vmem:[%s14830_s1 + $0xe28] ss:$16 sps:$4 sm:$0xff]  }
 0x199   :  { %3453 = vmatpush1.bf16.msra.mxu0 %v10332_v19  ;;  %3781 = vmatpush1.bf16.msra.mxu1 %v10335_v21  ;;  %v10406_v19 = vld [vmem:[%s14830_s1 + $0xe20] ss:$16 sps:$4 sm:$0xff]   ;;  %v12872_v21 = vcombine.high %v12846_v11, %v12846_v11 }
 0x19a   :  { %3454 = vmatprep.subr.bf16.mxu0 %v10340_v23  ;;  %3782 = vmatprep.subr.bf16.mxu1 %v10343_v14  ;;  %v10414_v23 = vld [vmem:[%s14830_s1 + $0xe44] ss:$16 sps:$4 sm:$0xff]   ;;  %v10417_v14 = vld [vmem:[%s14830_s1 + $0xe4c] ss:$16 sps:$4 sm:$0xff]  }
 0x19d   :  { %3455 = vmatpush1.bf16.msra.mxu0 %v10338_v25  ;;  %3783 = vmatpush1.bf16.msra.mxu1 %v10341_v26  ;;  %v10412_v25 = vld [vmem:[%s14830_s1 + $0xe40] ss:$16 sps:$4 sm:$0xff]   ;;  %v10415_v26 = vld [vmem:[%s14830_s1 + $0xe48] ss:$16 sps:$4 sm:$0xff]  }
 0x19e   :  { %3456 = vmatprep.subr.bf16.mxu0 %v10346_v27  ;;  %3784 = vmatprep.subr.bf16.mxu1 %v10349_v28  ;;  %v10420_v27 = vld [vmem:[%s14830_s1 + $0xe64] ss:$16 sps:$4 sm:$0xff]   ;;  %v10423_v28 = vld [vmem:[%s14830_s1 + $0xe6c] ss:$16 sps:$4 sm:$0xff]  }
 0x1a1   :  { %3457 = vmatpush1.bf16.msra.mxu0 %v10344_v29  ;;  %3785 = vmatpush1.bf16.msra.mxu1 %v10347_v33  ;;  %v10418_v29 = vld [vmem:[%s14830_s1 + $0xe60] ss:$16 sps:$4 sm:$0xff]   ;;  %v10421_v33 = vld [vmem:[%s14830_s1 + $0xe68] ss:$16 sps:$4 sm:$0xff]  }
 0x1a2   :  { %3458 = vmatprep.subr.bf16.mxu0 %v10352_v34  ;;  %3786 = vmatprep.subr.bf16.mxu1 %v10355_v22  ;;  %v10426_v34 = vld [vmem:[%s14830_s1 + $0xe84] ss:$16 sps:$4 sm:$0xff]   ;;  %v10429_v22 = vld [vmem:[%s14830_s1 + $0xe8c] ss:$16 sps:$4 sm:$0xff]  }
 0x1a5   :  { %3459 = vmatpush1.bf16.msra.mxu0 %v10350_v36  ;;  %3787 = vmatpush1.bf16.msra.mxu1 %v10353_v37  ;;  %v10424_v36 = vld [vmem:[%s14830_s1 + $0xe80] ss:$16 sps:$4 sm:$0xff]   ;;  %v10427_v37 = vld [vmem:[%s14830_s1 + $0xe88] ss:$16 sps:$4 sm:$0xff]  }
 0x1a6   :  { %3460 = vmatprep.subr.bf16.mxu0 %v10358_v38  ;;  %3788 = vmatprep.subr.bf16.mxu1 %v10361_v39  ;;  %v10432_v38 = vld [vmem:[%s14830_s1 + $0xea4] ss:$16 sps:$4 sm:$0xff]   ;;  %v10435_v39 = vld [vmem:[%s14830_s1 + $0xeac] ss:$16 sps:$4 sm:$0xff]  }
 0x1a9   :  { %3461 = vmatpush1.bf16.msra.mxu0 %v10356_v40  ;;  %3789 = vmatpush1.bf16.msra.mxu1 %v10359_v41  ;;  %v10430_v40 = vld [vmem:[%s14830_s1 + $0xea0] ss:$16 sps:$4 sm:$0xff]   ;;  %v10433_v41 = vld [vmem:[%s14830_s1 + $0xea8] ss:$16 sps:$4 sm:$0xff]  }
 0x1aa   :  { %3462 = vmatprep.subr.bf16.mxu0 %v10364_v44  ;;  %3790 = vmatprep.subr.bf16.mxu1 %v10367_v45  ;;  %v10438_v44 = vld [vmem:[%s14830_s1 + $0xec4] ss:$16 sps:$4 sm:$0xff]   ;;  %v10441_v45 = vld [vmem:[%s14830_s1 + $0xecc] ss:$16 sps:$4 sm:$0xff]  }
 0x1ad   :  { %3463 = vmatpush1.bf16.msra.mxu0 %v10362_v46  ;;  %3791 = vmatpush1.bf16.msra.mxu1 %v10365_v32  ;;  %v10436_v46 = vld [vmem:[%s14830_s1 + $0xec0] ss:$16 sps:$4 sm:$0xff]   ;;  %v10439_v32 = vld [vmem:[%s14830_s1 + $0xec8] ss:$16 sps:$4 sm:$0xff]  }
 0x1ae   :  { %3464 = vmatprep.subr.bf16.mxu0 %v10370_v48  ;;  %3792 = vmatprep.subr.bf16.mxu1 %v10373_v50  ;;  %v10444_v48 = vld [vmem:[%s14830_s1 + $0xee4] ss:$16 sps:$4 sm:$0xff]   ;;  %v10447_v50 = vld [vmem:[%s14830_s1 + $0xeec] ss:$16 sps:$4 sm:$0xff]  }
 0x1b1   :  { %3465 = vmatpush1.bf16.msra.mxu0 %v10368_v51  ;;  %3793 = vmatpush1.bf16.msra.mxu1 %v10371_v52  ;;  %v10442_v51 = vld [vmem:[%s14830_s1 + $0xee0] ss:$16 sps:$4 sm:$0xff]   ;;  %v10445_v52 = vld [vmem:[%s14830_s1 + $0xee8] ss:$16 sps:$4 sm:$0xff]  }
 0x1b2   :  { %3466 = vmatprep.subr.bf16.mxu0 %v10376_v53  ;;  %3794 = vmatprep.subr.bf16.mxu1 %v10379_v54  ;;  %v10450_v53 = vld [vmem:[%s14830_s1 + $0xf04] ss:$16 sps:$4 sm:$0xff]   ;;  %v10453_v54 = vld [vmem:[%s14830_s1 + $0xf0c] ss:$16 sps:$4 sm:$0xff]  }
 0x1b5   :  { %3467 = vmatpush1.bf16.msra.mxu0 %v10374_v55  ;;  %3795 = vmatpush1.bf16.msra.mxu1 %v10377_v56  ;;  %v10448_v55 = vld [vmem:[%s14830_s1 + $0xf00] ss:$16 sps:$4 sm:$0xff]   ;;  %v10451_v56 = vld [vmem:[%s14830_s1 + $0xf08] ss:$16 sps:$4 sm:$0xff]  }
 0x1b6   :  { %3468 = vmatprep.subr.bf16.mxu0 %v10382_v57  ;;  %3796 = vmatprep.subr.bf16.mxu1 %v10385_v58  ;;  %v10456_v57 = vld [vmem:[%s14830_s1 + $0xf24] ss:$16 sps:$4 sm:$0xff]   ;;  %v10459_v58 = vld [vmem:[%s14830_s1 + $0xf2c] ss:$16 sps:$4 sm:$0xff]  }
 0x1b9   :  { %3469 = vmatpush1.bf16.msra.mxu0 %v10380_v60  ;;  %3797 = vmatpush1.bf16.msra.mxu1 %v10383_v61  ;;  %v10454_v60 = vld [vmem:[%s14830_s1 + $0xf20] ss:$16 sps:$4 sm:$0xff]   ;;  %v10457_v61 = vld [vmem:[%s14830_s1 + $0xf28] ss:$16 sps:$4 sm:$0xff]  }
 0x1ba   :  { %3470 = vmatprep.subr.bf16.mxu0 %v10388_v42  ;;  %3798 = vmatprep.subr.bf16.mxu1 %v10391_v63  ;;  %v10462_v42 = vld [vmem:[%s14830_s1 + $0xf44] ss:$16 sps:$4 sm:$0xff]   ;;  %v10465_v63 = vld [vmem:[%s14830_s1 + $0xf4c] ss:$16 sps:$4 sm:$0xff]  }
 0x1bd   :  { %3471 = vmatpush1.bf16.msra.mxu0 %v10386_v1  ;;  %3799 = vmatpush1.bf16.msra.mxu1 %v10389_v2  ;;  %v10460_v1 = vld [vmem:[%s14830_s1 + $0xf40] ss:$16 sps:$4 sm:$0xff]   ;;  %v10463_v2 = vld [vmem:[%s14830_s1 + $0xf48] ss:$16 sps:$4 sm:$0xff]  }
 0x1be   :  { %3472 = vmatprep.subr.bf16.mxu0 %v10394_v3  ;;  %3800 = vmatprep.subr.bf16.mxu1 %v10397_v4  ;;  %v10468_v3 = vld [vmem:[%s14830_s1 + $0xf64] ss:$16 sps:$4 sm:$0xff]   ;;  %v10471_v4 = vld [vmem:[%s14830_s1 + $0xf6c] ss:$16 sps:$4 sm:$0xff]  }
 0x1c1   :  { %3473 = vmatpush1.bf16.msra.mxu0 %v10392_v5  ;;  %3801 = vmatpush1.bf16.msra.mxu1 %v10395_v7  ;;  %v10466_v5 = vld [vmem:[%s14830_s1 + $0xf60] ss:$16 sps:$4 sm:$0xff]   ;;  %v10469_v7 = vld [vmem:[%s14830_s1 + $0xf68] ss:$16 sps:$4 sm:$0xff]  }
 0x1c2   :  { %3483 = vmatprep.subr.bf16.mxu0 %v10402_v8  ;;  %3811 = vmatprep.subr.bf16.mxu1 %v10405_v9  ;;  %v10474_v8 = vld [vmem:[%s14830_s1 + $0xf84] ss:$16 sps:$4 sm:$0xff]   ;;  %v10477_v9 = vld [vmem:[%s14830_s1 + $0xf8c] ss:$16 sps:$4 sm:$0xff]  }
 0x1c4   :  { %3475 = vmatmul.mubr.bf16.vlgmr.msra.gmra.mrb[0].mxu0 %v12856_v15  ;;  %3803 = vmatmul.mubr.bf16.vlgmr.msra.gmra.mrb[0].mxu1 %v12856_v15 }
 0x1c5   :  { %3484 = vmatpush1.bf16.msra.mxu0 %v10400_v12  ;;  %3812 = vmatpush1.bf16.msra.mxu1 %v10403_v13  ;;  %v10472_v12 = vld [vmem:[%s14830_s1 + $0xf80] ss:$16 sps:$4 sm:$0xff]   ;;  %v10475_v13 = vld [vmem:[%s14830_s1 + $0xf88] ss:$16 sps:$4 sm:$0xff]  }
 0x1c6   :  { %3485 = vmatprep.subr.bf16.mxu0 %v10408_v17  ;;  %3813 = vmatprep.subr.bf16.mxu1 %v10411_v18  ;;  %v10480_v17 = vld [vmem:[%s14830_s1 + $0xfa4] ss:$16 sps:$4 sm:$0xff]   ;;  %v10483_v18 = vld [vmem:[%s14830_s1 + $0xfac] ss:$16 sps:$4 sm:$0xff]  }
 0x1c7   :  { %3515 = vmatprep.mubr.bf16.mxu0 %v12872_v21  ;;  %3843 = vmatprep.mubr.bf16.mxu1 %v12872_v21 }
 0x1c9   :  { %3486 = vmatpush1.bf16.msra.mxu0 %v10406_v19  ;;  %3814 = vmatpush1.bf16.msra.mxu1 %v10409_v62  ;;  %v10478_v19 = vld [vmem:[%s14830_s1 + $0xfa0] ss:$16 sps:$4 sm:$0xff]   ;;  %v10481_v62 = vld [vmem:[%s14830_s1 + $0xfa8] ss:$16 sps:$4 sm:$0xff]  }
 0x1ca   :  { %3487 = vmatprep.subr.bf16.mxu0 %v10414_v23  ;;  %3815 = vmatprep.subr.bf16.mxu1 %v10417_v14  ;;  %v10486_v23 = vld [vmem:[%s14830_s1 + $0xfc4] ss:$16 sps:$4 sm:$0xff]   ;;  %v10489_v14 = vld [vmem:[%s14830_s1 + $0xfcc] ss:$16 sps:$4 sm:$0xff]  }
 0x1cd   :  { %3488 = vmatpush1.bf16.msra.mxu0 %v10412_v25  ;;  %3816 = vmatpush1.bf16.msra.mxu1 %v10415_v26  ;;  %v10484_v25 = vld [vmem:[%s14830_s1 + $0xfc0] ss:$16 sps:$4 sm:$0xff]   ;;  %v10487_v26 = vld [vmem:[%s14830_s1 + $0xfc8] ss:$16 sps:$4 sm:$0xff]  }
 0x1ce   :  { %3489 = vmatprep.subr.bf16.mxu0 %v10420_v27  ;;  %3817 = vmatprep.subr.bf16.mxu1 %v10423_v28  ;;  %v10492_v27 = vld [vmem:[%s14830_s1 + $0xfe4] ss:$16 sps:$4 sm:$0xff]   ;;  %v10495_v28 = vld [vmem:[%s14830_s1 + $0xfec] ss:$16 sps:$4 sm:$0xff]  }
 0x1d1   :  { %3490 = vmatpush1.bf16.msra.mxu0 %v10418_v29  ;;  %3818 = vmatpush1.bf16.msra.mxu1 %v10421_v33  ;;  %v10490_v29 = vld [vmem:[%s14830_s1 + $0xfe0] ss:$16 sps:$4 sm:$0xff]   ;;  %v10493_v33 = vld [vmem:[%s14830_s1 + $0xfe8] ss:$16 sps:$4 sm:$0xff]  }
 0x1d2   :  { %3491 = vmatprep.subr.bf16.mxu0 %v10426_v34  ;;  %3819 = vmatprep.subr.bf16.mxu1 %v10429_v22  ;;  %v13048_v34 = vcombine.low %v12846_v11, %v12846_v11 }
 0x1d5   :  { %3492 = vmatpush1.bf16.msra.mxu0 %v10424_v36  ;;  %3820 = vmatpush1.bf16.msra.mxu1 %v10427_v37 }
 0x1d6   :  { %3493 = vmatprep.subr.bf16.mxu0 %v10432_v38  ;;  %3821 = vmatprep.subr.bf16.mxu1 %v10435_v39 }
 0x1d9   :  { %3494 = vmatpush1.bf16.msra.mxu0 %v10430_v40  ;;  %3822 = vmatpush1.bf16.msra.mxu1 %v10433_v41 }
 0x1da   :  { %3495 = vmatprep.subr.bf16.mxu0 %v10438_v44  ;;  %3823 = vmatprep.subr.bf16.mxu1 %v10441_v45 }
 0x1dd   :  { %3496 = vmatpush1.bf16.msra.mxu0 %v10436_v46  ;;  %3824 = vmatpush1.bf16.msra.mxu1 %v10439_v32 }
 0x1de   :  { %3497 = vmatprep.subr.bf16.mxu0 %v10444_v48  ;;  %3825 = vmatprep.subr.bf16.mxu1 %v10447_v50 }
 0x1e1   :  { %3498 = vmatpush1.bf16.msra.mxu0 %v10442_v51  ;;  %3826 = vmatpush1.bf16.msra.mxu1 %v10445_v52 }
 0x1e2   :  { %3499 = vmatprep.subr.bf16.mxu0 %v10450_v53  ;;  %3827 = vmatprep.subr.bf16.mxu1 %v10453_v54 }
 0x1e5   :  { %3500 = vmatpush1.bf16.msra.mxu0 %v10448_v55  ;;  %3828 = vmatpush1.bf16.msra.mxu1 %v10451_v56 }
 0x1e6   :  { %3501 = vmatprep.subr.bf16.mxu0 %v10456_v57  ;;  %3829 = vmatprep.subr.bf16.mxu1 %v10459_v58 }
 0x1e9   :  { %3502 = vmatpush1.bf16.msra.mxu0 %v10454_v60  ;;  %3830 = vmatpush1.bf16.msra.mxu1 %v10457_v61 }
 0x1ea   :  { %3503 = vmatprep.subr.bf16.mxu0 %v10462_v42  ;;  %3831 = vmatprep.subr.bf16.mxu1 %v10465_v63 }
 0x1ed   :  { %3504 = vmatpush1.bf16.msra.mxu0 %v10460_v1  ;;  %3832 = vmatpush1.bf16.msra.mxu1 %v10463_v2 }
 0x1ee   :  { %3505 = vmatprep.subr.bf16.mxu0 %v10468_v3  ;;  %3833 = vmatprep.subr.bf16.mxu1 %v10471_v4 }
 0x1f1   :  { %3506 = vmatpush1.bf16.msra.mxu0 %v10466_v5  ;;  %3834 = vmatpush1.bf16.msra.mxu1 %v10469_v7 }
 0x1f2   :  { %3507 = vmatprep.subr.bf16.mxu0 %v10474_v8  ;;  %3835 = vmatprep.subr.bf16.mxu1 %v10477_v9 }
 0x1f5   :  { %3508 = vmatpush1.bf16.msra.mxu0 %v10472_v12  ;;  %3836 = vmatpush1.bf16.msra.mxu1 %v10475_v13 }
 0x1f6   :  { %3509 = vmatprep.subr.bf16.mxu0 %v10480_v17  ;;  %3837 = vmatprep.subr.bf16.mxu1 %v10483_v18 }
 0x1f9   :  { %3510 = vmatpush1.bf16.msra.mxu0 %v10478_v19  ;;  %3838 = vmatpush1.bf16.msra.mxu1 %v10481_v62 }
 0x1fa   :  { %3511 = vmatprep.subr.bf16.mxu0 %v10486_v23  ;;  %3839 = vmatprep.subr.bf16.mxu1 %v10489_v14 }
 0x1fd   :  { %3512 = vmatpush1.bf16.msra.mxu0 %v10484_v25  ;;  %3840 = vmatpush1.bf16.msra.mxu1 %v10487_v26 }
 0x1fe   :  { %3513 = vmatprep.subr.bf16.mxu0 %v10492_v27  ;;  %3841 = vmatprep.subr.bf16.mxu1 %v10495_v28 }
 0x201   :  { %3514 = vmatpush1.bf16.msra.mxu0 %v10490_v29  ;;  %3842 = vmatpush1.bf16.msra.mxu1 %v10493_v33 }
 0x204   :  { %3516 = vmatmul.mubr.bf16.vlgmr.msra.gmra.mrb[0].mxu0 %v13048_v34  ;;  %3844 = vmatmul.mubr.bf16.vlgmr.msra.gmra.mrb[0].mxu1 %v13048_v34 }
 0x205   :  { %18 = vsyncpa [#allocation4], 0  ;;  %v11326_v22 = vmov 0   ;;  %v560_v36 = vlaneseq  ;;  %v558_v39 = vld [vmem:[%s14831_s2] sm:$0xf]  ;;  %vm3928_vm0 = vcmask 1043456  }
 0x206   :  { %9713 = vset.pattern.permute.xlu0 %v11326_v22  ;;  %4009 = vmatprep.mubr.bf16.mxu0 %v11326_v22  ;;  %v3856_v46 = vld [vmem:[%s14832_s3] sm:$0xf]  ;;  %v3930_v14 = vsel %vm3928_vm0, %v11594_v6, 0  ;;  %v3936_v25 = vsel %vm3928_vm0, %v11800_v10, 0  ;;  %vm3912_vm3 = vcmask 57344   ;;  %vm3924_vm5 = vcmask 64512  }
 0x207   :  { %4050 = vmatprep.mubr.bf16.mxu1 %v11326_v22  ;;  %v13055_v37 = vshrl.u32 %v560_v36, 7  ;;  %v3887_v23 = vld [vmem:[#allocation2] sm:$0x1]  ;;  %8986 = vmatprep.subr.msk.bf16.mxu0 %vm3928_vm0, %v11530_v49  ;;  %v3906_v10 = vand.u32 127, %v560_v36  ;;  %v3942_v36 = vsel %vm3928_vm0, %v12012_v20, 0  ;;  %v3954_v20 = vsel %vm3928_vm0, %v12432_v43, 0 }
 0x208   :  { %8988 = vmatprep.subr.msk.bf16.mxu1 %vm3928_vm0, %v11674_v31  ;;  %3978 = vmatpush1.bf16.msra.mxu0 %v3930_v14  ;;  %v3972_v43 = vsel %vm3928_vm0, %v13048_v34, 0  ;;  %v10509_v34 = vld [vmem:[%s14834_s5 + $0x2c] ss:$16 sps:$4 sm:$0xff]   ;;  %v10554_v14 = vld [vmem:[%s14834_s5 + $0x124] ss:$16 sps:$4 sm:$0xff]   ;;  %s11327_s20 = smov [#allocation3]  }
 0x209   :  { %v13058_v11 = vsub.s32 0, %v13055_v37  ;;  %v13061_v38 = vsub.s32 2, %v13055_v37  ;;  %v13067_v40 = vsub.s32 1, %v13055_v37  ;;  %v13070_v41 = vsub.s32 3, %v13055_v37  ;;  %4019 = vmatpush1.bf16.msra.mxu1 %v3936_v25  ;;  %8990 = vmatprep.subr.msk.bf16.mxu0 %vm3928_vm0, %v11821_v16  ;;  %v10557_v25 = vld [vmem:[%s14834_s5 + $0x12c] ss:$16 sps:$4 sm:$0xff]  }
 0x20a   :  { %8992 = vmatprep.subr.msk.bf16.mxu1 %vm3928_vm0, %v12030_v24  ;;  %v3918_v33 = vadd.s32 1, %v13055_v37  ;;  %v3909_v16 = vsub.s32 %v3906_v10, %v13055_v37  ;;  %s8447_s21 = sshll.u32 %s11327_s20, 4  ;;  %s8448_s21 = int_to_ptr.vmem [resolvable:$true] %s8447_s21 }
 0x20b   :  { %v563_v44 = vrot.slane %v558_v39, %v13058_v11  ;;  %v571_v45 = vrot.slane %v558_v39, %v13061_v38  ;;  %v567_v32 = vrot.slane %v558_v39, %v13067_v40  ;;  %v575_v48 = vrot.slane %v558_v39, %v13070_v41  ;;  %s11302_s22 = scalar_lea.vmem %s8448_s21, 32  ;;  %p11307_p1 = scmp.lt.s32.totalorder %s8448_s21, %s8448_s21 }
 0x20c   :  { %v3861_v53 = vrot.slane %v3856_v46, %v13058_v11  ;;  %v3865_v58 = vrot.slane %v3856_v46, %v13067_v40  ;;  %v3869_v4 = vrot.slane %v3856_v46, %v13061_v38  ;;  %v3873_v12 = vrot.slane %v3856_v46, %v13070_v41  ;;  %p11303_p0 = scmp.ne.s32.totalorder %s8448_s21, %s11302_s22  ;;  %p11308_p2 = scmp.lt.s32.totalorder %s11302_s22, %s11302_s22 }
 0x20d   :  { %v3916_v39 = vmul.u32 4, %v13055_v37  ;;  %v10507_v37 = vld [vmem:[%s14834_s5 + $0x28] ss:$16 sps:$4 sm:$0xff]  }
 0x20e   :  { %p11309_p3 = por %p11308_p2, %p11307_p1 }
 0x20f   :  { %vm3917_vm1 = vcmp.ge.s32.totalorder %v3906_v10, %v3916_v39  ;;  %v10567_v39 = vld [vmem:[%s14834_s5 + $0x168] ss:$16 sps:$4 sm:$0xff]  }
 0x210   :  { %p11310_p4 = pnand %p11309_p3, %p11303_p0 }
 0x2d7   :  { %v3517_v50 = vpop.f32.mrb[0].mxu0  ;;  %v3845_v51 = vpop.f32.mrb[0].mxu1 }
 0x2d8   :  { %v9591_v52 = vadd.f32 %v3517_v50, %v563_v44  ;;  %v9593_v54 = vadd.f32 %v3845_v51, %v571_v45  ;;  %v3519_v55 = vpop.f32.mrb[1].mxu0  ;;  %v3847_v56 = vpop.f32.mrb[1].mxu1  ;;  %v3919_v44 = vmul.u32 4, %v3918_v33  ;;  %v10512_v50 = vld [vmem:[%s14834_s5 + $0x44] ss:$16 sps:$4 sm:$0xff]  }
 0x2d9   :  { %v9592_v57 = vadd.f32 %v3519_v55, %v567_v32  ;;  %v9594_v60 = vadd.f32 %v3847_v56, %v575_v48  ;;  %v3521_v61 = vpop.f32.mrb[2].mxu0  ;;  %v3849_v42 = vpop.f32.mrb[2].mxu1  ;;  %v3948_v48 = vsel %vm3928_vm0, %v12221_v30, 0  ;;  %v3960_v30 = vsel %vm3928_vm0, %v12642_v59, 0  ;;  %v10503_v59 = vld [vmem:[%s14834_s5 + $0xc] ss:$16 sps:$4 sm:$0xff]  }
 0x2da   :  { %v3852_v63 = vmax.f32 %v9591_v52, 0.0  ;;  %v3522_v1 = vpop.f32.mrb[3].mxu0  ;;  %v3850_v2 = vpop.f32.mrb[3].mxu1  ;;  %v3854_v3 = vmax.f32 %v9593_v54, 0.0  ;;  %vm3920_vm2 = vcmp.lt.s32.totalorder %v3906_v10, %v3919_v44  ;;  %v10515_v51 = vld [vmem:[%s14834_s5 + $0x4c] ss:$16 sps:$4 sm:$0xff]  }
 0x2db   :  { %v3853_v5 = vmax.f32 %v9592_v57, 0.0  ;;  %v3855_v9 = vmax.f32 %v9594_v60, 0.0  ;;  %vm3921_vm4 = vmand %vm3917_vm1, %vm3920_vm2  ;;  %v10510_v52 = vld [vmem:[%s14834_s5 + $0x40] ss:$16 sps:$4 sm:$0xff]   ;;  %v10518_v54 = vld [vmem:[%s14834_s5 + $0x64] ss:$16 sps:$4 sm:$0xff]  }
 0x2dc   :  { %v3878_v7 = vmul.f32 %v3861_v53, %v3852_v63  ;;  %v3880_v13 = vmul.f32 %v3869_v4, %v3854_v3  ;;  %v10513_v53 = vld [vmem:[%s14834_s5 + $0x48] ss:$16 sps:$4 sm:$0xff]   ;;  %v10521_v55 = vld [vmem:[%s14834_s5 + $0x6c] ss:$16 sps:$4 sm:$0xff]   ;;  %v10516_v56 = vld [vmem:[%s14834_s5 + $0x60] ss:$16 sps:$4 sm:$0xff]  }
 0x2dd   :  { %v3879_v8 = vmul.f32 %v3865_v58, %v3853_v5  ;;  %v3881_v18 = vmul.f32 %v3873_v12, %v3855_v9  ;;  %v10519_v57 = vld [vmem:[%s14834_s5 + $0x68] ss:$16 sps:$4 sm:$0xff]   ;;  %v10524_v58 = vld [vmem:[%s14834_s5 + $0x84] ss:$16 sps:$4 sm:$0xff]   ;;  %v10527_v60 = vld [vmem:[%s14834_s5 + $0x8c] ss:$16 sps:$4 sm:$0xff]  }
 0x2de   :  { %v10522_v61 = vld [vmem:[%s14834_s5 + $0x80] ss:$16 sps:$4 sm:$0xff]   ;;  %v10525_v42 = vld [vmem:[%s14834_s5 + $0x88] ss:$16 sps:$4 sm:$0xff]   ;;  %v10530_v63 = vld [vmem:[%s14834_s5 + $0xa4] ss:$16 sps:$4 sm:$0xff]  }
 0x2df   :  { %v3882_v17 = vadd.f32 %v3879_v8, %v3878_v7  ;;  %v10533_v1 = vld [vmem:[%s14834_s5 + $0xac] ss:$16 sps:$4 sm:$0xff]   ;;  %v10528_v2 = vld [vmem:[%s14834_s5 + $0xa0] ss:$16 sps:$4 sm:$0xff]   ;;  %v10531_v3 = vld [vmem:[%s14834_s5 + $0xa8] ss:$16 sps:$4 sm:$0xff]  }
 0x2e0   :  { %v10536_v4 = vld [vmem:[%s14834_s5 + $0xc4] ss:$16 sps:$4 sm:$0xff]   ;;  %v10539_v5 = vld [vmem:[%s14834_s5 + $0xcc] ss:$16 sps:$4 sm:$0xff]   ;;  %v10534_v7 = vld [vmem:[%s14834_s5 + $0xc0] ss:$16 sps:$4 sm:$0xff]  }
 0x2e1   :  { %v3883_v19 = vadd.f32 %v3882_v17, %v3880_v13  ;;  %v10537_v8 = vld [vmem:[%s14834_s5 + $0xc8] ss:$16 sps:$4 sm:$0xff]   ;;  %v10542_v9 = vld [vmem:[%s14834_s5 + $0xe4] ss:$16 sps:$4 sm:$0xff]   ;;  %v10545_v12 = vld [vmem:[%s14834_s5 + $0xec] ss:$16 sps:$4 sm:$0xff]  }
 0x2e2   :  { %v10540_v13 = vld [vmem:[%s14834_s5 + $0xe0] ss:$16 sps:$4 sm:$0xff]   ;;  %v10543_v17 = vld [vmem:[%s14834_s5 + $0xe8] ss:$16 sps:$4 sm:$0xff]   ;;  %v10569_v33 = vld [vmem:[%s14834_s5 + $0x16c] ss:$16 sps:$4 sm:$0xff]  }
 0x2e3   :  { %v3884_v62 = vadd.f32 %v3883_v19, %v3881_v18  ;;  %v10548_v18 = vld [vmem:[%s14834_s5 + $0x104] ss:$16 sps:$4 sm:$0xff]   ;;  %v10551_v19 = vld [vmem:[%s14834_s5 + $0x10c] ss:$16 sps:$4 sm:$0xff]   ;;  %v10564_v10 = vld [vmem:[%s14834_s5 + $0x160] ss:$16 sps:$4 sm:$0xff]  }
 0x2e4   :  { %v10572_v44 = vld [vmem:[%s14834_s5 + $0x184] ss:$16 sps:$4 sm:$0xff]  }
 0x2e5   :  { %3885 = vadd.xlane.f32.xlu0 %v3884_v62  ;;  %v10546_v62 = vld [vmem:[%s14834_s5 + $0x100] ss:$16 sps:$4 sm:$0xff]  }
 0x2fb   :  { %3890 = vperm.xlu0 %9713, %v3887_v23   ;;  %v10549_v23 = vld [vmem:[%s14834_s5 + $0x108] ss:$16 sps:$4 sm:$0xff]  }
 0x372   :  { %v3886_v26 = vpop.xlane.xlu0 %3885 }
 0x37a   :  { %v3891_v27 = vpop.permute.xlu0 %3890 }
 0x37b   :  { %v3896_v49 = vrot.slane %v3891_v27, %v13058_v11  ;;  %v10555_v27 = vld [vmem:[%s14834_s5 + $0x128] ss:$16 sps:$4 sm:$0xff]  }
 0x37d   :  { %v3897_v28 = vadd.f32 %v3896_v49, %v3886_v26  ;;  %v10552_v26 = vld [vmem:[%s14834_s5 + $0x120] ss:$16 sps:$4 sm:$0xff]   ;;  %v10560_v49 = vld [vmem:[%s14834_s5 + $0x144] ss:$16 sps:$4 sm:$0xff]  }
 0x37f   :  { %v8985_v6 = vmul.f32 -1.442695, %v3897_v28  ;;  %v10563_v28 = vld [vmem:[%s14834_s5 + $0x14c] ss:$16 sps:$4 sm:$0xff]  }
 0x381   :  { %11298 = vpow2.f32 %v8985_v6  ;;  %v10558_v6 = vld [vmem:[%s14834_s5 + $0x140] ss:$16 sps:$4 sm:$0xff]  }
 0x38b   :  { %v11299_v29 = vpop.eup %11298 }
 0x38c   :  { %v3901_v31 = vadd.f32 1.0, %v11299_v29  ;;  %v10561_v29 = vld [vmem:[%s14834_s5 + $0x148] ss:$16 sps:$4 sm:$0xff]  }
 0x38e   :  { %11300 = vrcp.f32 %v3901_v31  ;;  %v10566_v31 = vld [vmem:[%s14834_s5 + $0x164] ss:$16 sps:$4 sm:$0xff]  }
 0x398   :  { %v11301_v24 = vpop.eup %11300 }
 0x399   :  { %v3910_v45 = vrot.slane %v11301_v24, %v3909_v16  ;;  %v10575_v16 = vld [vmem:[%s14834_s5 + $0x18c] ss:$16 sps:$4 sm:$0xff]   ;;  %v10570_v24 = vld [vmem:[%s14834_s5 + $0x180] ss:$16 sps:$4 sm:$0xff]  }
 0x39b   :  { %3913 = vst.msk [vmem:[%s14838_s9] sm:$0x1] %vm3912_vm3, %v3910_v45  ;;  %v3922_v46 = vsel %vm3921_vm4, %v3910_v45, 0.0  ;;  %v10573_v45 = vld [vmem:[%s14834_s5 + $0x188] ss:$16 sps:$4 sm:$0xff]  }
 0x39c   :  { %v3923_v32 = vpack.c.bf16 %v3922_v46, %v3922_v46  ;;  %v10578_v46 = vld [vmem:[%s14834_s5 + $0x1a4] ss:$16 sps:$4 sm:$0xff]  }
 0x39e   :  { %8987 = vmatmul.mubr.msk.bf16.vlgmr.msra.gmra.mrb[4].mxu0 %vm3924_vm5, %v3923_v32  ;;  %8989 = vmatmul.mubr.msk.bf16.vlgmr.msra.gmra.mrb[4].mxu1 %vm3924_vm5, %v3923_v32 }
 0x39f   :  { %4060 = vmatpush1.bf16.msra.mxu0 %v3942_v36  ;;  %4101 = vmatpush1.bf16.msra.mxu1 %v3948_v48  ;;  %v10576_v36 = vld [vmem:[%s14834_s5 + $0x1a0] ss:$16 sps:$4 sm:$0xff]   ;;  %v10579_v48 = vld [vmem:[%s14834_s5 + $0x1a8] ss:$16 sps:$4 sm:$0xff]  }
 0x3a0   :  { %4091 = vmatprep.mubr.bf16.mxu0 %v11326_v22  ;;  %4132 = vmatprep.mubr.bf16.mxu1 %v11326_v22 }
 0x3a1   :  { %8994 = vmatprep.subr.msk.bf16.mxu0 %vm3928_vm0, %v12239_v35  ;;  %8996 = vmatprep.subr.msk.bf16.mxu1 %vm3928_vm0, %v12448_v47  ;;  %v3966_v35 = vsel %vm3928_vm0, %v12856_v15, 0  ;;  %v10500_v47 = vld [vmem:[%s14834_s5 + $0x4] ss:$16 sps:$4 sm:$0xff]   ;;  %v10501_v15 = vld [vmem:[%s14834_s5 + $0x8] ss:$16 sps:$4 sm:$0xff]  }
 0x3a6   :  { %8991 = vmatmul.mubr.msk.bf16.vlgmr.msra.gmra.mrb[8].mxu0 %vm3924_vm5, %v3923_v32  ;;  %8993 = vmatmul.mubr.msk.bf16.vlgmr.msra.gmra.mrb[8].mxu1 %vm3924_vm5, %v3923_v32 }
 0x3a7   :  { %4142 = vmatpush1.bf16.msra.mxu0 %v3954_v20  ;;  %4183 = vmatpush1.bf16.msra.mxu1 %v3960_v30  ;;  %v10584_v20 = vld [vmem:[%s14834_s5 + $0x1c4] ss:$16 sps:$4 sm:$0xff]   ;;  %v10587_v30 = vld [vmem:[%s14834_s5 + $0x1cc] ss:$16 sps:$4 sm:$0xff]  }
 0x3a8   :  { %4173 = vmatprep.mubr.bf16.mxu0 %v11326_v22  ;;  %4214 = vmatprep.mubr.bf16.mxu1 %v11326_v22 }
 0x3a9   :  { %8998 = vmatprep.subr.msk.bf16.mxu0 %vm3928_vm0, %v12663_v0  ;;  %9000 = vmatprep.subr.msk.bf16.mxu1 %vm3928_vm0, %v12872_v21  ;;  %v10498_v0 = vld [vmem:[%s14834_s5] ss:$16 sps:$4 sm:$0xff]   ;;  %v10506_v21 = vld [vmem:[%s14834_s5 + $0x24] ss:$16 sps:$4 sm:$0xff]  }
 0x3ae   :  { %8995 = vmatmul.mubr.msk.bf16.vlgmr.msra.gmra.mrb[12].mxu0 %vm3924_vm5, %v3923_v32  ;;  %8997 = vmatmul.mubr.msk.bf16.vlgmr.msra.gmra.mrb[12].mxu1 %vm3924_vm5, %v3923_v32 }
 0x3af   :  { %4224 = vmatpush1.bf16.msra.mxu0 %v3966_v35  ;;  %4265 = vmatpush1.bf16.msra.mxu1 %v3972_v43  ;;  %v10582_v35 = vld [vmem:[%s14834_s5 + $0x1c0] ss:$16 sps:$4 sm:$0xff]   ;;  %v10585_v43 = vld [vmem:[%s14834_s5 + $0x1c8] ss:$16 sps:$4 sm:$0xff]  }
 0x3b0   :  { %4255 = vmatprep.mubr.bf16.mxu0 %v11326_v22  ;;  %4296 = vmatprep.mubr.bf16.mxu1 %v11326_v22  ;;  %v10504_v22 = vld [vmem:[%s14834_s5 + $0x20] ss:$16 sps:$4 sm:$0xff]  }
 0x3b1   :  { %7431 = vmatprep.subr.bf16.mxu0 %v10500_v47  ;;  %7759 = vmatprep.subr.bf16.mxu1 %v10503_v59  ;;  %v10590_v47 = vld [vmem:[%s14834_s5 + $0x1e4] ss:$16 sps:$4 sm:$0xff]   ;;  %v10593_v59 = vld [vmem:[%s14834_s5 + $0x1ec] ss:$16 sps:$4 sm:$0xff]  }
 0x3b6   :  { %8999 = vmatmul.mubr.msk.bf16.vlgmr.msra.gmra.mrb[16].mxu0 %vm3924_vm5, %v3923_v32  ;;  %9001 = vmatmul.mubr.msk.bf16.vlgmr.msra.gmra.mrb[16].mxu1 %vm3924_vm5, %v3923_v32  ;;  %v10581_v32 = vld [vmem:[%s14834_s5 + $0x1ac] ss:$16 sps:$4 sm:$0xff]  }
 0x3b7   :  { %7432 = vmatpush1.bf16.msra.mxu0 %v10498_v0  ;;  %7760 = vmatpush1.bf16.msra.mxu1 %v10501_v15  ;;  %v10588_v0 = vld [vmem:[%s14834_s5 + $0x1e0] ss:$16 sps:$4 sm:$0xff]   ;;  %v10591_v15 = vld [vmem:[%s14834_s5 + $0x1e8] ss:$16 sps:$4 sm:$0xff]  }
 0x3b8   :  { %7433 = vmatprep.subr.bf16.mxu0 %v10506_v21  ;;  %7761 = vmatprep.subr.bf16.mxu1 %v10509_v34  ;;  %v10596_v21 = vld [vmem:[%s14834_s5 + $0x204] ss:$16 sps:$4 sm:$0xff]   ;;  %v10599_v34 = vld [vmem:[%s14834_s5 + $0x20c] ss:$16 sps:$4 sm:$0xff]  }
 0x3bb   :  { %7434 = vmatpush1.bf16.msra.mxu0 %v10504_v22  ;;  %7762 = vmatpush1.bf16.msra.mxu1 %v10507_v37 }
 0x3bc   :  { %7435 = vmatprep.subr.bf16.mxu0 %v10512_v50  ;;  %7763 = vmatprep.subr.bf16.mxu1 %v10515_v51 }
 0x3bf   :  { %7436 = vmatpush1.bf16.msra.mxu0 %v10510_v52  ;;  %7764 = vmatpush1.bf16.msra.mxu1 %v10513_v53 }
 0x3c0   :  { %7437 = vmatprep.subr.bf16.mxu0 %v10518_v54  ;;  %7765 = vmatprep.subr.bf16.mxu1 %v10521_v55 }
 0x3c3   :  { %7438 = vmatpush1.bf16.msra.mxu0 %v10516_v56  ;;  %7766 = vmatpush1.bf16.msra.mxu1 %v10519_v57 }
 0x3c4   :  { %7439 = vmatprep.subr.bf16.mxu0 %v10524_v58  ;;  %7767 = vmatprep.subr.bf16.mxu1 %v10527_v60 }
 0x3c7   :  { %7440 = vmatpush1.bf16.msra.mxu0 %v10522_v61  ;;  %7768 = vmatpush1.bf16.msra.mxu1 %v10525_v42  ;;  %v10594_v61 = vld [vmem:[%s14834_s5 + $0x200] ss:$16 sps:$4 sm:$0xff]   ;;  %v10597_v42 = vld [vmem:[%s14834_s5 + $0x208] ss:$16 sps:$4 sm:$0xff]  }
 0x3c8   :  { %7441 = vmatprep.subr.bf16.mxu0 %v10530_v63  ;;  %7769 = vmatprep.subr.bf16.mxu1 %v10533_v1  ;;  %v10602_v1 = vld [vmem:[%s14834_s5 + $0x224] ss:$16 sps:$4 sm:$0xff]  }
 0x3cb   :  { %7442 = vmatpush1.bf16.msra.mxu0 %v10528_v2  ;;  %7770 = vmatpush1.bf16.msra.mxu1 %v10531_v3  ;;  %v10605_v2 = vld [vmem:[%s14834_s5 + $0x22c] ss:$16 sps:$4 sm:$0xff]  }
 0x3cc   :  { %7443 = vmatprep.subr.bf16.mxu0 %v10536_v4  ;;  %7771 = vmatprep.subr.bf16.mxu1 %v10539_v5 }
 0x3cf   :  { %7444 = vmatpush1.bf16.msra.mxu0 %v10534_v7  ;;  %7772 = vmatpush1.bf16.msra.mxu1 %v10537_v8  ;;  %v10600_v7 = vld [vmem:[%s14834_s5 + $0x220] ss:$16 sps:$4 sm:$0xff]   ;;  %v10603_v8 = vld [vmem:[%s14834_s5 + $0x228] ss:$16 sps:$4 sm:$0xff]  }
 0x3d0   :  { %7445 = vmatprep.subr.bf16.mxu0 %v10542_v9  ;;  %7773 = vmatprep.subr.bf16.mxu1 %v10545_v12 }
 0x3d3   :  { %7446 = vmatpush1.bf16.msra.mxu0 %v10540_v13  ;;  %7774 = vmatpush1.bf16.msra.mxu1 %v10543_v17  ;;  %v10608_v13 = vld [vmem:[%s14834_s5 + $0x244] ss:$16 sps:$4 sm:$0xff]   ;;  %v10611_v17 = vld [vmem:[%s14834_s5 + $0x24c] ss:$16 sps:$4 sm:$0xff]  }
 0x3d4   :  { %7447 = vmatprep.subr.bf16.mxu0 %v10548_v18  ;;  %7775 = vmatprep.subr.bf16.mxu1 %v10551_v19 }
 0x3d7   :  { %7448 = vmatpush1.bf16.msra.mxu0 %v10546_v62  ;;  %7776 = vmatpush1.bf16.msra.mxu1 %v10549_v23 }
 0x3d8   :  { %7449 = vmatprep.subr.bf16.mxu0 %v10554_v14  ;;  %7777 = vmatprep.subr.bf16.mxu1 %v10557_v25  ;;  %v10606_v14 = vld [vmem:[%s14834_s5 + $0x240] ss:$16 sps:$4 sm:$0xff]   ;;  %v10609_v25 = vld [vmem:[%s14834_s5 + $0x248] ss:$16 sps:$4 sm:$0xff]  }
 0x3db   :  { %7450 = vmatpush1.bf16.msra.mxu0 %v10552_v26  ;;  %7778 = vmatpush1.bf16.msra.mxu1 %v10555_v27  ;;  %v10614_v26 = vld [vmem:[%s14834_s5 + $0x264] ss:$16 sps:$4 sm:$0xff]   ;;  %v10617_v27 = vld [vmem:[%s14834_s5 + $0x26c] ss:$16 sps:$4 sm:$0xff]  }
 0x3dc   :  { %7451 = vmatprep.subr.bf16.mxu0 %v10560_v49  ;;  %7779 = vmatprep.subr.bf16.mxu1 %v10563_v28 }
 0x3df   :  { %7452 = vmatpush1.bf16.msra.mxu0 %v10558_v6  ;;  %7780 = vmatpush1.bf16.msra.mxu1 %v10561_v29  ;;  %v10612_v6 = vld [vmem:[%s14834_s5 + $0x260] ss:$16 sps:$4 sm:$0xff]   ;;  %v10615_v29 = vld [vmem:[%s14834_s5 + $0x268] ss:$16 sps:$4 sm:$0xff]  }
 0x3e0   :  { %7453 = vmatprep.subr.bf16.mxu0 %v10566_v31  ;;  %7781 = vmatprep.subr.bf16.mxu1 %v10569_v33 }
 0x3e3   :  { %7454 = vmatpush1.bf16.msra.mxu0 %v10564_v10  ;;  %7782 = vmatpush1.bf16.msra.mxu1 %v10567_v39  ;;  %v10620_v10 = vld [vmem:[%s14834_s5 + $0x284] ss:$16 sps:$4 sm:$0xff]   ;;  %v10623_v39 = vld [vmem:[%s14834_s5 + $0x28c] ss:$16 sps:$4 sm:$0xff]  }
 0x3e4   :  { %7455 = vmatprep.subr.bf16.mxu0 %v10572_v44  ;;  %7783 = vmatprep.subr.bf16.mxu1 %v10575_v16 }
 0x3e7   :  { %7456 = vmatpush1.bf16.msra.mxu0 %v10570_v24  ;;  %7784 = vmatpush1.bf16.msra.mxu1 %v10573_v45 }
 0x3e8   :  { %7457 = vmatprep.subr.bf16.mxu0 %v10578_v46  ;;  %7785 = vmatprep.subr.bf16.mxu1 %v10581_v32  ;;  %v10618_v46 = vld [vmem:[%s14834_s5 + $0x280] ss:$16 sps:$4 sm:$0xff]   ;;  %v10621_v32 = vld [vmem:[%s14834_s5 + $0x288] ss:$16 sps:$4 sm:$0xff]  }
 0x3eb   :  { %7458 = vmatpush1.bf16.msra.mxu0 %v10576_v36  ;;  %7786 = vmatpush1.bf16.msra.mxu1 %v10579_v48  ;;  %v10626_v36 = vld [vmem:[%s14834_s5 + $0x2a4] ss:$16 sps:$4 sm:$0xff]   ;;  %v10629_v48 = vld [vmem:[%s14834_s5 + $0x2ac] ss:$16 sps:$4 sm:$0xff]  }
 0x3ec   :  { %7459 = vmatprep.subr.bf16.mxu0 %v10584_v20  ;;  %7787 = vmatprep.subr.bf16.mxu1 %v10587_v30 }
 0x3ef   :  { %7460 = vmatpush1.bf16.msra.mxu0 %v10582_v35  ;;  %7788 = vmatpush1.bf16.msra.mxu1 %v10585_v43  ;;  %v10624_v35 = vld [vmem:[%s14834_s5 + $0x2a0] ss:$16 sps:$4 sm:$0xff]   ;;  %v10627_v43 = vld [vmem:[%s14834_s5 + $0x2a8] ss:$16 sps:$4 sm:$0xff]  }
 0x3f0   :  { %7461 = vmatprep.subr.bf16.mxu0 %v10590_v47  ;;  %7789 = vmatprep.subr.bf16.mxu1 %v10593_v59 }
 0x3f3   :  { %7462 = vmatpush1.bf16.msra.mxu0 %v10588_v0  ;;  %7790 = vmatpush1.bf16.msra.mxu1 %v10591_v15  ;;  %v10632_v0 = vld [vmem:[%s14834_s5 + $0x2c4] ss:$16 sps:$4 sm:$0xff]   ;;  %v10635_v15 = vld [vmem:[%s14834_s5 + $0x2cc] ss:$16 sps:$4 sm:$0xff]  }
 0x3f4   :  { %7472 = vmatprep.subr.bf16.mxu0 %v10596_v21  ;;  %7800 = vmatprep.subr.bf16.mxu1 %v10599_v34 }
 0x471   :  { %v4011_v22 = vpop.f32.mrb[4].mxu0  ;;  %v13334_v37 = vpop.f32.mrb[4].mxu1 }
 0x472   :  { %v4305_v50 = vmul.f32 0.25, %v4011_v22  ;;  %v4013_v51 = vpop.f32.mrb[5].mxu0  ;;  %v4054_v52 = vpop.f32.mrb[5].mxu1 }
 0x473   :  { %v4306_v53 = vmul.f32 0.25, %v4013_v51  ;;  %v4015_v54 = vpop.f32.mrb[6].mxu0  ;;  %v4056_v55 = vpop.f32.mrb[6].mxu1  ;;  %v4308_v56 = vmul.f32 0.25, %v4054_v52  ;;  %v10630_v51 = vld [vmem:[%s14834_s5 + $0x2c0] ss:$16 sps:$4 sm:$0xff]  }
 0x474   :  { %v4016_v57 = vpop.f32.mrb[7].mxu0  ;;  %v4057_v58 = vpop.f32.mrb[7].mxu1  ;;  %v4321_v63 = vpack.c.bf16 %v4305_v50, %v4305_v50  ;;  %v10633_v52 = vld [vmem:[%s14834_s5 + $0x2c8] ss:$16 sps:$4 sm:$0xff]   ;;  %v10641_v54 = vld [vmem:[%s14834_s5 + $0x2ec] ss:$16 sps:$4 sm:$0xff]  }
 0x475   :  { %v4322_v60 = vpack.c.bf16 %v4306_v53, %v4306_v53  ;;  %v4324_v3 = vpack.c.bf16 %v4308_v56, %v4308_v56  ;;  %v10638_v53 = vld [vmem:[%s14834_s5 + $0x2e4] ss:$16 sps:$4 sm:$0xff]   ;;  %v10636_v55 = vld [vmem:[%s14834_s5 + $0x2e0] ss:$16 sps:$4 sm:$0xff]   ;;  %v10639_v56 = vld [vmem:[%s14834_s5 + $0x2e8] ss:$16 sps:$4 sm:$0xff]  }
 0x476   :  { %v10644_v57 = vld [vmem:[%s14834_s5 + $0x304] ss:$16 sps:$4 sm:$0xff]   ;;  %v10647_v58 = vld [vmem:[%s14834_s5 + $0x30c] ss:$16 sps:$4 sm:$0xff]  }
 0x477   :  { %7463 = vmatprep.mubr.bf16.mxu0 %v4322_v60  ;;  %7791 = vmatprep.mubr.bf16.mxu1 %v4322_v60  ;;  %v10642_v60 = vld [vmem:[%s14834_s5 + $0x300] ss:$16 sps:$4 sm:$0xff]  }
 0x478   :  { %7464 = vmatmul.mubr.bf16.vlgmr.msra.gmra.mrb[20].mxu0 %v4321_v63  ;;  %7792 = vmatmul.mubr.bf16.vlgmr.msra.gmra.mrb[20].mxu1 %v4321_v63  ;;  %v10653_v63 = vld [vmem:[%s14834_s5 + $0x32c] ss:$16 sps:$4 sm:$0xff]  }
 0x479   :  { %7473 = vmatpush1.bf16.msra.mxu0 %v10594_v61  ;;  %7801 = vmatpush1.bf16.msra.mxu1 %v10597_v42  ;;  %v13348_v4 = vpop.f32.mrb[8].mxu0  ;;  %v13350_v5 = vpop.f32.mrb[8].mxu1  ;;  %v10645_v61 = vld [vmem:[%s14834_s5 + $0x308] ss:$16 sps:$4 sm:$0xff]   ;;  %v10650_v42 = vld [vmem:[%s14834_s5 + $0x324] ss:$16 sps:$4 sm:$0xff]  }
 0x47a   :  { %7504 = vmatprep.mubr.bf16.mxu0 %v4324_v3  ;;  %7832 = vmatprep.mubr.bf16.mxu1 %v4324_v3  ;;  %v13358_v9 = vpop.f32.mrb[9].mxu0  ;;  %v13360_v12 = vpop.f32.mrb[9].mxu1  ;;  %v10656_v3 = vld [vmem:[%s14834_s5 + $0x344] ss:$16 sps:$4 sm:$0xff]  }
 0x47b   :  { %v4097_v18 = vpop.f32.mrb[10].mxu0  ;;  %v4138_v19 = vpop.f32.mrb[10].mxu1  ;;  %7474 = vmatprep.subr.bf16.mxu0 %v10602_v1  ;;  %7802 = vmatprep.subr.bf16.mxu1 %v10605_v2  ;;  %v10648_v1 = vld [vmem:[%s14834_s5 + $0x320] ss:$16 sps:$4 sm:$0xff]   ;;  %v10651_v2 = vld [vmem:[%s14834_s5 + $0x328] ss:$16 sps:$4 sm:$0xff]  }
 0x47c   :  { %v4098_v62 = vpop.f32.mrb[11].mxu0  ;;  %v4139_v23 = vpop.f32.mrb[11].mxu1  ;;  %v10665_v18 = vld [vmem:[%s14834_s5 + $0x36c] ss:$16 sps:$4 sm:$0xff]   ;;  %v10660_v19 = vld [vmem:[%s14834_s5 + $0x360] ss:$16 sps:$4 sm:$0xff]  }
 0x47d   :  { %7475 = vmatpush1.bf16.msra.mxu0 %v10600_v7  ;;  %7803 = vmatpush1.bf16.msra.mxu1 %v10603_v8  ;;  %v10659_v7 = vld [vmem:[%s14834_s5 + $0x34c] ss:$16 sps:$4 sm:$0xff]   ;;  %v10654_v8 = vld [vmem:[%s14834_s5 + $0x340] ss:$16 sps:$4 sm:$0xff]   ;;  %v10663_v62 = vld [vmem:[%s14834_s5 + $0x368] ss:$16 sps:$4 sm:$0xff]  }
 0x47e   :  { %7476 = vmatprep.subr.bf16.mxu0 %v10608_v13  ;;  %7804 = vmatprep.subr.bf16.mxu1 %v10611_v17  ;;  %v10657_v13 = vld [vmem:[%s14834_s5 + $0x348] ss:$16 sps:$4 sm:$0xff]   ;;  %v10662_v17 = vld [vmem:[%s14834_s5 + $0x364] ss:$16 sps:$4 sm:$0xff]  }
 0x47f   :  { %v10668_v23 = vld [vmem:[%s14834_s5 + $0x384] ss:$16 sps:$4 sm:$0xff]  }
 0x481   :  { %7477 = vmatpush1.bf16.msra.mxu0 %v10606_v14  ;;  %7805 = vmatpush1.bf16.msra.mxu1 %v10609_v25  ;;  %v13380_v49 = vpop.f32.mrb[12].mxu0  ;;  %v13382_v28 = vpop.f32.mrb[12].mxu1  ;;  %v10671_v14 = vld [vmem:[%s14834_s5 + $0x38c] ss:$16 sps:$4 sm:$0xff]   ;;  %v10666_v25 = vld [vmem:[%s14834_s5 + $0x380] ss:$16 sps:$4 sm:$0xff]  }
 0x482   :  { %v13390_v31 = vpop.f32.mrb[13].mxu0  ;;  %v13392_v33 = vpop.f32.mrb[13].mxu1  ;;  %7478 = vmatprep.subr.bf16.mxu0 %v10614_v26  ;;  %7806 = vmatprep.subr.bf16.mxu1 %v10617_v27  ;;  %v10669_v26 = vld [vmem:[%s14834_s5 + $0x388] ss:$16 sps:$4 sm:$0xff]   ;;  %v10674_v27 = vld [vmem:[%s14834_s5 + $0x3a4] ss:$16 sps:$4 sm:$0xff]  }
 0x483   :  { %v4179_v44 = vpop.f32.mrb[14].mxu0  ;;  %v4220_v16 = vpop.f32.mrb[14].mxu1 }
 0x484   :  { %v4180_v24 = vpop.f32.mrb[15].mxu0  ;;  %v4221_v45 = vpop.f32.mrb[15].mxu1  ;;  %v10683_v44 = vld [vmem:[%s14834_s5 + $0x3cc] ss:$16 sps:$4 sm:$0xff]   ;;  %v10678_v16 = vld [vmem:[%s14834_s5 + $0x3c0] ss:$16 sps:$4 sm:$0xff]  }
 0x485   :  { %7479 = vmatpush1.bf16.msra.mxu0 %v10612_v6  ;;  %7807 = vmatpush1.bf16.msra.mxu1 %v10615_v29  ;;  %v10677_v6 = vld [vmem:[%s14834_s5 + $0x3ac] ss:$16 sps:$4 sm:$0xff]   ;;  %v10672_v29 = vld [vmem:[%s14834_s5 + $0x3a0] ss:$16 sps:$4 sm:$0xff]   ;;  %v10681_v24 = vld [vmem:[%s14834_s5 + $0x3c8] ss:$16 sps:$4 sm:$0xff]  }
 0x486   :  { %7480 = vmatprep.subr.bf16.mxu0 %v10620_v10  ;;  %7808 = vmatprep.subr.bf16.mxu1 %v10623_v39  ;;  %v10675_v10 = vld [vmem:[%s14834_s5 + $0x3a8] ss:$16 sps:$4 sm:$0xff]   ;;  %v10680_v39 = vld [vmem:[%s14834_s5 + $0x3c4] ss:$16 sps:$4 sm:$0xff]  }
 0x487   :  { %v10686_v45 = vld [vmem:[%s14834_s5 + $0x3e4] ss:$16 sps:$4 sm:$0xff]  }
 0x489   :  { %7481 = vmatpush1.bf16.msra.mxu0 %v10618_v46  ;;  %7809 = vmatpush1.bf16.msra.mxu1 %v10621_v32  ;;  %v13412_v20 = vpop.f32.mrb[16].mxu0  ;;  %v13414_v30 = vpop.f32.mrb[16].mxu1  ;;  %v10689_v46 = vld [vmem:[%s14834_s5 + $0x3ec] ss:$16 sps:$4 sm:$0xff]   ;;  %v10684_v32 = vld [vmem:[%s14834_s5 + $0x3e0] ss:$16 sps:$4 sm:$0xff]  }
 0x48a   :  { %v13422_v47 = vpop.f32.mrb[17].mxu0  ;;  %v13424_v59 = vpop.f32.mrb[17].mxu1  ;;  %7482 = vmatprep.subr.bf16.mxu0 %v10626_v36  ;;  %7810 = vmatprep.subr.bf16.mxu1 %v10629_v48  ;;  %v10687_v36 = vld [vmem:[%s14834_s5 + $0x3e8] ss:$16 sps:$4 sm:$0xff]   ;;  %v4307_v48 = vmul.f32 0.25, %v13334_v37 }
 0x48b   :  { %v4261_v21 = vpop.f32.mrb[18].mxu0  ;;  %v4302_v34 = vpop.f32.mrb[18].mxu1  ;;  %v10693_v37 = vld [vmem:[%s14834_s5 + $0x408] ss:$16 sps:$4 sm:$0xff]  }
 0x48c   :  { %v4262_v22 = vpop.f32.mrb[19].mxu0  ;;  %v4303_v50 = vpop.f32.mrb[19].mxu1  ;;  %v4323_v21 = vpack.c.bf16 %v4307_v48, %v4307_v48  ;;  %v10761_v48 = vld [vmem:[%s14834_s5 + $0x56c] ss:$16 sps:$4 sm:$0xff]  }
 0x48d   :  { %7483 = vmatpush1.bf16.msra.mxu0 %v10624_v35  ;;  %7811 = vmatpush1.bf16.msra.mxu1 %v10627_v43  ;;  %v10692_v35 = vld [vmem:[%s14834_s5 + $0x404] ss:$16 sps:$4 sm:$0xff]   ;;  %v10695_v43 = vld [vmem:[%s14834_s5 + $0x40c] ss:$16 sps:$4 sm:$0xff]   ;;  %v10696_v50 = vld [vmem:[%s14834_s5 + $0x420] ss:$16 sps:$4 sm:$0xff]  }
 0x48e   :  { %7484 = vmatprep.subr.bf16.mxu0 %v10632_v0  ;;  %7812 = vmatprep.subr.bf16.mxu1 %v10635_v15  ;;  %v4310_v0 = vmul.f32 0.25, %v13358_v9  ;;  %v10690_v15 = vld [vmem:[%s14834_s5 + $0x400] ss:$16 sps:$4 sm:$0xff]   ;;  %v10698_v22 = vld [vmem:[%s14834_s5 + $0x424] ss:$16 sps:$4 sm:$0xff]  }
 0x48f   :  { %v10701_v9 = vld [vmem:[%s14834_s5 + $0x42c] ss:$16 sps:$4 sm:$0xff]  }
 0x490   :  { %v4326_v34 = vpack.c.bf16 %v4310_v0, %v4310_v0  ;;  %v10764_v0 = vld [vmem:[%s14834_s5 + $0x584] ss:$16 sps:$4 sm:$0xff]  }
 0x491   :  { %7485 = vmatpush1.bf16.msra.mxu0 %v10630_v51  ;;  %7813 = vmatpush1.bf16.msra.mxu1 %v10633_v52  ;;  %v10699_v51 = vld [vmem:[%s14834_s5 + $0x428] ss:$16 sps:$4 sm:$0xff]   ;;  %v10704_v52 = vld [vmem:[%s14834_s5 + $0x444] ss:$16 sps:$4 sm:$0xff]  }
 0x492   :  { %7486 = vmatprep.subr.bf16.mxu0 %v10638_v53  ;;  %7814 = vmatprep.subr.bf16.mxu1 %v10641_v54  ;;  %v10707_v53 = vld [vmem:[%s14834_s5 + $0x44c] ss:$16 sps:$4 sm:$0xff]   ;;  %v10702_v54 = vld [vmem:[%s14834_s5 + $0x440] ss:$16 sps:$4 sm:$0xff]  }
 0x495   :  { %7487 = vmatpush1.bf16.msra.mxu0 %v10636_v55  ;;  %7815 = vmatpush1.bf16.msra.mxu1 %v10639_v56  ;;  %v10705_v55 = vld [vmem:[%s14834_s5 + $0x448] ss:$16 sps:$4 sm:$0xff]   ;;  %v10710_v56 = vld [vmem:[%s14834_s5 + $0x464] ss:$16 sps:$4 sm:$0xff]  }
 0x496   :  { %7488 = vmatprep.subr.bf16.mxu0 %v10644_v57  ;;  %7816 = vmatprep.subr.bf16.mxu1 %v10647_v58  ;;  %v10713_v57 = vld [vmem:[%s14834_s5 + $0x46c] ss:$16 sps:$4 sm:$0xff]   ;;  %v10708_v58 = vld [vmem:[%s14834_s5 + $0x460] ss:$16 sps:$4 sm:$0xff]  }
 0x499   :  { %7489 = vmatpush1.bf16.msra.mxu0 %v10642_v60  ;;  %7817 = vmatpush1.bf16.msra.mxu1 %v10645_v61  ;;  %v10711_v60 = vld [vmem:[%s14834_s5 + $0x468] ss:$16 sps:$4 sm:$0xff]   ;;  %v10716_v61 = vld [vmem:[%s14834_s5 + $0x484] ss:$16 sps:$4 sm:$0xff]  }
 0x49a   :  { %7490 = vmatprep.subr.bf16.mxu0 %v10650_v42  ;;  %7818 = vmatprep.subr.bf16.mxu1 %v10653_v63  ;;  %v10719_v42 = vld [vmem:[%s14834_s5 + $0x48c] ss:$16 sps:$4 sm:$0xff]   ;;  %v10714_v63 = vld [vmem:[%s14834_s5 + $0x480] ss:$16 sps:$4 sm:$0xff]  }
 0x49d   :  { %7491 = vmatpush1.bf16.msra.mxu0 %v10648_v1  ;;  %7819 = vmatpush1.bf16.msra.mxu1 %v10651_v2  ;;  %v10717_v1 = vld [vmem:[%s14834_s5 + $0x488] ss:$16 sps:$4 sm:$0xff]   ;;  %v10722_v2 = vld [vmem:[%s14834_s5 + $0x4a4] ss:$16 sps:$4 sm:$0xff]  }
 0x49e   :  { %7492 = vmatprep.subr.bf16.mxu0 %v10656_v3  ;;  %7820 = vmatprep.subr.bf16.mxu1 %v10659_v7  ;;  %v10725_v3 = vld [vmem:[%s14834_s5 + $0x4ac] ss:$16 sps:$4 sm:$0xff]   ;;  %v10720_v7 = vld [vmem:[%s14834_s5 + $0x4a0] ss:$16 sps:$4 sm:$0xff]  }
 0x4a1   :  { %7493 = vmatpush1.bf16.msra.mxu0 %v10654_v8  ;;  %7821 = vmatpush1.bf16.msra.mxu1 %v10657_v13  ;;  %v10723_v8 = vld [vmem:[%s14834_s5 + $0x4a8] ss:$16 sps:$4 sm:$0xff]   ;;  %v10728_v13 = vld [vmem:[%s14834_s5 + $0x4c4] ss:$16 sps:$4 sm:$0xff]  }
 0x4a2   :  { %7494 = vmatprep.subr.bf16.mxu0 %v10662_v17  ;;  %7822 = vmatprep.subr.bf16.mxu1 %v10665_v18  ;;  %v10731_v17 = vld [vmem:[%s14834_s5 + $0x4cc] ss:$16 sps:$4 sm:$0xff]   ;;  %v10726_v18 = vld [vmem:[%s14834_s5 + $0x4c0] ss:$16 sps:$4 sm:$0xff]  }
 0x4a5   :  { %7495 = vmatpush1.bf16.msra.mxu0 %v10660_v19  ;;  %7823 = vmatpush1.bf16.msra.mxu1 %v10663_v62  ;;  %v10729_v19 = vld [vmem:[%s14834_s5 + $0x4c8] ss:$16 sps:$4 sm:$0xff]   ;;  %v10734_v62 = vld [vmem:[%s14834_s5 + $0x4e4] ss:$16 sps:$4 sm:$0xff]  }
 0x4a6   :  { %7496 = vmatprep.subr.bf16.mxu0 %v10668_v23  ;;  %7824 = vmatprep.subr.bf16.mxu1 %v10671_v14  ;;  %v10737_v23 = vld [vmem:[%s14834_s5 + $0x4ec] ss:$16 sps:$4 sm:$0xff]   ;;  %v10732_v14 = vld [vmem:[%s14834_s5 + $0x4e0] ss:$16 sps:$4 sm:$0xff]  }
 0x4a9   :  { %7497 = vmatpush1.bf16.msra.mxu0 %v10666_v25  ;;  %7825 = vmatpush1.bf16.msra.mxu1 %v10669_v26  ;;  %v10735_v25 = vld [vmem:[%s14834_s5 + $0x4e8] ss:$16 sps:$4 sm:$0xff]   ;;  %v10740_v26 = vld [vmem:[%s14834_s5 + $0x504] ss:$16 sps:$4 sm:$0xff]  }
 0x4aa   :  { %7498 = vmatprep.subr.bf16.mxu0 %v10674_v27  ;;  %7826 = vmatprep.subr.bf16.mxu1 %v10677_v6  ;;  %v10743_v27 = vld [vmem:[%s14834_s5 + $0x50c] ss:$16 sps:$4 sm:$0xff]   ;;  %v10738_v6 = vld [vmem:[%s14834_s5 + $0x500] ss:$16 sps:$4 sm:$0xff]  }
 0x4ad   :  { %7499 = vmatpush1.bf16.msra.mxu0 %v10672_v29  ;;  %7827 = vmatpush1.bf16.msra.mxu1 %v10675_v10  ;;  %v10741_v29 = vld [vmem:[%s14834_s5 + $0x508] ss:$16 sps:$4 sm:$0xff]   ;;  %v10746_v10 = vld [vmem:[%s14834_s5 + $0x524] ss:$16 sps:$4 sm:$0xff]  }
 0x4ae   :  { %7500 = vmatprep.subr.bf16.mxu0 %v10680_v39  ;;  %7828 = vmatprep.subr.bf16.mxu1 %v10683_v44  ;;  %v10749_v39 = vld [vmem:[%s14834_s5 + $0x52c] ss:$16 sps:$4 sm:$0xff]   ;;  %v10744_v44 = vld [vmem:[%s14834_s5 + $0x520] ss:$16 sps:$4 sm:$0xff]  }
 0x4b1   :  { %7501 = vmatpush1.bf16.msra.mxu0 %v10678_v16  ;;  %7829 = vmatpush1.bf16.msra.mxu1 %v10681_v24  ;;  %v10747_v16 = vld [vmem:[%s14834_s5 + $0x528] ss:$16 sps:$4 sm:$0xff]   ;;  %v10752_v24 = vld [vmem:[%s14834_s5 + $0x544] ss:$16 sps:$4 sm:$0xff]  }
 0x4b2   :  { %7502 = vmatprep.subr.bf16.mxu0 %v10686_v45  ;;  %7830 = vmatprep.subr.bf16.mxu1 %v10689_v46  ;;  %v10755_v45 = vld [vmem:[%s14834_s5 + $0x54c] ss:$16 sps:$4 sm:$0xff]   ;;  %v10750_v46 = vld [vmem:[%s14834_s5 + $0x540] ss:$16 sps:$4 sm:$0xff]  }
 0x4b5   :  { %7503 = vmatpush1.bf16.msra.mxu0 %v10684_v32  ;;  %7831 = vmatpush1.bf16.msra.mxu1 %v10687_v36  ;;  %v10753_v32 = vld [vmem:[%s14834_s5 + $0x548] ss:$16 sps:$4 sm:$0xff]   ;;  %v10758_v36 = vld [vmem:[%s14834_s5 + $0x564] ss:$16 sps:$4 sm:$0xff]  }
 0x4b6   :  { %7513 = vmatprep.subr.bf16.mxu0 %v10692_v35  ;;  %7841 = vmatprep.subr.bf16.mxu1 %v10695_v43  ;;  %v10756_v35 = vld [vmem:[%s14834_s5 + $0x560] ss:$16 sps:$4 sm:$0xff]   ;;  %v10759_v43 = vld [vmem:[%s14834_s5 + $0x568] ss:$16 sps:$4 sm:$0xff]  }
 0x4b8   :  { %7505 = vmatmul.mubr.bf16.vlgmr.msra.gmra.mrb[20].mxu0 %v4323_v21  ;;  %7833 = vmatmul.mubr.bf16.vlgmr.msra.gmra.mrb[20].mxu1 %v4323_v21  ;;  %v10762_v21 = vld [vmem:[%s14834_s5 + $0x580] ss:$16 sps:$4 sm:$0xff]  }
 0x4b9   :  { %7514 = vmatpush1.bf16.msra.mxu0 %v10690_v15  ;;  %7545 = vmatprep.mubr.bf16.mxu0 %v4326_v34  ;;  %v10767_v15 = vld [vmem:[%s14834_s5 + $0x58c] ss:$16 sps:$4 sm:$0xff]  }
 0x4ba   :  { %7842 = vmatpush1.bf16.msra.mxu1 %v10693_v37  ;;  %7873 = vmatprep.mubr.bf16.mxu1 %v4326_v34  ;;  %v10765_v37 = vld [vmem:[%s14834_s5 + $0x588] ss:$16 sps:$4 sm:$0xff]   ;;  %v10770_v34 = vld [vmem:[%s14834_s5 + $0x5a4] ss:$16 sps:$4 sm:$0xff]  }
 0x4bb   :  { %7515 = vmatprep.subr.bf16.mxu0 %v10698_v22  ;;  %7843 = vmatprep.subr.bf16.mxu1 %v10701_v9  ;;  %v10773_v22 = vld [vmem:[%s14834_s5 + $0x5ac] ss:$16 sps:$4 sm:$0xff]   ;;  %v10768_v9 = vld [vmem:[%s14834_s5 + $0x5a0] ss:$16 sps:$4 sm:$0xff]  }
 0x4bd   :  { %7516 = vmatpush1.bf16.msra.mxu0 %v10696_v50  ;;  %v10771_v50 = vld [vmem:[%s14834_s5 + $0x5a8] ss:$16 sps:$4 sm:$0xff]  }
 0x4be   :  { %7844 = vmatpush1.bf16.msra.mxu1 %v10699_v51  ;;  %7517 = vmatprep.subr.bf16.mxu0 %v10704_v52  ;;  %v10776_v51 = vld [vmem:[%s14834_s5 + $0x5c4] ss:$16 sps:$4 sm:$0xff]   ;;  %v10779_v52 = vld [vmem:[%s14834_s5 + $0x5cc] ss:$16 sps:$4 sm:$0xff]  }
 0x4bf   :  { %7845 = vmatprep.subr.bf16.mxu1 %v10707_v53  ;;  %v10774_v53 = vld [vmem:[%s14834_s5 + $0x5c0] ss:$16 sps:$4 sm:$0xff]  }
 0x4c1   :  { %7518 = vmatpush1.bf16.msra.mxu0 %v10702_v54  ;;  %v10777_v54 = vld [vmem:[%s14834_s5 + $0x5c8] ss:$16 sps:$4 sm:$0xff]  }
 0x4c2   :  { %7846 = vmatpush1.bf16.msra.mxu1 %v10705_v55  ;;  %7519 = vmatprep.subr.bf16.mxu0 %v10710_v56  ;;  %v10782_v55 = vld [vmem:[%s14834_s5 + $0x5e4] ss:$16 sps:$4 sm:$0xff]   ;;  %v10785_v56 = vld [vmem:[%s14834_s5 + $0x5ec] ss:$16 sps:$4 sm:$0xff]  }
 0x4c3   :  { %7847 = vmatprep.subr.bf16.mxu1 %v10713_v57  ;;  %v10780_v57 = vld [vmem:[%s14834_s5 + $0x5e0] ss:$16 sps:$4 sm:$0xff]  }
 0x4c5   :  { %7520 = vmatpush1.bf16.msra.mxu0 %v10708_v58  ;;  %v4309_v58 = vmul.f32 0.25, %v13348_v4  ;;  %v10786_v4 = vld [vmem:[%s14834_s5 + $0x600] ss:$16 sps:$4 sm:$0xff]  }
 0x4c6   :  { %7848 = vmatpush1.bf16.msra.mxu1 %v10711_v60  ;;  %7521 = vmatprep.subr.bf16.mxu0 %v10716_v61  ;;  %v10783_v60 = vld [vmem:[%s14834_s5 + $0x5e8] ss:$16 sps:$4 sm:$0xff]   ;;  %v10788_v61 = vld [vmem:[%s14834_s5 + $0x604] ss:$16 sps:$4 sm:$0xff]  }
 0x4c7   :  { %7849 = vmatprep.subr.bf16.mxu1 %v10719_v42  ;;  %v10791_v42 = vld [vmem:[%s14834_s5 + $0x60c] ss:$16 sps:$4 sm:$0xff]  }
 0x4c9   :  { %7522 = vmatpush1.bf16.msra.mxu0 %v10714_v63  ;;  %v4312_v63 = vmul.f32 0.25, %v13360_v12  ;;  %v10797_v12 = vld [vmem:[%s14834_s5 + $0x62c] ss:$16 sps:$4 sm:$0xff]  }
 0x4ca   :  { %7850 = vmatpush1.bf16.msra.mxu1 %v10717_v1  ;;  %7523 = vmatprep.subr.bf16.mxu0 %v10722_v2  ;;  %v4325_v1 = vpack.c.bf16 %v4309_v58, %v4309_v58  ;;  %v10789_v2 = vld [vmem:[%s14834_s5 + $0x608] ss:$16 sps:$4 sm:$0xff]   ;;  %v10852_v58 = vld [vmem:[%s14834_s5 + $0x760] ss:$16 sps:$4 sm:$0xff]  }
 0x4cb   :  { %7851 = vmatprep.subr.bf16.mxu1 %v10725_v3  ;;  %v10794_v3 = vld [vmem:[%s14834_s5 + $0x624] ss:$16 sps:$4 sm:$0xff]  }
 0x4cd   :  { %7524 = vmatpush1.bf16.msra.mxu0 %v10720_v7  ;;  %v4328_v7 = vpack.c.bf16 %v4312_v63, %v4312_v63  ;;  %v10858_v63 = vld [vmem:[%s14834_s5 + $0x780] ss:$16 sps:$4 sm:$0xff]  }
 0x4ce   :  { %7852 = vmatpush1.bf16.msra.mxu1 %v10723_v8  ;;  %7525 = vmatprep.subr.bf16.mxu0 %v10728_v13  ;;  %v10792_v8 = vld [vmem:[%s14834_s5 + $0x620] ss:$16 sps:$4 sm:$0xff]   ;;  %v10795_v13 = vld [vmem:[%s14834_s5 + $0x628] ss:$16 sps:$4 sm:$0xff]  }
 0x4cf   :  { %7853 = vmatprep.subr.bf16.mxu1 %v10731_v17  ;;  %v10800_v17 = vld [vmem:[%s14834_s5 + $0x644] ss:$16 sps:$4 sm:$0xff]  }
 0x4d1   :  { %7526 = vmatpush1.bf16.msra.mxu0 %v10726_v18  ;;  %v10803_v18 = vld [vmem:[%s14834_s5 + $0x64c] ss:$16 sps:$4 sm:$0xff]  }
 0x4d2   :  { %7854 = vmatpush1.bf16.msra.mxu1 %v10729_v19  ;;  %7527 = vmatprep.subr.bf16.mxu0 %v10734_v62  ;;  %v10798_v19 = vld [vmem:[%s14834_s5 + $0x640] ss:$16 sps:$4 sm:$0xff]   ;;  %v10801_v62 = vld [vmem:[%s14834_s5 + $0x648] ss:$16 sps:$4 sm:$0xff]  }
 0x4d3   :  { %7855 = vmatprep.subr.bf16.mxu1 %v10737_v23  ;;  %v10806_v23 = vld [vmem:[%s14834_s5 + $0x664] ss:$16 sps:$4 sm:$0xff]  }
 0x4d5   :  { %7528 = vmatpush1.bf16.msra.mxu0 %v10732_v14  ;;  %v10809_v14 = vld [vmem:[%s14834_s5 + $0x66c] ss:$16 sps:$4 sm:$0xff]  }
 0x4d6   :  { %7856 = vmatpush1.bf16.msra.mxu1 %v10735_v25  ;;  %7529 = vmatprep.subr.bf16.mxu0 %v10740_v26  ;;  %v10804_v25 = vld [vmem:[%s14834_s5 + $0x660] ss:$16 sps:$4 sm:$0xff]   ;;  %v10807_v26 = vld [vmem:[%s14834_s5 + $0x668] ss:$16 sps:$4 sm:$0xff]  }
 0x4d7   :  { %7857 = vmatprep.subr.bf16.mxu1 %v10743_v27  ;;  %v10812_v27 = vld [vmem:[%s14834_s5 + $0x684] ss:$16 sps:$4 sm:$0xff]  }
 0x4d9   :  { %7530 = vmatpush1.bf16.msra.mxu0 %v10738_v6  ;;  %v10815_v6 = vld [vmem:[%s14834_s5 + $0x68c] ss:$16 sps:$4 sm:$0xff]  }
 0x4da   :  { %7858 = vmatpush1.bf16.msra.mxu1 %v10741_v29  ;;  %7531 = vmatprep.subr.bf16.mxu0 %v10746_v10  ;;  %v10810_v29 = vld [vmem:[%s14834_s5 + $0x680] ss:$16 sps:$4 sm:$0xff]   ;;  %v10813_v10 = vld [vmem:[%s14834_s5 + $0x688] ss:$16 sps:$4 sm:$0xff]  }
 0x4db   :  { %7859 = vmatprep.subr.bf16.mxu1 %v10749_v39  ;;  %v10818_v39 = vld [vmem:[%s14834_s5 + $0x6a4] ss:$16 sps:$4 sm:$0xff]  }
 0x4dd   :  { %7532 = vmatpush1.bf16.msra.mxu0 %v10744_v44  ;;  %v10821_v44 = vld [vmem:[%s14834_s5 + $0x6ac] ss:$16 sps:$4 sm:$0xff]  }
 0x4de   :  { %7860 = vmatpush1.bf16.msra.mxu1 %v10747_v16  ;;  %7533 = vmatprep.subr.bf16.mxu0 %v10752_v24  ;;  %v10816_v16 = vld [vmem:[%s14834_s5 + $0x6a0] ss:$16 sps:$4 sm:$0xff]   ;;  %v10819_v24 = vld [vmem:[%s14834_s5 + $0x6a8] ss:$16 sps:$4 sm:$0xff]  }
 0x4df   :  { %7861 = vmatprep.subr.bf16.mxu1 %v10755_v45  ;;  %v10824_v45 = vld [vmem:[%s14834_s5 + $0x6c4] ss:$16 sps:$4 sm:$0xff]  }
 0x4e1   :  { %7534 = vmatpush1.bf16.msra.mxu0 %v10750_v46  ;;  %v10827_v46 = vld [vmem:[%s14834_s5 + $0x6cc] ss:$16 sps:$4 sm:$0xff]  }
 0x4e2   :  { %7862 = vmatpush1.bf16.msra.mxu1 %v10753_v32  ;;  %7535 = vmatprep.subr.bf16.mxu0 %v10758_v36  ;;  %v10822_v32 = vld [vmem:[%s14834_s5 + $0x6c0] ss:$16 sps:$4 sm:$0xff]   ;;  %v10825_v36 = vld [vmem:[%s14834_s5 + $0x6c8] ss:$16 sps:$4 sm:$0xff]  }
 0x4e3   :  { %7863 = vmatprep.subr.bf16.mxu1 %v10761_v48  ;;  %v10830_v48 = vld [vmem:[%s14834_s5 + $0x6e4] ss:$16 sps:$4 sm:$0xff]  }
 0x4e5   :  { %7536 = vmatpush1.bf16.msra.mxu0 %v10756_v35  ;;  %v10833_v35 = vld [vmem:[%s14834_s5 + $0x6ec] ss:$16 sps:$4 sm:$0xff]  }
 0x4e6   :  { %7864 = vmatpush1.bf16.msra.mxu1 %v10759_v43  ;;  %7537 = vmatprep.subr.bf16.mxu0 %v10764_v0  ;;  %v10828_v43 = vld [vmem:[%s14834_s5 + $0x6e0] ss:$16 sps:$4 sm:$0xff]   ;;  %v10831_v0 = vld [vmem:[%s14834_s5 + $0x6e8] ss:$16 sps:$4 sm:$0xff]  }
 0x4e7   :  { %7865 = vmatprep.subr.bf16.mxu1 %v10767_v15  ;;  %v10836_v15 = vld [vmem:[%s14834_s5 + $0x704] ss:$16 sps:$4 sm:$0xff]  }
 0x4e9   :  { %7538 = vmatpush1.bf16.msra.mxu0 %v10762_v21  ;;  %v10839_v21 = vld [vmem:[%s14834_s5 + $0x70c] ss:$16 sps:$4 sm:$0xff]  }
 0x4ea   :  { %7866 = vmatpush1.bf16.msra.mxu1 %v10765_v37  ;;  %7539 = vmatprep.subr.bf16.mxu0 %v10770_v34  ;;  %v10834_v37 = vld [vmem:[%s14834_s5 + $0x700] ss:$16 sps:$4 sm:$0xff]   ;;  %v10837_v34 = vld [vmem:[%s14834_s5 + $0x708] ss:$16 sps:$4 sm:$0xff]  }
 0x4eb   :  { %7867 = vmatprep.subr.bf16.mxu1 %v10773_v22  ;;  %v10842_v22 = vld [vmem:[%s14834_s5 + $0x724] ss:$16 sps:$4 sm:$0xff]  }
 0x4ed   :  { %7540 = vmatpush1.bf16.msra.mxu0 %v10768_v9  ;;  %v10845_v9 = vld [vmem:[%s14834_s5 + $0x72c] ss:$16 sps:$4 sm:$0xff]  }
 0x4ee   :  { %7868 = vmatpush1.bf16.msra.mxu1 %v10771_v50  ;;  %7541 = vmatprep.subr.bf16.mxu0 %v10776_v51  ;;  %v10840_v50 = vld [vmem:[%s14834_s5 + $0x720] ss:$16 sps:$4 sm:$0xff]   ;;  %v10843_v51 = vld [vmem:[%s14834_s5 + $0x728] ss:$16 sps:$4 sm:$0xff]  }
 0x4ef   :  { %7869 = vmatprep.subr.bf16.mxu1 %v10779_v52  ;;  %v10848_v52 = vld [vmem:[%s14834_s5 + $0x744] ss:$16 sps:$4 sm:$0xff]  }
 0x4f1   :  { %7542 = vmatpush1.bf16.msra.mxu0 %v10774_v53  ;;  %v10851_v53 = vld [vmem:[%s14834_s5 + $0x74c] ss:$16 sps:$4 sm:$0xff]  }
 0x4f2   :  { %7870 = vmatpush1.bf16.msra.mxu1 %v10777_v54  ;;  %7543 = vmatprep.subr.bf16.mxu0 %v10782_v55  ;;  %v10846_v54 = vld [vmem:[%s14834_s5 + $0x740] ss:$16 sps:$4 sm:$0xff]   ;;  %v10849_v55 = vld [vmem:[%s14834_s5 + $0x748] ss:$16 sps:$4 sm:$0xff]  }
 0x4f3   :  { %7871 = vmatprep.subr.bf16.mxu1 %v10785_v56  ;;  %v10854_v56 = vld [vmem:[%s14834_s5 + $0x764] ss:$16 sps:$4 sm:$0xff]  }
 0x4f5   :  { %7544 = vmatpush1.bf16.msra.mxu0 %v10780_v57  ;;  %v10857_v57 = vld [vmem:[%s14834_s5 + $0x76c] ss:$16 sps:$4 sm:$0xff]  }
 0x4f6   :  { %7872 = vmatpush1.bf16.msra.mxu1 %v10783_v60  ;;  %7554 = vmatprep.subr.bf16.mxu0 %v10788_v61  ;;  %v10855_v60 = vld [vmem:[%s14834_s5 + $0x768] ss:$16 sps:$4 sm:$0xff]   ;;  %v10860_v61 = vld [vmem:[%s14834_s5 + $0x784] ss:$16 sps:$4 sm:$0xff]  }
 0x4f7   :  { %7882 = vmatprep.subr.bf16.mxu1 %v10791_v42  ;;  %v10863_v42 = vld [vmem:[%s14834_s5 + $0x78c] ss:$16 sps:$4 sm:$0xff]  }
 0x4f8   :  { %7546 = vmatmul.mubr.bf16.vlgmr.msra.gmra.mrb[20].mxu0 %v4325_v1 }
 0x4f9   :  { %7874 = vmatmul.mubr.bf16.vlgmr.msra.gmra.mrb[20].mxu1 %v4325_v1  ;;  %7555 = vmatpush1.bf16.msra.mxu0 %v10786_v4  ;;  %v10861_v4 = vld [vmem:[%s14834_s5 + $0x788] ss:$16 sps:$4 sm:$0xff]   ;;  %v10866_v1 = vld [vmem:[%s14834_s5 + $0x7a4] ss:$16 sps:$4 sm:$0xff]  }
 0x4fa   :  { %7586 = vmatprep.mubr.bf16.mxu0 %v4328_v7  ;;  %7883 = vmatpush1.bf16.msra.mxu1 %v10789_v2  ;;  %v10869_v2 = vld [vmem:[%s14834_s5 + $0x7ac] ss:$16 sps:$4 sm:$0xff]  }
 0x4fb   :  { %7914 = vmatprep.mubr.bf16.mxu1 %v4328_v7  ;;  %7556 = vmatprep.subr.bf16.mxu0 %v10794_v3  ;;  %v10864_v3 = vld [vmem:[%s14834_s5 + $0x7a0] ss:$16 sps:$4 sm:$0xff]   ;;  %v10867_v7 = vld [vmem:[%s14834_s5 + $0x7a8] ss:$16 sps:$4 sm:$0xff]  }
 0x4fc   :  { %7884 = vmatprep.subr.bf16.mxu1 %v10797_v12  ;;  %v10872_v12 = vld [vmem:[%s14834_s5 + $0x7c4] ss:$16 sps:$4 sm:$0xff]  }
 0x4fd   :  { %7557 = vmatpush1.bf16.msra.mxu0 %v10792_v8  ;;  %v10875_v8 = vld [vmem:[%s14834_s5 + $0x7cc] ss:$16 sps:$4 sm:$0xff]  }
 0x4fe   :  { %7885 = vmatpush1.bf16.msra.mxu1 %v10795_v13  ;;  %7558 = vmatprep.subr.bf16.mxu0 %v10800_v17  ;;  %v10870_v13 = vld [vmem:[%s14834_s5 + $0x7c0] ss:$16 sps:$4 sm:$0xff]   ;;  %v10873_v17 = vld [vmem:[%s14834_s5 + $0x7c8] ss:$16 sps:$4 sm:$0xff]  }
 0x4ff   :  { %7886 = vmatprep.subr.bf16.mxu1 %v10803_v18  ;;  %v10878_v18 = vld [vmem:[%s14834_s5 + $0x7e4] ss:$16 sps:$4 sm:$0xff]  }
 0x501   :  { %7559 = vmatpush1.bf16.msra.mxu0 %v10798_v19  ;;  %v10881_v19 = vld [vmem:[%s14834_s5 + $0x7ec] ss:$16 sps:$4 sm:$0xff]  }
 0x502   :  { %7887 = vmatpush1.bf16.msra.mxu1 %v10801_v62  ;;  %7560 = vmatprep.subr.bf16.mxu0 %v10806_v23  ;;  %v10876_v62 = vld [vmem:[%s14834_s5 + $0x7e0] ss:$16 sps:$4 sm:$0xff]   ;;  %v4311_v23 = vmul.f32 0.25, %v13350_v5 }
 0x503   :  { %7888 = vmatprep.subr.bf16.mxu1 %v10809_v14  ;;  %v10879_v14 = vld [vmem:[%s14834_s5 + $0x7e8] ss:$16 sps:$4 sm:$0xff]   ;;  %v10882_v5 = vld [vmem:[%s14834_s5 + $0x800] ss:$16 sps:$4 sm:$0xff]  }
 0x505   :  { %7561 = vmatpush1.bf16.msra.mxu0 %v10804_v25  ;;  %v10884_v25 = vld [vmem:[%s14834_s5 + $0x804] ss:$16 sps:$4 sm:$0xff]  }
 0x506   :  { %7889 = vmatpush1.bf16.msra.mxu1 %v10807_v26  ;;  %7562 = vmatprep.subr.bf16.mxu0 %v10812_v27  ;;  %v10887_v26 = vld [vmem:[%s14834_s5 + $0x80c] ss:$16 sps:$4 sm:$0xff]   ;;  %v4314_v27 = vmul.f32 0.25, %v13390_v31 }
 0x507   :  { %7890 = vmatprep.subr.bf16.mxu1 %v10815_v6  ;;  %v4327_v6 = vpack.c.bf16 %v4311_v23, %v4311_v23  ;;  %v10893_v31 = vld [vmem:[%s14834_s5 + $0x82c] ss:$16 sps:$4 sm:$0xff]   ;;  %v10956_v23 = vld [vmem:[%s14834_s5 + $0x984] ss:$16 sps:$4 sm:$0xff]  }
 0x509   :  { %7563 = vmatpush1.bf16.msra.mxu0 %v10810_v29  ;;  %v10885_v29 = vld [vmem:[%s14834_s5 + $0x808] ss:$16 sps:$4 sm:$0xff]  }
 0x50a   :  { %7891 = vmatpush1.bf16.msra.mxu1 %v10813_v10  ;;  %7564 = vmatprep.subr.bf16.mxu0 %v10818_v39  ;;  %v10890_v10 = vld [vmem:[%s14834_s5 + $0x824] ss:$16 sps:$4 sm:$0xff]   ;;  %v4330_v39 = vpack.c.bf16 %v4314_v27, %v4314_v27 }
 0x50b   :  { %7892 = vmatprep.subr.bf16.mxu1 %v10821_v44  ;;  %v10888_v44 = vld [vmem:[%s14834_s5 + $0x820] ss:$16 sps:$4 sm:$0xff]   ;;  %v10962_v27 = vld [vmem:[%s14834_s5 + $0x9a4] ss:$16 sps:$4 sm:$0xff]  }
 0x50d   :  { %7565 = vmatpush1.bf16.msra.mxu0 %v10816_v16  ;;  %v10891_v16 = vld [vmem:[%s14834_s5 + $0x828] ss:$16 sps:$4 sm:$0xff]  }
 0x50e   :  { %7893 = vmatpush1.bf16.msra.mxu1 %v10819_v24  ;;  %7566 = vmatprep.subr.bf16.mxu0 %v10824_v45  ;;  %v10896_v24 = vld [vmem:[%s14834_s5 + $0x844] ss:$16 sps:$4 sm:$0xff]   ;;  %v10899_v45 = vld [vmem:[%s14834_s5 + $0x84c] ss:$16 sps:$4 sm:$0xff]  }
 0x50f   :  { %7894 = vmatprep.subr.bf16.mxu1 %v10827_v46  ;;  %v10894_v46 = vld [vmem:[%s14834_s5 + $0x840] ss:$16 sps:$4 sm:$0xff]  }
 0x511   :  { %7567 = vmatpush1.bf16.msra.mxu0 %v10822_v32  ;;  %v10897_v32 = vld [vmem:[%s14834_s5 + $0x848] ss:$16 sps:$4 sm:$0xff]  }
 0x512   :  { %7895 = vmatpush1.bf16.msra.mxu1 %v10825_v36  ;;  %7568 = vmatprep.subr.bf16.mxu0 %v10830_v48  ;;  %v10902_v36 = vld [vmem:[%s14834_s5 + $0x864] ss:$16 sps:$4 sm:$0xff]   ;;  %v10905_v48 = vld [vmem:[%s14834_s5 + $0x86c] ss:$16 sps:$4 sm:$0xff]  }
 0x513   :  { %7896 = vmatprep.subr.bf16.mxu1 %v10833_v35  ;;  %v10900_v35 = vld [vmem:[%s14834_s5 + $0x860] ss:$16 sps:$4 sm:$0xff]  }
 0x515   :  { %7569 = vmatpush1.bf16.msra.mxu0 %v10828_v43  ;;  %v10903_v43 = vld [vmem:[%s14834_s5 + $0x868] ss:$16 sps:$4 sm:$0xff]  }
 0x516   :  { %7897 = vmatpush1.bf16.msra.mxu1 %v10831_v0  ;;  %7570 = vmatprep.subr.bf16.mxu0 %v10836_v15  ;;  %v10908_v0 = vld [vmem:[%s14834_s5 + $0x884] ss:$16 sps:$4 sm:$0xff]   ;;  %v10911_v15 = vld [vmem:[%s14834_s5 + $0x88c] ss:$16 sps:$4 sm:$0xff]  }
 0x517   :  { %7898 = vmatprep.subr.bf16.mxu1 %v10839_v21  ;;  %v10906_v21 = vld [vmem:[%s14834_s5 + $0x880] ss:$16 sps:$4 sm:$0xff]  }
 0x519   :  { %7571 = vmatpush1.bf16.msra.mxu0 %v10834_v37  ;;  %v10909_v37 = vld [vmem:[%s14834_s5 + $0x888] ss:$16 sps:$4 sm:$0xff]  }
 0x51a   :  { %7899 = vmatpush1.bf16.msra.mxu1 %v10837_v34  ;;  %7572 = vmatprep.subr.bf16.mxu0 %v10842_v22  ;;  %v10914_v34 = vld [vmem:[%s14834_s5 + $0x8a4] ss:$16 sps:$4 sm:$0xff]   ;;  %v10917_v22 = vld [vmem:[%s14834_s5 + $0x8ac] ss:$16 sps:$4 sm:$0xff]  }
 0x51b   :  { %7900 = vmatprep.subr.bf16.mxu1 %v10845_v9  ;;  %v10912_v9 = vld [vmem:[%s14834_s5 + $0x8a0] ss:$16 sps:$4 sm:$0xff]  }
 0x51d   :  { %7573 = vmatpush1.bf16.msra.mxu0 %v10840_v50  ;;  %v10915_v50 = vld [vmem:[%s14834_s5 + $0x8a8] ss:$16 sps:$4 sm:$0xff]  }
 0x51e   :  { %7901 = vmatpush1.bf16.msra.mxu1 %v10843_v51  ;;  %7574 = vmatprep.subr.bf16.mxu0 %v10848_v52  ;;  %v10920_v51 = vld [vmem:[%s14834_s5 + $0x8c4] ss:$16 sps:$4 sm:$0xff]   ;;  %v10923_v52 = vld [vmem:[%s14834_s5 + $0x8cc] ss:$16 sps:$4 sm:$0xff]  }
 0x51f   :  { %7902 = vmatprep.subr.bf16.mxu1 %v10851_v53  ;;  %v10918_v53 = vld [vmem:[%s14834_s5 + $0x8c0] ss:$16 sps:$4 sm:$0xff]  }
 0x521   :  { %7575 = vmatpush1.bf16.msra.mxu0 %v10846_v54  ;;  %v10921_v54 = vld [vmem:[%s14834_s5 + $0x8c8] ss:$16 sps:$4 sm:$0xff]  }
 0x522   :  { %7903 = vmatpush1.bf16.msra.mxu1 %v10849_v55  ;;  %7576 = vmatprep.subr.bf16.mxu0 %v10854_v56  ;;  %v10926_v55 = vld [vmem:[%s14834_s5 + $0x8e4] ss:$16 sps:$4 sm:$0xff]   ;;  %v10929_v56 = vld [vmem:[%s14834_s5 + $0x8ec] ss:$16 sps:$4 sm:$0xff]  }
 0x523   :  { %7904 = vmatprep.subr.bf16.mxu1 %v10857_v57  ;;  %v10924_v57 = vld [vmem:[%s14834_s5 + $0x8e0] ss:$16 sps:$4 sm:$0xff]  }
 0x525   :  { %7577 = vmatpush1.bf16.msra.mxu0 %v10852_v58  ;;  %v10927_v58 = vld [vmem:[%s14834_s5 + $0x8e8] ss:$16 sps:$4 sm:$0xff]  }
 0x526   :  { %7905 = vmatpush1.bf16.msra.mxu1 %v10855_v60  ;;  %7578 = vmatprep.subr.bf16.mxu0 %v10860_v61  ;;  %v10932_v60 = vld [vmem:[%s14834_s5 + $0x904] ss:$16 sps:$4 sm:$0xff]   ;;  %v10935_v61 = vld [vmem:[%s14834_s5 + $0x90c] ss:$16 sps:$4 sm:$0xff]  }
 0x527   :  { %7906 = vmatprep.subr.bf16.mxu1 %v10863_v42  ;;  %v10930_v42 = vld [vmem:[%s14834_s5 + $0x900] ss:$16 sps:$4 sm:$0xff]  }
 0x529   :  { %7579 = vmatpush1.bf16.msra.mxu0 %v10858_v63  ;;  %v10933_v63 = vld [vmem:[%s14834_s5 + $0x908] ss:$16 sps:$4 sm:$0xff]  }
 0x52a   :  { %7907 = vmatpush1.bf16.msra.mxu1 %v10861_v4  ;;  %7580 = vmatprep.subr.bf16.mxu0 %v10866_v1  ;;  %v10938_v4 = vld [vmem:[%s14834_s5 + $0x924] ss:$16 sps:$4 sm:$0xff]   ;;  %v10941_v1 = vld [vmem:[%s14834_s5 + $0x92c] ss:$16 sps:$4 sm:$0xff]  }
 0x52b   :  { %7908 = vmatprep.subr.bf16.mxu1 %v10869_v2  ;;  %v10936_v2 = vld [vmem:[%s14834_s5 + $0x920] ss:$16 sps:$4 sm:$0xff]  }
 0x52d   :  { %7581 = vmatpush1.bf16.msra.mxu0 %v10864_v3  ;;  %v10939_v3 = vld [vmem:[%s14834_s5 + $0x928] ss:$16 sps:$4 sm:$0xff]  }
 0x52e   :  { %7909 = vmatpush1.bf16.msra.mxu1 %v10867_v7  ;;  %7582 = vmatprep.subr.bf16.mxu0 %v10872_v12  ;;  %v10944_v7 = vld [vmem:[%s14834_s5 + $0x944] ss:$16 sps:$4 sm:$0xff]   ;;  %v10947_v12 = vld [vmem:[%s14834_s5 + $0x94c] ss:$16 sps:$4 sm:$0xff]  }
 0x52f   :  { %7910 = vmatprep.subr.bf16.mxu1 %v10875_v8  ;;  %v10942_v8 = vld [vmem:[%s14834_s5 + $0x940] ss:$16 sps:$4 sm:$0xff]  }
 0x531   :  { %7583 = vmatpush1.bf16.msra.mxu0 %v10870_v13  ;;  %v10945_v13 = vld [vmem:[%s14834_s5 + $0x948] ss:$16 sps:$4 sm:$0xff]  }
 0x532   :  { %7911 = vmatpush1.bf16.msra.mxu1 %v10873_v17  ;;  %7584 = vmatprep.subr.bf16.mxu0 %v10878_v18  ;;  %v10950_v17 = vld [vmem:[%s14834_s5 + $0x964] ss:$16 sps:$4 sm:$0xff]   ;;  %v10953_v18 = vld [vmem:[%s14834_s5 + $0x96c] ss:$16 sps:$4 sm:$0xff]  }
 0x533   :  { %7912 = vmatprep.subr.bf16.mxu1 %v10881_v19  ;;  %v10948_v19 = vld [vmem:[%s14834_s5 + $0x960] ss:$16 sps:$4 sm:$0xff]  }
 0x535   :  { %7585 = vmatpush1.bf16.msra.mxu0 %v10876_v62  ;;  %v10951_v62 = vld [vmem:[%s14834_s5 + $0x968] ss:$16 sps:$4 sm:$0xff]  }
 0x536   :  { %7913 = vmatpush1.bf16.msra.mxu1 %v10879_v14  ;;  %7595 = vmatprep.subr.bf16.mxu0 %v10884_v25  ;;  %v10959_v14 = vld [vmem:[%s14834_s5 + $0x98c] ss:$16 sps:$4 sm:$0xff]   ;;  %v10954_v25 = vld [vmem:[%s14834_s5 + $0x980] ss:$16 sps:$4 sm:$0xff]  }
 0x537   :  { %7923 = vmatprep.subr.bf16.mxu1 %v10887_v26  ;;  %v10957_v26 = vld [vmem:[%s14834_s5 + $0x988] ss:$16 sps:$4 sm:$0xff]  }
 0x538   :  { %7587 = vmatmul.mubr.bf16.vlgmr.msra.gmra.mrb[20].mxu0 %v4327_v6 }
 0x539   :  { %7915 = vmatmul.mubr.bf16.vlgmr.msra.gmra.mrb[20].mxu1 %v4327_v6  ;;  %7596 = vmatpush1.bf16.msra.mxu0 %v10882_v5  ;;  %v10965_v5 = vld [vmem:[%s14834_s5 + $0x9ac] ss:$16 sps:$4 sm:$0xff]   ;;  %v10960_v6 = vld [vmem:[%s14834_s5 + $0x9a0] ss:$16 sps:$4 sm:$0xff]  }
 0x53a   :  { %7627 = vmatprep.mubr.bf16.mxu0 %v4330_v39  ;;  %7924 = vmatpush1.bf16.msra.mxu1 %v10885_v29  ;;  %v10963_v29 = vld [vmem:[%s14834_s5 + $0x9a8] ss:$16 sps:$4 sm:$0xff]  }
 0x53b   :  { %7955 = vmatprep.mubr.bf16.mxu1 %v4330_v39  ;;  %7597 = vmatprep.subr.bf16.mxu0 %v10890_v10  ;;  %v10968_v10 = vld [vmem:[%s14834_s5 + $0x9c4] ss:$16 sps:$4 sm:$0xff]   ;;  %v10971_v39 = vld [vmem:[%s14834_s5 + $0x9cc] ss:$16 sps:$4 sm:$0xff]  }
 0x53c   :  { %7925 = vmatprep.subr.bf16.mxu1 %v10893_v31  ;;  %v10966_v31 = vld [vmem:[%s14834_s5 + $0x9c0] ss:$16 sps:$4 sm:$0xff]  }
 0x53d   :  { %7598 = vmatpush1.bf16.msra.mxu0 %v10888_v44  ;;  %v10969_v44 = vld [vmem:[%s14834_s5 + $0x9c8] ss:$16 sps:$4 sm:$0xff]  }
 0x53e   :  { %7926 = vmatpush1.bf16.msra.mxu1 %v10891_v16  ;;  %7599 = vmatprep.subr.bf16.mxu0 %v10896_v24  ;;  %v10974_v16 = vld [vmem:[%s14834_s5 + $0x9e4] ss:$16 sps:$4 sm:$0xff]   ;;  %v10977_v24 = vld [vmem:[%s14834_s5 + $0x9ec] ss:$16 sps:$4 sm:$0xff]  }
 0x53f   :  { %7927 = vmatprep.subr.bf16.mxu1 %v10899_v45  ;;  %v10972_v45 = vld [vmem:[%s14834_s5 + $0x9e0] ss:$16 sps:$4 sm:$0xff]  }
 0x541   :  { %7600 = vmatpush1.bf16.msra.mxu0 %v10894_v46  ;;  %v4313_v46 = vmul.f32 0.25, %v13380_v49  ;;  %v10978_v49 = vld [vmem:[%s14834_s5 + $0xa00] ss:$16 sps:$4 sm:$0xff]  }
 0x542   :  { %7928 = vmatpush1.bf16.msra.mxu1 %v10897_v32  ;;  %7601 = vmatprep.subr.bf16.mxu0 %v10902_v36  ;;  %v10975_v32 = vld [vmem:[%s14834_s5 + $0x9e8] ss:$16 sps:$4 sm:$0xff]   ;;  %v10980_v36 = vld [vmem:[%s14834_s5 + $0xa04] ss:$16 sps:$4 sm:$0xff]  }
 0x543   :  { %7929 = vmatprep.subr.bf16.mxu1 %v10905_v48  ;;  %v10983_v48 = vld [vmem:[%s14834_s5 + $0xa0c] ss:$16 sps:$4 sm:$0xff]  }
 0x545   :  { %7602 = vmatpush1.bf16.msra.mxu0 %v10900_v35  ;;  %v4316_v35 = vmul.f32 0.25, %v13392_v33  ;;  %v10989_v33 = vld [vmem:[%s14834_s5 + $0xa2c] ss:$16 sps:$4 sm:$0xff]  }
 0x546   :  { %7930 = vmatpush1.bf16.msra.mxu1 %v10903_v43  ;;  %7603 = vmatprep.subr.bf16.mxu0 %v10908_v0  ;;  %v4329_v43 = vpack.c.bf16 %v4313_v46, %v4313_v46  ;;  %v10981_v0 = vld [vmem:[%s14834_s5 + $0xa08] ss:$16 sps:$4 sm:$0xff]   ;;  %v11050_v46 = vld [vmem:[%s14834_s5 + $0xb80] ss:$16 sps:$4 sm:$0xff]  }
 0x547   :  { %7931 = vmatprep.subr.bf16.mxu1 %v10911_v15  ;;  %v10986_v15 = vld [vmem:[%s14834_s5 + $0xa24] ss:$16 sps:$4 sm:$0xff]  }
 0x549   :  { %7604 = vmatpush1.bf16.msra.mxu0 %v10906_v21  ;;  %v4332_v21 = vpack.c.bf16 %v4316_v35, %v4316_v35  ;;  %v11056_v35 = vld [vmem:[%s14834_s5 + $0xba0] ss:$16 sps:$4 sm:$0xff]  }
 0x54a   :  { %7932 = vmatpush1.bf16.msra.mxu1 %v10909_v37  ;;  %7605 = vmatprep.subr.bf16.mxu0 %v10914_v34  ;;  %v10984_v37 = vld [vmem:[%s14834_s5 + $0xa20] ss:$16 sps:$4 sm:$0xff]   ;;  %v10987_v34 = vld [vmem:[%s14834_s5 + $0xa28] ss:$16 sps:$4 sm:$0xff]  }
 0x54b   :  { %7933 = vmatprep.subr.bf16.mxu1 %v10917_v22  ;;  %v10992_v22 = vld [vmem:[%s14834_s5 + $0xa44] ss:$16 sps:$4 sm:$0xff]  }
 0x54d   :  { %7606 = vmatpush1.bf16.msra.mxu0 %v10912_v9  ;;  %v10995_v9 = vld [vmem:[%s14834_s5 + $0xa4c] ss:$16 sps:$4 sm:$0xff]  }
 0x54e   :  { %7934 = vmatpush1.bf16.msra.mxu1 %v10915_v50  ;;  %7607 = vmatprep.subr.bf16.mxu0 %v10920_v51  ;;  %v10990_v50 = vld [vmem:[%s14834_s5 + $0xa40] ss:$16 sps:$4 sm:$0xff]   ;;  %v10993_v51 = vld [vmem:[%s14834_s5 + $0xa48] ss:$16 sps:$4 sm:$0xff]  }
 0x54f   :  { %7935 = vmatprep.subr.bf16.mxu1 %v10923_v52  ;;  %v10998_v52 = vld [vmem:[%s14834_s5 + $0xa64] ss:$16 sps:$4 sm:$0xff]  }
 0x551   :  { %7608 = vmatpush1.bf16.msra.mxu0 %v10918_v53  ;;  %v11001_v53 = vld [vmem:[%s14834_s5 + $0xa6c] ss:$16 sps:$4 sm:$0xff]  }
 0x552   :  { %7936 = vmatpush1.bf16.msra.mxu1 %v10921_v54  ;;  %7609 = vmatprep.subr.bf16.mxu0 %v10926_v55  ;;  %v10996_v54 = vld [vmem:[%s14834_s5 + $0xa60] ss:$16 sps:$4 sm:$0xff]   ;;  %v10999_v55 = vld [vmem:[%s14834_s5 + $0xa68] ss:$16 sps:$4 sm:$0xff]  }
 0x553   :  { %7937 = vmatprep.subr.bf16.mxu1 %v10929_v56  ;;  %v11004_v56 = vld [vmem:[%s14834_s5 + $0xa84] ss:$16 sps:$4 sm:$0xff]  }
 0x555   :  { %7610 = vmatpush1.bf16.msra.mxu0 %v10924_v57  ;;  %v11007_v57 = vld [vmem:[%s14834_s5 + $0xa8c] ss:$16 sps:$4 sm:$0xff]  }
 0x556   :  { %7938 = vmatpush1.bf16.msra.mxu1 %v10927_v58  ;;  %7611 = vmatprep.subr.bf16.mxu0 %v10932_v60  ;;  %v11002_v58 = vld [vmem:[%s14834_s5 + $0xa80] ss:$16 sps:$4 sm:$0xff]   ;;  %v11005_v60 = vld [vmem:[%s14834_s5 + $0xa88] ss:$16 sps:$4 sm:$0xff]  }
 0x557   :  { %7939 = vmatprep.subr.bf16.mxu1 %v10935_v61  ;;  %v11010_v61 = vld [vmem:[%s14834_s5 + $0xaa4] ss:$16 sps:$4 sm:$0xff]  }
 0x559   :  { %7612 = vmatpush1.bf16.msra.mxu0 %v10930_v42  ;;  %v11013_v42 = vld [vmem:[%s14834_s5 + $0xaac] ss:$16 sps:$4 sm:$0xff]  }
 0x55a   :  { %7940 = vmatpush1.bf16.msra.mxu1 %v10933_v63  ;;  %7613 = vmatprep.subr.bf16.mxu0 %v10938_v4  ;;  %v11008_v63 = vld [vmem:[%s14834_s5 + $0xaa0] ss:$16 sps:$4 sm:$0xff]   ;;  %v11011_v4 = vld [vmem:[%s14834_s5 + $0xaa8] ss:$16 sps:$4 sm:$0xff]  }
 0x55b   :  { %7941 = vmatprep.subr.bf16.mxu1 %v10941_v1  ;;  %v11016_v1 = vld [vmem:[%s14834_s5 + $0xac4] ss:$16 sps:$4 sm:$0xff]  }
 0x55d   :  { %7614 = vmatpush1.bf16.msra.mxu0 %v10936_v2  ;;  %v11019_v2 = vld [vmem:[%s14834_s5 + $0xacc] ss:$16 sps:$4 sm:$0xff]  }
 0x55e   :  { %7942 = vmatpush1.bf16.msra.mxu1 %v10939_v3  ;;  %7615 = vmatprep.subr.bf16.mxu0 %v10944_v7  ;;  %v11014_v3 = vld [vmem:[%s14834_s5 + $0xac0] ss:$16 sps:$4 sm:$0xff]   ;;  %v11017_v7 = vld [vmem:[%s14834_s5 + $0xac8] ss:$16 sps:$4 sm:$0xff]  }
 0x55f   :  { %7943 = vmatprep.subr.bf16.mxu1 %v10947_v12  ;;  %v11022_v12 = vld [vmem:[%s14834_s5 + $0xae4] ss:$16 sps:$4 sm:$0xff]  }
 0x561   :  { %7616 = vmatpush1.bf16.msra.mxu0 %v10942_v8  ;;  %v11025_v8 = vld [vmem:[%s14834_s5 + $0xaec] ss:$16 sps:$4 sm:$0xff]  }
 0x562   :  { %7944 = vmatpush1.bf16.msra.mxu1 %v10945_v13  ;;  %7617 = vmatprep.subr.bf16.mxu0 %v10950_v17  ;;  %v11020_v13 = vld [vmem:[%s14834_s5 + $0xae0] ss:$16 sps:$4 sm:$0xff]   ;;  %v11023_v17 = vld [vmem:[%s14834_s5 + $0xae8] ss:$16 sps:$4 sm:$0xff]  }
 0x563   :  { %7945 = vmatprep.subr.bf16.mxu1 %v10953_v18  ;;  %v11028_v18 = vld [vmem:[%s14834_s5 + $0xb04] ss:$16 sps:$4 sm:$0xff]  }
 0x565   :  { %7618 = vmatpush1.bf16.msra.mxu0 %v10948_v19  ;;  %v11031_v19 = vld [vmem:[%s14834_s5 + $0xb0c] ss:$16 sps:$4 sm:$0xff]  }
 0x566   :  { %7946 = vmatpush1.bf16.msra.mxu1 %v10951_v62  ;;  %7619 = vmatprep.subr.bf16.mxu0 %v10956_v23  ;;  %v11026_v62 = vld [vmem:[%s14834_s5 + $0xb00] ss:$16 sps:$4 sm:$0xff]   ;;  %v11029_v23 = vld [vmem:[%s14834_s5 + $0xb08] ss:$16 sps:$4 sm:$0xff]  }
 0x567   :  { %7947 = vmatprep.subr.bf16.mxu1 %v10959_v14  ;;  %v11034_v14 = vld [vmem:[%s14834_s5 + $0xb24] ss:$16 sps:$4 sm:$0xff]  }
 0x569   :  { %7620 = vmatpush1.bf16.msra.mxu0 %v10954_v25  ;;  %v11037_v25 = vld [vmem:[%s14834_s5 + $0xb2c] ss:$16 sps:$4 sm:$0xff]  }
 0x56a   :  { %7948 = vmatpush1.bf16.msra.mxu1 %v10957_v26  ;;  %7621 = vmatprep.subr.bf16.mxu0 %v10962_v27  ;;  %v11032_v26 = vld [vmem:[%s14834_s5 + $0xb20] ss:$16 sps:$4 sm:$0xff]   ;;  %v11035_v27 = vld [vmem:[%s14834_s5 + $0xb28] ss:$16 sps:$4 sm:$0xff]  }
 0x56b   :  { %7949 = vmatprep.subr.bf16.mxu1 %v10965_v5  ;;  %v11040_v5 = vld [vmem:[%s14834_s5 + $0xb44] ss:$16 sps:$4 sm:$0xff]  }
 0x56d   :  { %7622 = vmatpush1.bf16.msra.mxu0 %v10960_v6  ;;  %v11043_v6 = vld [vmem:[%s14834_s5 + $0xb4c] ss:$16 sps:$4 sm:$0xff]  }
 0x56e   :  { %7950 = vmatpush1.bf16.msra.mxu1 %v10963_v29  ;;  %7623 = vmatprep.subr.bf16.mxu0 %v10968_v10  ;;  %v11038_v29 = vld [vmem:[%s14834_s5 + $0xb40] ss:$16 sps:$4 sm:$0xff]   ;;  %v11041_v10 = vld [vmem:[%s14834_s5 + $0xb48] ss:$16 sps:$4 sm:$0xff]  }
 0x56f   :  { %7951 = vmatprep.subr.bf16.mxu1 %v10971_v39  ;;  %v11046_v39 = vld [vmem:[%s14834_s5 + $0xb64] ss:$16 sps:$4 sm:$0xff]  }
 0x571   :  { %7624 = vmatpush1.bf16.msra.mxu0 %v10966_v31  ;;  %v11049_v31 = vld [vmem:[%s14834_s5 + $0xb6c] ss:$16 sps:$4 sm:$0xff]  }
 0x572   :  { %7952 = vmatpush1.bf16.msra.mxu1 %v10969_v44  ;;  %7625 = vmatprep.subr.bf16.mxu0 %v10974_v16  ;;  %v11044_v44 = vld [vmem:[%s14834_s5 + $0xb60] ss:$16 sps:$4 sm:$0xff]   ;;  %v11047_v16 = vld [vmem:[%s14834_s5 + $0xb68] ss:$16 sps:$4 sm:$0xff]  }
 0x573   :  { %7953 = vmatprep.subr.bf16.mxu1 %v10977_v24  ;;  %v11052_v24 = vld [vmem:[%s14834_s5 + $0xb84] ss:$16 sps:$4 sm:$0xff]  }
 0x575   :  { %7626 = vmatpush1.bf16.msra.mxu0 %v10972_v45  ;;  %v11055_v45 = vld [vmem:[%s14834_s5 + $0xb8c] ss:$16 sps:$4 sm:$0xff]  }
 0x576   :  { %7954 = vmatpush1.bf16.msra.mxu1 %v10975_v32  ;;  %7636 = vmatprep.subr.bf16.mxu0 %v10980_v36  ;;  %v11053_v32 = vld [vmem:[%s14834_s5 + $0xb88] ss:$16 sps:$4 sm:$0xff]   ;;  %v11058_v36 = vld [vmem:[%s14834_s5 + $0xba4] ss:$16 sps:$4 sm:$0xff]  }
 0x577   :  { %7964 = vmatprep.subr.bf16.mxu1 %v10983_v48  ;;  %v11061_v48 = vld [vmem:[%s14834_s5 + $0xbac] ss:$16 sps:$4 sm:$0xff]  }
 0x578   :  { %7628 = vmatmul.mubr.bf16.vlgmr.msra.gmra.mrb[20].mxu0 %v4329_v43 }
 0x579   :  { %7956 = vmatmul.mubr.bf16.vlgmr.msra.gmra.mrb[20].mxu1 %v4329_v43  ;;  %7637 = vmatpush1.bf16.msra.mxu0 %v10978_v49  ;;  %v11059_v49 = vld [vmem:[%s14834_s5 + $0xba8] ss:$16 sps:$4 sm:$0xff]   ;;  %v11064_v43 = vld [vmem:[%s14834_s5 + $0xbc4] ss:$16 sps:$4 sm:$0xff]  }
 0x57a   :  { %7668 = vmatprep.mubr.bf16.mxu0 %v4332_v21  ;;  %7965 = vmatpush1.bf16.msra.mxu1 %v10981_v0  ;;  %v11067_v0 = vld [vmem:[%s14834_s5 + $0xbcc] ss:$16 sps:$4 sm:$0xff]  }
 0x57b   :  { %7996 = vmatprep.mubr.bf16.mxu1 %v4332_v21  ;;  %7638 = vmatprep.subr.bf16.mxu0 %v10986_v15  ;;  %v11062_v15 = vld [vmem:[%s14834_s5 + $0xbc0] ss:$16 sps:$4 sm:$0xff]   ;;  %v11065_v21 = vld [vmem:[%s14834_s5 + $0xbc8] ss:$16 sps:$4 sm:$0xff]  }
 0x57c   :  { %7966 = vmatprep.subr.bf16.mxu1 %v10989_v33  ;;  %v11070_v33 = vld [vmem:[%s14834_s5 + $0xbe4] ss:$16 sps:$4 sm:$0xff]  }
 0x57d   :  { %7639 = vmatpush1.bf16.msra.mxu0 %v10984_v37  ;;  %v11073_v37 = vld [vmem:[%s14834_s5 + $0xbec] ss:$16 sps:$4 sm:$0xff]  }
 0x57e   :  { %7967 = vmatpush1.bf16.msra.mxu1 %v10987_v34  ;;  %7640 = vmatprep.subr.bf16.mxu0 %v10992_v22  ;;  %v11068_v34 = vld [vmem:[%s14834_s5 + $0xbe0] ss:$16 sps:$4 sm:$0xff]   ;;  %v4315_v22 = vmul.f32 0.25, %v13382_v28 }
 0x57f   :  { %7968 = vmatprep.subr.bf16.mxu1 %v10995_v9  ;;  %v11071_v9 = vld [vmem:[%s14834_s5 + $0xbe8] ss:$16 sps:$4 sm:$0xff]   ;;  %v11074_v28 = vld [vmem:[%s14834_s5 + $0xc00] ss:$16 sps:$4 sm:$0xff]  }
 0x581   :  { %7641 = vmatpush1.bf16.msra.mxu0 %v10990_v50  ;;  %v11076_v50 = vld [vmem:[%s14834_s5 + $0xc04] ss:$16 sps:$4 sm:$0xff]  }
 0x582   :  { %7969 = vmatpush1.bf16.msra.mxu1 %v10993_v51  ;;  %7642 = vmatprep.subr.bf16.mxu0 %v10998_v52  ;;  %v11079_v51 = vld [vmem:[%s14834_s5 + $0xc0c] ss:$16 sps:$4 sm:$0xff]   ;;  %v4318_v52 = vmul.f32 0.25, %v13422_v47 }
 0x583   :  { %7970 = vmatprep.subr.bf16.mxu1 %v11001_v53  ;;  %v4331_v53 = vpack.c.bf16 %v4315_v22, %v4315_v22  ;;  %v11085_v47 = vld [vmem:[%s14834_s5 + $0xc2c] ss:$16 sps:$4 sm:$0xff]   ;;  %v11154_v22 = vld [vmem:[%s14834_s5 + $0xda4] ss:$16 sps:$4 sm:$0xff]  }
 0x585   :  { %7643 = vmatpush1.bf16.msra.mxu0 %v10996_v54  ;;  %v11077_v54 = vld [vmem:[%s14834_s5 + $0xc08] ss:$16 sps:$4 sm:$0xff]  }
 0x586   :  { %7971 = vmatpush1.bf16.msra.mxu1 %v10999_v55  ;;  %7644 = vmatprep.subr.bf16.mxu0 %v11004_v56  ;;  %v11082_v55 = vld [vmem:[%s14834_s5 + $0xc24] ss:$16 sps:$4 sm:$0xff]   ;;  %v4334_v56 = vpack.c.bf16 %v4318_v52, %v4318_v52 }
 0x587   :  { %7972 = vmatprep.subr.bf16.mxu1 %v11007_v57  ;;  %v11080_v57 = vld [vmem:[%s14834_s5 + $0xc20] ss:$16 sps:$4 sm:$0xff]   ;;  %v11160_v52 = vld [vmem:[%s14834_s5 + $0xdc4] ss:$16 sps:$4 sm:$0xff]  }
 0x589   :  { %7645 = vmatpush1.bf16.msra.mxu0 %v11002_v58  ;;  %v11083_v58 = vld [vmem:[%s14834_s5 + $0xc28] ss:$16 sps:$4 sm:$0xff]  }
 0x58a   :  { %7973 = vmatpush1.bf16.msra.mxu1 %v11005_v60  ;;  %7646 = vmatprep.subr.bf16.mxu0 %v11010_v61  ;;  %v11088_v60 = vld [vmem:[%s14834_s5 + $0xc44] ss:$16 sps:$4 sm:$0xff]   ;;  %v11091_v61 = vld [vmem:[%s14834_s5 + $0xc4c] ss:$16 sps:$4 sm:$0xff]  }
 0x58b   :  { %7974 = vmatprep.subr.bf16.mxu1 %v11013_v42  ;;  %v11086_v42 = vld [vmem:[%s14834_s5 + $0xc40] ss:$16 sps:$4 sm:$0xff]  }
 0x58d   :  { %7647 = vmatpush1.bf16.msra.mxu0 %v11008_v63  ;;  %v11089_v63 = vld [vmem:[%s14834_s5 + $0xc48] ss:$16 sps:$4 sm:$0xff]  }
 0x58e   :  { %7975 = vmatpush1.bf16.msra.mxu1 %v11011_v4  ;;  %7648 = vmatprep.subr.bf16.mxu0 %v11016_v1  ;;  %v11094_v4 = vld [vmem:[%s14834_s5 + $0xc64] ss:$16 sps:$4 sm:$0xff]   ;;  %v11097_v1 = vld [vmem:[%s14834_s5 + $0xc6c] ss:$16 sps:$4 sm:$0xff]  }
 0x58f   :  { %7976 = vmatprep.subr.bf16.mxu1 %v11019_v2  ;;  %v11092_v2 = vld [vmem:[%s14834_s5 + $0xc60] ss:$16 sps:$4 sm:$0xff]  }
 0x591   :  { %7649 = vmatpush1.bf16.msra.mxu0 %v11014_v3  ;;  %v11095_v3 = vld [vmem:[%s14834_s5 + $0xc68] ss:$16 sps:$4 sm:$0xff]  }
 0x592   :  { %7977 = vmatpush1.bf16.msra.mxu1 %v11017_v7  ;;  %7650 = vmatprep.subr.bf16.mxu0 %v11022_v12  ;;  %v11100_v7 = vld [vmem:[%s14834_s5 + $0xc84] ss:$16 sps:$4 sm:$0xff]   ;;  %v11103_v12 = vld [vmem:[%s14834_s5 + $0xc8c] ss:$16 sps:$4 sm:$0xff]  }
 0x593   :  { %7978 = vmatprep.subr.bf16.mxu1 %v11025_v8  ;;  %v11098_v8 = vld [vmem:[%s14834_s5 + $0xc80] ss:$16 sps:$4 sm:$0xff]  }
 0x595   :  { %7651 = vmatpush1.bf16.msra.mxu0 %v11020_v13  ;;  %v11101_v13 = vld [vmem:[%s14834_s5 + $0xc88] ss:$16 sps:$4 sm:$0xff]  }
 0x596   :  { %7979 = vmatpush1.bf16.msra.mxu1 %v11023_v17  ;;  %7652 = vmatprep.subr.bf16.mxu0 %v11028_v18  ;;  %v11106_v17 = vld [vmem:[%s14834_s5 + $0xca4] ss:$16 sps:$4 sm:$0xff]   ;;  %v11109_v18 = vld [vmem:[%s14834_s5 + $0xcac] ss:$16 sps:$4 sm:$0xff]  }
 0x597   :  { %7980 = vmatprep.subr.bf16.mxu1 %v11031_v19  ;;  %v11104_v19 = vld [vmem:[%s14834_s5 + $0xca0] ss:$16 sps:$4 sm:$0xff]  }
 0x599   :  { %7653 = vmatpush1.bf16.msra.mxu0 %v11026_v62  ;;  %v11107_v62 = vld [vmem:[%s14834_s5 + $0xca8] ss:$16 sps:$4 sm:$0xff]  }
 0x59a   :  { %7981 = vmatpush1.bf16.msra.mxu1 %v11029_v23  ;;  %7654 = vmatprep.subr.bf16.mxu0 %v11034_v14  ;;  %v11112_v23 = vld [vmem:[%s14834_s5 + $0xcc4] ss:$16 sps:$4 sm:$0xff]   ;;  %v11115_v14 = vld [vmem:[%s14834_s5 + $0xccc] ss:$16 sps:$4 sm:$0xff]  }
 0x59b   :  { %7982 = vmatprep.subr.bf16.mxu1 %v11037_v25  ;;  %v11110_v25 = vld [vmem:[%s14834_s5 + $0xcc0] ss:$16 sps:$4 sm:$0xff]  }
 0x59d   :  { %7655 = vmatpush1.bf16.msra.mxu0 %v11032_v26  ;;  %v11113_v26 = vld [vmem:[%s14834_s5 + $0xcc8] ss:$16 sps:$4 sm:$0xff]  }
 0x59e   :  { %7983 = vmatpush1.bf16.msra.mxu1 %v11035_v27  ;;  %7656 = vmatprep.subr.bf16.mxu0 %v11040_v5  ;;  %v11118_v27 = vld [vmem:[%s14834_s5 + $0xce4] ss:$16 sps:$4 sm:$0xff]   ;;  %v11121_v5 = vld [vmem:[%s14834_s5 + $0xcec] ss:$16 sps:$4 sm:$0xff]  }
 0x59f   :  { %7984 = vmatprep.subr.bf16.mxu1 %v11043_v6  ;;  %v11116_v6 = vld [vmem:[%s14834_s5 + $0xce0] ss:$16 sps:$4 sm:$0xff]  }
 0x5a1   :  { %7657 = vmatpush1.bf16.msra.mxu0 %v11038_v29  ;;  %v11119_v29 = vld [vmem:[%s14834_s5 + $0xce8] ss:$16 sps:$4 sm:$0xff]  }
 0x5a2   :  { %7985 = vmatpush1.bf16.msra.mxu1 %v11041_v10  ;;  %7658 = vmatprep.subr.bf16.mxu0 %v11046_v39  ;;  %v11124_v10 = vld [vmem:[%s14834_s5 + $0xd04] ss:$16 sps:$4 sm:$0xff]   ;;  %v11127_v39 = vld [vmem:[%s14834_s5 + $0xd0c] ss:$16 sps:$4 sm:$0xff]  }
 0x5a3   :  { %7986 = vmatprep.subr.bf16.mxu1 %v11049_v31  ;;  %v11122_v31 = vld [vmem:[%s14834_s5 + $0xd00] ss:$16 sps:$4 sm:$0xff]  }
 0x5a5   :  { %7659 = vmatpush1.bf16.msra.mxu0 %v11044_v44  ;;  %v11125_v44 = vld [vmem:[%s14834_s5 + $0xd08] ss:$16 sps:$4 sm:$0xff]  }
 0x5a6   :  { %7987 = vmatpush1.bf16.msra.mxu1 %v11047_v16  ;;  %7660 = vmatprep.subr.bf16.mxu0 %v11052_v24  ;;  %v11130_v16 = vld [vmem:[%s14834_s5 + $0xd24] ss:$16 sps:$4 sm:$0xff]   ;;  %v11133_v24 = vld [vmem:[%s14834_s5 + $0xd2c] ss:$16 sps:$4 sm:$0xff]  }
 0x5a7   :  { %7988 = vmatprep.subr.bf16.mxu1 %v11055_v45  ;;  %v11128_v45 = vld [vmem:[%s14834_s5 + $0xd20] ss:$16 sps:$4 sm:$0xff]  }
 0x5a9   :  { %7661 = vmatpush1.bf16.msra.mxu0 %v11050_v46  ;;  %v11131_v46 = vld [vmem:[%s14834_s5 + $0xd28] ss:$16 sps:$4 sm:$0xff]  }
 0x5aa   :  { %7989 = vmatpush1.bf16.msra.mxu1 %v11053_v32  ;;  %7662 = vmatprep.subr.bf16.mxu0 %v11058_v36  ;;  %v11136_v32 = vld [vmem:[%s14834_s5 + $0xd44] ss:$16 sps:$4 sm:$0xff]   ;;  %v11139_v36 = vld [vmem:[%s14834_s5 + $0xd4c] ss:$16 sps:$4 sm:$0xff]  }
 0x5ab   :  { %7990 = vmatprep.subr.bf16.mxu1 %v11061_v48  ;;  %v11134_v48 = vld [vmem:[%s14834_s5 + $0xd40] ss:$16 sps:$4 sm:$0xff]  }
 0x5ad   :  { %7663 = vmatpush1.bf16.msra.mxu0 %v11056_v35  ;;  %v11137_v35 = vld [vmem:[%s14834_s5 + $0xd48] ss:$16 sps:$4 sm:$0xff]  }
 0x5ae   :  { %7991 = vmatpush1.bf16.msra.mxu1 %v11059_v49  ;;  %7664 = vmatprep.subr.bf16.mxu0 %v11064_v43  ;;  %v11142_v49 = vld [vmem:[%s14834_s5 + $0xd64] ss:$16 sps:$4 sm:$0xff]   ;;  %v11145_v43 = vld [vmem:[%s14834_s5 + $0xd6c] ss:$16 sps:$4 sm:$0xff]  }
 0x5af   :  { %7992 = vmatprep.subr.bf16.mxu1 %v11067_v0  ;;  %v11140_v0 = vld [vmem:[%s14834_s5 + $0xd60] ss:$16 sps:$4 sm:$0xff]  }
 0x5b1   :  { %7665 = vmatpush1.bf16.msra.mxu0 %v11062_v15  ;;  %v11143_v15 = vld [vmem:[%s14834_s5 + $0xd68] ss:$16 sps:$4 sm:$0xff]  }
 0x5b2   :  { %7993 = vmatpush1.bf16.msra.mxu1 %v11065_v21  ;;  %7666 = vmatprep.subr.bf16.mxu0 %v11070_v33  ;;  %v11148_v21 = vld [vmem:[%s14834_s5 + $0xd84] ss:$16 sps:$4 sm:$0xff]   ;;  %v11151_v33 = vld [vmem:[%s14834_s5 + $0xd8c] ss:$16 sps:$4 sm:$0xff]  }
 0x5b3   :  { %7994 = vmatprep.subr.bf16.mxu1 %v11073_v37  ;;  %v11146_v37 = vld [vmem:[%s14834_s5 + $0xd80] ss:$16 sps:$4 sm:$0xff]  }
 0x5b5   :  { %7667 = vmatpush1.bf16.msra.mxu0 %v11068_v34  ;;  %v11149_v34 = vld [vmem:[%s14834_s5 + $0xd88] ss:$16 sps:$4 sm:$0xff]  }
 0x5b6   :  { %7995 = vmatpush1.bf16.msra.mxu1 %v11071_v9  ;;  %7677 = vmatprep.subr.bf16.mxu0 %v11076_v50  ;;  %v11157_v9 = vld [vmem:[%s14834_s5 + $0xdac] ss:$16 sps:$4 sm:$0xff]   ;;  %v11152_v50 = vld [vmem:[%s14834_s5 + $0xda0] ss:$16 sps:$4 sm:$0xff]  }
 0x5b7   :  { %8005 = vmatprep.subr.bf16.mxu1 %v11079_v51  ;;  %v11155_v51 = vld [vmem:[%s14834_s5 + $0xda8] ss:$16 sps:$4 sm:$0xff]  }
 0x5b8   :  { %7669 = vmatmul.mubr.bf16.vlgmr.msra.gmra.mrb[20].mxu0 %v4331_v53 }
 0x5b9   :  { %7997 = vmatmul.mubr.bf16.vlgmr.msra.gmra.mrb[20].mxu1 %v4331_v53  ;;  %7678 = vmatpush1.bf16.msra.mxu0 %v11074_v28  ;;  %v11163_v28 = vld [vmem:[%s14834_s5 + $0xdcc] ss:$16 sps:$4 sm:$0xff]   ;;  %v11158_v53 = vld [vmem:[%s14834_s5 + $0xdc0] ss:$16 sps:$4 sm:$0xff]  }
 0x5ba   :  { %7709 = vmatprep.mubr.bf16.mxu0 %v4334_v56  ;;  %8006 = vmatpush1.bf16.msra.mxu1 %v11077_v54  ;;  %v11161_v54 = vld [vmem:[%s14834_s5 + $0xdc8] ss:$16 sps:$4 sm:$0xff]  }
 0x5bb   :  { %8037 = vmatprep.mubr.bf16.mxu1 %v4334_v56  ;;  %7679 = vmatprep.subr.bf16.mxu0 %v11082_v55  ;;  %v11166_v55 = vld [vmem:[%s14834_s5 + $0xde4] ss:$16 sps:$4 sm:$0xff]   ;;  %v11169_v56 = vld [vmem:[%s14834_s5 + $0xdec] ss:$16 sps:$4 sm:$0xff]  }
 0x5bc   :  { %8007 = vmatprep.subr.bf16.mxu1 %v11085_v47  ;;  %v11164_v47 = vld [vmem:[%s14834_s5 + $0xde0] ss:$16 sps:$4 sm:$0xff]  }
 0x5bd   :  { %7680 = vmatpush1.bf16.msra.mxu0 %v11080_v57  ;;  %v4317_v57 = vmul.f32 0.25, %v13412_v20  ;;  %v11170_v20 = vld [vmem:[%s14834_s5 + $0xe00] ss:$16 sps:$4 sm:$0xff]  }
 0x5be   :  { %8008 = vmatpush1.bf16.msra.mxu1 %v11083_v58  ;;  %7681 = vmatprep.subr.bf16.mxu0 %v11088_v60  ;;  %v11167_v58 = vld [vmem:[%s14834_s5 + $0xde8] ss:$16 sps:$4 sm:$0xff]   ;;  %v11172_v60 = vld [vmem:[%s14834_s5 + $0xe04] ss:$16 sps:$4 sm:$0xff]  }
 0x5bf   :  { %8009 = vmatprep.subr.bf16.mxu1 %v11091_v61  ;;  %v11175_v61 = vld [vmem:[%s14834_s5 + $0xe0c] ss:$16 sps:$4 sm:$0xff]  }
 0x5c1   :  { %7682 = vmatpush1.bf16.msra.mxu0 %v11086_v42  ;;  %v4320_v42 = vmul.f32 0.25, %v13424_v59  ;;  %v11181_v59 = vld [vmem:[%s14834_s5 + $0xe2c] ss:$16 sps:$4 sm:$0xff]  }
 0x5c2   :  { %8010 = vmatpush1.bf16.msra.mxu1 %v11089_v63  ;;  %7683 = vmatprep.subr.bf16.mxu0 %v11094_v4  ;;  %v4333_v63 = vpack.c.bf16 %v4317_v57, %v4317_v57  ;;  %v11173_v4 = vld [vmem:[%s14834_s5 + $0xe08] ss:$16 sps:$4 sm:$0xff]   ;;  %v11248_v57 = vld [vmem:[%s14834_s5 + $0xfa0] ss:$16 sps:$4 sm:$0xff]  }
 0x5c3   :  { %8011 = vmatprep.subr.bf16.mxu1 %v11097_v1  ;;  %v11178_v1 = vld [vmem:[%s14834_s5 + $0xe24] ss:$16 sps:$4 sm:$0xff]  }
 0x5c5   :  { %7684 = vmatpush1.bf16.msra.mxu0 %v11092_v2  ;;  %v4336_v2 = vpack.c.bf16 %v4320_v42, %v4320_v42  ;;  %v11254_v42 = vld [vmem:[%s14834_s5 + $0xfc0] ss:$16 sps:$4 sm:$0xff]  }
 0x5c6   :  { %8012 = vmatpush1.bf16.msra.mxu1 %v11095_v3  ;;  %7685 = vmatprep.subr.bf16.mxu0 %v11100_v7  ;;  %v11176_v3 = vld [vmem:[%s14834_s5 + $0xe20] ss:$16 sps:$4 sm:$0xff]   ;;  %v11179_v7 = vld [vmem:[%s14834_s5 + $0xe28] ss:$16 sps:$4 sm:$0xff]  }
 0x5c7   :  { %8013 = vmatprep.subr.bf16.mxu1 %v11103_v12  ;;  %v11184_v12 = vld [vmem:[%s14834_s5 + $0xe44] ss:$16 sps:$4 sm:$0xff]  }
 0x5c9   :  { %7686 = vmatpush1.bf16.msra.mxu0 %v11098_v8  ;;  %v11187_v8 = vld [vmem:[%s14834_s5 + $0xe4c] ss:$16 sps:$4 sm:$0xff]  }
 0x5ca   :  { %8014 = vmatpush1.bf16.msra.mxu1 %v11101_v13  ;;  %7687 = vmatprep.subr.bf16.mxu0 %v11106_v17  ;;  %v11182_v13 = vld [vmem:[%s14834_s5 + $0xe40] ss:$16 sps:$4 sm:$0xff]   ;;  %v11185_v17 = vld [vmem:[%s14834_s5 + $0xe48] ss:$16 sps:$4 sm:$0xff]  }
 0x5cb   :  { %8015 = vmatprep.subr.bf16.mxu1 %v11109_v18  ;;  %v11190_v18 = vld [vmem:[%s14834_s5 + $0xe64] ss:$16 sps:$4 sm:$0xff]  }
 0x5cd   :  { %7688 = vmatpush1.bf16.msra.mxu0 %v11104_v19  ;;  %v11193_v19 = vld [vmem:[%s14834_s5 + $0xe6c] ss:$16 sps:$4 sm:$0xff]  }
 0x5ce   :  { %8016 = vmatpush1.bf16.msra.mxu1 %v11107_v62  ;;  %7689 = vmatprep.subr.bf16.mxu0 %v11112_v23  ;;  %v11188_v62 = vld [vmem:[%s14834_s5 + $0xe60] ss:$16 sps:$4 sm:$0xff]   ;;  %v11191_v23 = vld [vmem:[%s14834_s5 + $0xe68] ss:$16 sps:$4 sm:$0xff]  }
 0x5cf   :  { %8017 = vmatprep.subr.bf16.mxu1 %v11115_v14  ;;  %v11196_v14 = vld [vmem:[%s14834_s5 + $0xe84] ss:$16 sps:$4 sm:$0xff]  }
 0x5d1   :  { %7690 = vmatpush1.bf16.msra.mxu0 %v11110_v25  ;;  %v11199_v25 = vld [vmem:[%s14834_s5 + $0xe8c] ss:$16 sps:$4 sm:$0xff]  }
 0x5d2   :  { %8018 = vmatpush1.bf16.msra.mxu1 %v11113_v26  ;;  %7691 = vmatprep.subr.bf16.mxu0 %v11118_v27  ;;  %v11194_v26 = vld [vmem:[%s14834_s5 + $0xe80] ss:$16 sps:$4 sm:$0xff]   ;;  %v11197_v27 = vld [vmem:[%s14834_s5 + $0xe88] ss:$16 sps:$4 sm:$0xff]  }
 0x5d3   :  { %8019 = vmatprep.subr.bf16.mxu1 %v11121_v5  ;;  %v11202_v5 = vld [vmem:[%s14834_s5 + $0xea4] ss:$16 sps:$4 sm:$0xff]  }
 0x5d5   :  { %7692 = vmatpush1.bf16.msra.mxu0 %v11116_v6  ;;  %v11205_v6 = vld [vmem:[%s14834_s5 + $0xeac] ss:$16 sps:$4 sm:$0xff]  }
 0x5d6   :  { %8020 = vmatpush1.bf16.msra.mxu1 %v11119_v29  ;;  %7693 = vmatprep.subr.bf16.mxu0 %v11124_v10  ;;  %v11200_v29 = vld [vmem:[%s14834_s5 + $0xea0] ss:$16 sps:$4 sm:$0xff]   ;;  %v11203_v10 = vld [vmem:[%s14834_s5 + $0xea8] ss:$16 sps:$4 sm:$0xff]  }
 0x5d7   :  { %8021 = vmatprep.subr.bf16.mxu1 %v11127_v39  ;;  %v11208_v39 = vld [vmem:[%s14834_s5 + $0xec4] ss:$16 sps:$4 sm:$0xff]  }
 0x5d9   :  { %7694 = vmatpush1.bf16.msra.mxu0 %v11122_v31  ;;  %v11211_v31 = vld [vmem:[%s14834_s5 + $0xecc] ss:$16 sps:$4 sm:$0xff]  }
 0x5da   :  { %8022 = vmatpush1.bf16.msra.mxu1 %v11125_v44  ;;  %7695 = vmatprep.subr.bf16.mxu0 %v11130_v16  ;;  %v11206_v44 = vld [vmem:[%s14834_s5 + $0xec0] ss:$16 sps:$4 sm:$0xff]   ;;  %v11209_v16 = vld [vmem:[%s14834_s5 + $0xec8] ss:$16 sps:$4 sm:$0xff]  }
 0x5db   :  { %8023 = vmatprep.subr.bf16.mxu1 %v11133_v24  ;;  %v11214_v24 = vld [vmem:[%s14834_s5 + $0xee4] ss:$16 sps:$4 sm:$0xff]  }
 0x5dd   :  { %7696 = vmatpush1.bf16.msra.mxu0 %v11128_v45  ;;  %v11217_v45 = vld [vmem:[%s14834_s5 + $0xeec] ss:$16 sps:$4 sm:$0xff]  }
 0x5de   :  { %8024 = vmatpush1.bf16.msra.mxu1 %v11131_v46  ;;  %7697 = vmatprep.subr.bf16.mxu0 %v11136_v32  ;;  %v11212_v46 = vld [vmem:[%s14834_s5 + $0xee0] ss:$16 sps:$4 sm:$0xff]   ;;  %v11215_v32 = vld [vmem:[%s14834_s5 + $0xee8] ss:$16 sps:$4 sm:$0xff]  }
 0x5df   :  { %8025 = vmatprep.subr.bf16.mxu1 %v11139_v36  ;;  %v11220_v36 = vld [vmem:[%s14834_s5 + $0xf04] ss:$16 sps:$4 sm:$0xff]  }
 0x5e1   :  { %7698 = vmatpush1.bf16.msra.mxu0 %v11134_v48  ;;  %v11223_v48 = vld [vmem:[%s14834_s5 + $0xf0c] ss:$16 sps:$4 sm:$0xff]  }
 0x5e2   :  { %8026 = vmatpush1.bf16.msra.mxu1 %v11137_v35  ;;  %7699 = vmatprep.subr.bf16.mxu0 %v11142_v49  ;;  %v11218_v35 = vld [vmem:[%s14834_s5 + $0xf00] ss:$16 sps:$4 sm:$0xff]   ;;  %v11221_v49 = vld [vmem:[%s14834_s5 + $0xf08] ss:$16 sps:$4 sm:$0xff]  }
 0x5e3   :  { %8027 = vmatprep.subr.bf16.mxu1 %v11145_v43  ;;  %v11226_v43 = vld [vmem:[%s14834_s5 + $0xf24] ss:$16 sps:$4 sm:$0xff]  }
 0x5e5   :  { %7700 = vmatpush1.bf16.msra.mxu0 %v11140_v0  ;;  %v11229_v0 = vld [vmem:[%s14834_s5 + $0xf2c] ss:$16 sps:$4 sm:$0xff]  }
 0x5e6   :  { %8028 = vmatpush1.bf16.msra.mxu1 %v11143_v15  ;;  %7701 = vmatprep.subr.bf16.mxu0 %v11148_v21  ;;  %v11224_v15 = vld [vmem:[%s14834_s5 + $0xf20] ss:$16 sps:$4 sm:$0xff]   ;;  %v11227_v21 = vld [vmem:[%s14834_s5 + $0xf28] ss:$16 sps:$4 sm:$0xff]  }
 0x5e7   :  { %8029 = vmatprep.subr.bf16.mxu1 %v11151_v33  ;;  %v11232_v33 = vld [vmem:[%s14834_s5 + $0xf44] ss:$16 sps:$4 sm:$0xff]  }
 0x5e9   :  { %7702 = vmatpush1.bf16.msra.mxu0 %v11146_v37  ;;  %v11235_v37 = vld [vmem:[%s14834_s5 + $0xf4c] ss:$16 sps:$4 sm:$0xff]  }
 0x5ea   :  { %8030 = vmatpush1.bf16.msra.mxu1 %v11149_v34  ;;  %7703 = vmatprep.subr.bf16.mxu0 %v11154_v22  ;;  %v11230_v34 = vld [vmem:[%s14834_s5 + $0xf40] ss:$16 sps:$4 sm:$0xff]   ;;  %v11233_v22 = vld [vmem:[%s14834_s5 + $0xf48] ss:$16 sps:$4 sm:$0xff]  }
 0x5eb   :  { %8031 = vmatprep.subr.bf16.mxu1 %v11157_v9  ;;  %v11238_v9 = vld [vmem:[%s14834_s5 + $0xf64] ss:$16 sps:$4 sm:$0xff]  }
 0x5ed   :  { %7704 = vmatpush1.bf16.msra.mxu0 %v11152_v50  ;;  %v11241_v50 = vld [vmem:[%s14834_s5 + $0xf6c] ss:$16 sps:$4 sm:$0xff]  }
 0x5ee   :  { %8032 = vmatpush1.bf16.msra.mxu1 %v11155_v51  ;;  %7705 = vmatprep.subr.bf16.mxu0 %v11160_v52  ;;  %v11236_v51 = vld [vmem:[%s14834_s5 + $0xf60] ss:$16 sps:$4 sm:$0xff]   ;;  %v11239_v52 = vld [vmem:[%s14834_s5 + $0xf68] ss:$16 sps:$4 sm:$0xff]  }
 0x5ef   :  { %8033 = vmatprep.subr.bf16.mxu1 %v11163_v28  ;;  %v11244_v28 = vld [vmem:[%s14834_s5 + $0xf84] ss:$16 sps:$4 sm:$0xff]  }
 0x5f1   :  { %7706 = vmatpush1.bf16.msra.mxu0 %v11158_v53  ;;  %v11247_v53 = vld [vmem:[%s14834_s5 + $0xf8c] ss:$16 sps:$4 sm:$0xff]  }
 0x5f2   :  { %8034 = vmatpush1.bf16.msra.mxu1 %v11161_v54  ;;  %7707 = vmatprep.subr.bf16.mxu0 %v11166_v55  ;;  %v11242_v54 = vld [vmem:[%s14834_s5 + $0xf80] ss:$16 sps:$4 sm:$0xff]   ;;  %v11245_v55 = vld [vmem:[%s14834_s5 + $0xf88] ss:$16 sps:$4 sm:$0xff]  }
 0x5f3   :  { %8035 = vmatprep.subr.bf16.mxu1 %v11169_v56  ;;  %v11250_v56 = vld [vmem:[%s14834_s5 + $0xfa4] ss:$16 sps:$4 sm:$0xff]  }
 0x5f5   :  { %7708 = vmatpush1.bf16.msra.mxu0 %v11164_v47  ;;  %v11253_v47 = vld [vmem:[%s14834_s5 + $0xfac] ss:$16 sps:$4 sm:$0xff]  }
 0x5f6   :  { %8036 = vmatpush1.bf16.msra.mxu1 %v11167_v58  ;;  %7718 = vmatprep.subr.bf16.mxu0 %v11172_v60  ;;  %v11251_v58 = vld [vmem:[%s14834_s5 + $0xfa8] ss:$16 sps:$4 sm:$0xff]   ;;  %v11256_v60 = vld [vmem:[%s14834_s5 + $0xfc4] ss:$16 sps:$4 sm:$0xff]  }
 0x5f7   :  { %8046 = vmatprep.subr.bf16.mxu1 %v11175_v61  ;;  %v11259_v61 = vld [vmem:[%s14834_s5 + $0xfcc] ss:$16 sps:$4 sm:$0xff]  }
 0x5f8   :  { %7710 = vmatmul.mubr.bf16.vlgmr.msra.gmra.mrb[20].mxu0 %v4333_v63 }
 0x5f9   :  { %8038 = vmatmul.mubr.bf16.vlgmr.msra.gmra.mrb[20].mxu1 %v4333_v63  ;;  %7719 = vmatpush1.bf16.msra.mxu0 %v11170_v20  ;;  %v11257_v20 = vld [vmem:[%s14834_s5 + $0xfc8] ss:$16 sps:$4 sm:$0xff]   ;;  %v11262_v63 = vld [vmem:[%s14834_s5 + $0xfe4] ss:$16 sps:$4 sm:$0xff]  }
 0x5fa   :  { %7750 = vmatprep.mubr.bf16.mxu0 %v4336_v2  ;;  %8047 = vmatpush1.bf16.msra.mxu1 %v11173_v4  ;;  %v11265_v4 = vld [vmem:[%s14834_s5 + $0xfec] ss:$16 sps:$4 sm:$0xff]  }
 0x5fb   :  { %8078 = vmatprep.mubr.bf16.mxu1 %v4336_v2  ;;  %7720 = vmatprep.subr.bf16.mxu0 %v11178_v1  ;;  %v11260_v1 = vld [vmem:[%s14834_s5 + $0xfe0] ss:$16 sps:$4 sm:$0xff]   ;;  %v4319_v2 = vmul.f32 0.25, %v13414_v30 }
 0x5fc   :  { %8048 = vmatprep.subr.bf16.mxu1 %v11181_v59  ;;  %v11263_v59 = vld [vmem:[%s14834_s5 + $0xfe8] ss:$16 sps:$4 sm:$0xff]   ;;  %v11268_v30 = vld [vmem:[%s14836_s7] sm:$0xff]  }
 0x5fd   :  { %7721 = vmatpush1.bf16.msra.mxu0 %v11176_v3  ;;  %v11266_v3 = vld [vmem:[%s14836_s7 + $0x40] sm:$0xff]  }
 0x5fe   :  { %8049 = vmatpush1.bf16.msra.mxu1 %v11179_v7  ;;  %7722 = vmatprep.subr.bf16.mxu0 %v11184_v12  ;;  %v11267_v7 = vld [vmem:[%s14836_s7 + $0xc0] sm:$0xff]   ;;  %v4335_v12 = vpack.c.bf16 %v4319_v2, %v4319_v2 }
 0x5ff   :  { %8050 = vmatprep.subr.bf16.mxu1 %v11187_v8  ;;  %v11269_v8 = vld [vmem:[%s14836_s7 + $0x80] sm:$0xff]  }
 0x601   :  { %7723 = vmatpush1.bf16.msra.mxu0 %v11182_v13  ;;  %v11270_v13 = vld [vmem:[%s14836_s7 + $0x48] sm:$0xff]  }
 0x602   :  { %8051 = vmatpush1.bf16.msra.mxu1 %v11185_v17  ;;  %7724 = vmatprep.subr.bf16.mxu0 %v11190_v18  ;;  %v11271_v17 = vld [vmem:[%s14836_s7 + $0xc8] sm:$0xff]  }
 0x603   :  { %8052 = vmatprep.subr.bf16.mxu1 %v11193_v19  ;;  %v11272_v18 = vld [vmem:[%s14836_s7 + $0x8] sm:$0xff]  }
 0x604   :  { %v11273_v19 = vld [vmem:[%s14836_s7 + $0x88] sm:$0xff]  }
 0x605   :  { %7725 = vmatpush1.bf16.msra.mxu0 %v11188_v62  ;;  %v11274_v62 = vld [vmem:[%s14836_s7 + $0x50] sm:$0xff]  }
 0x606   :  { %8053 = vmatpush1.bf16.msra.mxu1 %v11191_v23  ;;  %7726 = vmatprep.subr.bf16.mxu0 %v11196_v14  ;;  %v11275_v23 = vld [vmem:[%s14836_s7 + $0xd0] sm:$0xff]  }
 0x607   :  { %8054 = vmatprep.subr.bf16.mxu1 %v11199_v25  ;;  %v11276_v14 = vld [vmem:[%s14836_s7 + $0x10] sm:$0xff]  }
 0x608   :  { %v11277_v25 = vld [vmem:[%s14836_s7 + $0x90] sm:$0xff]  }
 0x609   :  { %7727 = vmatpush1.bf16.msra.mxu0 %v11194_v26  ;;  %v11278_v26 = vld [vmem:[%s14836_s7 + $0x58] sm:$0xff]  }
 0x60a   :  { %8055 = vmatpush1.bf16.msra.mxu1 %v11197_v27  ;;  %7728 = vmatprep.subr.bf16.mxu0 %v11202_v5  ;;  %v11279_v27 = vld [vmem:[%s14836_s7 + $0xd8] sm:$0xff]  }
 0x60b   :  { %8056 = vmatprep.subr.bf16.mxu1 %v11205_v6  ;;  %v11280_v5 = vld [vmem:[%s14836_s7 + $0x18] sm:$0xff]  }
 0x60c   :  { %v11281_v6 = vld [vmem:[%s14836_s7 + $0x98] sm:$0xff]  }
 0x60d   :  { %7729 = vmatpush1.bf16.msra.mxu0 %v11200_v29  ;;  %v11282_v29 = vld [vmem:[%s14836_s7 + $0x60] sm:$0xff]  }
 0x60e   :  { %8057 = vmatpush1.bf16.msra.mxu1 %v11203_v10  ;;  %7730 = vmatprep.subr.bf16.mxu0 %v11208_v39  ;;  %v11283_v10 = vld [vmem:[%s14836_s7 + $0xe0] sm:$0xff]  }
 0x60f   :  { %8058 = vmatprep.subr.bf16.mxu1 %v11211_v31  ;;  %v11284_v39 = vld [vmem:[%s14836_s7 + $0x20] sm:$0xff]  }
 0x610   :  { %v11285_v31 = vld [vmem:[%s14836_s7 + $0xa0] sm:$0xff]  }
 0x611   :  { %7731 = vmatpush1.bf16.msra.mxu0 %v11206_v44  ;;  %v11286_v44 = vld [vmem:[%s14836_s7 + $0x68] sm:$0xff]  }
 0x612   :  { %8059 = vmatpush1.bf16.msra.mxu1 %v11209_v16  ;;  %7732 = vmatprep.subr.bf16.mxu0 %v11214_v24  ;;  %v11287_v16 = vld [vmem:[%s14836_s7 + $0xe8] sm:$0xff]  }
 0x613   :  { %8060 = vmatprep.subr.bf16.mxu1 %v11217_v45  ;;  %v11288_v24 = vld [vmem:[%s14836_s7 + $0x28] sm:$0xff]  }
 0x614   :  { %v11289_v45 = vld [vmem:[%s14836_s7 + $0xa8] sm:$0xff]  }
 0x615   :  { %7733 = vmatpush1.bf16.msra.mxu0 %v11212_v46  ;;  %v11290_v46 = vld [vmem:[%s14836_s7 + $0x70] sm:$0xff]  }
 0x616   :  { %8061 = vmatpush1.bf16.msra.mxu1 %v11215_v32  ;;  %7734 = vmatprep.subr.bf16.mxu0 %v11220_v36  ;;  %v11291_v32 = vld [vmem:[%s14836_s7 + $0xf0] sm:$0xff]  }
 0x617   :  { %8062 = vmatprep.subr.bf16.mxu1 %v11223_v48  ;;  %v11292_v36 = vld [vmem:[%s14836_s7 + $0x30] sm:$0xff]  }
 0x618   :  { %v11293_v48 = vld [vmem:[%s14836_s7 + $0xb0] sm:$0xff]  }
 0x619   :  { %7735 = vmatpush1.bf16.msra.mxu0 %v11218_v35  ;;  %v11294_v35 = vld [vmem:[%s14836_s7 + $0x78] sm:$0xff]  }
 0x61a   :  { %8063 = vmatpush1.bf16.msra.mxu1 %v11221_v49  ;;  %7736 = vmatprep.subr.bf16.mxu0 %v11226_v43  ;;  %v11295_v49 = vld [vmem:[%s14836_s7 + $0xf8] sm:$0xff]  }
 0x61b   :  { %8064 = vmatprep.subr.bf16.mxu1 %v11229_v0  ;;  %v11296_v43 = vld [vmem:[%s14836_s7 + $0x38] sm:$0xff]  }
 0x61c   :  { %v11297_v0 = vld [vmem:[%s14836_s7 + $0xb8] sm:$0xff]  }
 0x61d   :  { %7737 = vmatpush1.bf16.msra.mxu0 %v11224_v15  ;;  %v4849_v15 = vld [vmem:[%s14835_s6] sm:$0xf] }
 0x61e   :  { %8065 = vmatpush1.bf16.msra.mxu1 %v11227_v21  ;;  %7738 = vmatprep.subr.bf16.mxu0 %v11232_v33  ;;  %v4854_v21 = vrot.slane %v4849_v15, %v13058_v11  ;;  %v4862_v33 = vrot.slane %v4849_v15, %v13061_v38 }
 0x61f   :  { %8066 = vmatprep.subr.bf16.mxu1 %v11235_v37  ;;  %v4858_v37 = vrot.slane %v4849_v15, %v13067_v40 }
 0x621   :  { %7739 = vmatpush1.bf16.msra.mxu0 %v11230_v34  ;;  %v4866_v34 = vrot.slane %v4849_v15, %v13070_v41 }
 0x622   :  { %8067 = vmatpush1.bf16.msra.mxu1 %v11233_v22  ;;  %7740 = vmatprep.subr.bf16.mxu0 %v11238_v9 }
 0x623   :  { %8068 = vmatprep.subr.bf16.mxu1 %v11241_v50 }
 0x625   :  { %7741 = vmatpush1.bf16.msra.mxu0 %v11236_v51 }
 0x626   :  { %8069 = vmatpush1.bf16.msra.mxu1 %v11239_v52  ;;  %7742 = vmatprep.subr.bf16.mxu0 %v11244_v28 }
 0x627   :  { %8070 = vmatprep.subr.bf16.mxu1 %v11247_v53 }
 0x629   :  { %7743 = vmatpush1.bf16.msra.mxu0 %v11242_v54 }
 0x62a   :  { %8071 = vmatpush1.bf16.msra.mxu1 %v11245_v55  ;;  %7744 = vmatprep.subr.bf16.mxu0 %v11250_v56 }
 0x62b   :  { %8072 = vmatprep.subr.bf16.mxu1 %v11253_v47 }
 0x62d   :  { %7745 = vmatpush1.bf16.msra.mxu0 %v11248_v57 }
 0x62e   :  { %8073 = vmatpush1.bf16.msra.mxu1 %v11251_v58  ;;  %7746 = vmatprep.subr.bf16.mxu0 %v11256_v60 }
 0x62f   :  { %8074 = vmatprep.subr.bf16.mxu1 %v11259_v61 }
 0x631   :  { %7747 = vmatpush1.bf16.msra.mxu0 %v11254_v42 }
 0x632   :  { %8075 = vmatpush1.bf16.msra.mxu1 %v11257_v20  ;;  %7748 = vmatprep.subr.bf16.mxu0 %v11262_v63 }
 0x633   :  { %8076 = vmatprep.subr.bf16.mxu1 %v11265_v4  ;;  %v9514_v4 = vld [vmem:[%s14837_s8] ss:$0 sm:$0xff] }
 0x635   :  { %7749 = vmatpush1.bf16.msra.mxu0 %v11260_v1 }
 0x636   :  { %8077 = vmatpush1.bf16.msra.mxu1 %v11263_v59  ;;  %9547 = vmatprep.subr.bf16.mxu0 %v11266_v3 }
 0x637   :  { %9569 = vmatprep.subr.bf16.mxu1 %v11267_v7 }
 0x638   :  { %7751 = vmatmul.mubr.bf16.vlgmr.msra.gmra.mrb[20].mxu0 %v4335_v12 }
 0x639   :  { %8079 = vmatmul.mubr.bf16.vlgmr.msra.gmra.mrb[20].mxu1 %v4335_v12  ;;  %9548 = vmatpush3.bf16.msra.mxu0 %v11268_v30 }
 0x63a   :  { %9570 = vmatpush3.bf16.msra.mxu1 %v11269_v8  ;;  %9549 = vmatprep.subr.bf16.mxu0 %v11270_v13 }
 0x63b   :  { %9571 = vmatprep.subr.bf16.mxu1 %v11271_v17 }
 0x63d   :  { %9550 = vmatpush3.bf16.msra.mxu0 %v11272_v18 }
 0x63e   :  { %9572 = vmatpush3.bf16.msra.mxu1 %v11273_v19  ;;  %9551 = vmatprep.subr.bf16.mxu0 %v11274_v62 }
 0x63f   :  { %9573 = vmatprep.subr.bf16.mxu1 %v11275_v23 }
 0x641   :  { %9552 = vmatpush3.bf16.msra.mxu0 %v11276_v14 }
 0x642   :  { %9574 = vmatpush3.bf16.msra.mxu1 %v11277_v25  ;;  %9553 = vmatprep.subr.bf16.mxu0 %v11278_v26 }
 0x643   :  { %9575 = vmatprep.subr.bf16.mxu1 %v11279_v27 }
 0x645   :  { %9554 = vmatpush3.bf16.msra.mxu0 %v11280_v5 }
 0x646   :  { %9576 = vmatpush3.bf16.msra.mxu1 %v11281_v6  ;;  %9555 = vmatprep.subr.bf16.mxu0 %v11282_v29 }
 0x647   :  { %9577 = vmatprep.subr.bf16.mxu1 %v11283_v10 }
 0x649   :  { %9556 = vmatpush3.bf16.msra.mxu0 %v11284_v39 }
 0x64a   :  { %9578 = vmatpush3.bf16.msra.mxu1 %v11285_v31  ;;  %9557 = vmatprep.subr.bf16.mxu0 %v11286_v44 }
 0x64b   :  { %9579 = vmatprep.subr.bf16.mxu1 %v11287_v16 }
 0x64d   :  { %9558 = vmatpush3.bf16.msra.mxu0 %v11288_v24 }
 0x64e   :  { %9580 = vmatpush3.bf16.msra.mxu1 %v11289_v45  ;;  %9559 = vmatprep.subr.bf16.mxu0 %v11290_v46 }
 0x64f   :  { %9581 = vmatprep.subr.bf16.mxu1 %v11291_v32 }
 0x651   :  { %9560 = vmatpush3.bf16.msra.mxu0 %v11292_v36 }
 0x652   :  { %9582 = vmatpush3.bf16.msra.mxu1 %v11293_v48  ;;  %9561 = vmatprep.subr.bf16.mxu0 %v11294_v35 }
 0x653   :  { %9583 = vmatprep.subr.bf16.mxu1 %v11295_v49 }
 0x655   :  { %9562 = vmatpush3.bf16.msra.mxu0 %v11296_v43 }
 0x656   :  { %9584 = vmatpush3.bf16.msra.mxu1 %v11297_v0 }
 0x70b   :  { %v7752_v22 = vpop.f32.mrb[20].mxu0 }
 0x70c   :  { %v9595_v9 = vadd.f32 %v7752_v22, %v4854_v21  ;;  %v8080_v50 = vpop.f32.mrb[20].mxu1  ;;  %v7754_v51 = vpop.f32.mrb[21].mxu0 }
 0x70d   :  { %v9597_v52 = vadd.f32 %v8080_v50, %v4862_v33  ;;  %v9596_v28 = vadd.f32 %v7754_v51, %v4858_v37  ;;  %v8082_v53 = vpop.f32.mrb[21].mxu1  ;;  %v7756_v54 = vpop.f32.mrb[22].mxu0 }
 0x70e   :  { %v8087_v55 = vmax.f32 %v9595_v9, 0.0  ;;  %v9598_v56 = vadd.f32 %v8082_v53, %v4866_v34  ;;  %v8084_v47 = vpop.f32.mrb[22].mxu1  ;;  %v7757_v57 = vpop.f32.mrb[23].mxu0 }
 0x70f   :  { %v8089_v58 = vmax.f32 %v9597_v52, 0.0  ;;  %v8088_v11 = vmax.f32 %v9596_v28, 0.0  ;;  %v8085_v60 = vpop.f32.mrb[23].mxu1 }
 0x710   :  { %v8090_v38 = vmax.f32 %v9598_v56, 0.0  ;;  %v8091_v40 = vpack.c.bf16 %v8087_v55, %v8087_v55 }
 0x711   :  { %v8092_v61 = vpack.c.bf16 %v8088_v11, %v8088_v11  ;;  %v8093_v41 = vpack.c.bf16 %v8089_v58, %v8089_v58 }
 0x712   :  { %v8094_v42 = vpack.c.bf16 %v8090_v38, %v8090_v38 }
 0x713   :  { %8390 = vmatprep.mubr.bf16.mxu0 %v8092_v61 }
 0x714   :  { %8430 = vmatprep.mubr.bf16.mxu1 %v8094_v42  ;;  %8391 = vmatmul.mubr.bf16.vlgmr.msra.gmra.mrb[24].mxu0 %v8091_v40 }
 0x715   :  { %8431 = vmatmul.mubr.bf16.vlgmr.msra.gmra.mrb[24].mxu1 %v8093_v41 }
 0x7e7   :  { %v9563_v20 = vpop.f32.mrb[24].mxu0 }
 0x7e8   :  { %v9585_v63 = vpop.f32.mrb[24].mxu1  ;;  %v9564_v1 = vpop.f32.mrb[25].mxu0 }
 0x7e9   :  { %v9565_v2 = vadd.f32 %v9564_v1, %v9563_v20  ;;  %v9586_v59 = vpop.f32.mrb[25].mxu1  ;;  %v9566_v3 = vpop.f32.mrb[26].mxu0 }
 0x7ea   :  { %v9587_v7 = vadd.f32 %v9586_v59, %v9585_v63  ;;  %v9588_v30 = vpop.f32.mrb[26].mxu1  ;;  %v9567_v12 = vpop.f32.mrb[27].mxu0 }
 0x7eb   :  { %v8393_v8 = vadd.f32 %v9565_v2, %v9514_v4  ;;  %v9589_v13 = vpop.f32.mrb[27].mxu1 }
 0x7ed   :  { %v8433_v17 = vadd.f32 %v9587_v7, %v8393_v8 }
 0x7ef   :  { %8438 = vst [vmem:[#allocation3] sm:$0x3] %v8433_v17 }
 0x7f0   :  { %11313 = shalt.err (!%p11310_p4)
}
 0x7f1   :  { %s11314_s3 = scalar_lea.hbm %s14839_s10, 32 }
 0x7f2   :  { %p11315_p5 = scmp.ne.s32.totalorder %s14839_s10, %s11314_s3  ;;  %p11318_p6 = scmp.lt.u32.totalorder %s11314_s3, %s14839_s10 }
 0x7f4   :  { %p11320_p7 = pnand %p11318_p6, %p11315_p5 }
 0x7f6   :  { %11323 = shalt.err (!%p11320_p7)
}
 0x7f7   :  { %8450 = dma.vmem_to_hbm [thread:$0]  %s8448_s21, 32, %s14839_s10, [#allocation4]  }
 0x7f8   :  { %11324 = dma.done.wait [#allocation4], 32  }
 0x7f9   :  { %11325 = vsyncadd [#allocation4], 4294967264 }
 0x7fa   :  { %8456 = vsyncpa [#allocation4], 1 }

</bundles_post_ra>
